<compile_context>
chip_gen: v6e
topology: v6e:2x2x1
jax: 0.10.0
libtpu: 0.0.40
codegen_flags: <defaults>
</compile_context>

<pallas_src>
import functools

import jax
import jax.numpy as jnp
import numpy as np
from jax.experimental import pallas as pl
from jax.experimental.pallas import tpu as pltpu


def _fused_kernel(x_ref, wconv_ref, bconv_ref, s_ref, wfc_ref, bfc_ref,
                  out_ref, *, rblk, q, nsteps):
    """Fused conv3x3 -> bias -> ReLU -> global-avg-pool -> fc for one block.

    x_ref:     (n_rows, C_in)        f32   flattened zero-padded NHWC slab (resident)
    wconv_ref: (9, C_in, C_feat)     bf16  conv taps, tap t = kh*3 + kw
    bconv_ref: (1, C_feat)           f32
    s_ref:     (bblk, rblk)          f32   segment-mean selector (1/(H*W) on valid rows)
    wfc_ref:   (C_feat, num_classes) f32
    bfc_ref:   (1, num_classes)      f32
    out_ref:   (bblk, num_classes)   f32
    """
    if nsteps == 1:
        row0 = 0                                   # fully static slicing
    else:
        row0 = pl.program_id(0) * rblk
        if rblk % 8 == 0:
            row0 = pl.multiple_of(row0, 8)

    # 3x3 "same" conv as 9 shifted matmul-accumulates on the MXU.
    acc = None
    for t in range(9):
        di, dj = divmod(t, 3)
        shift = di * q + dj                        # row offset in the flat slab
        xs = x_ref[pl.ds(row0 + shift, rblk), :]   # (rblk, C_in) f32
        wt = wconv_ref[t]                          # (C_in, C_feat) bf16
        d = jnp.dot(xs.astype(jnp.bfloat16), wt,
                    preferred_element_type=jnp.float32)
        acc = d if acc is None else acc + d

    y = jnp.maximum(acc + bconv_ref[...], 0.0)     # bias + ReLU, f32 (rblk, C_feat)

    # Global average pool fused into the MXU: S selects the H*W valid rows of
    # each image in the block and scales by 1/(H*W) (invalid/padded rows -> 0).
    feat = jnp.dot(s_ref[...], y, preferred_element_type=jnp.float32)  # (bblk, C_feat)

    # Batched fc head; one dense (bblk, num_classes) store per grid step.
    out_ref[...] = (jnp.dot(feat, wfc_ref[...],
                            preferred_element_type=jnp.float32) + bfc_ref[...])


def model_forward(data_nchw, w_conv, b_conv, w_fc, b_fc):
    """data_nchw: [B, C_in, H, W] f32.  Returns pred: [B, num_classes] f32."""
    B, C_in, H, W = data_nchw.shape
    C_feat = w_conv.shape[0]
    num_classes = w_fc.shape[0]
    P, Q = H + 2, W + 2                 # zero-padded spatial extent
    PQ = P * Q
    HW = H * W

    # Images per grid step: target ~512-2048 conv rows per step so the fixed
    # per-step cost is amortised and DMA/compute tiles are large; for bigger B
    # this yields several independent ("parallel") steps that the two v7x
    # TensorCores can split.
    target_rows = 2048
    bblk = max(1, min(B, target_rows // PQ)) if PQ <= target_rows else 1
    nsteps = -(-B // bblk)
    Bpad = nsteps * bblk
    rblk = bblk * PQ

    # Host glue (~1x input bytes, no im2col): NCHW -> NHWC, 1px zero border,
    # flatten to a 2-D row slab, plus halo rows so the shifted windows of the
    # last image never read out of bounds.
    x_nhwc = jnp.transpose(data_nchw, (0, 2, 3, 1))
    x_pad = jnp.pad(x_nhwc, ((0, Bpad - B), (1, 1), (1, 1), (0, 0)))
    halo = 2 * Q + 2                               # max tap shift
    n_rows = -(-(Bpad * PQ + halo) // 8) * 8
    x_flat = jnp.pad(x_pad.reshape(Bpad * PQ, C_in),
                     ((0, n_rows - Bpad * PQ), (0, 0))).astype(jnp.float32)

    # Conv weight [C_out, C_in, kh, kw] -> (9, C_in, C_out), tap-major, bf16.
    wconv_taps = jnp.transpose(w_conv, (2, 3, 1, 0)).reshape(9, C_in, C_feat)
    wconv_taps = wconv_taps.astype(jnp.bfloat16)
    bconv_row = b_conv.reshape(1, C_feat).astype(jnp.float32)
    wfc_mat = jnp.transpose(w_fc, (1, 0)).astype(jnp.float32)
    bfc_row = b_fc.reshape(1, num_classes).astype(jnp.float32)

    # Segment-mean selector (identical for every grid step): S[l, r] = 1/(H*W)
    # when flat row r belongs to local image l and lies inside the HxW valid
    # window of the padded grid, else 0.  Built once on the host (constant).
    r = np.arange(rblk)
    img = r // PQ
    hh = (r % PQ) // Q
    ww = r % Q
    valid = (hh < H) & (ww < W)
    s_np = np.where((img[None, :] == np.arange(bblk)[:, None]) & valid[None, :],
                    1.0 / HW, 0.0).astype(np.float32)
    s_mat = jnp.asarray(s_np)

    kernel = functools.partial(_fused_kernel, rblk=rblk, q=Q, nsteps=nsteps)

    out = pl.pallas_call(
        kernel,
        out_shape=jax.ShapeDtypeStruct((Bpad, num_classes), jnp.float32),
        grid_spec=pltpu.PrefetchScalarGridSpec(
            num_scalar_prefetch=0,
            grid=(nsteps,),
            in_specs=[
                # image slab: constant index map -> DMA'd once, stays resident
                pl.BlockSpec((n_rows, C_in), lambda b: (0, 0)),
                pl.BlockSpec((9, C_in, C_feat), lambda b: (0, 0, 0)),
                pl.BlockSpec((1, C_feat), lambda b: (0, 0)),
                pl.BlockSpec((bblk, rblk), lambda b: (0, 0)),
                pl.BlockSpec((C_feat, num_classes), lambda b: (0, 0)),
                pl.BlockSpec((1, num_classes), lambda b: (0, 0)),
            ],
            out_specs=pl.BlockSpec((bblk, num_classes), lambda b: (b, 0)),
        ),
        compiler_params=pltpu.CompilerParams(
            dimension_semantics=("parallel",)),
    )(x_flat, wconv_taps, bconv_row, s_mat, wfc_mat, bfc_row)
    return out[:B]


def _reference(data_nchw, w_conv, b_conv, w_fc, b_fc):
    """Plain-JAX reference for sanity checking."""
    y = jax.lax.conv_general_dilated(
        data_nchw, w_conv, window_strides=(1, 1), padding="SAME",
        dimension_numbers=("NCHW", "OIHW", "NCHW"))
    y = y + b_conv[None, :, None, None]
    y = jnp.maximum(y, 0.0)
    feat = jnp.mean(y, axis=(2, 3))                 # [B, C_feat]
    return feat @ w_fc.T + b_fc


if __name__ == "__main__":
    B, C_in, H, W = 2, 4, 16, 16
    C_feat, num_classes = 32, 8

    key = jax.random.PRNGKey(0)
    k1, k2, k3, k4, k5 = jax.random.split(key, 5)

    data = jax.random.normal(k1, (B, C_in, H, W), dtype=jnp.float32)
    w_conv = 0.1 * jax.random.normal(k2, (C_feat, C_in, 3, 3), dtype=jnp.float32)
    b_conv = 0.01 * jax.random.normal(k3, (C_feat,), dtype=jnp.float32)
    w_fc = 0.1 * jax.random.normal(k4, (num_classes, C_feat), dtype=jnp.float32)
    b_fc = 0.01 * jax.random.normal(k5, (num_classes,), dtype=jnp.float32)

    pred = model_forward(data, w_conv, b_conv, w_fc, b_fc)
    pred = jax.block_until_ready(pred)

    ref = _reference(data, w_conv, b_conv, w_fc, b_fc)
    assert pred.shape == (B, num_classes)
    # bf16 matmul operands (f32 accumulate) -> slightly looser tolerance than pure f32.
    assert jnp.allclose(pred, ref, atol=5e-3, rtol=5e-3), (pred, ref)

    print("KERNEL_OK")
</pallas_src>

<mosaic_0001>
module attributes {stable_mosaic.version = 11 : i64} {
  func.func @_fused_kernel(%arg0: i32, %arg1: memref<688x4xf32, #tpu.memory_space<vmem>>, %arg2: memref<9x4x32xbf16, #tpu.memory_space<vmem>>, %arg3: memref<1x32xf32, #tpu.memory_space<vmem>>, %arg4: memref<2x648xf32, #tpu.memory_space<vmem>>, %arg5: memref<32x8xf32, #tpu.memory_space<vmem>>, %arg6: memref<1x8xf32, #tpu.memory_space<vmem>>, %arg7: memref<2x8xf32, #tpu.memory_space<vmem>>) attributes {dimension_semantics = [#tpu.dimension_semantics<parallel>], iteration_bounds = array<i64: 1>, scalar_prefetch = 0 : i64, scratch_operands = 0 : i64, tpu.core_type = #tpu.core_type<tc>, window_params = [{pipeline_mode = #tpu.pipeline_mode<synchronous>, transform_indices = @transform_0, window_bounds = array<i64: 688, 4>}, {pipeline_mode = #tpu.pipeline_mode<synchronous>, transform_indices = @transform_1, window_bounds = array<i64: 9, 4, 32>}, {pipeline_mode = #tpu.pipeline_mode<synchronous>, transform_indices = @transform_2, window_bounds = array<i64: 1, 32>}, {pipeline_mode = #tpu.pipeline_mode<synchronous>, transform_indices = @transform_3, window_bounds = array<i64: 2, 648>}, {pipeline_mode = #tpu.pipeline_mode<synchronous>, transform_indices = @transform_4, window_bounds = array<i64: 32, 8>}, {pipeline_mode = #tpu.pipeline_mode<synchronous>, transform_indices = @transform_5, window_bounds = array<i64: 1, 8>}, {transform_indices = @transform_6, window_bounds = array<i64: 2, 8>}]} {
    %c0 = arith.constant 0 : index
    %c0_0 = arith.constant 0 : index
    %0 = vector.load %arg1[%c0, %c0_0] : memref<688x4xf32, #tpu.memory_space<vmem>>, vector<648x4xf32>
    %c0_1 = arith.constant 0 : index
    %c0_2 = arith.constant 0 : index
    %c0_3 = arith.constant 0 : index
    %1 = vector.load %arg2[%c0_1, %c0_2, %c0_3] : memref<9x4x32xbf16, #tpu.memory_space<vmem>>, vector<1x4x32xbf16>
    %2 = vector.shape_cast %1 : vector<1x4x32xbf16> to vector<4x32xbf16>
    %3 = arith.truncf %0 : vector<648x4xf32> to vector<648x4xbf16>
    %cst = arith.constant dense<0.000000e+00> : vector<648x32xf32>
    %4 = tpu.matmul %3, %2, %cst {dimension_numbers = #tpu.dot_dimension_numbers<[1], [0], [0], [1], [0, 0, 1, 1], [], []>} : vector<648x4xbf16>, vector<4x32xbf16>, vector<648x32xf32> -> vector<648x32xf32>
    %c1 = arith.constant 1 : index
    %c0_4 = arith.constant 0 : index
    %5 = vector.load %arg1[%c1, %c0_4] : memref<688x4xf32, #tpu.memory_space<vmem>>, vector<648x4xf32>
    %c1_5 = arith.constant 1 : index
    %c0_6 = arith.constant 0 : index
    %c0_7 = arith.constant 0 : index
    %6 = vector.load %arg2[%c1_5, %c0_6, %c0_7] : memref<9x4x32xbf16, #tpu.memory_space<vmem>>, vector<1x4x32xbf16>
    %7 = vector.shape_cast %6 : vector<1x4x32xbf16> to vector<4x32xbf16>
    %8 = arith.truncf %5 : vector<648x4xf32> to vector<648x4xbf16>
    %cst_8 = arith.constant dense<0.000000e+00> : vector<648x32xf32>
    %9 = tpu.matmul %8, %7, %cst_8 {dimension_numbers = #tpu.dot_dimension_numbers<[1], [0], [0], [1], [0, 0, 1, 1], [], []>} : vector<648x4xbf16>, vector<4x32xbf16>, vector<648x32xf32> -> vector<648x32xf32>
    %10 = arith.addf %4, %9 : vector<648x32xf32>
    %c2 = arith.constant 2 : index
    %c0_9 = arith.constant 0 : index
    %11 = vector.load %arg1[%c2, %c0_9] : memref<688x4xf32, #tpu.memory_space<vmem>>, vector<648x4xf32>
    %c2_10 = arith.constant 2 : index
    %c0_11 = arith.constant 0 : index
    %c0_12 = arith.constant 0 : index
    %12 = vector.load %arg2[%c2_10, %c0_11, %c0_12] : memref<9x4x32xbf16, #tpu.memory_space<vmem>>, vector<1x4x32xbf16>
    %13 = vector.shape_cast %12 : vector<1x4x32xbf16> to vector<4x32xbf16>
    %14 = arith.truncf %11 : vector<648x4xf32> to vector<648x4xbf16>
    %cst_13 = arith.constant dense<0.000000e+00> : vector<648x32xf32>
    %15 = tpu.matmul %14, %13, %cst_13 {dimension_numbers = #tpu.dot_dimension_numbers<[1], [0], [0], [1], [0, 0, 1, 1], [], []>} : vector<648x4xbf16>, vector<4x32xbf16>, vector<648x32xf32> -> vector<648x32xf32>
    %16 = arith.addf %10, %15 : vector<648x32xf32>
    %c18 = arith.constant 18 : index
    %c0_14 = arith.constant 0 : index
    %17 = vector.load %arg1[%c18, %c0_14] : memref<688x4xf32, #tpu.memory_space<vmem>>, vector<648x4xf32>
    %c3 = arith.constant 3 : index
    %c0_15 = arith.constant 0 : index
    %c0_16 = arith.constant 0 : index
    %18 = vector.load %arg2[%c3, %c0_15, %c0_16] : memref<9x4x32xbf16, #tpu.memory_space<vmem>>, vector<1x4x32xbf16>
    %19 = vector.shape_cast %18 : vector<1x4x32xbf16> to vector<4x32xbf16>
    %20 = arith.truncf %17 : vector<648x4xf32> to vector<648x4xbf16>
    %cst_17 = arith.constant dense<0.000000e+00> : vector<648x32xf32>
    %21 = tpu.matmul %20, %19, %cst_17 {dimension_numbers = #tpu.dot_dimension_numbers<[1], [0], [0], [1], [0, 0, 1, 1], [], []>} : vector<648x4xbf16>, vector<4x32xbf16>, vector<648x32xf32> -> vector<648x32xf32>
    %22 = arith.addf %16, %21 : vector<648x32xf32>
    %c19 = arith.constant 19 : index
    %c0_18 = arith.constant 0 : index
    %23 = vector.load %arg1[%c19, %c0_18] : memref<688x4xf32, #tpu.memory_space<vmem>>, vector<648x4xf32>
    %c4 = arith.constant 4 : index
    %c0_19 = arith.constant 0 : index
    %c0_20 = arith.constant 0 : index
    %24 = vector.load %arg2[%c4, %c0_19, %c0_20] : memref<9x4x32xbf16, #tpu.memory_space<vmem>>, vector<1x4x32xbf16>
    %25 = vector.shape_cast %24 : vector<1x4x32xbf16> to vector<4x32xbf16>
    %26 = arith.truncf %23 : vector<648x4xf32> to vector<648x4xbf16>
    %cst_21 = arith.constant dense<0.000000e+00> : vector<648x32xf32>
    %27 = tpu.matmul %26, %25, %cst_21 {dimension_numbers = #tpu.dot_dimension_numbers<[1], [0], [0], [1], [0, 0, 1, 1], [], []>} : vector<648x4xbf16>, vector<4x32xbf16>, vector<648x32xf32> -> vector<648x32xf32>
    %28 = arith.addf %22, %27 : vector<648x32xf32>
    %c20 = arith.constant 20 : index
    %c0_22 = arith.constant 0 : index
    %29 = vector.load %arg1[%c20, %c0_22] : memref<688x4xf32, #tpu.memory_space<vmem>>, vector<648x4xf32>
    %c5 = arith.constant 5 : index
    %c0_23 = arith.constant 0 : index
    %c0_24 = arith.constant 0 : index
    %30 = vector.load %arg2[%c5, %c0_23, %c0_24] : memref<9x4x32xbf16, #tpu.memory_space<vmem>>, vector<1x4x32xbf16>
    %31 = vector.shape_cast %30 : vector<1x4x32xbf16> to vector<4x32xbf16>
    %32 = arith.truncf %29 : vector<648x4xf32> to vector<648x4xbf16>
    %cst_25 = arith.constant dense<0.000000e+00> : vector<648x32xf32>
    %33 = tpu.matmul %32, %31, %cst_25 {dimension_numbers = #tpu.dot_dimension_numbers<[1], [0], [0], [1], [0, 0, 1, 1], [], []>} : vector<648x4xbf16>, vector<4x32xbf16>, vector<648x32xf32> -> vector<648x32xf32>
    %34 = arith.addf %28, %33 : vector<648x32xf32>
    %c36 = arith.constant 36 : index
    %c0_26 = arith.constant 0 : index
    %35 = vector.load %arg1[%c36, %c0_26] : memref<688x4xf32, #tpu.memory_space<vmem>>, vector<648x4xf32>
    %c6 = arith.constant 6 : index
    %c0_27 = arith.constant 0 : index
    %c0_28 = arith.constant 0 : index
    %36 = vector.load %arg2[%c6, %c0_27, %c0_28] : memref<9x4x32xbf16, #tpu.memory_space<vmem>>, vector<1x4x32xbf16>
    %37 = vector.shape_cast %36 : vector<1x4x32xbf16> to vector<4x32xbf16>
    %38 = arith.truncf %35 : vector<648x4xf32> to vector<648x4xbf16>
    %cst_29 = arith.constant dense<0.000000e+00> : vector<648x32xf32>
    %39 = tpu.matmul %38, %37, %cst_29 {dimension_numbers = #tpu.dot_dimension_numbers<[1], [0], [0], [1], [0, 0, 1, 1], [], []>} : vector<648x4xbf16>, vector<4x32xbf16>, vector<648x32xf32> -> vector<648x32xf32>
    %40 = arith.addf %34, %39 : vector<648x32xf32>
    %c37 = arith.constant 37 : index
    %c0_30 = arith.constant 0 : index
    %41 = vector.load %arg1[%c37, %c0_30] : memref<688x4xf32, #tpu.memory_space<vmem>>, vector<648x4xf32>
    %c7 = arith.constant 7 : index
    %c0_31 = arith.constant 0 : index
    %c0_32 = arith.constant 0 : index
    %42 = vector.load %arg2[%c7, %c0_31, %c0_32] : memref<9x4x32xbf16, #tpu.memory_space<vmem>>, vector<1x4x32xbf16>
    %43 = vector.shape_cast %42 : vector<1x4x32xbf16> to vector<4x32xbf16>
    %44 = arith.truncf %41 : vector<648x4xf32> to vector<648x4xbf16>
    %cst_33 = arith.constant dense<0.000000e+00> : vector<648x32xf32>
    %45 = tpu.matmul %44, %43, %cst_33 {dimension_numbers = #tpu.dot_dimension_numbers<[1], [0], [0], [1], [0, 0, 1, 1], [], []>} : vector<648x4xbf16>, vector<4x32xbf16>, vector<648x32xf32> -> vector<648x32xf32>
    %46 = arith.addf %40, %45 : vector<648x32xf32>
    %c38 = arith.constant 38 : index
    %c0_34 = arith.constant 0 : index
    %47 = vector.load %arg1[%c38, %c0_34] : memref<688x4xf32, #tpu.memory_space<vmem>>, vector<648x4xf32>
    %c8 = arith.constant 8 : index
    %c0_35 = arith.constant 0 : index
    %c0_36 = arith.constant 0 : index
    %48 = vector.load %arg2[%c8, %c0_35, %c0_36] : memref<9x4x32xbf16, #tpu.memory_space<vmem>>, vector<1x4x32xbf16>
    %49 = vector.shape_cast %48 : vector<1x4x32xbf16> to vector<4x32xbf16>
    %50 = arith.truncf %47 : vector<648x4xf32> to vector<648x4xbf16>
    %cst_37 = arith.constant dense<0.000000e+00> : vector<648x32xf32>
    %51 = tpu.matmul %50, %49, %cst_37 {dimension_numbers = #tpu.dot_dimension_numbers<[1], [0], [0], [1], [0, 0, 1, 1], [], []>} : vector<648x4xbf16>, vector<4x32xbf16>, vector<648x32xf32> -> vector<648x32xf32>
    %52 = arith.addf %46, %51 : vector<648x32xf32>
    %c0_38 = arith.constant 0 : index
    %c0_39 = arith.constant 0 : index
    %53 = vector.load %arg3[%c0_38, %c0_39] : memref<1x32xf32, #tpu.memory_space<vmem>>, vector<1x32xf32>
    %54 = vector.broadcast %53 : vector<1x32xf32> to vector<648x32xf32>
    %55 = arith.addf %52, %54 : vector<648x32xf32>
    %cst_40 = arith.constant 0.000000e+00 : f32
    %56 = vector.broadcast %cst_40 : f32 to vector<648x32xf32>
    %57 = arith.maximumf %55, %56 : vector<648x32xf32>
    %c0_41 = arith.constant 0 : index
    %c0_42 = arith.constant 0 : index
    %58 = vector.load %arg4[%c0_41, %c0_42] : memref<2x648xf32, #tpu.memory_space<vmem>>, vector<2x648xf32>
    %cst_43 = arith.constant dense<0.000000e+00> : vector<2x32xf32>
    %59 = tpu.matmul %58, %57, %cst_43 {dimension_numbers = #tpu.dot_dimension_numbers<[1], [0], [0], [1], [0, 0, 1, 1], [], []>} : vector<2x648xf32>, vector<648x32xf32>, vector<2x32xf32> -> vector<2x32xf32>
    %c0_44 = arith.constant 0 : index
    %c0_45 = arith.constant 0 : index
    %60 = vector.load %arg5[%c0_44, %c0_45] : memref<32x8xf32, #tpu.memory_space<vmem>>, vector<32x8xf32>
    %cst_46 = arith.constant dense<0.000000e+00> : vector<2x8xf32>
    %61 = tpu.matmul %59, %60, %cst_46 {dimension_numbers = #tpu.dot_dimension_numbers<[1], [0], [0], [1], [0, 0, 1, 1], [], []>} : vector<2x32xf32>, vector<32x8xf32>, vector<2x8xf32> -> vector<2x8xf32>
    %c0_47 = arith.constant 0 : index
    %c0_48 = arith.constant 0 : index
    %62 = vector.load %arg6[%c0_47, %c0_48] : memref<1x8xf32, #tpu.memory_space<vmem>>, vector<1x8xf32>
    %63 = vector.broadcast %62 : vector<1x8xf32> to vector<2x8xf32>
    %64 = arith.addf %61, %63 : vector<2x8xf32>
    %c0_49 = arith.constant 0 : index
    %c0_50 = arith.constant 0 : index
    %65 = vector.load %arg7[%c0_49, %c0_50] : memref<2x8xf32, #tpu.memory_space<vmem>>, vector<2x8xf32>
    tpu.vector_store %arg7[%c0_49, %c0_50], %64 {strides = array<i32>} : memref<2x8xf32, #tpu.memory_space<vmem>>, vector<2x8xf32>,
    return
  }
  func.func @transform_0(%arg0: i32) -> (i32, i32) {
    %c0_i32 = arith.constant 0 : i32
    %c0_i32_0 = arith.constant 0 : i32
    %c0_i32_1 = arith.constant 0 : i32
    return %c0_i32, %c0_i32_0 : i32, i32
  }
  func.func @transform_1(%arg0: i32) -> (i32, i32, i32) {
    %c0_i32 = arith.constant 0 : i32
    %c0_i32_0 = arith.constant 0 : i32
    %c0_i32_1 = arith.constant 0 : i32
    %c0_i32_2 = arith.constant 0 : i32
    return %c0_i32, %c0_i32_0, %c0_i32_1 : i32, i32, i32
  }
  func.func @transform_2(%arg0: i32) -> (i32, i32) {
    %c0_i32 = arith.constant 0 : i32
    %c0_i32_0 = arith.constant 0 : i32
    %c0_i32_1 = arith.constant 0 : i32
    return %c0_i32, %c0_i32_0 : i32, i32
  }
  func.func @transform_3(%arg0: i32) -> (i32, i32) {
    %c0_i32 = arith.constant 0 : i32
    %c0_i32_0 = arith.constant 0 : i32
    %c0_i32_1 = arith.constant 0 : i32
    return %c0_i32, %c0_i32_0 : i32, i32
  }
  func.func @transform_4(%arg0: i32) -> (i32, i32) {
    %c0_i32 = arith.constant 0 : i32
    %c0_i32_0 = arith.constant 0 : i32
    %c0_i32_1 = arith.constant 0 : i32
    return %c0_i32, %c0_i32_0 : i32, i32
  }
  func.func @transform_5(%arg0: i32) -> (i32, i32) {
    %c0_i32 = arith.constant 0 : i32
    %c0_i32_0 = arith.constant 0 : i32
    %c0_i32_1 = arith.constant 0 : i32
    return %c0_i32, %c0_i32_0 : i32, i32
  }
  func.func @transform_6(%arg0: i32) -> (i32, i32) {
    %c0_i32 = arith.constant 0 : i32
    %c0_i32_0 = arith.constant 0 : i32
    return %arg0, %c0_i32 : i32, i32
  }
}

</mosaic_0001>

<bundles_post_ra>
// kernel: tpu_custom_call.1
= control target key start
LH: loop header
LB: loop body
LE: loop exit
PB: predicated region body
PF: predicated region fallthrough
CT: control target
= control target key end

     0   :  { %vm396_vm0 = vcmask 1041408   ;;  %v14560_v2 = vmov 0.0   ;;  %vm272_vm1 = vcmask 31744   ;;  %vm8971_vm2 = vmmov 0   ;;  %s14553_s0 = inlined_call_operand.vmem [shape: f32[688,4], index: 0, kind: input, shape index: {}]   ;;  %s14554_s1 = inlined_call_operand.vmem [shape: bf16[9,4,32], index: 1, kind: input, shape index: {}]   ;;  %s14555_s2 = inlined_call_operand.vmem [shape: f32[1,32], index: 2, kind: input, shape index: {}]   ;;  %s14556_s3 = inlined_call_operand.vmem [shape: f32[2,648], index: 3, kind: input, shape index: {}]   ;;  %s14557_s4 = inlined_call_operand.vmem [shape: f32[32,8], index: 4, kind: input, shape index: {}]   ;;  %s14558_s5 = inlined_call_operand.vmem [shape: f32[1,8], index: 5, kind: input, shape index: {}]   ;;  %s14559_s6 = inlined_call_operand.hbm [shape: f32[2,8], index: 6, kind: output, shape index: {}]  }
   0x1   :  { %v6600_v0 = vld [vmem:[%s14554_s1 + $0x2] sm:$0x3]  ;;  %7435 = vmatprep.subr.bf16.mxu0 %v14560_v2  ;;  %8940 = vmatprep.subr.bf16.mxu1 %v14560_v2  ;;  %v149_v4 = vld [vmem:[%s14553_s0 + $0x9] sm:$0xff]  ;;  %v150_v9 = vld [vmem:[%s14553_s0 + $0x11] sm:$0xff] }
   0x2   :  { %v148_v1 = vld [vmem:[%s14553_s0 + $0x1] sm:$0xff]  ;;  %v398_v3 = vsel %vm396_vm0, %v6600_v0, 0  ;;  %v201_v6 = vld [vmem:[%s14553_s0 + $0x1a9] sm:$0xff]  ;;  %7437 = vmatprep.mubr.msk.bf16.mxu0 %vm8971_vm2, %v14560_v2  ;;  %7541 = vmatprep.mubr.msk.bf16.mxu1 %vm8971_vm2, %v14560_v2  ;;  %v151_v10 = vld [vmem:[%s14553_s0 + $0x19] sm:$0xff] }
   0x3   :  { %v200_v5 = vld [vmem:[%s14553_s0 + $0x1a1] sm:$0xff]  ;;  %7436 = vmatpush3.bf16.msra.mxu0 %v398_v3  ;;  %8941 = vmatpush3.bf16.msra.mxu1 %v398_v3  ;;  %v231_v7 = vpack.c.bf16 %v149_v4, %v148_v1  ;;  %v202_v11 = vld [vmem:[%s14553_s0 + $0x1b1] sm:$0xff]  ;;  %v203_v12 = vld [vmem:[%s14553_s0 + $0x1b9] sm:$0xff]  ;;  %v232_v13 = vpack.c.bf16 %v151_v10, %v150_v9 }
   0x4   :  { %v257_v8 = vpack.c.bf16 %v201_v6, %v200_v5  ;;  %7601 = vmatprep.subr.bf16.mxu1 %v14560_v2  ;;  %7767 = vmatprep.subr.bf16.mxu0 %v14560_v2  ;;  %v258_v14 = vpack.c.bf16 %v203_v12, %v202_v11  ;;  %v152_v15 = vld [vmem:[%s14553_s0 + $0x21] sm:$0xff]  ;;  %v153_v16 = vld [vmem:[%s14553_s0 + $0x29] sm:$0xff]  ;;  %v154_v22 = vld [vmem:[%s14553_s0 + $0x31] sm:$0xff] }
   0x5   :  { %v204_v17 = vld [vmem:[%s14553_s0 + $0x1c1] sm:$0xff]  ;;  %v205_v18 = vld [vmem:[%s14553_s0 + $0x1c9] sm:$0xff]  ;;  %v233_v19 = vpack.c.bf16 %v153_v16, %v152_v15  ;;  %v155_v24 = vld [vmem:[%s14553_s0 + $0x39] sm:$0xff] }
   0x6   :  { %7438 = vmatmul.mubr.msk.bf16.vlgmr.msra.gmra.mxu0 %vm272_vm1, %v231_v7  ;;  %7542 = vmatmul.mubr.msk.bf16.vlgmr.msra.gmra.mxu1 %vm272_vm1, %v257_v8  ;;  %v259_v20 = vpack.c.bf16 %v205_v18, %v204_v17  ;;  %v106_v21 = vld [vmem:[%s14554_s1] sm:$0x3]  ;;  %v206_v25 = vld [vmem:[%s14553_s0 + $0x1d1] sm:$0xff]  ;;  %v234_v27 = vpack.c.bf16 %v155_v24, %v154_v22 }
   0x7   :  { %7441 = vmatprep.mubr.msk.bf16.mxu0 %vm8971_vm2, %v14560_v2  ;;  %7545 = vmatprep.mubr.msk.bf16.mxu1 %vm8971_vm2, %v14560_v2  ;;  %v884_v23 = vsel %vm396_vm0, %v106_v21, 0  ;;  %v207_v26 = vld [vmem:[%s14553_s0 + $0x1d9] sm:$0xff] }
   0x8   :  { %7602 = vmatpush3.bf16.msra.mxu1 %v884_v23  ;;  %v260_v28 = vpack.c.bf16 %v207_v26, %v206_v25 }
   0x9   :  { %7933 = vmatprep.subr.bf16.mxu1 %v14560_v2 }
   0xe   :  { %7442 = vmatmul.mubr.msk.bf16.gmra.mxu0 %vm272_vm1, %v232_v13  ;;  %7546 = vmatmul.mubr.msk.bf16.gmra.mxu1 %vm272_vm1, %v258_v14 }
   0xf   :  { %7445 = vmatprep.mubr.msk.bf16.mxu0 %vm8971_vm2, %v14560_v2  ;;  %7549 = vmatprep.mubr.msk.bf16.mxu1 %vm8971_vm2, %v14560_v2 }
  0x16   :  { %7446 = vmatmul.mubr.msk.bf16.gmra.mxu0 %vm272_vm1, %v233_v19  ;;  %7550 = vmatmul.mubr.msk.bf16.gmra.mxu1 %vm272_vm1, %v259_v20 }
  0x17   :  { %7449 = vmatprep.mubr.msk.bf16.mxu0 %vm8971_vm2, %v14560_v2  ;;  %7553 = vmatprep.mubr.msk.bf16.mxu1 %vm8971_vm2, %v14560_v2 }
  0x18   :  { %11 = vsyncpa [#allocation3], 0  ;;  %v156_v29 = vld [vmem:[%s14553_s0 + $0x41] sm:$0xff]  ;;  %v157_v30 = vld [vmem:[%s14553_s0 + $0x49] sm:$0xff]  ;;  %vm6286_vm3 = vcmask 64512   ;;  %vm6510_vm4 = vcmask 261120  }
  0x19   :  { %v208_v31 = vld [vmem:[%s14553_s0 + $0x1e1] sm:$0xff]  ;;  %v209_v32 = vld [vmem:[%s14553_s0 + $0x1e9] sm:$0xff]  ;;  %v235_v33 = vpack.c.bf16 %v157_v30, %v156_v29  ;;  %v158_v35 = vld [vmem:[%s14553_s0 + $0x51] sm:$0xff]  ;;  %s8973_s16 = smov [#allocation2]   ;;  %vm6584_vm5 = vcmask 58368  }
  0x1a   :  { %v261_v34 = vpack.c.bf16 %v209_v32, %v208_v31  ;;  %v159_v36 = vld [vmem:[%s14553_s0 + $0x59] sm:$0xff]  ;;  %v210_v37 = vld [vmem:[%s14553_s0 + $0x1f1] sm:$0xff]  ;;  %v160_v41 = vld [vmem:[%s14553_s0 + $0x61] sm:$0xff]  ;;  %s6592_s17 = sshll.u32 %s8973_s16, 4  ;;  %s6593_s17 = int_to_ptr.vmem [resolvable:$true] %s6592_s17 }
  0x1b   :  { %v211_v38 = vld [vmem:[%s14553_s0 + $0x1f9] sm:$0xff]  ;;  %v236_v39 = vpack.c.bf16 %v159_v36, %v158_v35  ;;  %v6683_v42 = vld [vmem:[%s14554_s1 + $0x4] sm:$0x3]  ;;  %v161_v43 = vld [vmem:[%s14553_s0 + $0x69] sm:$0xff]  ;;  %p8953_p1 = scmp.lt.s32.totalorder %s6593_s17, %s6593_s17 }
  0x1c   :  { %v262_v40 = vpack.c.bf16 %v211_v38, %v210_v37  ;;  %v212_v44 = vld [vmem:[%s14553_s0 + $0x201] sm:$0xff]  ;;  %v213_v45 = vld [vmem:[%s14553_s0 + $0x209] sm:$0xff]  ;;  %v1494_v46 = vsel %vm396_vm0, %v6683_v42, 0  ;;  %v237_v47 = vpack.c.bf16 %v161_v43, %v160_v41  ;;  %v162_v49 = vld [vmem:[%s14553_s0 + $0x71] sm:$0xff] }
  0x1d   :  { %7768 = vmatpush3.bf16.msra.mxu0 %v1494_v46  ;;  %v263_v48 = vpack.c.bf16 %v213_v45, %v212_v44  ;;  %v163_v50 = vld [vmem:[%s14553_s0 + $0x79] sm:$0xff]  ;;  %v214_v51 = vld [vmem:[%s14553_s0 + $0x211] sm:$0xff]  ;;  %v164_v55 = vld [vmem:[%s14553_s0 + $0x81] sm:$0xff] }
  0x1e   :  { %7450 = vmatmul.mubr.msk.bf16.gmra.mxu0 %vm272_vm1, %v234_v27  ;;  %7554 = vmatmul.mubr.msk.bf16.gmra.mxu1 %vm272_vm1, %v260_v28  ;;  %v215_v52 = vld [vmem:[%s14553_s0 + $0x219] sm:$0xff]  ;;  %v238_v53 = vpack.c.bf16 %v163_v50, %v162_v49  ;;  %v165_v56 = vld [vmem:[%s14553_s0 + $0x89] sm:$0xff]  ;;  %v216_v57 = vld [vmem:[%s14553_s0 + $0x221] sm:$0xff] }
  0x1f   :  { %7453 = vmatprep.mubr.msk.bf16.mxu0 %vm8971_vm2, %v14560_v2  ;;  %7557 = vmatprep.mubr.msk.bf16.mxu1 %vm8971_vm2, %v14560_v2  ;;  %v264_v54 = vpack.c.bf16 %v215_v52, %v214_v51  ;;  %v217_v58 = vld [vmem:[%s14553_s0 + $0x229] sm:$0xff]  ;;  %v239_v59 = vpack.c.bf16 %v165_v56, %v164_v55  ;;  %v166_v61 = vld [vmem:[%s14553_s0 + $0x91] sm:$0xff]  ;;  %v167_v62 = vld [vmem:[%s14553_s0 + $0x99] sm:$0xff] }
  0x20   :  { %8099 = vmatprep.subr.bf16.mxu0 %v14560_v2  ;;  %v265_v60 = vpack.c.bf16 %v217_v58, %v216_v57  ;;  %v218_v63 = vld [vmem:[%s14553_s0 + $0x231] sm:$0xff]  ;;  %v219_v0 = vld [vmem:[%s14553_s0 + $0x239] sm:$0xff]  ;;  %v240_v1 = vpack.c.bf16 %v167_v62, %v166_v61  ;;  %v168_v4 = vld [vmem:[%s14553_s0 + $0xa1] sm:$0xff] }
  0x21   :  { %v266_v3 = vpack.c.bf16 %v219_v0, %v218_v63  ;;  %v169_v5 = vld [vmem:[%s14553_s0 + $0xa9] sm:$0xff]  ;;  %v220_v6 = vld [vmem:[%s14553_s0 + $0x241] sm:$0xff]  ;;  %v170_v10 = vld [vmem:[%s14553_s0 + $0xb1] sm:$0xff] }
  0x22   :  { %v221_v7 = vld [vmem:[%s14553_s0 + $0x249] sm:$0xff]  ;;  %v241_v8 = vpack.c.bf16 %v169_v5, %v168_v4  ;;  %v171_v11 = vld [vmem:[%s14553_s0 + $0xb9] sm:$0xff]  ;;  %v222_v12 = vld [vmem:[%s14553_s0 + $0x251] sm:$0xff] }
  0x23   :  { %v267_v9 = vpack.c.bf16 %v221_v7, %v220_v6  ;;  %v223_v13 = vld [vmem:[%s14553_s0 + $0x259] sm:$0xff]  ;;  %v242_v14 = vpack.c.bf16 %v171_v11, %v170_v10  ;;  %v172_v16 = vld [vmem:[%s14553_s0 + $0xc1] sm:$0xff]  ;;  %v173_v17 = vld [vmem:[%s14553_s0 + $0xc9] sm:$0xff] }
  0x24   :  { %v268_v15 = vpack.c.bf16 %v223_v13, %v222_v12  ;;  %v224_v18 = vld [vmem:[%s14553_s0 + $0x261] sm:$0xff]  ;;  %v225_v19 = vld [vmem:[%s14553_s0 + $0x269] sm:$0xff]  ;;  %v243_v20 = vpack.c.bf16 %v173_v17, %v172_v16  ;;  %v174_v22 = vld [vmem:[%s14553_s0 + $0xd1] sm:$0xff] }
  0x25   :  { %v269_v21 = vpack.c.bf16 %v225_v19, %v224_v18  ;;  %v175_v23 = vld [vmem:[%s14553_s0 + $0xd9] sm:$0xff]  ;;  %v226_v24 = vld [vmem:[%s14553_s0 + $0x271] sm:$0xff]  ;;  %v176_v28 = vld [vmem:[%s14553_s0 + $0xe1] sm:$0xff] }
  0x26   :  { %7454 = vmatmul.mubr.msk.bf16.gmra.mxu0 %vm272_vm1, %v235_v33  ;;  %7558 = vmatmul.mubr.msk.bf16.gmra.mxu1 %vm272_vm1, %v261_v34  ;;  %v227_v25 = vld [vmem:[%s14553_s0 + $0x279] sm:$0xff]  ;;  %v244_v26 = vpack.c.bf16 %v175_v23, %v174_v22  ;;  %v177_v29 = vld [vmem:[%s14553_s0 + $0xe9] sm:$0xff]  ;;  %v228_v30 = vld [vmem:[%s14553_s0 + $0x281] sm:$0xff] }
  0x27   :  { %7457 = vmatprep.mubr.msk.bf16.mxu0 %vm8971_vm2, %v14560_v2  ;;  %7561 = vmatprep.mubr.msk.bf16.mxu1 %vm8971_vm2, %v14560_v2  ;;  %v270_v27 = vpack.c.bf16 %v227_v25, %v226_v24  ;;  %v245_v31 = vpack.c.bf16 %v177_v29, %v176_v28  ;;  %v271_v32 = vpack.c.bf16 %v228_v30, %v228_v30  ;;  %v178_v33 = vld [vmem:[%s14553_s0 + $0xf1] sm:$0xff]  ;;  %v179_v34 = vld [vmem:[%s14553_s0 + $0xf9] sm:$0xff]  ;;  %v26_v36 = vld [vmem:[%s14553_s0 + $0x8] sm:$0xff] }
  0x28   :  { %v25_v35 = vld [vmem:[%s14553_s0] sm:$0xff]  ;;  %v246_v37 = vpack.c.bf16 %v179_v34, %v178_v33  ;;  %v27_v41 = vld [vmem:[%s14553_s0 + $0x10] sm:$0xff]  ;;  %v28_v42 = vld [vmem:[%s14553_s0 + $0x18] sm:$0xff] }
  0x29   :  { %v107_v38 = vpack.c.bf16 %v26_v36, %v25_v35  ;;  %v108_v44 = vpack.c.bf16 %v28_v42, %v27_v41  ;;  %v182_v45 = vld [vmem:[%s14553_s0 + $0x111] sm:$0xff]  ;;  %v183_v46 = vld [vmem:[%s14553_s0 + $0x119] sm:$0xff]  ;;  %v184_v51 = vld [vmem:[%s14553_s0 + $0x121] sm:$0xff] }
  0x2a   :  { %v248_v49 = vpack.c.bf16 %v183_v46, %v182_v45  ;;  %v185_v52 = vld [vmem:[%s14553_s0 + $0x129] sm:$0xff]  ;;  %v186_v57 = vld [vmem:[%s14553_s0 + $0x131] sm:$0xff]  ;;  %v187_v58 = vld [vmem:[%s14553_s0 + $0x139] sm:$0xff] }
  0x2b   :  { %v249_v55 = vpack.c.bf16 %v185_v52, %v184_v51  ;;  %v250_v61 = vpack.c.bf16 %v187_v58, %v186_v57  ;;  %v188_v63 = vld [vmem:[%s14553_s0 + $0x141] sm:$0xff]  ;;  %v189_v0 = vld [vmem:[%s14553_s0 + $0x149] sm:$0xff]  ;;  %v190_v6 = vld [vmem:[%s14553_s0 + $0x151] sm:$0xff] }
  0x2c   :  { %v251_v4 = vpack.c.bf16 %v189_v0, %v188_v63  ;;  %v191_v7 = vld [vmem:[%s14553_s0 + $0x159] sm:$0xff]  ;;  %v192_v12 = vld [vmem:[%s14553_s0 + $0x161] sm:$0xff]  ;;  %v193_v13 = vld [vmem:[%s14553_s0 + $0x169] sm:$0xff] }
  0x2d   :  { %v252_v10 = vpack.c.bf16 %v191_v7, %v190_v6  ;;  %v253_v16 = vpack.c.bf16 %v193_v13, %v192_v12  ;;  %v194_v18 = vld [vmem:[%s14553_s0 + $0x171] sm:$0xff]  ;;  %v195_v19 = vld [vmem:[%s14553_s0 + $0x179] sm:$0xff]  ;;  %v196_v24 = vld [vmem:[%s14553_s0 + $0x181] sm:$0xff] }
  0x2e   :  { %7458 = vmatmul.mubr.msk.bf16.gmra.mxu0 %vm272_vm1, %v236_v39  ;;  %7562 = vmatmul.mubr.msk.bf16.gmra.mxu1 %vm272_vm1, %v262_v40  ;;  %v180_v39 = vld [vmem:[%s14553_s0 + $0x101] sm:$0xff]  ;;  %v181_v40 = vld [vmem:[%s14553_s0 + $0x109] sm:$0xff]  ;;  %v254_v22 = vpack.c.bf16 %v195_v19, %v194_v18  ;;  %v199_v33 = vld [vmem:[%s14553_s0 + $0x199] sm:$0xff] }
  0x2f   :  { %7461 = vmatprep.mubr.msk.bf16.mxu0 %vm8971_vm2, %v14560_v2  ;;  %7565 = vmatprep.mubr.msk.bf16.mxu1 %vm8971_vm2, %v14560_v2  ;;  %v247_v43 = vpack.c.bf16 %v181_v40, %v180_v39  ;;  %v197_v25 = vld [vmem:[%s14553_s0 + $0x189] sm:$0xff]  ;;  %v45_v34 = vld [vmem:[%s14553_s0 + $0xa0] sm:$0xff]  ;;  %v52_v12 = vld [vmem:[%s14553_s0 + $0xd8] sm:$0xff] }
  0x30   :  { %v255_v28 = vpack.c.bf16 %v197_v25, %v196_v24  ;;  %v46_v35 = vld [vmem:[%s14553_s0 + $0xa8] sm:$0xff]  ;;  %v47_v46 = vld [vmem:[%s14553_s0 + $0xb0] sm:$0xff]  ;;  %v1249_v63 = vld [vmem:[%s14553_s0 + $0x1a] sm:$0xff] }
  0x31   :  { %v117_v41 = vpack.c.bf16 %v46_v35, %v45_v34  ;;  %v1250_v13 = vld [vmem:[%s14553_s0 + $0x22] sm:$0xff] }
  0x32   :  { %v53_v25 = vld [vmem:[%s14553_s0 + $0xe0] sm:$0xff] }
  0x36   :  { %7462 = vmatmul.mubr.msk.bf16.gmra.mxu0 %vm272_vm1, %v237_v47  ;;  %7566 = vmatmul.mubr.msk.bf16.gmra.mxu1 %vm272_vm1, %v263_v48  ;;  %v29_v47 = vld [vmem:[%s14553_s0 + $0x20] sm:$0xff]  ;;  %v30_v48 = vld [vmem:[%s14553_s0 + $0x28] sm:$0xff] }
  0x37   :  { %7465 = vmatprep.mubr.msk.bf16.mxu0 %vm8971_vm2, %v14560_v2  ;;  %7569 = vmatprep.mubr.msk.bf16.mxu1 %vm8971_vm2, %v14560_v2  ;;  %v109_v50 = vpack.c.bf16 %v30_v48, %v29_v47  ;;  %v48_v47 = vld [vmem:[%s14553_s0 + $0xb8] sm:$0xff]  ;;  %v1246_v48 = vld [vmem:[%s14553_s0 + $0x2] sm:$0xff] }
  0x3e   :  { %7466 = vmatmul.mubr.msk.bf16.gmra.mxu0 %vm272_vm1, %v238_v53  ;;  %7570 = vmatmul.mubr.msk.bf16.gmra.mxu1 %vm272_vm1, %v264_v54  ;;  %v31_v53 = vld [vmem:[%s14553_s0 + $0x30] sm:$0xff]  ;;  %v32_v54 = vld [vmem:[%s14553_s0 + $0x38] sm:$0xff] }
  0x3f   :  { %7469 = vmatprep.mubr.msk.bf16.mxu0 %vm8971_vm2, %v14560_v2  ;;  %7573 = vmatprep.mubr.msk.bf16.mxu1 %vm8971_vm2, %v14560_v2  ;;  %v110_v56 = vpack.c.bf16 %v32_v54, %v31_v53  ;;  %v118_v54 = vpack.c.bf16 %v48_v47, %v47_v46  ;;  %v56_v46 = vld [vmem:[%s14553_s0 + $0xf8] sm:$0xff]  ;;  %v1254_v47 = vld [vmem:[%s14553_s0 + $0x42] sm:$0xff] }
  0x46   :  { %7470 = vmatmul.mubr.msk.bf16.gmra.mxu0 %vm272_vm1, %v239_v59  ;;  %7574 = vmatmul.mubr.msk.bf16.gmra.mxu1 %vm272_vm1, %v265_v60  ;;  %v33_v59 = vld [vmem:[%s14553_s0 + $0x40] sm:$0xff]  ;;  %v34_v60 = vld [vmem:[%s14553_s0 + $0x48] sm:$0xff] }
  0x47   :  { %7473 = vmatprep.mubr.msk.bf16.mxu0 %vm8971_vm2, %v14560_v2  ;;  %7577 = vmatprep.mubr.msk.bf16.mxu1 %vm8971_vm2, %v14560_v2  ;;  %v111_v62 = vpack.c.bf16 %v34_v60, %v33_v59  ;;  %v49_v60 = vld [vmem:[%s14553_s0 + $0xc0] sm:$0xff] }
  0x4e   :  { %7474 = vmatmul.mubr.msk.bf16.gmra.mxu0 %vm272_vm1, %v240_v1  ;;  %7578 = vmatmul.mubr.msk.bf16.gmra.mxu1 %vm272_vm1, %v266_v3  ;;  %v35_v1 = vld [vmem:[%s14553_s0 + $0x50] sm:$0xff]  ;;  %v36_v3 = vld [vmem:[%s14553_s0 + $0x58] sm:$0xff] }
  0x4f   :  { %7477 = vmatprep.mubr.msk.bf16.mxu0 %vm8971_vm2, %v14560_v2  ;;  %7581 = vmatprep.mubr.msk.bf16.mxu1 %vm8971_vm2, %v14560_v2  ;;  %v112_v5 = vpack.c.bf16 %v36_v3, %v35_v1 }
  0x56   :  { %7478 = vmatmul.mubr.msk.bf16.gmra.mxu0 %vm272_vm1, %v241_v8  ;;  %7582 = vmatmul.mubr.msk.bf16.gmra.mxu1 %vm272_vm1, %v267_v9  ;;  %v37_v8 = vld [vmem:[%s14553_s0 + $0x60] sm:$0xff]  ;;  %v38_v9 = vld [vmem:[%s14553_s0 + $0x68] sm:$0xff] }
  0x57   :  { %7481 = vmatprep.mubr.msk.bf16.mxu0 %vm8971_vm2, %v14560_v2  ;;  %7585 = vmatprep.mubr.msk.bf16.mxu1 %vm8971_vm2, %v14560_v2  ;;  %v113_v11 = vpack.c.bf16 %v38_v9, %v37_v8 }
  0x5e   :  { %7482 = vmatmul.mubr.msk.bf16.gmra.mxu0 %vm272_vm1, %v242_v14  ;;  %7586 = vmatmul.mubr.msk.bf16.gmra.mxu1 %vm272_vm1, %v268_v15  ;;  %v39_v14 = vld [vmem:[%s14553_s0 + $0x70] sm:$0xff]  ;;  %v40_v15 = vld [vmem:[%s14553_s0 + $0x78] sm:$0xff] }
  0x5f   :  { %7485 = vmatprep.mubr.msk.bf16.mxu0 %vm8971_vm2, %v14560_v2  ;;  %7589 = vmatprep.mubr.msk.bf16.mxu1 %vm8971_vm2, %v14560_v2  ;;  %v114_v17 = vpack.c.bf16 %v40_v15, %v39_v14  ;;  %v1251_v14 = vld [vmem:[%s14553_s0 + $0x2a] sm:$0xff] }
  0x66   :  { %7486 = vmatmul.mubr.msk.bf16.gmra.mxu0 %vm272_vm1, %v243_v20  ;;  %7590 = vmatmul.mubr.msk.bf16.gmra.mxu1 %vm272_vm1, %v269_v21  ;;  %v41_v20 = vld [vmem:[%s14553_s0 + $0x80] sm:$0xff]  ;;  %v42_v21 = vld [vmem:[%s14553_s0 + $0x88] sm:$0xff] }
  0x67   :  { %7489 = vmatprep.mubr.msk.bf16.mxu0 %vm8971_vm2, %v14560_v2  ;;  %7593 = vmatprep.mubr.msk.bf16.mxu1 %vm8971_vm2, %v14560_v2  ;;  %v115_v23 = vpack.c.bf16 %v42_v21, %v41_v20  ;;  %v1331_v20 = vpack.c.bf16 %v1251_v14, %v1250_v13 }
  0x6e   :  { %7490 = vmatmul.mubr.msk.bf16.gmra.mxu0 %vm272_vm1, %v244_v26  ;;  %7594 = vmatmul.mubr.msk.bf16.gmra.mxu1 %vm272_vm1, %v270_v27  ;;  %v43_v26 = vld [vmem:[%s14553_s0 + $0x90] sm:$0xff]  ;;  %v44_v27 = vld [vmem:[%s14553_s0 + $0x98] sm:$0xff] }
  0x6f   :  { %7493 = vmatprep.mubr.msk.bf16.mxu0 %vm8971_vm2, %v14560_v2  ;;  %7597 = vmatprep.mubr.msk.bf16.mxu1 %vm8971_vm2, %v14560_v2  ;;  %v116_v29 = vpack.c.bf16 %v44_v27, %v43_v26  ;;  %v54_v26 = vld [vmem:[%s14553_s0 + $0xe8] sm:$0xff]  ;;  %v1252_v27 = vld [vmem:[%s14553_s0 + $0x32] sm:$0xff] }
  0x70   :  { %v121_v35 = vpack.c.bf16 %v54_v26, %v53_v25  ;;  %v60_v25 = vld [vmem:[%s14553_s0 + $0x118] sm:$0xff]  ;;  %v1258_v26 = vld [vmem:[%s14553_s0 + $0x62] sm:$0xff] }
  0x76   :  { %7494 = vmatmul.mubr.msk.bf16.gmra.mxu0 %vm272_vm1, %v245_v31  ;;  %7598 = vmatmul.mubr.msk.bf16.gmra.mxu1 %vm272_vm1, %v271_v32  ;;  %v198_v32 = vld [vmem:[%s14553_s0 + $0x191] sm:$0xff] }
  0x77   :  { %7497 = vmatprep.mubr.msk.bf16.mxu0 %vm8971_vm2, %v14560_v2  ;;  %7603 = vmatprep.mubr.msk.bf16.mxu1 %vm8971_vm2, %v14560_v2  ;;  %v256_v40 = vpack.c.bf16 %v199_v33, %v198_v32 }
  0x7e   :  { %7498 = vmatmul.mubr.msk.bf16.gmra.mxu0 %vm272_vm1, %v246_v37  ;;  %7604 = vmatmul.mubr.msk.bf16.vlgmr.msra.gmra.mxu1 %vm272_vm1, %v107_v38 }
  0x7f   :  { %7501 = vmatprep.mubr.msk.bf16.mxu0 %vm8971_vm2, %v14560_v2  ;;  %7607 = vmatprep.mubr.msk.bf16.mxu1 %vm8971_vm2, %v14560_v2 }
  0x86   :  { %7502 = vmatmul.mubr.msk.bf16.gmra.mxu0 %vm272_vm1, %v247_v43  ;;  %7608 = vmatmul.mubr.msk.bf16.gmra.mxu1 %vm272_vm1, %v108_v44 }
  0x87   :  { %7505 = vmatprep.mubr.msk.bf16.mxu0 %vm8971_vm2, %v14560_v2  ;;  %7611 = vmatprep.mubr.msk.bf16.mxu1 %vm8971_vm2, %v14560_v2 }
  0x8e   :  { %7506 = vmatmul.mubr.msk.bf16.gmra.mxu0 %vm272_vm1, %v248_v49  ;;  %7612 = vmatmul.mubr.msk.bf16.gmra.mxu1 %vm272_vm1, %v109_v50  ;;  %v1247_v49 = vld [vmem:[%s14553_s0 + $0xa] sm:$0xff] }
  0x8f   :  { %7509 = vmatprep.mubr.msk.bf16.mxu0 %vm8971_vm2, %v14560_v2  ;;  %7615 = vmatprep.mubr.msk.bf16.mxu1 %vm8971_vm2, %v14560_v2 }
  0x96   :  { %7510 = vmatmul.mubr.msk.bf16.gmra.mxu0 %vm272_vm1, %v249_v55  ;;  %7616 = vmatmul.mubr.msk.bf16.gmra.mxu1 %vm272_vm1, %v110_v56  ;;  %v1329_v55 = vpack.c.bf16 %v1247_v49, %v1246_v48  ;;  %v1255_v48 = vld [vmem:[%s14553_s0 + $0x4a] sm:$0xff] }
  0x97   :  { %7513 = vmatprep.mubr.msk.bf16.mxu0 %vm8971_vm2, %v14560_v2  ;;  %7619 = vmatprep.mubr.msk.bf16.mxu1 %vm8971_vm2, %v14560_v2 }
  0x9e   :  { %7514 = vmatmul.mubr.msk.bf16.gmra.mxu0 %vm272_vm1, %v250_v61  ;;  %7620 = vmatmul.mubr.msk.bf16.gmra.mxu1 %vm272_vm1, %v111_v62  ;;  %v50_v61 = vld [vmem:[%s14553_s0 + $0xc8] sm:$0xff]  ;;  %v1248_v62 = vld [vmem:[%s14553_s0 + $0x12] sm:$0xff] }
  0x9f   :  { %7517 = vmatprep.mubr.msk.bf16.mxu0 %vm8971_vm2, %v14560_v2  ;;  %7623 = vmatprep.mubr.msk.bf16.mxu1 %vm8971_vm2, %v14560_v2  ;;  %v1330_v6 = vpack.c.bf16 %v1249_v63, %v1248_v62  ;;  %v57_v63 = vld [vmem:[%s14553_s0 + $0x100] sm:$0xff] }
  0xa6   :  { %7518 = vmatmul.mubr.msk.bf16.gmra.mxu0 %vm272_vm1, %v251_v4  ;;  %7624 = vmatmul.mubr.msk.bf16.gmra.mxu1 %vm272_vm1, %v112_v5  ;;  %v119_v5 = vpack.c.bf16 %v50_v61, %v49_v60 }
  0xa7   :  { %7521 = vmatprep.mubr.msk.bf16.mxu0 %vm8971_vm2, %v14560_v2  ;;  %7627 = vmatprep.mubr.msk.bf16.mxu1 %vm8971_vm2, %v14560_v2 }
  0xae   :  { %7522 = vmatmul.mubr.msk.bf16.gmra.mxu0 %vm272_vm1, %v252_v10  ;;  %7628 = vmatmul.mubr.msk.bf16.gmra.mxu1 %vm272_vm1, %v113_v11  ;;  %v51_v11 = vld [vmem:[%s14553_s0 + $0xd0] sm:$0xff] }
  0xaf   :  { %7525 = vmatprep.mubr.msk.bf16.mxu0 %vm8971_vm2, %v14560_v2  ;;  %7631 = vmatprep.mubr.msk.bf16.mxu1 %vm8971_vm2, %v14560_v2  ;;  %v120_v19 = vpack.c.bf16 %v52_v12, %v51_v11 }
  0xb6   :  { %7526 = vmatmul.mubr.msk.bf16.gmra.mxu0 %vm272_vm1, %v253_v16  ;;  %7632 = vmatmul.mubr.msk.bf16.gmra.mxu1 %vm272_vm1, %v114_v17 }
  0xb7   :  { %7529 = vmatprep.mubr.msk.bf16.mxu0 %vm8971_vm2, %v14560_v2  ;;  %7635 = vmatprep.mubr.msk.bf16.mxu1 %vm8971_vm2, %v14560_v2 }
  0xbe   :  { %7530 = vmatmul.mubr.msk.bf16.gmra.mxu0 %vm272_vm1, %v254_v22  ;;  %7636 = vmatmul.mubr.msk.bf16.gmra.mxu1 %vm272_vm1, %v115_v23 }
  0xbf   :  { %7533 = vmatprep.mubr.msk.bf16.mxu0 %vm8971_vm2, %v14560_v2  ;;  %7639 = vmatprep.mubr.msk.bf16.mxu1 %vm8971_vm2, %v14560_v2 }
  0xc6   :  { %v9472_v30 = vpop.f32.mrf.mxu0  ;;  %7534 = vmatmul.mubr.msk.bf16.gmra.mxu0 %vm272_vm1, %v255_v28  ;;  %v9475_v31 = vpop.f32.mrf.mxu1  ;;  %7640 = vmatmul.mubr.msk.bf16.gmra.mxu1 %vm272_vm1, %v116_v29  ;;  %v1253_v28 = vld [vmem:[%s14553_s0 + $0x3a] sm:$0xff] }
  0xc7   :  { %14563 = vst [vmem:[#allocation5_spill] sm:$0xff] %v9475_v31  ;;  %7537 = vmatprep.mubr.msk.bf16.mxu0 %vm8971_vm2, %v14560_v2  ;;  %7643 = vmatprep.mubr.msk.bf16.mxu1 %vm8971_vm2, %v14560_v2 }
  0xc8   :  { %v7439_v36 = vpop.f32.mrf.mxu0  ;;  %v7543_v37 = vpop.f32.mrf.mxu1 }
  0xc9   :  { %v1332_v36 = vpack.c.bf16 %v1253_v28, %v1252_v27  ;;  %v1259_v27 = vld [vmem:[%s14553_s0 + $0x6a] sm:$0xff]  ;;  %v6767_v28 = vld [vmem:[%s14554_s1 + $0x8] sm:$0x3] }
  0xca   :  { %v9494_v38 = vpop.f32.mrf.mxu0  ;;  %v9496_v39 = vpop.f32.mrf.mxu1 }
  0xcb   :  { %14564 = vst [vmem:[#allocation6_spill] sm:$0xff] %v9496_v39 }
  0xcc   :  { %v7440_v42 = vpop.f32.mrf.mxu0  ;;  %v7544_v43 = vpop.f32.mrf.mxu1 }
  0xcd   :  { %v55_v43 = vld [vmem:[%s14553_s0 + $0xf0] sm:$0xff] }
  0xce   :  { %v9498_v44 = vpop.f32.mrf.mxu0  ;;  %7538 = vmatmul.mubr.msk.bf16.gmra.mxu0 %vm272_vm1, %v256_v40  ;;  %v9501_v45 = vpop.f32.mrf.mxu1  ;;  %7644 = vmatmul.mubr.msk.bf16.gmra.mxu1 %vm272_vm1, %v117_v41 }
  0xcf   :  { %14565 = vst [vmem:[#allocation7_spill] sm:$0xff] %v9501_v45  ;;  %7647 = vmatprep.mubr.msk.bf16.mxu1 %vm8971_vm2, %v14560_v2  ;;  %7769 = vmatprep.mubr.msk.bf16.mxu0 %vm8971_vm2, %v14560_v2 }
  0xd0   :  { %v7443_v50 = vpop.f32.mrf.mxu0  ;;  %v7547_v51 = vpop.f32.mrf.mxu1 }
  0xd2   :  { %v9520_v52 = vpop.f32.mrf.mxu0  ;;  %v9522_v53 = vpop.f32.mrf.mxu1 }
  0xd3   :  { %14566 = vst [vmem:[#allocation8_spill] sm:$0xff] %v9522_v53 }
  0xd4   :  { %v7444_v56 = vpop.f32.mrf.mxu0  ;;  %v7548_v57 = vpop.f32.mrf.mxu1 }
  0xd5   :  { %v1333_v56 = vpack.c.bf16 %v1255_v48, %v1254_v47 }
  0xd6   :  { %v9524_v58 = vpop.f32.mrf.mxu0  ;;  %v9526_v59 = vpop.f32.mrf.mxu1  ;;  %7648 = vmatmul.mubr.msk.bf16.gmra.mxu1 %vm272_vm1, %v118_v54  ;;  %7770 = vmatmul.mubr.msk.bf16.vlgmr.msra.gmra.mxu0 %vm272_vm1, %v1329_v55  ;;  %v122_v55 = vpack.c.bf16 %v56_v46, %v55_v43  ;;  %v1335_v43 = vpack.c.bf16 %v1259_v27, %v1258_v26 }
  0xd7   :  { %14567 = vst [vmem:[#allocation9_spill] sm:$0xff] %v9526_v59  ;;  %7651 = vmatprep.mubr.msk.bf16.mxu1 %vm8971_vm2, %v14560_v2  ;;  %7773 = vmatprep.mubr.msk.bf16.mxu0 %vm8971_vm2, %v14560_v2 }
  0xd8   :  { %v7447_v0 = vpop.f32.mrf.mxu0  ;;  %v7551_v1 = vpop.f32.mrf.mxu1 }
  0xd9   :  { %v58_v0 = vld [vmem:[%s14553_s0 + $0x108] sm:$0xff]  ;;  %v1256_v1 = vld [vmem:[%s14553_s0 + $0x52] sm:$0xff] }
  0xda   :  { %v9546_v3 = vpop.f32.mrf.mxu0  ;;  %v9548_v4 = vpop.f32.mrf.mxu1  ;;  %v123_v12 = vpack.c.bf16 %v58_v0, %v57_v63 }
  0xdb   :  { %14568 = vst [vmem:[#allocation10_spill] sm:$0xff] %v9548_v4 }
  0xdc   :  { %v7448_v7 = vpop.f32.mrf.mxu0  ;;  %v7552_v8 = vpop.f32.mrf.mxu1 }
  0xde   :  { %v9550_v9 = vpop.f32.mrf.mxu0  ;;  %v9552_v10 = vpop.f32.mrf.mxu1  ;;  %7652 = vmatmul.mubr.msk.bf16.gmra.mxu1 %vm272_vm1, %v119_v5  ;;  %7774 = vmatmul.mubr.msk.bf16.gmra.mxu0 %vm272_vm1, %v1330_v6  ;;  %v1257_v5 = vld [vmem:[%s14553_s0 + $0x5a] sm:$0xff] }
  0xdf   :  { %14569 = vst [vmem:[#allocation11_spill] sm:$0xff] %v9552_v10  ;;  %7655 = vmatprep.mubr.msk.bf16.mxu1 %vm8971_vm2, %v14560_v2  ;;  %7777 = vmatprep.mubr.msk.bf16.mxu0 %vm8971_vm2, %v14560_v2  ;;  %v1334_v13 = vpack.c.bf16 %v1257_v5, %v1256_v1 }
  0xe0   :  { %v7451_v15 = vpop.f32.mrf.mxu0  ;;  %v7555_v16 = vpop.f32.mrf.mxu1 }
  0xe1   :  { %v6725_v16 = vld [vmem:[%s14554_s1 + $0x6] sm:$0x3] }
  0xe2   :  { %v9572_v17 = vpop.f32.mrf.mxu0  ;;  %v9574_v18 = vpop.f32.mrf.mxu1 }
  0xe3   :  { %14570 = vst [vmem:[#allocation12_spill] sm:$0xff] %v9574_v18 }
  0xe4   :  { %v7452_v21 = vpop.f32.mrf.mxu0  ;;  %v7556_v22 = vpop.f32.mrf.mxu1 }
  0xe5   :  { %v59_v22 = vld [vmem:[%s14553_s0 + $0x110] sm:$0xff] }
  0xe6   :  { %v9576_v23 = vpop.f32.mrf.mxu0  ;;  %v9578_v24 = vpop.f32.mrf.mxu1  ;;  %7656 = vmatmul.mubr.msk.bf16.gmra.mxu1 %vm272_vm1, %v120_v19  ;;  %7778 = vmatmul.mubr.msk.bf16.gmra.mxu0 %vm272_vm1, %v1331_v20  ;;  %v2185_v19 = vsel %vm396_vm0, %v6725_v16, 0  ;;  %v64_v16 = vld [vmem:[%s14553_s0 + $0x138] sm:$0xff] }
  0xe7   :  { %14571 = vst [vmem:[#allocation13_spill] sm:$0xff] %v9578_v24  ;;  %7659 = vmatprep.mubr.msk.bf16.mxu1 %vm8971_vm2, %v14560_v2  ;;  %7781 = vmatprep.mubr.msk.bf16.mxu0 %vm8971_vm2, %v14560_v2 }
  0xe8   :  { %v7455_v29 = vpop.f32.mrf.mxu0  ;;  %v7559_v32 = vpop.f32.mrf.mxu1  ;;  %7934 = vmatpush3.bf16.msra.mxu1 %v2185_v19  ;;  %v1262_v19 = vld [vmem:[%s14553_s0 + $0x82] sm:$0xff] }
  0xe9   :  { %8265 = vmatprep.subr.bf16.mxu1 %v14560_v2 }
  0xea   :  { %v9598_v33 = vpop.f32.mrf.mxu0  ;;  %v9600_v34 = vpop.f32.mrf.mxu1 }
  0xeb   :  { %14572 = vst [vmem:[#allocation14_spill] sm:$0xff] %v9600_v34 }
  0xec   :  { %v7456_v37 = vpop.f32.mrf.mxu0  ;;  %v7560_v40 = vpop.f32.mrf.mxu1 }
  0xed   :  { %v124_v40 = vpack.c.bf16 %v60_v25, %v59_v22  ;;  %v1263_v22 = vld [vmem:[%s14553_s0 + $0x8a] sm:$0xff] }
  0xee   :  { %v9602_v41 = vpop.f32.mrf.mxu0  ;;  %v9604_v42 = vpop.f32.mrf.mxu1  ;;  %7660 = vmatmul.mubr.msk.bf16.gmra.mxu1 %vm272_vm1, %v121_v35  ;;  %7782 = vmatmul.mubr.msk.bf16.gmra.mxu0 %vm272_vm1, %v1332_v36  ;;  %v2876_v35 = vsel %vm396_vm0, %v6767_v28, 0 }
  0xef   :  { %14573 = vst [vmem:[#allocation15_spill] sm:$0xff] %v9604_v42  ;;  %7663 = vmatprep.mubr.msk.bf16.mxu1 %vm8971_vm2, %v14560_v2  ;;  %7785 = vmatprep.mubr.msk.bf16.mxu0 %vm8971_vm2, %v14560_v2 }
  0xf0   :  { %v7459_v49 = vpop.f32.mrf.mxu0  ;;  %v7563_v50 = vpop.f32.mrf.mxu1  ;;  %8100 = vmatpush3.bf16.msra.mxu0 %v2876_v35 }
  0xf1   :  { %8431 = vmatprep.subr.bf16.mxu0 %v14560_v2  ;;  %v61_v50 = vld [vmem:[%s14553_s0 + $0x120] sm:$0xff] }
  0xf2   :  { %v9624_v51 = vpop.f32.mrf.mxu0  ;;  %v9626_v54 = vpop.f32.mrf.mxu1 }
  0xf3   :  { %14574 = vst [vmem:[#allocation16_spill] sm:$0xff] %v9626_v54 }
  0xf4   :  { %v7460_v57 = vpop.f32.mrf.mxu0  ;;  %v7564_v60 = vpop.f32.mrf.mxu1 }
  0xf5   :  { %v1261_v57 = vld [vmem:[%s14553_s0 + $0x7a] sm:$0xff] }
  0xf6   :  { %v9628_v61 = vpop.f32.mrf.mxu0  ;;  %v9630_v62 = vpop.f32.mrf.mxu1  ;;  %7664 = vmatmul.mubr.msk.bf16.gmra.mxu1 %vm272_vm1, %v122_v55  ;;  %7786 = vmatmul.mubr.msk.bf16.gmra.mxu0 %vm272_vm1, %v1333_v56  ;;  %v62_v55 = vld [vmem:[%s14553_s0 + $0x128] sm:$0xff]  ;;  %v1260_v56 = vld [vmem:[%s14553_s0 + $0x72] sm:$0xff] }
  0xf7   :  { %14575 = vst [vmem:[#allocation17_spill] sm:$0xff] %v9630_v62  ;;  %7667 = vmatprep.mubr.msk.bf16.mxu1 %vm8971_vm2, %v14560_v2  ;;  %7789 = vmatprep.mubr.msk.bf16.mxu0 %vm8971_vm2, %v14560_v2  ;;  %v125_v5 = vpack.c.bf16 %v62_v55, %v61_v50  ;;  %v66_v50 = vld [vmem:[%s14553_s0 + $0x148] sm:$0xff]  ;;  %v1264_v55 = vld [vmem:[%s14553_s0 + $0x92] sm:$0xff] }
  0xf8   :  { %v7463_v6 = vpop.f32.mrf.mxu0  ;;  %v7567_v7 = vpop.f32.mrf.mxu1 }
  0xf9   :  { %v1336_v6 = vpack.c.bf16 %v1261_v57, %v1260_v56  ;;  %v1265_v56 = vld [vmem:[%s14553_s0 + $0x9a] sm:$0xff] }
  0xfa   :  { %v9650_v8 = vpop.f32.mrf.mxu0  ;;  %v9652_v11 = vpop.f32.mrf.mxu1 }
  0xfb   :  { %14576 = vst [vmem:[#allocation18_spill] sm:$0xff] %v9652_v11 }
  0xfc   :  { %v7464_v14 = vpop.f32.mrf.mxu0  ;;  %v7568_v15 = vpop.f32.mrf.mxu1 }
  0xfd   :  { %v63_v15 = vld [vmem:[%s14553_s0 + $0x130] sm:$0xff] }
  0xfe   :  { %v9658_v20 = vpop.f32.mrf.mxu0  ;;  %v9660_v21 = vpop.f32.mrf.mxu1  ;;  %7668 = vmatmul.mubr.msk.bf16.gmra.mxu1 %vm272_vm1, %v123_v12  ;;  %7790 = vmatmul.mubr.msk.bf16.gmra.mxu0 %vm272_vm1, %v1334_v13 }
  0xff   :  { %14577 = vst [vmem:[#allocation19_spill] sm:$0xff] %v9660_v21  ;;  %7671 = vmatprep.mubr.msk.bf16.mxu1 %vm8971_vm2, %v14560_v2  ;;  %7793 = vmatprep.mubr.msk.bf16.mxu0 %vm8971_vm2, %v14560_v2 }
 0x100   :  { %v7467_v29 = vpop.f32.mrf.mxu0  ;;  %v7571_v32 = vpop.f32.mrf.mxu1 }
 0x101   :  { %v126_v29 = vpack.c.bf16 %v64_v16, %v63_v15  ;;  %v1337_v32 = vpack.c.bf16 %v1263_v22, %v1262_v19  ;;  %v67_v22 = vld [vmem:[%s14553_s0 + $0x150] sm:$0xff] }
 0x102   :  { %v9685_v36 = vpop.f32.mrf.mxu0  ;;  %v9687_v37 = vpop.f32.mrf.mxu1 }
 0x103   :  { %14578 = vst [vmem:[#allocation20_spill] sm:$0xff] %v9687_v37 }
 0x104   :  { %v7468_v46 = vpop.f32.mrf.mxu0  ;;  %v7572_v47 = vpop.f32.mrf.mxu1 }
 0x105   :  { %v65_v47 = vld [vmem:[%s14553_s0 + $0x140] sm:$0xff] }
 0x106   :  { %v9690_v48 = vpop.f32.mrf.mxu0  ;;  %v9692_v49 = vpop.f32.mrf.mxu1  ;;  %7672 = vmatmul.mubr.msk.bf16.gmra.mxu1 %vm272_vm1, %v124_v40  ;;  %7794 = vmatmul.mubr.msk.bf16.gmra.mxu0 %vm272_vm1, %v1335_v43 }
 0x107   :  { %14579 = vst [vmem:[#allocation21_spill] sm:$0xff] %v9692_v49  ;;  %7675 = vmatprep.mubr.msk.bf16.mxu1 %vm8971_vm2, %v14560_v2  ;;  %7797 = vmatprep.mubr.msk.bf16.mxu0 %vm8971_vm2, %v14560_v2 }
 0x108   :  { %v7471_v60 = vpop.f32.mrf.mxu0  ;;  %v7575_v63 = vpop.f32.mrf.mxu1 }
 0x10a   :  { %v9712_v0 = vpop.f32.mrf.mxu0  ;;  %v9714_v1 = vpop.f32.mrf.mxu1 }
 0x10b   :  { %14580 = vst [vmem:[#allocation22_spill] sm:$0xff] %v9714_v1 }
 0x10c   :  { %v7472_v7 = vpop.f32.mrf.mxu0  ;;  %v7576_v12 = vpop.f32.mrf.mxu1 }
 0x10d   :  { %v1338_v7 = vpack.c.bf16 %v1265_v56, %v1264_v55 }
 0x10e   :  { %v9716_v13 = vpop.f32.mrf.mxu0  ;;  %v9718_v14 = vpop.f32.mrf.mxu1  ;;  %7676 = vmatmul.mubr.msk.bf16.gmra.mxu1 %vm272_vm1, %v125_v5  ;;  %7798 = vmatmul.mubr.msk.bf16.gmra.mxu0 %vm272_vm1, %v1336_v6  ;;  %v127_v6 = vpack.c.bf16 %v66_v50, %v65_v47 }
 0x10f   :  { %14581 = vst [vmem:[#allocation23_spill] sm:$0xff] %v9718_v14  ;;  %7679 = vmatprep.mubr.msk.bf16.mxu1 %vm8971_vm2, %v14560_v2  ;;  %7801 = vmatprep.mubr.msk.bf16.mxu0 %vm8971_vm2, %v14560_v2 }
 0x110   :  { %v7475_v25 = vpop.f32.mrf.mxu0  ;;  %v7579_v26 = vpop.f32.mrf.mxu1 }
 0x111   :  { %v68_v25 = vld [vmem:[%s14553_s0 + $0x158] sm:$0xff]  ;;  %v1266_v26 = vld [vmem:[%s14553_s0 + $0xa2] sm:$0xff] }
 0x112   :  { %v9738_v27 = vpop.f32.mrf.mxu0  ;;  %v9740_v28 = vpop.f32.mrf.mxu1  ;;  %v128_v50 = vpack.c.bf16 %v68_v25, %v67_v22  ;;  %v1269_v22 = vld [vmem:[%s14553_s0 + $0xba] sm:$0xff] }
 0x113   :  { %14582 = vst [vmem:[#allocation24_spill] sm:$0xff] %v9740_v28 }
 0x114   :  { %v7476_v35 = vpop.f32.mrf.mxu0  ;;  %v7580_v40 = vpop.f32.mrf.mxu1 }
 0x116   :  { %v9742_v43 = vpop.f32.mrf.mxu0  ;;  %v9744_v46 = vpop.f32.mrf.mxu1  ;;  %7680 = vmatmul.mubr.msk.bf16.gmra.mxu1 %vm272_vm1, %v126_v29  ;;  %7802 = vmatmul.mubr.msk.bf16.gmra.mxu0 %vm272_vm1, %v1337_v32  ;;  %v1267_v29 = vld [vmem:[%s14553_s0 + $0xaa] sm:$0xff] }
 0x117   :  { %14583 = vst [vmem:[#allocation25_spill] sm:$0xff] %v9744_v46  ;;  %7683 = vmatprep.mubr.msk.bf16.mxu1 %vm8971_vm2, %v14560_v2  ;;  %7805 = vmatprep.mubr.msk.bf16.mxu0 %vm8971_vm2, %v14560_v2  ;;  %v1339_v55 = vpack.c.bf16 %v1267_v29, %v1266_v26 }
 0x118   :  { %v7479_v57 = vpop.f32.mrf.mxu0  ;;  %v7583_v60 = vpop.f32.mrf.mxu1 }
 0x11a   :  { %v9764_v63 = vpop.f32.mrf.mxu0  ;;  %v9766_v5 = vpop.f32.mrf.mxu1 }
 0x11b   :  { %14584 = vst [vmem:[#allocation26_spill] sm:$0xff] %v9766_v5 }
 0x11c   :  { %v7480_v12 = vpop.f32.mrf.mxu0  ;;  %v7584_v15 = vpop.f32.mrf.mxu1 }
 0x11d   :  { %v70_v12 = vld [vmem:[%s14553_s0 + $0x168] sm:$0xff]  ;;  %v1268_v15 = vld [vmem:[%s14553_s0 + $0xb2] sm:$0xff] }
 0x11e   :  { %v9768_v16 = vpop.f32.mrf.mxu0  ;;  %v9770_v19 = vpop.f32.mrf.mxu1  ;;  %7684 = vmatmul.mubr.msk.bf16.gmra.mxu1 %vm272_vm1, %v127_v6  ;;  %7806 = vmatmul.mubr.msk.bf16.gmra.mxu0 %vm272_vm1, %v1338_v7  ;;  %v69_v7 = vld [vmem:[%s14553_s0 + $0x160] sm:$0xff] }
 0x11f   :  { %14585 = vst [vmem:[#allocation27_spill] sm:$0xff] %v9770_v19  ;;  %7687 = vmatprep.mubr.msk.bf16.mxu1 %vm8971_vm2, %v14560_v2  ;;  %7809 = vmatprep.mubr.msk.bf16.mxu0 %vm8971_vm2, %v14560_v2 }
 0x120   :  { %v7483_v32 = vpop.f32.mrf.mxu0  ;;  %v7587_v35 = vpop.f32.mrf.mxu1 }
 0x121   :  { %v129_v35 = vpack.c.bf16 %v70_v12, %v69_v7  ;;  %v72_v7 = vld [vmem:[%s14553_s0 + $0x178] sm:$0xff]  ;;  %v1270_v12 = vld [vmem:[%s14553_s0 + $0xc2] sm:$0xff] }
 0x122   :  { %v9790_v40 = vpop.f32.mrf.mxu0  ;;  %v9792_v47 = vpop.f32.mrf.mxu1 }
 0x123   :  { %14586 = vst [vmem:[#allocation28_spill] sm:$0xff] %v9792_v47 }
 0x124   :  { %v7484_v56 = vpop.f32.mrf.mxu0  ;;  %v7588_v57 = vpop.f32.mrf.mxu1 }
 0x126   :  { %v9794_v60 = vpop.f32.mrf.mxu0  ;;  %v9796_v6 = vpop.f32.mrf.mxu1  ;;  %7688 = vmatmul.mubr.msk.bf16.gmra.mxu1 %vm272_vm1, %v128_v50  ;;  %7810 = vmatmul.mubr.msk.bf16.gmra.mxu0 %vm272_vm1, %v1339_v55  ;;  %v1340_v50 = vpack.c.bf16 %v1269_v22, %v1268_v15  ;;  %v1271_v15 = vld [vmem:[%s14553_s0 + $0xca] sm:$0xff] }
 0x127   :  { %14587 = vst [vmem:[#allocation29_spill] sm:$0xff] %v9796_v6  ;;  %7691 = vmatprep.mubr.msk.bf16.mxu1 %vm8971_vm2, %v14560_v2  ;;  %7813 = vmatprep.mubr.msk.bf16.mxu0 %vm8971_vm2, %v14560_v2 }
 0x128   :  { %v7487_v25 = vpop.f32.mrf.mxu0  ;;  %v7591_v26 = vpop.f32.mrf.mxu1 }
 0x129   :  { %v71_v25 = vld [vmem:[%s14553_s0 + $0x170] sm:$0xff]  ;;  %v14591_v26 = vmov 0.0  }
 0x12a   :  { %v9816_v29 = vpop.f32.mrf.mxu0  ;;  %v9818_v32 = vpop.f32.mrf.mxu1 }
 0x12b   :  { %14588 = vst [vmem:[#allocation30_spill] sm:$0xff] %v9818_v32 }
 0x12c   :  { %v7488_v55 = vpop.f32.mrf.mxu0  ;;  %v7592_v56 = vpop.f32.mrf.mxu1 }
 0x12d   :  { %v130_v56 = vpack.c.bf16 %v72_v7, %v71_v25 }
 0x12e   :  { %v9820_v57 = vpop.f32.mrf.mxu0  ;;  %v9822_v2 = vpop.f32.mrf.mxu1  ;;  %7692 = vmatmul.mubr.msk.bf16.gmra.mxu1 %vm272_vm1, %v129_v35  ;;  %7814 = vmatmul.mubr.msk.bf16.gmra.mxu0 %vm272_vm1, %v1340_v50 }
 0x12f   :  { %14589 = vst [vmem:[#allocation31_spill] sm:$0xff] %v9820_v57  ;;  %14590 = vst [vmem:[#allocation32_spill] sm:$0xff] %v9822_v2  ;;  %7695 = vmatprep.mubr.msk.bf16.mxu1 %vm8971_vm2, %v14591_v26  ;;  %7817 = vmatprep.mubr.msk.bf16.mxu0 %vm8971_vm2, %v14591_v26  ;;  %v1341_v2 = vpack.c.bf16 %v1271_v15, %v1270_v12 }
 0x130   :  { %v7491_v22 = vpop.f32.mrf.mxu0  ;;  %v7595_v35 = vpop.f32.mrf.mxu1 }
 0x131   :  { %v73_v22 = vld [vmem:[%s14553_s0 + $0x180] sm:$0xff] }
 0x132   :  { %v9842_v50 = vpop.f32.mrf.mxu0  ;;  %v9844_v55 = vpop.f32.mrf.mxu1 }
 0x133   :  { %14592 = vst [vmem:[#allocation33_spill] sm:$0xff] %v9842_v50  ;;  %14593 = vst [vmem:[#allocation34_spill] sm:$0xff] %v9844_v55 }
 0x134   :  { %v7492_v32 = vpop.f32.mrf.mxu0  ;;  %v7596_v6 = vpop.f32.mrf.mxu1 }
 0x135   :  { %v74_v6 = vld [vmem:[%s14553_s0 + $0x188] sm:$0xff]  ;;  %v1272_v32 = vld [vmem:[%s14553_s0 + $0xd2] sm:$0xff] }
 0x136   :  { %v9846_v47 = vpop.f32.mrf.mxu0  ;;  %v9848_v19 = vpop.f32.mrf.mxu1  ;;  %7696 = vmatmul.mubr.msk.bf16.gmra.mxu1 %vm272_vm1, %v130_v56  ;;  %7818 = vmatmul.mubr.msk.bf16.gmra.mxu0 %vm272_vm1, %v1341_v2  ;;  %v1273_v2 = vld [vmem:[%s14553_s0 + $0xda] sm:$0xff]  ;;  %v131_v35 = vpack.c.bf16 %v74_v6, %v73_v22  ;;  %v1275_v22 = vld [vmem:[%s14553_s0 + $0xea] sm:$0xff] }
 0x137   :  { %14594 = vst [vmem:[#allocation35_spill] sm:$0xff] %v9846_v47  ;;  %14595 = vst [vmem:[#allocation36_spill] sm:$0xff] %v9848_v19  ;;  %7699 = vmatprep.mubr.msk.bf16.mxu1 %vm8971_vm2, %v14591_v26  ;;  %7821 = vmatprep.mubr.msk.bf16.mxu0 %vm8971_vm2, %v14591_v26  ;;  %v1342_v56 = vpack.c.bf16 %v1273_v2, %v1272_v32 }
 0x138   :  { %v7495_v25 = vpop.f32.mrf.mxu0  ;;  %v7599_v7 = vpop.f32.mrf.mxu1 }
 0x139   :  { %v75_v25 = vld [vmem:[%s14553_s0 + $0x190] sm:$0xff] }
 0x13a   :  { %v9868_v12 = vpop.f32.mrf.mxu0  ;;  %v757_v15 = vpop.f32.mrf.mxu1 }
 0x13b   :  { %14596 = vst [vmem:[#allocation37_spill] sm:$0xff] %v9868_v12 }
 0x13c   :  { %v7496_v19 = vpop.f32.mrf.mxu0  ;;  %v7600_v55 = vpop.f32.mrf.mxu1 }
 0x13d   :  { %v76_v19 = vld [vmem:[%s14553_s0 + $0x198] sm:$0xff]  ;;  %v1274_v55 = vld [vmem:[%s14553_s0 + $0xe2] sm:$0xff] }
 0x13e   :  { %v9870_v5 = vpop.f32.mrf.mxu0  ;;  %v9872_v46 = vpop.f32.mrf.mxu1  ;;  %7700 = vmatmul.mubr.msk.bf16.gmra.mxu1 %vm272_vm1, %v131_v35  ;;  %7822 = vmatmul.mubr.msk.bf16.gmra.mxu0 %vm272_vm1, %v1342_v56  ;;  %v132_v15 = vpack.c.bf16 %v76_v19, %v75_v25  ;;  %v1343_v35 = vpack.c.bf16 %v1275_v22, %v1274_v55  ;;  %v1276_v25 = vld [vmem:[%s14553_s0 + $0xf2] sm:$0xff]  ;;  %v1277_v19 = vld [vmem:[%s14553_s0 + $0xfa] sm:$0xff] }
 0x13f   :  { %14597 = vst [vmem:[#allocation38_spill] sm:$0xff] %v9870_v5  ;;  %7703 = vmatprep.mubr.msk.bf16.mxu1 %vm8971_vm2, %v14591_v26  ;;  %7825 = vmatprep.mubr.msk.bf16.mxu0 %vm8971_vm2, %v14591_v26  ;;  %v921_v12 = vadd.f32 %v9872_v46, %v9472_v30  ;;  %v98_v30 = vld [vmem:[%s14553_s0 + $0x248] sm:$0xff]  ;;  %v1296_v46 = vld [vmem:[%s14553_s0 + $0x192] sm:$0xff] }
 0x140   :  { %v7499_v6 = vpop.f32.mrf.mxu0  ;;  %v7605_v32 = vpop.f32.mrf.mxu1 }
 0x141   :  { %v77_v6 = vld [vmem:[%s14553_s0 + $0x1a0] sm:$0xff] }
 0x142   :  { %v9892_v2 = vpop.f32.mrf.mxu0  ;;  %v9894_v7 = vpop.f32.mrf.mxu1 }
 0x143   :  { %14598 = vst [vmem:[#allocation39_spill] sm:$0xff] %v9892_v2 }
 0x144   :  { %v7500_v56 = vpop.f32.mrf.mxu0  ;;  %v7606_v28 = vpop.f32.mrf.mxu1 }
 0x145   :  { %v78_v28 = vld [vmem:[%s14553_s0 + $0x1a8] sm:$0xff]  ;;  %v1344_v56 = vpack.c.bf16 %v1277_v19, %v1276_v25 }
 0x146   :  { %v9896_v14 = vpop.f32.mrf.mxu0  ;;  %v9898_v1 = vpop.f32.mrf.mxu1  ;;  %7704 = vmatmul.mubr.msk.bf16.gmra.mxu1 %vm272_vm1, %v132_v15  ;;  %7826 = vmatmul.mubr.msk.bf16.gmra.mxu0 %vm272_vm1, %v1343_v35  ;;  %v133_v35 = vpack.c.bf16 %v78_v28, %v77_v6  ;;  %v1279_v6 = vld [vmem:[%s14553_s0 + $0x10a] sm:$0xff] }
 0x147   :  { %14599 = vst [vmem:[#allocation40_spill] sm:$0xff] %v9896_v14  ;;  %7707 = vmatprep.mubr.msk.bf16.mxu1 %vm8971_vm2, %v14591_v26  ;;  %7829 = vmatprep.mubr.msk.bf16.mxu0 %vm8971_vm2, %v14591_v26 }
 0x148   :  { %v7503_v55 = vpop.f32.mrf.mxu0  ;;  %v7609_v22 = vpop.f32.mrf.mxu1 }
 0x149   :  { %v79_v55 = vld [vmem:[%s14553_s0 + $0x1b0] sm:$0xff] }
 0x14a   :  { %v9918_v32 = vpop.f32.mrf.mxu0  ;;  %v9920_v15 = vpop.f32.mrf.mxu1 }
 0x14b   :  { %14600 = vst [vmem:[#allocation41_spill] sm:$0xff] %v9918_v32 }
 0x14c   :  { %v7504_v49 = vpop.f32.mrf.mxu0  ;;  %v7610_v37 = vpop.f32.mrf.mxu1 }
 0x14d   :  { %v80_v37 = vld [vmem:[%s14553_s0 + $0x1b8] sm:$0xff]  ;;  %v1278_v49 = vld [vmem:[%s14553_s0 + $0x102] sm:$0xff] }
 0x14e   :  { %v9922_v21 = vpop.f32.mrf.mxu0  ;;  %v9924_v11 = vpop.f32.mrf.mxu1  ;;  %7708 = vmatmul.mubr.msk.bf16.gmra.mxu1 %vm272_vm1, %v133_v35  ;;  %7830 = vmatmul.mubr.msk.bf16.gmra.mxu0 %vm272_vm1, %v1344_v56  ;;  %v134_v35 = vpack.c.bf16 %v80_v37, %v79_v55  ;;  %v1345_v56 = vpack.c.bf16 %v1279_v6, %v1278_v49  ;;  %v1281_v55 = vld [vmem:[%s14553_s0 + $0x11a] sm:$0xff] }
 0x14f   :  { %14601 = vst [vmem:[#allocation42_spill] sm:$0xff] %v9922_v21  ;;  %7711 = vmatprep.mubr.msk.bf16.mxu1 %vm8971_vm2, %v14591_v26  ;;  %7833 = vmatprep.mubr.msk.bf16.mxu0 %vm8971_vm2, %v14591_v26 }
 0x150   :  { %v7507_v28 = vpop.f32.mrf.mxu0  ;;  %v7613_v25 = vpop.f32.mrf.mxu1 }
 0x151   :  { %v81_v28 = vld [vmem:[%s14553_s0 + $0x1c0] sm:$0xff] }
 0x152   :  { %v9944_v19 = vpop.f32.mrf.mxu0  ;;  %v9946_v22 = vpop.f32.mrf.mxu1 }
 0x153   :  { %14602 = vst [vmem:[#allocation43_spill] sm:$0xff] %v9944_v19 }
 0x154   :  { %v7508_v62 = vpop.f32.mrf.mxu0  ;;  %v7614_v54 = vpop.f32.mrf.mxu1 }
 0x155   :  { %v82_v54 = vld [vmem:[%s14553_s0 + $0x1c8] sm:$0xff]  ;;  %v1280_v62 = vld [vmem:[%s14553_s0 + $0x112] sm:$0xff] }
 0x156   :  { %v9948_v42 = vpop.f32.mrf.mxu0  ;;  %v9950_v34 = vpop.f32.mrf.mxu1  ;;  %7712 = vmatmul.mubr.msk.bf16.gmra.mxu1 %vm272_vm1, %v134_v35  ;;  %7834 = vmatmul.mubr.msk.bf16.gmra.mxu0 %vm272_vm1, %v1345_v56  ;;  %v135_v35 = vpack.c.bf16 %v82_v54, %v81_v28  ;;  %v1346_v56 = vpack.c.bf16 %v1281_v55, %v1280_v62  ;;  %v1283_v28 = vld [vmem:[%s14553_s0 + $0x12a] sm:$0xff] }
 0x157   :  { %14603 = vst [vmem:[#allocation44_spill] sm:$0xff] %v9948_v42  ;;  %7715 = vmatprep.mubr.msk.bf16.mxu1 %vm8971_vm2, %v14591_v26  ;;  %7837 = vmatprep.mubr.msk.bf16.mxu0 %vm8971_vm2, %v14591_v26 }
 0x158   :  { %v7511_v37 = vpop.f32.mrf.mxu0  ;;  %v7617_v49 = vpop.f32.mrf.mxu1 }
 0x159   :  { %v83_v37 = vld [vmem:[%s14553_s0 + $0x1d0] sm:$0xff] }
 0x15a   :  { %v9970_v6 = vpop.f32.mrf.mxu0  ;;  %v9972_v25 = vpop.f32.mrf.mxu1 }
 0x15b   :  { %14604 = vst [vmem:[#allocation45_spill] sm:$0xff] %v9970_v6 }
 0x15c   :  { %v7512_v24 = vpop.f32.mrf.mxu0  ;;  %v7618_v18 = vpop.f32.mrf.mxu1 }
 0x15d   :  { %v84_v18 = vld [vmem:[%s14553_s0 + $0x1d8] sm:$0xff]  ;;  %v1282_v24 = vld [vmem:[%s14553_s0 + $0x122] sm:$0xff] }
 0x15e   :  { %v9974_v10 = vpop.f32.mrf.mxu0  ;;  %v9976_v4 = vpop.f32.mrf.mxu1  ;;  %7716 = vmatmul.mubr.msk.bf16.gmra.mxu1 %vm272_vm1, %v135_v35  ;;  %7838 = vmatmul.mubr.msk.bf16.gmra.mxu0 %vm272_vm1, %v1346_v56  ;;  %v136_v35 = vpack.c.bf16 %v84_v18, %v83_v37  ;;  %v1347_v56 = vpack.c.bf16 %v1283_v28, %v1282_v24  ;;  %v1285_v37 = vld [vmem:[%s14553_s0 + $0x13a] sm:$0xff] }
 0x15f   :  { %14605 = vst [vmem:[#allocation46_spill] sm:$0xff] %v9974_v10  ;;  %7719 = vmatprep.mubr.msk.bf16.mxu1 %vm8971_vm2, %v14591_v26  ;;  %7841 = vmatprep.mubr.msk.bf16.mxu0 %vm8971_vm2, %v14591_v26 }
 0x160   :  { %v7515_v54 = vpop.f32.mrf.mxu0  ;;  %v7621_v62 = vpop.f32.mrf.mxu1 }
 0x161   :  { %v85_v54 = vld [vmem:[%s14553_s0 + $0x1e0] sm:$0xff] }
 0x162   :  { %v9996_v55 = vpop.f32.mrf.mxu0  ;;  %v9998_v49 = vpop.f32.mrf.mxu1 }
 0x163   :  { %14606 = vst [vmem:[#allocation47_spill] sm:$0xff] %v9996_v55 }
 0x164   :  { %v7516_v59 = vpop.f32.mrf.mxu0  ;;  %v7622_v53 = vpop.f32.mrf.mxu1 }
 0x165   :  { %v86_v53 = vld [vmem:[%s14553_s0 + $0x1e8] sm:$0xff]  ;;  %v1284_v59 = vld [vmem:[%s14553_s0 + $0x132] sm:$0xff] }
 0x166   :  { %v10000_v45 = vpop.f32.mrf.mxu0  ;;  %v10002_v39 = vpop.f32.mrf.mxu1  ;;  %7720 = vmatmul.mubr.msk.bf16.gmra.mxu1 %vm272_vm1, %v136_v35  ;;  %7842 = vmatmul.mubr.msk.bf16.gmra.mxu0 %vm272_vm1, %v1347_v56  ;;  %v137_v35 = vpack.c.bf16 %v86_v53, %v85_v54  ;;  %v1348_v56 = vpack.c.bf16 %v1285_v37, %v1284_v59  ;;  %v1287_v54 = vld [vmem:[%s14553_s0 + $0x14a] sm:$0xff] }
 0x167   :  { %14607 = vst [vmem:[#allocation48_spill] sm:$0xff] %v10000_v45  ;;  %7723 = vmatprep.mubr.msk.bf16.mxu1 %vm8971_vm2, %v14591_v26  ;;  %7845 = vmatprep.mubr.msk.bf16.mxu0 %vm8971_vm2, %v14591_v26 }
 0x168   :  { %v7519_v18 = vpop.f32.mrf.mxu0  ;;  %v7625_v24 = vpop.f32.mrf.mxu1 }
 0x169   :  { %v87_v18 = vld [vmem:[%s14553_s0 + $0x1f0] sm:$0xff] }
 0x16a   :  { %v10022_v28 = vpop.f32.mrf.mxu0  ;;  %v10024_v62 = vpop.f32.mrf.mxu1 }
 0x16b   :  { %14608 = vst [vmem:[#allocation49_spill] sm:$0xff] %v10022_v28 }
 0x16c   :  { %v7520_v31 = vpop.f32.mrf.mxu0  ;;  %v7626_v45 = vpop.f32.mrf.mxu1 }
 0x16d   :  { %v88_v31 = vld [vmem:[%s14553_s0 + $0x1f8] sm:$0xff]  ;;  %v1286_v45 = vld [vmem:[%s14553_s0 + $0x142] sm:$0xff] }
 0x16e   :  { %v10026_v55 = vpop.f32.mrf.mxu0  ;;  %v10028_v10 = vpop.f32.mrf.mxu1  ;;  %7724 = vmatmul.mubr.msk.bf16.gmra.mxu1 %vm272_vm1, %v137_v35  ;;  %7846 = vmatmul.mubr.msk.bf16.gmra.mxu0 %vm272_vm1, %v1348_v56  ;;  %v138_v35 = vpack.c.bf16 %v88_v31, %v87_v18  ;;  %v1349_v56 = vpack.c.bf16 %v1287_v54, %v1286_v45  ;;  %v1289_v18 = vld [vmem:[%s14553_s0 + $0x15a] sm:$0xff] }
 0x16f   :  { %14609 = vst [vmem:[#allocation50_spill] sm:$0xff] %v10026_v55  ;;  %7727 = vmatprep.mubr.msk.bf16.mxu1 %vm8971_vm2, %v14591_v26  ;;  %7849 = vmatprep.mubr.msk.bf16.mxu0 %vm8971_vm2, %v14591_v26 }
 0x170   :  { %v7523_v53 = vpop.f32.mrf.mxu0  ;;  %v7629_v59 = vpop.f32.mrf.mxu1 }
 0x171   :  { %v89_v53 = vld [vmem:[%s14553_s0 + $0x200] sm:$0xff] }
 0x172   :  { %v10048_v37 = vpop.f32.mrf.mxu0  ;;  %v10050_v24 = vpop.f32.mrf.mxu1 }
 0x173   :  { %14610 = vst [vmem:[#allocation51_spill] sm:$0xff] %v10048_v37 }
 0x174   :  { %v7524_v55 = vpop.f32.mrf.mxu0  ;;  %v7630_v28 = vpop.f32.mrf.mxu1 }
 0x175   :  { %v90_v55 = vld [vmem:[%s14553_s0 + $0x208] sm:$0xff]  ;;  %v1288_v28 = vld [vmem:[%s14553_s0 + $0x152] sm:$0xff] }
 0x176   :  { %v10052_v6 = vpop.f32.mrf.mxu0  ;;  %v10054_v42 = vpop.f32.mrf.mxu1  ;;  %7728 = vmatmul.mubr.msk.bf16.gmra.mxu1 %vm272_vm1, %v138_v35  ;;  %7850 = vmatmul.mubr.msk.bf16.gmra.mxu0 %vm272_vm1, %v1349_v56  ;;  %v139_v35 = vpack.c.bf16 %v90_v55, %v89_v53  ;;  %v1350_v56 = vpack.c.bf16 %v1289_v18, %v1288_v28  ;;  %v1291_v53 = vld [vmem:[%s14553_s0 + $0x16a] sm:$0xff] }
 0x177   :  { %14611 = vst [vmem:[#allocation52_spill] sm:$0xff] %v10052_v6  ;;  %7731 = vmatprep.mubr.msk.bf16.mxu1 %vm8971_vm2, %v14591_v26  ;;  %7853 = vmatprep.mubr.msk.bf16.mxu0 %vm8971_vm2, %v14591_v26 }
 0x178   :  { %v7527_v31 = vpop.f32.mrf.mxu0  ;;  %v7633_v45 = vpop.f32.mrf.mxu1 }
 0x179   :  { %v91_v31 = vld [vmem:[%s14553_s0 + $0x210] sm:$0xff] }
 0x17a   :  { %v10074_v54 = vpop.f32.mrf.mxu0  ;;  %v10076_v59 = vpop.f32.mrf.mxu1 }
 0x17b   :  { %14612 = vst [vmem:[#allocation53_spill] sm:$0xff] %v10074_v54 }
 0x17c   :  { %v7528_v6 = vpop.f32.mrf.mxu0  ;;  %v7634_v37 = vpop.f32.mrf.mxu1 }
 0x17d   :  { %v92_v6 = vld [vmem:[%s14553_s0 + $0x218] sm:$0xff]  ;;  %v1290_v37 = vld [vmem:[%s14553_s0 + $0x162] sm:$0xff] }
 0x17e   :  { %v10078_v19 = vpop.f32.mrf.mxu0  ;;  %v10080_v21 = vpop.f32.mrf.mxu1  ;;  %7732 = vmatmul.mubr.msk.bf16.gmra.mxu1 %vm272_vm1, %v139_v35  ;;  %7854 = vmatmul.mubr.msk.bf16.gmra.mxu0 %vm272_vm1, %v1350_v56  ;;  %v140_v35 = vpack.c.bf16 %v92_v6, %v91_v31  ;;  %v1351_v56 = vpack.c.bf16 %v1291_v53, %v1290_v37  ;;  %v1293_v31 = vld [vmem:[%s14553_s0 + $0x17a] sm:$0xff] }
 0x17f   :  { %14613 = vst [vmem:[#allocation54_spill] sm:$0xff] %v10078_v19  ;;  %7735 = vmatprep.mubr.msk.bf16.mxu1 %vm8971_vm2, %v14591_v26  ;;  %7857 = vmatprep.mubr.msk.bf16.mxu0 %vm8971_vm2, %v14591_v26 }
 0x180   :  { %v7531_v55 = vpop.f32.mrf.mxu0  ;;  %v7637_v28 = vpop.f32.mrf.mxu1 }
 0x181   :  { %v93_v55 = vld [vmem:[%s14553_s0 + $0x220] sm:$0xff] }
 0x182   :  { %v10100_v18 = vpop.f32.mrf.mxu0  ;;  %v10102_v45 = vpop.f32.mrf.mxu1 }
 0x183   :  { %14614 = vst [vmem:[#allocation55_spill] sm:$0xff] %v10100_v18 }
 0x184   :  { %v7532_v19 = vpop.f32.mrf.mxu0  ;;  %v7638_v54 = vpop.f32.mrf.mxu1 }
 0x185   :  { %v94_v19 = vld [vmem:[%s14553_s0 + $0x228] sm:$0xff]  ;;  %v1292_v54 = vld [vmem:[%s14553_s0 + $0x172] sm:$0xff] }
 0x186   :  { %v10104_v32 = vpop.f32.mrf.mxu0  ;;  %v10106_v14 = vpop.f32.mrf.mxu1  ;;  %7736 = vmatmul.mubr.msk.bf16.gmra.mxu1 %vm272_vm1, %v140_v35  ;;  %7858 = vmatmul.mubr.msk.bf16.gmra.mxu0 %vm272_vm1, %v1351_v56  ;;  %v141_v35 = vpack.c.bf16 %v94_v19, %v93_v55  ;;  %v1352_v56 = vpack.c.bf16 %v1293_v31, %v1292_v54  ;;  %v1295_v55 = vld [vmem:[%s14553_s0 + $0x18a] sm:$0xff] }
 0x187   :  { %14615 = vst [vmem:[#allocation56_spill] sm:$0xff] %v10104_v32  ;;  %7739 = vmatprep.mubr.msk.bf16.mxu1 %vm8971_vm2, %v14591_v26  ;;  %7861 = vmatprep.mubr.msk.bf16.mxu0 %vm8971_vm2, %v14591_v26 }
 0x188   :  { %v7535_v6 = vpop.f32.mrf.mxu0  ;;  %v7641_v37 = vpop.f32.mrf.mxu1 }
 0x189   :  { %v95_v6 = vld [vmem:[%s14553_s0 + $0x230] sm:$0xff] }
 0x18a   :  { %v10126_v53 = vpop.f32.mrf.mxu0  ;;  %v10128_v28 = vpop.f32.mrf.mxu1 }
 0x18b   :  { %14616 = vst [vmem:[#allocation57_spill] sm:$0xff] %v10126_v53 }
 0x18c   :  { %v7536_v32 = vpop.f32.mrf.mxu0  ;;  %v7642_v18 = vpop.f32.mrf.mxu1 }
 0x18d   :  { %v96_v32 = vld [vmem:[%s14553_s0 + $0x238] sm:$0xff]  ;;  %v1294_v18 = vld [vmem:[%s14553_s0 + $0x182] sm:$0xff] }
 0x18e   :  { %v10130_v2 = vpop.f32.mrf.mxu0  ;;  %v10132_v5 = vpop.f32.mrf.mxu1  ;;  %7740 = vmatmul.mubr.msk.bf16.gmra.mxu1 %vm272_vm1, %v141_v35  ;;  %7862 = vmatmul.mubr.msk.bf16.gmra.mxu0 %vm272_vm1, %v1352_v56  ;;  %v142_v35 = vpack.c.bf16 %v96_v32, %v95_v6  ;;  %v1353_v56 = vpack.c.bf16 %v1295_v55, %v1294_v18 }
 0x18f   :  { %14617 = vst [vmem:[#allocation58_spill] sm:$0xff] %v10130_v2  ;;  %7743 = vmatprep.mubr.msk.bf16.mxu1 %vm8971_vm2, %v14591_v26  ;;  %7865 = vmatprep.mubr.msk.bf16.mxu0 %vm8971_vm2, %v14591_v26 }
 0x190   :  { %v7539_v19 = vpop.f32.mrf.mxu0  ;;  %v7645_v54 = vpop.f32.mrf.mxu1 }
 0x191   :  { %v97_v19 = vld [vmem:[%s14553_s0 + $0x240] sm:$0xff] }
 0x192   :  { %v10152_v31 = vpop.f32.mrf.mxu0  ;;  %v10154_v37 = vpop.f32.mrf.mxu1  ;;  %v143_v18 = vpack.c.bf16 %v98_v30, %v97_v19  ;;  %v1299_v19 = vld [vmem:[%s14553_s0 + $0x1aa] sm:$0xff]  ;;  %v932_v30 = vadd.f32 %v9920_v15, %v9520_v52  ;;  %v101_v52 = vld [vmem:[%s14553_s0 + $0x260] sm:$0xff] }
 0x193   :  { %14618 = vst [vmem:[#allocation59_spill] sm:$0xff] %v10152_v31  ;;  %v929_v31 = vadd.f32 %v9898_v1, %v9498_v44  ;;  %v100_v44 = vld [vmem:[%s14553_s0 + $0x258] sm:$0xff]  ;;  %v1298_v1 = vld [vmem:[%s14553_s0 + $0x1a2] sm:$0xff] }
 0x194   :  { %v7540_v2 = vpop.f32.mrf.mxu0  ;;  %v7646_v53 = vpop.f32.mrf.mxu1 }
 0x195   :  { %v1297_v2 = vld [vmem:[%s14553_s0 + $0x19a] sm:$0xff]  ;;  %v924_v53 = vadd.f32 %v9894_v7, %v9494_v38  ;;  %v99_v38 = vld [vmem:[%s14553_s0 + $0x250] sm:$0xff] }
 0x196   :  { %v10158_v47 = vpop.f32.mrf.mxu1  ;;  %7744 = vmatmul.mubr.msk.bf16.gmra.mxu1 %vm272_vm1, %v142_v35  ;;  %v1530_v50 = vpop.f32.mrf.mxu0  ;;  %7866 = vmatmul.mubr.msk.bf16.gmra.mxu0 %vm272_vm1, %v1353_v56  ;;  %v1354_v55 = vpack.c.bf16 %v1297_v2, %v1296_v46 }
 0x197   :  { %v10165_v54 = vadd.f32 %v1530_v50, %v921_v12  ;;  %7747 = vmatprep.mubr.msk.bf16.mxu1 %vm8971_vm2, %v14591_v26  ;;  %7869 = vmatprep.mubr.msk.bf16.mxu0 %vm8971_vm2, %v14591_v26 }
 0x198   :  { %v7649_v50 = vpop.f32.mrf.mxu1  ;;  %v7771_v12 = vpop.f32.mrf.mxu0 }
 0x199   :  { %14619 = vst [vmem:[#allocation60_spill] sm:$0xff] %v10165_v54  ;;  %v144_v12 = vpack.c.bf16 %v100_v44, %v99_v38  ;;  %v1301_v38 = vld [vmem:[%s14553_s0 + $0x1ba] sm:$0xff] }
 0x19a   :  { %v10182_v6 = vpop.f32.mrf.mxu1  ;;  %v1533_v32 = vpop.f32.mrf.mxu0 }
 0x19b   :  { %v10184_v35 = vadd.f32 %v1533_v32, %v924_v53  ;;  %v1355_v53 = vpack.c.bf16 %v1299_v19, %v1298_v1  ;;  %v940_v19 = vadd.f32 %v9946_v22, %v9546_v3  ;;  %v103_v3 = vld [vmem:[%s14553_s0 + $0x270] sm:$0xff] }
 0x19c   :  { %v7650_v56 = vpop.f32.mrf.mxu1  ;;  %v7772_v54 = vpop.f32.mrf.mxu0 }
 0x19d   :  { %v937_v56 = vadd.f32 %v9924_v11, %v9524_v58  ;;  %v102_v58 = vld [vmem:[%s14553_s0 + $0x268] sm:$0xff]  ;;  %v1300_v11 = vld [vmem:[%s14553_s0 + $0x1b2] sm:$0xff] }
 0x19e   :  { %v10188_v57 = vpop.f32.mrf.mxu1  ;;  %7748 = vmatmul.mubr.msk.bf16.gmra.mxu1 %vm272_vm1, %v143_v18  ;;  %v1538_v50 = vpop.f32.mrf.mxu0  ;;  %7870 = vmatmul.mubr.msk.bf16.gmra.mxu0 %vm272_vm1, %v1354_v55 }
 0x19f   :  { %v10195_v7 = vadd.f32 %v1538_v50, %v929_v31  ;;  %7751 = vmatprep.mubr.msk.bf16.mxu1 %vm8971_vm2, %v14591_v26  ;;  %7873 = vmatprep.mubr.msk.bf16.mxu0 %vm8971_vm2, %v14591_v26 }
 0x1a0   :  { %v7653_v31 = vpop.f32.mrf.mxu1  ;;  %v7775_v54 = vpop.f32.mrf.mxu0 }
 0x1a2   :  { %v10212_v46 = vpop.f32.mrf.mxu1  ;;  %v1541_v2 = vpop.f32.mrf.mxu0 }
 0x1a3   :  { %v10214_v32 = vadd.f32 %v1541_v2, %v932_v30  ;;  %v145_v2 = vpack.c.bf16 %v102_v58, %v101_v52  ;;  %v1303_v52 = vld [vmem:[%s14553_s0 + $0x1ca] sm:$0xff] }
 0x1a4   :  { %v7654_v18 = vpop.f32.mrf.mxu1  ;;  %v7776_v55 = vpop.f32.mrf.mxu0 }
 0x1a6   :  { %v10218_v50 = vpop.f32.mrf.mxu1  ;;  %7752 = vmatmul.mubr.msk.bf16.gmra.mxu1 %vm272_vm1, %v144_v12  ;;  %v1546_v31 = vpop.f32.mrf.mxu0  ;;  %7874 = vmatmul.mubr.msk.bf16.gmra.mxu0 %vm272_vm1, %v1355_v53  ;;  %v1356_v12 = vpack.c.bf16 %v1301_v38, %v1300_v11  ;;  %v948_v38 = vadd.f32 %v9972_v25, %v9572_v17  ;;  %v105_v25 = vld [vmem:[%s14553_s0 + $0x280] sm:$0xff] }
 0x1a7   :  { %v10225_v15 = vadd.f32 %v1546_v31, %v937_v56  ;;  %7755 = vmatprep.mubr.msk.bf16.mxu1 %vm8971_vm2, %v14591_v26  ;;  %7877 = vmatprep.mubr.msk.bf16.mxu0 %vm8971_vm2, %v14591_v26  ;;  %v945_v56 = vadd.f32 %v9950_v34, %v9550_v9  ;;  %v104_v9 = vld [vmem:[%s14553_s0 + $0x278] sm:$0xff]  ;;  %v1302_v34 = vld [vmem:[%s14553_s0 + $0x1c2] sm:$0xff] }
 0x1a8   :  { %v7657_v44 = vpop.f32.mrf.mxu1  ;;  %v7779_v1 = vpop.f32.mrf.mxu0 }
 0x1aa   :  { %v10242_v54 = vpop.f32.mrf.mxu1  ;;  %v1549_v30 = vpop.f32.mrf.mxu0 }
 0x1ab   :  { %v10244_v53 = vadd.f32 %v1549_v30, %v940_v19  ;;  %v146_v30 = vpack.c.bf16 %v104_v9, %v103_v3 }
 0x1ac   :  { %v7658_v18 = vpop.f32.mrf.mxu1  ;;  %v7780_v55 = vpop.f32.mrf.mxu0 }
 0x1ae   :  { %v10248_v31 = vpop.f32.mrf.mxu1  ;;  %7756 = vmatmul.mubr.msk.bf16.gmra.mxu1 %vm272_vm1, %v145_v2  ;;  %v1554_v44 = vpop.f32.mrf.mxu0  ;;  %7878 = vmatmul.mubr.msk.bf16.gmra.mxu0 %vm272_vm1, %v1356_v12  ;;  %v1357_v2 = vpack.c.bf16 %v1303_v52, %v1302_v34  ;;  %v956_v34 = vadd.f32 %v9998_v49, %v9598_v33  ;;  %v1306_v33 = vld [vmem:[%s14553_s0 + $0x1e2] sm:$0xff] }
 0x1af   :  { %v10255_v22 = vadd.f32 %v1554_v44, %v945_v56  ;;  %7759 = vmatprep.mubr.msk.bf16.mxu1 %vm8971_vm2, %v14591_v26  ;;  %7881 = vmatprep.mubr.msk.bf16.mxu0 %vm8971_vm2, %v14591_v26  ;;  %v953_v56 = vadd.f32 %v9976_v4, %v9576_v23  ;;  %v1304_v4 = vld [vmem:[%s14553_s0 + $0x1d2] sm:$0xff]  ;;  %v1305_v23 = vld [vmem:[%s14553_s0 + $0x1da] sm:$0xff] }
 0x1b0   :  { %v7661_v58 = vpop.f32.mrf.mxu1  ;;  %v7783_v11 = vpop.f32.mrf.mxu0 }
 0x1b2   :  { %v10272_v1 = vpop.f32.mrf.mxu1  ;;  %v1557_v19 = vpop.f32.mrf.mxu0 }
 0x1b3   :  { %v10274_v12 = vadd.f32 %v1557_v19, %v948_v38  ;;  %v147_v38 = vpack.c.bf16 %v105_v25, %v105_v25  ;;  %v1358_v19 = vpack.c.bf16 %v1305_v23, %v1304_v4  ;;  %v1938_v25 = vld [vmem:[%s14553_s0 + $0x1a] sm:$0xff] }
 0x1b4   :  { %v7662_v18 = vpop.f32.mrf.mxu1  ;;  %v7784_v55 = vpop.f32.mrf.mxu0 }
 0x1b5   :  { %v961_v55 = vadd.f32 %v10002_v39, %v9602_v41  ;;  %v1307_v39 = vld [vmem:[%s14553_s0 + $0x1ea] sm:$0xff]  ;;  %v1937_v41 = vld [vmem:[%s14553_s0 + $0x12] sm:$0xff] }
 0x1b6   :  { %v10278_v44 = vpop.f32.mrf.mxu1  ;;  %7760 = vmatmul.mubr.msk.bf16.gmra.mxu1 %vm272_vm1, %v146_v30  ;;  %v1562_v58 = vpop.f32.mrf.mxu0  ;;  %7882 = vmatmul.mubr.msk.bf16.gmra.mxu0 %vm272_vm1, %v1357_v2 }
 0x1b7   :  { %v10282_v17 = vadd.f32 %v1562_v58, %v953_v56  ;;  %7763 = vmatprep.mubr.msk.bf16.mxu1 %vm8971_vm2, %v14591_v26  ;;  %7885 = vmatprep.mubr.msk.bf16.mxu0 %vm8971_vm2, %v14591_v26 }
 0x1b8   :  { %v7665_v3 = vpop.f32.mrf.mxu1  ;;  %v7787_v9 = vpop.f32.mrf.mxu0 }
 0x1b9   :  { %v964_v3 = vadd.f32 %v10024_v62, %v9624_v51  ;;  %v1308_v51 = vld [vmem:[%s14553_s0 + $0x1f2] sm:$0xff] }
 0x1ba   :  { %v10299_v52 = vpop.f32.mrf.mxu1  ;;  %v1565_v11 = vpop.f32.mrf.mxu0 }
 0x1bb   :  { %v10301_v30 = vadd.f32 %v1565_v11, %v956_v34  ;;  %v1359_v11 = vpack.c.bf16 %v1307_v39, %v1306_v33  ;;  %v1940_v33 = vld [vmem:[%s14553_s0 + $0x2a] sm:$0xff] }
 0x1bc   :  { %v7666_v2 = vpop.f32.mrf.mxu1  ;;  %v7788_v18 = vpop.f32.mrf.mxu0 }
 0x1be   :  { %v10305_v56 = vpop.f32.mrf.mxu1  ;;  %7764 = vmatmul.mubr.msk.bf16.gmra.mxu1 %vm272_vm1, %v147_v38  ;;  %v1570_v58 = vpop.f32.mrf.mxu0  ;;  %7886 = vmatmul.mubr.msk.bf16.gmra.mxu0 %vm272_vm1, %v1358_v19  ;;  %v2020_v38 = vpack.c.bf16 %v1938_v25, %v1937_v41  ;;  %v972_v41 = vadd.f32 %v10050_v24, %v9650_v8  ;;  %v1310_v8 = vld [vmem:[%s14553_s0 + $0x202] sm:$0xff] }
 0x1bf   :  { %v10312_v49 = vadd.f32 %v1570_v58, %v961_v55  ;;  %7889 = vmatprep.mubr.msk.bf16.mxu0 %vm8971_vm2, %v14591_v26  ;;  %7935 = vmatprep.mubr.msk.bf16.mxu1 %vm8971_vm2, %v14591_v26  ;;  %v969_v55 = vadd.f32 %v10028_v10, %v9628_v61  ;;  %v1309_v10 = vld [vmem:[%s14553_s0 + $0x1fa] sm:$0xff]  ;;  %v1939_v61 = vld [vmem:[%s14553_s0 + $0x22] sm:$0xff] }
 0x1c0   :  { %v7669_v4 = vpop.f32.mrf.mxu1  ;;  %v7791_v23 = vpop.f32.mrf.mxu0 }
 0x1c1   :  { %14620 = vst [vmem:[#allocation61_spill] sm:$0xff] %v10312_v49  ;;  %v1360_v23 = vpack.c.bf16 %v1309_v10, %v1308_v51  ;;  %v1942_v51 = vld [vmem:[%s14553_s0 + $0x3a] sm:$0xff] }
 0x1c2   :  { %v10329_v9 = vpop.f32.mrf.mxu1  ;;  %v1573_v34 = vpop.f32.mrf.mxu0 }
 0x1c3   :  { %v10331_v19 = vadd.f32 %v1573_v34, %v964_v3  ;;  %v2021_v3 = vpack.c.bf16 %v1940_v33, %v1939_v61  ;;  %v980_v33 = vadd.f32 %v10076_v59, %v9685_v36  ;;  %v1312_v36 = vld [vmem:[%s14553_s0 + $0x212] sm:$0xff] }
 0x1c4   :  { %v7670_v2 = vpop.f32.mrf.mxu1  ;;  %v7792_v18 = vpop.f32.mrf.mxu0 }
 0x1c5   :  { %v977_v2 = vadd.f32 %v10054_v42, %v9658_v20  ;;  %v1311_v42 = vld [vmem:[%s14553_s0 + $0x20a] sm:$0xff]  ;;  %v1941_v20 = vld [vmem:[%s14553_s0 + $0x32] sm:$0xff] }
 0x1c6   :  { %v10335_v58 = vpop.f32.mrf.mxu1  ;;  %v1578_v49 = vpop.f32.mrf.mxu0  ;;  %7890 = vmatmul.mubr.msk.bf16.gmra.mxu0 %vm272_vm1, %v1359_v11  ;;  %7936 = vmatmul.mubr.msk.bf16.vlgmr.msra.gmra.mxu1 %vm272_vm1, %v2020_v38 }
 0x1c7   :  { %v10342_v62 = vadd.f32 %v1578_v49, %v969_v55  ;;  %7893 = vmatprep.mubr.msk.bf16.mxu0 %vm8971_vm2, %v14591_v26  ;;  %7939 = vmatprep.mubr.msk.bf16.mxu1 %vm8971_vm2, %v14591_v26 }
 0x1c8   :  { %v7673_v49 = vpop.f32.mrf.mxu1  ;;  %v7795_v39 = vpop.f32.mrf.mxu0 }
 0x1ca   :  { %v10359_v25 = vpop.f32.mrf.mxu1  ;;  %v1581_v4 = vpop.f32.mrf.mxu0 }
 0x1cb   :  { %v10361_v34 = vadd.f32 %v1581_v4, %v972_v41  ;;  %v1361_v41 = vpack.c.bf16 %v1311_v42, %v1310_v8  ;;  %v2022_v4 = vpack.c.bf16 %v1942_v51, %v1941_v20  ;;  %v1944_v8 = vld [vmem:[%s14553_s0 + $0x4a] sm:$0xff]  ;;  %v988_v51 = vadd.f32 %v10102_v45, %v9712_v0  ;;  %v1314_v0 = vld [vmem:[%s14553_s0 + $0x222] sm:$0xff] }
 0x1cc   :  { %v7674_v11 = vpop.f32.mrf.mxu1  ;;  %v7796_v38 = vpop.f32.mrf.mxu0 }
 0x1cd   :  { %v985_v38 = vadd.f32 %v10080_v21, %v9690_v48  ;;  %v1313_v21 = vld [vmem:[%s14553_s0 + $0x21a] sm:$0xff]  ;;  %v1943_v48 = vld [vmem:[%s14553_s0 + $0x42] sm:$0xff] }
 0x1ce   :  { %v10365_v18 = vpop.f32.mrf.mxu1  ;;  %v1586_v55 = vpop.f32.mrf.mxu0  ;;  %7894 = vmatmul.mubr.msk.bf16.gmra.mxu0 %vm272_vm1, %v1360_v23  ;;  %7940 = vmatmul.mubr.msk.bf16.gmra.mxu1 %vm272_vm1, %v2021_v3 }
 0x1cf   :  { %v10372_v24 = vadd.f32 %v1586_v55, %v977_v2  ;;  %7897 = vmatprep.mubr.msk.bf16.mxu0 %vm8971_vm2, %v14591_v26  ;;  %7943 = vmatprep.mubr.msk.bf16.mxu1 %vm8971_vm2, %v14591_v26 }
 0x1d0   :  { %v7677_v10 = vpop.f32.mrf.mxu1  ;;  %v7799_v61 = vpop.f32.mrf.mxu0 }
 0x1d2   :  { %v10389_v49 = vpop.f32.mrf.mxu1  ;;  %v1589_v39 = vpop.f32.mrf.mxu0 }
 0x1d3   :  { %v10391_v23 = vadd.f32 %v1589_v39, %v980_v33  ;;  %v1362_v33 = vpack.c.bf16 %v1313_v21, %v1312_v36  ;;  %v2023_v39 = vpack.c.bf16 %v1944_v8, %v1943_v48  ;;  %v1946_v36 = vld [vmem:[%s14553_s0 + $0x5a] sm:$0xff]  ;;  %v996_v8 = vadd.f32 %v10128_v28, %v9738_v27  ;;  %v1316_v27 = vld [vmem:[%s14553_s0 + $0x232] sm:$0xff] }
 0x1d4   :  { %v7678_v3 = vpop.f32.mrf.mxu1  ;;  %v7800_v11 = vpop.f32.mrf.mxu0 }
 0x1d5   :  { %v993_v11 = vadd.f32 %v10106_v14, %v9716_v13  ;;  %v1315_v13 = vld [vmem:[%s14553_s0 + $0x22a] sm:$0xff]  ;;  %v1945_v14 = vld [vmem:[%s14553_s0 + $0x52] sm:$0xff] }
 0x1d6   :  { %v10395_v2 = vpop.f32.mrf.mxu1  ;;  %v1594_v55 = vpop.f32.mrf.mxu0  ;;  %7898 = vmatmul.mubr.msk.bf16.gmra.mxu0 %vm272_vm1, %v1361_v41  ;;  %7944 = vmatmul.mubr.msk.bf16.gmra.mxu1 %vm272_vm1, %v2022_v4 }
 0x1d7   :  { %v10402_v59 = vadd.f32 %v1594_v55, %v985_v38  ;;  %7901 = vmatprep.mubr.msk.bf16.mxu0 %vm8971_vm2, %v14591_v26  ;;  %7947 = vmatprep.mubr.msk.bf16.mxu1 %vm8971_vm2, %v14591_v26 }
 0x1d8   :  { %v7681_v42 = vpop.f32.mrf.mxu1  ;;  %v7803_v20 = vpop.f32.mrf.mxu0 }
 0x1da   :  { %v10419_v10 = vpop.f32.mrf.mxu1  ;;  %v1597_v61 = vpop.f32.mrf.mxu0 }
 0x1db   :  { %v10421_v41 = vadd.f32 %v1597_v61, %v988_v51  ;;  %v1363_v51 = vpack.c.bf16 %v1315_v13, %v1314_v0  ;;  %v2024_v61 = vpack.c.bf16 %v1946_v36, %v1945_v14  ;;  %v1948_v0 = vld [vmem:[%s14553_s0 + $0x6a] sm:$0xff]  ;;  %v1004_v36 = vadd.f32 %v10154_v37, %v9764_v63  ;;  %v1318_v63 = vld [vmem:[%s14553_s0 + $0x242] sm:$0xff] }
 0x1dc   :  { %v7682_v4 = vpop.f32.mrf.mxu1  ;;  %v7804_v3 = vpop.f32.mrf.mxu0 }
 0x1dd   :  { %v1001_v3 = vadd.f32 %v10132_v5, %v9742_v43  ;;  %v1317_v43 = vld [vmem:[%s14553_s0 + $0x23a] sm:$0xff]  ;;  %v1947_v5 = vld [vmem:[%s14553_s0 + $0x62] sm:$0xff] }
 0x1de   :  { %v10425_v38 = vpop.f32.mrf.mxu1  ;;  %v1602_v55 = vpop.f32.mrf.mxu0  ;;  %7902 = vmatmul.mubr.msk.bf16.gmra.mxu0 %vm272_vm1, %v1362_v33  ;;  %7948 = vmatmul.mubr.msk.bf16.gmra.mxu1 %vm272_vm1, %v2023_v39 }
 0x1df   :  { %v10432_v45 = vadd.f32 %v1602_v55, %v993_v11  ;;  %7905 = vmatprep.mubr.msk.bf16.mxu0 %vm8971_vm2, %v14591_v26  ;;  %7951 = vmatprep.mubr.msk.bf16.mxu1 %vm8971_vm2, %v14591_v26 }
 0x1e0   :  { %v7685_v21 = vpop.f32.mrf.mxu1  ;;  %v7807_v48 = vpop.f32.mrf.mxu0 }
 0x1e2   :  { %v10449_v42 = vpop.f32.mrf.mxu1  ;;  %v1605_v20 = vpop.f32.mrf.mxu0 }
 0x1e3   :  { %v10451_v33 = vadd.f32 %v1605_v20, %v996_v8  ;;  %v1364_v8 = vpack.c.bf16 %v1317_v43, %v1316_v27  ;;  %v2025_v20 = vpack.c.bf16 %v1948_v0, %v1947_v5  ;;  %v1950_v27 = vld [vmem:[%s14553_s0 + $0x7a] sm:$0xff]  ;;  %v1012_v0 = vadd.f32 %v10182_v6, %v9790_v40  ;;  %v1320_v40 = vld [vmem:[%s14553_s0 + $0x252] sm:$0xff] }
 0x1e4   :  { %v7686_v39 = vpop.f32.mrf.mxu1  ;;  %v7808_v4 = vpop.f32.mrf.mxu0 }
 0x1e5   :  { %v1009_v4 = vadd.f32 %v10158_v47, %v9768_v16  ;;  %v1319_v16 = vld [vmem:[%s14553_s0 + $0x24a] sm:$0xff]  ;;  %v1949_v47 = vld [vmem:[%s14553_s0 + $0x72] sm:$0xff] }
 0x1e6   :  { %v10455_v11 = vpop.f32.mrf.mxu1  ;;  %v1610_v55 = vpop.f32.mrf.mxu0  ;;  %7906 = vmatmul.mubr.msk.bf16.gmra.mxu0 %vm272_vm1, %v1363_v51  ;;  %7952 = vmatmul.mubr.msk.bf16.gmra.mxu1 %vm272_vm1, %v2024_v61 }
 0x1e7   :  { %v10462_v28 = vadd.f32 %v1610_v55, %v1001_v3  ;;  %7909 = vmatprep.mubr.msk.bf16.mxu0 %vm8971_vm2, %v14591_v26  ;;  %7955 = vmatprep.mubr.msk.bf16.mxu1 %vm8971_vm2, %v14591_v26 }
 0x1e8   :  { %v7689_v13 = vpop.f32.mrf.mxu1  ;;  %v7811_v14 = vpop.f32.mrf.mxu0 }
 0x1ea   :  { %v10479_v21 = vpop.f32.mrf.mxu1  ;;  %v1613_v48 = vpop.f32.mrf.mxu0 }
 0x1eb   :  { %v10481_v51 = vadd.f32 %v1613_v48, %v1004_v36  ;;  %v1365_v36 = vpack.c.bf16 %v1319_v16, %v1318_v63  ;;  %v2026_v48 = vpack.c.bf16 %v1950_v27, %v1949_v47  ;;  %v1952_v63 = vld [vmem:[%s14553_s0 + $0x8a] sm:$0xff]  ;;  %v1020_v27 = vadd.f32 %v10212_v46, %v9816_v29  ;;  %v1322_v29 = vld [vmem:[%s14553_s0 + $0x262] sm:$0xff] }
 0x1ec   :  { %v7690_v61 = vpop.f32.mrf.mxu1  ;;  %v7812_v39 = vpop.f32.mrf.mxu0 }
 0x1ed   :  { %v1017_v39 = vadd.f32 %v10188_v57, %v9794_v60  ;;  %v1321_v60 = vld [vmem:[%s14553_s0 + $0x25a] sm:$0xff]  ;;  %v1951_v57 = vld [vmem:[%s14553_s0 + $0x82] sm:$0xff] }
 0x1ee   :  { %v10485_v3 = vpop.f32.mrf.mxu1  ;;  %v1618_v55 = vpop.f32.mrf.mxu0  ;;  %7910 = vmatmul.mubr.msk.bf16.gmra.mxu0 %vm272_vm1, %v1364_v8  ;;  %7956 = vmatmul.mubr.msk.bf16.gmra.mxu1 %vm272_vm1, %v2025_v20 }
 0x1ef   :  { %v10492_v37 = vadd.f32 %v1618_v55, %v1009_v4  ;;  %7913 = vmatprep.mubr.msk.bf16.mxu0 %vm8971_vm2, %v14591_v26  ;;  %7959 = vmatprep.mubr.msk.bf16.mxu1 %vm8971_vm2, %v14591_v26 }
 0x1f0   :  { %v7693_v43 = vpop.f32.mrf.mxu1  ;;  %v7815_v5 = vpop.f32.mrf.mxu0 }
 0x1f2   :  { %v10509_v13 = vpop.f32.mrf.mxu1  ;;  %v1621_v14 = vpop.f32.mrf.mxu0 }
 0x1f3   :  { %v10511_v8 = vadd.f32 %v1621_v14, %v1012_v0  ;;  %v1366_v0 = vpack.c.bf16 %v1321_v60, %v1320_v40  ;;  %v2027_v14 = vpack.c.bf16 %v1952_v63, %v1951_v57  ;;  %v1953_v40 = vld [vmem:[%s14553_s0 + $0x92] sm:$0xff]  ;;  %v1954_v60 = vld [vmem:[%s14553_s0 + $0x9a] sm:$0xff]  ;;  %v14625_v63 = vld [vmem:[#allocation33_spill] sm:$0xff] }
 0x1f4   :  { %v7694_v20 = vpop.f32.mrf.mxu1  ;;  %v7816_v61 = vpop.f32.mrf.mxu0 }
 0x1f5   :  { %v14623_v61 = vld [vmem:[#allocation31_spill] sm:$0xff] }
 0x1f6   :  { %v10515_v4 = vpop.f32.mrf.mxu1  ;;  %v1626_v55 = vpop.f32.mrf.mxu0  ;;  %7914 = vmatmul.mubr.msk.bf16.gmra.mxu0 %vm272_vm1, %v1365_v36  ;;  %7960 = vmatmul.mubr.msk.bf16.gmra.mxu1 %vm272_vm1, %v2026_v48 }
 0x1f7   :  { %v10522_v6 = vadd.f32 %v1626_v55, %v1017_v39  ;;  %7917 = vmatprep.mubr.msk.bf16.mxu0 %vm8971_vm2, %v14591_v26  ;;  %7963 = vmatprep.mubr.msk.bf16.mxu1 %vm8971_vm2, %v14591_v26  ;;  %v1025_v39 = vadd.f32 %v10218_v50, %v14623_v61  ;;  %v1323_v50 = vld [vmem:[%s14553_s0 + $0x26a] sm:$0xff]  ;;  %v14627_v61 = vld [vmem:[#allocation35_spill] sm:$0xff] }
 0x1f8   :  { %v7697_v16 = vpop.f32.mrf.mxu1  ;;  %v7819_v47 = vpop.f32.mrf.mxu0 }
 0x1f9   :  { %14621 = vst [vmem:[#allocation62_spill] sm:$0xff] %v10522_v6  ;;  %v1028_v16 = vadd.f32 %v10242_v54, %v14625_v63  ;;  %v1324_v54 = vld [vmem:[%s14553_s0 + $0x272] sm:$0xff] }
 0x1fa   :  { %v10539_v43 = vpop.f32.mrf.mxu1  ;;  %v1629_v5 = vpop.f32.mrf.mxu0 }
 0x1fb   :  { %v10541_v36 = vadd.f32 %v1629_v5, %v1020_v27  ;;  %v1367_v5 = vpack.c.bf16 %v1323_v50, %v1322_v29  ;;  %v1955_v50 = vld [vmem:[%s14553_s0 + $0xa2] sm:$0xff] }
 0x1fc   :  { %v7698_v48 = vpop.f32.mrf.mxu1  ;;  %v7820_v20 = vpop.f32.mrf.mxu0 }
 0x1fd   :  { %14622 = vst [vmem:[#allocation63_spill] sm:$0xff] %v10541_v36 }
 0x1fe   :  { %v10545_v55 = vpop.f32.mrf.mxu1  ;;  %v1634_v6 = vpop.f32.mrf.mxu0  ;;  %7918 = vmatmul.mubr.msk.bf16.gmra.mxu0 %vm272_vm1, %v1366_v0  ;;  %7964 = vmatmul.mubr.msk.bf16.gmra.mxu1 %vm272_vm1, %v2027_v14  ;;  %v2028_v0 = vpack.c.bf16 %v1954_v60, %v1953_v40  ;;  %v1956_v40 = vld [vmem:[%s14553_s0 + $0xaa] sm:$0xff] }
 0x1ff   :  { %v10552_v46 = vadd.f32 %v1634_v6, %v1025_v39  ;;  %7921 = vmatprep.mubr.msk.bf16.mxu0 %vm8971_vm2, %v14591_v26  ;;  %7967 = vmatprep.mubr.msk.bf16.mxu1 %vm8971_vm2, %v14591_v26  ;;  %v1033_v39 = vadd.f32 %v10248_v31, %v14627_v61  ;;  %v1325_v31 = vld [vmem:[%s14553_s0 + $0x27a] sm:$0xff]  ;;  %v14631_v61 = vld [vmem:[#allocation38_spill] sm:$0xff] }
 0x200   :  { %v7701_v6 = vpop.f32.mrf.mxu1  ;;  %v7823_v57 = vpop.f32.mrf.mxu0 }
 0x201   :  { %14624 = vst [vmem:[#allocation31_spill] sm:$0xff] %v10552_v46  ;;  %v14629_v6 = vld [vmem:[#allocation37_spill] sm:$0xff] }
 0x202   :  { %v10569_v47 = vpop.f32.mrf.mxu1  ;;  %v1637_v27 = vpop.f32.mrf.mxu0  ;;  %v1036_v57 = vadd.f32 %v10272_v1, %v14629_v6 }
 0x203   :  { %v10571_v14 = vadd.f32 %v1637_v27, %v1028_v16  ;;  %v1368_v27 = vpack.c.bf16 %v1325_v31, %v1324_v54  ;;  %v1326_v54 = vld [vmem:[%s14553_s0 + $0x282] sm:$0xff]  ;;  %v1958_v31 = vld [vmem:[%s14553_s0 + $0xba] sm:$0xff] }
 0x204   :  { %v7702_v48 = vpop.f32.mrf.mxu1  ;;  %v7824_v20 = vpop.f32.mrf.mxu0 }
 0x205   :  { %14626 = vst [vmem:[#allocation33_spill] sm:$0xff] %v10571_v14 }
 0x206   :  { %v10575_v46 = vpop.f32.mrf.mxu1  ;;  %v1642_v36 = vpop.f32.mrf.mxu0  ;;  %7922 = vmatmul.mubr.msk.bf16.gmra.mxu0 %vm272_vm1, %v1367_v5  ;;  %7968 = vmatmul.mubr.msk.bf16.gmra.mxu1 %vm272_vm1, %v2028_v0  ;;  %v2029_v5 = vpack.c.bf16 %v1956_v40, %v1955_v50  ;;  %v14633_v40 = vld [vmem:[#allocation39_spill] sm:$0xff] }
 0x207   :  { %v10582_v29 = vadd.f32 %v1642_v36, %v1033_v39  ;;  %7925 = vmatprep.mubr.msk.bf16.mxu0 %vm8971_vm2, %v14591_v26  ;;  %7971 = vmatprep.mubr.msk.bf16.mxu1 %vm8971_vm2, %v14591_v26  ;;  %v1041_v39 = vadd.f32 %v10278_v44, %v14631_v61  ;;  %v1957_v44 = vld [vmem:[%s14553_s0 + $0xb2] sm:$0xff] }
 0x208   :  { %v7705_v36 = vpop.f32.mrf.mxu1  ;;  %v7827_v60 = vpop.f32.mrf.mxu0 }
 0x209   :  { %14628 = vst [vmem:[#allocation35_spill] sm:$0xff] %v10582_v29  ;;  %v1044_v36 = vadd.f32 %v10299_v52, %v14633_v40  ;;  %v1959_v52 = vld [vmem:[%s14553_s0 + $0xc2] sm:$0xff] }
 0x20a   :  { %v10599_v63 = vpop.f32.mrf.mxu1  ;;  %v1645_v16 = vpop.f32.mrf.mxu0 }
 0x20b   :  { %v10601_v0 = vadd.f32 %v1645_v16, %v1036_v57  ;;  %v1369_v57 = vpack.c.bf16 %v1326_v54, %v1326_v54  ;;  %v2030_v16 = vpack.c.bf16 %v1958_v31, %v1957_v44  ;;  %v2628_v44 = vld [vmem:[%s14553_s0 + $0x13] sm:$0xff]  ;;  %v2629_v31 = vld [vmem:[%s14553_s0 + $0x1b] sm:$0xff] }
 0x20c   :  { %v7706_v48 = vpop.f32.mrf.mxu1  ;;  %v7828_v20 = vpop.f32.mrf.mxu0 }
 0x20d   :  { %14630 = vst [vmem:[#allocation37_spill] sm:$0xff] %v10601_v0  ;;  %v14635_v20 = vld [vmem:[#allocation40_spill] sm:$0xff] }
 0x20e   :  { %v10605_v29 = vpop.f32.mrf.mxu1  ;;  %v1650_v14 = vpop.f32.mrf.mxu0  ;;  %7926 = vmatmul.mubr.msk.bf16.gmra.mxu0 %vm272_vm1, %v1368_v27  ;;  %7972 = vmatmul.mubr.msk.bf16.gmra.mxu1 %vm272_vm1, %v2029_v5  ;;  %v1049_v61 = vadd.f32 %v10305_v56, %v14635_v20  ;;  %v1960_v56 = vld [vmem:[%s14553_s0 + $0xca] sm:$0xff] }
 0x20f   :  { %v10609_v1 = vadd.f32 %v1650_v14, %v1041_v39  ;;  %7929 = vmatprep.mubr.msk.bf16.mxu0 %vm8971_vm2, %v14591_v26  ;;  %7975 = vmatprep.mubr.msk.bf16.mxu1 %vm8971_vm2, %v14591_v26 }
 0x210   :  { %v7709_v14 = vpop.f32.mrf.mxu1  ;;  %v7831_v50 = vpop.f32.mrf.mxu0 }
 0x211   :  { %14632 = vst [vmem:[#allocation38_spill] sm:$0xff] %v10609_v1  ;;  %v14637_v50 = vld [vmem:[#allocation41_spill] sm:$0xff] }
 0x212   :  { %v10626_v60 = vpop.f32.mrf.mxu1  ;;  %v1653_v6 = vpop.f32.mrf.mxu0  ;;  %v1052_v40 = vadd.f32 %v10329_v9, %v14637_v50  ;;  %v1961_v9 = vld [vmem:[%s14553_s0 + $0xd2] sm:$0xff] }
 0x213   :  { %v10628_v27 = vadd.f32 %v1653_v6, %v1044_v36 }
 0x214   :  { %v7710_v5 = vpop.f32.mrf.mxu1  ;;  %v7832_v48 = vpop.f32.mrf.mxu0 }
 0x215   :  { %14634 = vst [vmem:[#allocation39_spill] sm:$0xff] %v10628_v27 }
 0x216   :  { %v10632_v39 = vpop.f32.mrf.mxu1  ;;  %v1658_v1 = vpop.f32.mrf.mxu0  ;;  %7930 = vmatmul.mubr.msk.bf16.gmra.mxu0 %vm272_vm1, %v1369_v57  ;;  %7976 = vmatmul.mubr.msk.bf16.gmra.mxu1 %vm272_vm1, %v2030_v16  ;;  %v2031_v57 = vpack.c.bf16 %v1960_v56, %v1959_v52  ;;  %v2711_v16 = vpack.c.bf16 %v2629_v31, %v2628_v44  ;;  %v2630_v56 = vld [vmem:[%s14553_s0 + $0x23] sm:$0xff]  ;;  %v2631_v44 = vld [vmem:[%s14553_s0 + $0x2b] sm:$0xff] }
 0x217   :  { %v10639_v54 = vadd.f32 %v1658_v1, %v1049_v61  ;;  %7979 = vmatprep.mubr.msk.bf16.mxu1 %vm8971_vm2, %v14591_v26  ;;  %8101 = vmatprep.mubr.msk.bf16.mxu0 %vm8971_vm2, %v14591_v26  ;;  %v14639_v61 = vld [vmem:[#allocation42_spill] sm:$0xff]  ;;  %v14641_v31 = vld [vmem:[#allocation43_spill] sm:$0xff] }
 0x218   :  { %v7713_v1 = vpop.f32.mrf.mxu1  ;;  %v7835_v14 = vpop.f32.mrf.mxu0 }
 0x219   :  { %14636 = vst [vmem:[#allocation40_spill] sm:$0xff] %v10639_v54  ;;  %v1057_v54 = vadd.f32 %v10335_v58, %v14639_v61  ;;  %v1962_v58 = vld [vmem:[%s14553_s0 + $0xda] sm:$0xff]  ;;  %v1060_v1 = vadd.f32 %v10359_v25, %v14641_v31  ;;  %v1963_v25 = vld [vmem:[%s14553_s0 + $0xe2] sm:$0xff] }
 0x21a   :  { %v10656_v36 = vpop.f32.mrf.mxu1  ;;  %v1661_v6 = vpop.f32.mrf.mxu0 }
 0x21b   :  { %v10658_v5 = vadd.f32 %v1661_v6, %v1052_v40  ;;  %v2032_v40 = vpack.c.bf16 %v1962_v58, %v1961_v9  ;;  %v2712_v6 = vpack.c.bf16 %v2631_v44, %v2630_v56  ;;  %v2632_v58 = vld [vmem:[%s14553_s0 + $0x33] sm:$0xff]  ;;  %v2633_v56 = vld [vmem:[%s14553_s0 + $0x3b] sm:$0xff] }
 0x21c   :  { %v7714_v48 = vpop.f32.mrf.mxu1  ;;  %v7836_v20 = vpop.f32.mrf.mxu0 }
 0x21d   :  { %14638 = vst [vmem:[#allocation41_spill] sm:$0xff] %v10658_v5  ;;  %v14643_v20 = vld [vmem:[#allocation44_spill] sm:$0xff] }
 0x21e   :  { %v10662_v27 = vpop.f32.mrf.mxu1  ;;  %v1666_v0 = vpop.f32.mrf.mxu0  ;;  %7980 = vmatmul.mubr.msk.bf16.gmra.mxu1 %vm272_vm1, %v2031_v57  ;;  %8102 = vmatmul.mubr.msk.bf16.vlgmr.msra.gmra.mxu0 %vm272_vm1, %v2711_v16  ;;  %v1065_v61 = vadd.f32 %v10365_v18, %v14643_v20  ;;  %v1964_v18 = vld [vmem:[%s14553_s0 + $0xea] sm:$0xff] }
 0x21f   :  { %v10669_v52 = vadd.f32 %v1666_v0, %v1057_v54  ;;  %7983 = vmatprep.mubr.msk.bf16.mxu1 %vm8971_vm2, %v14591_v26  ;;  %8105 = vmatprep.mubr.msk.bf16.mxu0 %vm8971_vm2, %v14591_v26  ;;  %v14647_v20 = vld [vmem:[#allocation46_spill] sm:$0xff] }
 0x220   :  { %v7717_v0 = vpop.f32.mrf.mxu1  ;;  %v7839_v54 = vpop.f32.mrf.mxu0 }
 0x221   :  { %14640 = vst [vmem:[#allocation42_spill] sm:$0xff] %v10669_v52  ;;  %v14645_v0 = vld [vmem:[#allocation45_spill] sm:$0xff] }
 0x222   :  { %v10686_v14 = vpop.f32.mrf.mxu1  ;;  %v1669_v50 = vpop.f32.mrf.mxu0  ;;  %v1068_v54 = vadd.f32 %v10389_v49, %v14645_v0  ;;  %v1965_v49 = vld [vmem:[%s14553_s0 + $0xf2] sm:$0xff] }
 0x223   :  { %v10688_v57 = vadd.f32 %v1669_v50, %v1060_v1  ;;  %v2033_v50 = vpack.c.bf16 %v1964_v18, %v1963_v25  ;;  %v2634_v18 = vld [vmem:[%s14553_s0 + $0x43] sm:$0xff] }
 0x224   :  { %v7718_v16 = vpop.f32.mrf.mxu1  ;;  %v7840_v48 = vpop.f32.mrf.mxu0 }
 0x225   :  { %14642 = vst [vmem:[#allocation43_spill] sm:$0xff] %v10688_v57 }
 0x226   :  { %v10692_v52 = vpop.f32.mrf.mxu1  ;;  %v1674_v5 = vpop.f32.mrf.mxu0  ;;  %7984 = vmatmul.mubr.msk.bf16.gmra.mxu1 %vm272_vm1, %v2032_v40  ;;  %8106 = vmatmul.mubr.msk.bf16.gmra.mxu0 %vm272_vm1, %v2712_v6  ;;  %v2713_v40 = vpack.c.bf16 %v2633_v56, %v2632_v58  ;;  %v2635_v58 = vld [vmem:[%s14553_s0 + $0x4b] sm:$0xff] }
 0x227   :  { %v10699_v9 = vadd.f32 %v1674_v5, %v1065_v61  ;;  %7987 = vmatprep.mubr.msk.bf16.mxu1 %vm8971_vm2, %v14591_v26  ;;  %8109 = vmatprep.mubr.msk.bf16.mxu0 %vm8971_vm2, %v14591_v26  ;;  %v1073_v61 = vadd.f32 %v10395_v2, %v14647_v20  ;;  %v1966_v2 = vld [vmem:[%s14553_s0 + $0xfa] sm:$0xff] }
 0x228   :  { %v7721_v5 = vpop.f32.mrf.mxu1  ;;  %v7843_v44 = vpop.f32.mrf.mxu0  ;;  %v14651_v20 = vld [vmem:[#allocation48_spill] sm:$0xff] }
 0x229   :  { %14644 = vst [vmem:[#allocation44_spill] sm:$0xff] %v10699_v9  ;;  %v14649_v5 = vld [vmem:[#allocation47_spill] sm:$0xff] }
 0x22a   :  { %v10716_v31 = vpop.f32.mrf.mxu1  ;;  %v1677_v1 = vpop.f32.mrf.mxu0  ;;  %v1076_v44 = vadd.f32 %v10419_v10, %v14649_v5  ;;  %v1967_v10 = vld [vmem:[%s14553_s0 + $0x102] sm:$0xff] }
 0x22b   :  { %v10718_v6 = vadd.f32 %v1677_v1, %v1068_v54  ;;  %v2034_v1 = vpack.c.bf16 %v1966_v2, %v1965_v49  ;;  %v2636_v2 = vld [vmem:[%s14553_s0 + $0x53] sm:$0xff] }
 0x22c   :  { %v7722_v16 = vpop.f32.mrf.mxu1  ;;  %v7844_v48 = vpop.f32.mrf.mxu0 }
 0x22d   :  { %14646 = vst [vmem:[#allocation45_spill] sm:$0xff] %v10718_v6 }
 0x22e   :  { %v10722_v9 = vpop.f32.mrf.mxu1  ;;  %v1682_v57 = vpop.f32.mrf.mxu0  ;;  %7988 = vmatmul.mubr.msk.bf16.gmra.mxu1 %vm272_vm1, %v2033_v50  ;;  %8110 = vmatmul.mubr.msk.bf16.gmra.mxu0 %vm272_vm1, %v2713_v40  ;;  %v2714_v50 = vpack.c.bf16 %v2635_v58, %v2634_v18  ;;  %v2637_v18 = vld [vmem:[%s14553_s0 + $0x5b] sm:$0xff] }
 0x22f   :  { %v10729_v25 = vadd.f32 %v1682_v57, %v1073_v61  ;;  %7991 = vmatprep.mubr.msk.bf16.mxu1 %vm8971_vm2, %v14591_v26  ;;  %8113 = vmatprep.mubr.msk.bf16.mxu0 %vm8971_vm2, %v14591_v26  ;;  %v1081_v61 = vadd.f32 %v10425_v38, %v14651_v20  ;;  %v1968_v38 = vld [vmem:[%s14553_s0 + $0x10a] sm:$0xff] }
 0x230   :  { %v7725_v57 = vpop.f32.mrf.mxu1  ;;  %v7847_v56 = vpop.f32.mrf.mxu0  ;;  %v14655_v20 = vld [vmem:[#allocation50_spill] sm:$0xff] }
 0x231   :  { %14648 = vst [vmem:[#allocation46_spill] sm:$0xff] %v10729_v25  ;;  %v14653_v57 = vld [vmem:[#allocation49_spill] sm:$0xff] }
 0x232   :  { %v10746_v0 = vpop.f32.mrf.mxu1  ;;  %v1685_v54 = vpop.f32.mrf.mxu0  ;;  %v1084_v56 = vadd.f32 %v10449_v42, %v14653_v57  ;;  %v1969_v42 = vld [vmem:[%s14553_s0 + $0x112] sm:$0xff] }
 0x233   :  { %v10748_v40 = vadd.f32 %v1685_v54, %v1076_v44  ;;  %v2035_v54 = vpack.c.bf16 %v1968_v38, %v1967_v10  ;;  %v2638_v38 = vld [vmem:[%s14553_s0 + $0x63] sm:$0xff] }
 0x234   :  { %v7726_v16 = vpop.f32.mrf.mxu1  ;;  %v7848_v48 = vpop.f32.mrf.mxu0 }
 0x235   :  { %14650 = vst [vmem:[#allocation47_spill] sm:$0xff] %v10748_v40 }
 0x236   :  { %v10752_v25 = vpop.f32.mrf.mxu1  ;;  %v1690_v6 = vpop.f32.mrf.mxu0  ;;  %7992 = vmatmul.mubr.msk.bf16.gmra.mxu1 %vm272_vm1, %v2034_v1  ;;  %8114 = vmatmul.mubr.msk.bf16.gmra.mxu0 %vm272_vm1, %v2714_v50  ;;  %v2715_v1 = vpack.c.bf16 %v2637_v18, %v2636_v2  ;;  %v2639_v2 = vld [vmem:[%s14553_s0 + $0x6b] sm:$0xff] }
 0x237   :  { %v10759_v49 = vadd.f32 %v1690_v6, %v1081_v61  ;;  %7995 = vmatprep.mubr.msk.bf16.mxu1 %vm8971_vm2, %v14591_v26  ;;  %8117 = vmatprep.mubr.msk.bf16.mxu0 %vm8971_vm2, %v14591_v26  ;;  %v1089_v61 = vadd.f32 %v10455_v11, %v14655_v20  ;;  %v1970_v11 = vld [vmem:[%s14553_s0 + $0x11a] sm:$0xff]  ;;  %v6809_v20 = vld [vmem:[%s14554_s1 + $0xa] sm:$0x3] }
 0x238   :  { %v7729_v6 = vpop.f32.mrf.mxu1  ;;  %v7851_v58 = vpop.f32.mrf.mxu0 }
 0x239   :  { %14652 = vst [vmem:[#allocation48_spill] sm:$0xff] %v10759_v49  ;;  %v14657_v6 = vld [vmem:[#allocation51_spill] sm:$0xff] }
 0x23a   :  { %v10776_v5 = vpop.f32.mrf.mxu1  ;;  %v1693_v44 = vpop.f32.mrf.mxu0  ;;  %v1092_v58 = vadd.f32 %v10479_v21, %v14657_v6  ;;  %v6851_v6 = vld [vmem:[%s14554_s1 + $0xc] sm:$0x3] }
 0x23b   :  { %v10778_v50 = vadd.f32 %v1693_v44, %v1084_v56  ;;  %v2036_v44 = vpack.c.bf16 %v1970_v11, %v1969_v42  ;;  %v1971_v42 = vld [vmem:[%s14553_s0 + $0x122] sm:$0xff]  ;;  %v1972_v11 = vld [vmem:[%s14553_s0 + $0x12a] sm:$0xff] }
 0x23c   :  { %v7730_v16 = vpop.f32.mrf.mxu1  ;;  %v7852_v48 = vpop.f32.mrf.mxu0 }
 0x23d   :  { %14654 = vst [vmem:[#allocation49_spill] sm:$0xff] %v10778_v50 }
 0x23e   :  { %v10782_v49 = vpop.f32.mrf.mxu1  ;;  %v1698_v40 = vpop.f32.mrf.mxu0  ;;  %7996 = vmatmul.mubr.msk.bf16.gmra.mxu1 %vm272_vm1, %v2035_v54  ;;  %8118 = vmatmul.mubr.msk.bf16.gmra.mxu0 %vm272_vm1, %v2715_v1  ;;  %v2716_v54 = vpack.c.bf16 %v2639_v2, %v2638_v38  ;;  %v2641_v2 = vld [vmem:[%s14553_s0 + $0x7b] sm:$0xff] }
 0x23f   :  { %v10789_v10 = vadd.f32 %v1698_v40, %v1089_v61  ;;  %7999 = vmatprep.mubr.msk.bf16.mxu1 %vm8971_vm2, %v14591_v26  ;;  %8121 = vmatprep.mubr.msk.bf16.mxu0 %vm8971_vm2, %v14591_v26  ;;  %v14659_v61 = vld [vmem:[#allocation52_spill] sm:$0xff] }
 0x240   :  { %v7733_v40 = vpop.f32.mrf.mxu1  ;;  %v7855_v18 = vpop.f32.mrf.mxu0 }
 0x241   :  { %14656 = vst [vmem:[#allocation50_spill] sm:$0xff] %v10789_v10  ;;  %v1097_v40 = vadd.f32 %v10485_v3, %v14659_v61  ;;  %v3567_v18 = vsel %vm396_vm0, %v6809_v20, 0  ;;  %v2640_v3 = vld [vmem:[%s14553_s0 + $0x73] sm:$0xff]  ;;  %v2037_v61 = vpack.c.bf16 %v1972_v11, %v1971_v42 }
 0x242   :  { %v10806_v57 = vpop.f32.mrf.mxu1  ;;  %v1701_v56 = vpop.f32.mrf.mxu0  ;;  %8266 = vmatpush3.bf16.msra.mxu1 %v3567_v18  ;;  %v14663_v18 = vld [vmem:[#allocation54_spill] sm:$0xff]  ;;  %v1973_v42 = vld [vmem:[%s14553_s0 + $0x132] sm:$0xff] }
 0x243   :  { %v10808_v1 = vadd.f32 %v1701_v56, %v1092_v58  ;;  %8597 = vmatprep.subr.bf16.mxu1 %v14591_v26 }
 0x244   :  { %v7734_v16 = vpop.f32.mrf.mxu1  ;;  %v7856_v48 = vpop.f32.mrf.mxu0 }
 0x245   :  { %14658 = vst [vmem:[#allocation51_spill] sm:$0xff] %v10808_v1 }
 0x246   :  { %v10816_v10 = vpop.f32.mrf.mxu1  ;;  %v1706_v21 = vpop.f32.mrf.mxu0  ;;  %8000 = vmatmul.mubr.msk.bf16.gmra.mxu1 %vm272_vm1, %v2036_v44  ;;  %8122 = vmatmul.mubr.msk.bf16.gmra.mxu0 %vm272_vm1, %v2716_v54  ;;  %v4258_v44 = vsel %vm396_vm0, %v6851_v6, 0  ;;  %v14661_v54 = vld [vmem:[#allocation53_spill] sm:$0xff]  ;;  %v1105_v6 = vadd.f32 %v10515_v4, %v14663_v18  ;;  %v1974_v4 = vld [vmem:[%s14553_s0 + $0x13a] sm:$0xff] }
 0x247   :  { %v10826_v38 = vadd.f32 %v1706_v21, %v1097_v40  ;;  %8003 = vmatprep.mubr.msk.bf16.mxu1 %vm8971_vm2, %v14591_v26  ;;  %8125 = vmatprep.mubr.msk.bf16.mxu0 %vm8971_vm2, %v14591_v26  ;;  %v1100_v16 = vadd.f32 %v10509_v13, %v14661_v54  ;;  %v2717_v40 = vpack.c.bf16 %v2641_v2, %v2640_v3  ;;  %v2642_v3 = vld [vmem:[%s14553_s0 + $0x83] sm:$0xff]  ;;  %v2643_v2 = vld [vmem:[%s14553_s0 + $0x8b] sm:$0xff] }
 0x248   :  { %v7737_v58 = vpop.f32.mrf.mxu1  ;;  %v7859_v56 = vpop.f32.mrf.mxu0  ;;  %8432 = vmatpush3.bf16.msra.mxu0 %v4258_v44 }
 0x249   :  { %14660 = vst [vmem:[#allocation52_spill] sm:$0xff] %v10826_v38  ;;  %8763 = vmatprep.subr.bf16.mxu0 %v14591_v26 }
 0x24a   :  { %v10845_v48 = vpop.f32.mrf.mxu1  ;;  %v1709_v20 = vpop.f32.mrf.mxu0 }
 0x24b   :  { %v10848_v21 = vadd.f32 %v1709_v20, %v1100_v16  ;;  %v14665_v16 = vld [vmem:[#allocation55_spill] sm:$0xff] }
 0x24c   :  { %v7738_v58 = vpop.f32.mrf.mxu1  ;;  %v7860_v56 = vpop.f32.mrf.mxu0  ;;  %v1108_v20 = vadd.f32 %v10539_v43, %v14665_v16  ;;  %v1975_v43 = vld [vmem:[%s14553_s0 + $0x142] sm:$0xff] }
 0x24d   :  { %14662 = vst [vmem:[#allocation53_spill] sm:$0xff] %v10848_v21  ;;  %v2038_v58 = vpack.c.bf16 %v1974_v4, %v1973_v42  ;;  %v2718_v56 = vpack.c.bf16 %v2643_v2, %v2642_v3  ;;  %v2645_v4 = vld [vmem:[%s14553_s0 + $0x9b] sm:$0xff] }
 0x24e   :  { %v10852_v38 = vpop.f32.mrf.mxu1  ;;  %v1714_v13 = vpop.f32.mrf.mxu0  ;;  %8004 = vmatmul.mubr.msk.bf16.gmra.mxu1 %vm272_vm1, %v2037_v61  ;;  %8126 = vmatmul.mubr.msk.bf16.gmra.mxu0 %vm272_vm1, %v2717_v40  ;;  %v14669_v3 = vld [vmem:[#allocation57_spill] sm:$0xff] }
 0x24f   :  { %v10859_v11 = vadd.f32 %v1714_v13, %v1105_v6  ;;  %8007 = vmatprep.mubr.msk.bf16.mxu1 %vm8971_vm2, %v14591_v26  ;;  %8129 = vmatprep.mubr.msk.bf16.mxu0 %vm8971_vm2, %v14591_v26  ;;  %v1116_v2 = vadd.f32 %v10569_v47, %v14669_v3  ;;  %v1977_v47 = vld [vmem:[%s14553_s0 + $0x152] sm:$0xff] }
 0x250   :  { %v7741_v44 = vpop.f32.mrf.mxu1  ;;  %v7863_v54 = vpop.f32.mrf.mxu0 }
 0x251   :  { %14664 = vst [vmem:[#allocation54_spill] sm:$0xff] %v10859_v11  ;;  %v14667_v11 = vld [vmem:[#allocation56_spill] sm:$0xff] }
 0x252   :  { %v10876_v61 = vpop.f32.mrf.mxu1  ;;  %v1717_v40 = vpop.f32.mrf.mxu0  ;;  %v1113_v21 = vadd.f32 %v10545_v55, %v14667_v11  ;;  %v1976_v55 = vld [vmem:[%s14553_s0 + $0x14a] sm:$0xff]  ;;  %v2644_v11 = vld [vmem:[%s14553_s0 + $0x93] sm:$0xff] }
 0x253   :  { %v10878_v18 = vadd.f32 %v1717_v40, %v1108_v20  ;;  %v2039_v16 = vpack.c.bf16 %v1976_v55, %v1975_v43  ;;  %v2719_v20 = vpack.c.bf16 %v2645_v4, %v2644_v11  ;;  %v2646_v55 = vld [vmem:[%s14553_s0 + $0xa3] sm:$0xff]  ;;  %v2647_v11 = vld [vmem:[%s14553_s0 + $0xab] sm:$0xff] }
 0x254   :  { %v7742_v6 = vpop.f32.mrf.mxu1  ;;  %v7864_v13 = vpop.f32.mrf.mxu0 }
 0x255   :  { %14666 = vst [vmem:[#allocation55_spill] sm:$0xff] %v10878_v18  ;;  %v14671_v6 = vld [vmem:[#allocation58_spill] sm:$0xff] }
 0x256   :  { %v10882_v1 = vpop.f32.mrf.mxu1  ;;  %v1722_v50 = vpop.f32.mrf.mxu0  ;;  %8008 = vmatmul.mubr.msk.bf16.gmra.mxu1 %vm272_vm1, %v2038_v58  ;;  %8130 = vmatmul.mubr.msk.bf16.gmra.mxu0 %vm272_vm1, %v2718_v56  ;;  %v1121_v13 = vadd.f32 %v10575_v46, %v14671_v6  ;;  %v1978_v46 = vld [vmem:[%s14553_s0 + $0x15a] sm:$0xff]  ;;  %v14675_v6 = vld [vmem:[#allocation5_spill] sm:$0xff] }
 0x257   :  { %v10889_v42 = vadd.f32 %v1722_v50, %v1113_v21  ;;  %8011 = vmatprep.mubr.msk.bf16.mxu1 %vm8971_vm2, %v14591_v26  ;;  %8133 = vmatprep.mubr.msk.bf16.mxu0 %vm8971_vm2, %v14591_v26 }
 0x258   :  { %v7745_v50 = vpop.f32.mrf.mxu1  ;;  %v7867_v21 = vpop.f32.mrf.mxu0 }
 0x259   :  { %14668 = vst [vmem:[#allocation56_spill] sm:$0xff] %v10889_v42  ;;  %v14673_v50 = vld [vmem:[#allocation59_spill] sm:$0xff] }
 0x25a   :  { %v10906_v44 = vpop.f32.mrf.mxu1  ;;  %v1725_v54 = vpop.f32.mrf.mxu0  ;;  %v1124_v21 = vadd.f32 %v10599_v63, %v14673_v50  ;;  %v1979_v63 = vld [vmem:[%s14553_s0 + $0x162] sm:$0xff] }
 0x25b   :  { %v10908_v40 = vadd.f32 %v1725_v54, %v1116_v2  ;;  %v2040_v54 = vpack.c.bf16 %v1978_v46, %v1977_v47  ;;  %v2648_v46 = vld [vmem:[%s14553_s0 + $0xb3] sm:$0xff] }
 0x25c   :  { %v7746_v58 = vpop.f32.mrf.mxu1  ;;  %v7868_v56 = vpop.f32.mrf.mxu0 }
 0x25d   :  { %14670 = vst [vmem:[#allocation57_spill] sm:$0xff] %v10908_v40 }
 0x25e   :  { %v10912_v42 = vpop.f32.mrf.mxu1  ;;  %v1730_v18 = vpop.f32.mrf.mxu0  ;;  %8012 = vmatmul.mubr.msk.bf16.gmra.mxu1 %vm272_vm1, %v2039_v16  ;;  %8134 = vmatmul.mubr.msk.bf16.gmra.mxu0 %vm272_vm1, %v2719_v20  ;;  %v2720_v16 = vpack.c.bf16 %v2647_v11, %v2646_v55  ;;  %v2649_v55 = vld [vmem:[%s14553_s0 + $0xbb] sm:$0xff] }
 0x25f   :  { %v10919_v43 = vadd.f32 %v1730_v18, %v1121_v13  ;;  %8015 = vmatprep.mubr.msk.bf16.mxu1 %vm8971_vm2, %v14591_v26  ;;  %8137 = vmatprep.mubr.msk.bf16.mxu0 %vm8971_vm2, %v14591_v26  ;;  %v1129_v13 = vadd.f32 %v10605_v29, %v14675_v6  ;;  %v1980_v29 = vld [vmem:[%s14553_s0 + $0x16a] sm:$0xff]  ;;  %v14679_v6 = vld [vmem:[#allocation7_spill] sm:$0xff] }
 0x260   :  { %v7749_v18 = vpop.f32.mrf.mxu1  ;;  %v7871_v4 = vpop.f32.mrf.mxu0 }
 0x261   :  { %14672 = vst [vmem:[#allocation58_spill] sm:$0xff] %v10919_v43  ;;  %v14677_v18 = vld [vmem:[#allocation6_spill] sm:$0xff] }
 0x262   :  { %v10936_v3 = vpop.f32.mrf.mxu1  ;;  %v1733_v2 = vpop.f32.mrf.mxu0  ;;  %v1132_v4 = vadd.f32 %v10626_v60, %v14677_v18  ;;  %v1981_v60 = vld [vmem:[%s14553_s0 + $0x172] sm:$0xff] }
 0x263   :  { %v10938_v20 = vadd.f32 %v1733_v2, %v1124_v21  ;;  %v2041_v2 = vpack.c.bf16 %v1980_v29, %v1979_v63  ;;  %v2650_v29 = vld [vmem:[%s14553_s0 + $0xc3] sm:$0xff] }
 0x264   :  { %v7750_v58 = vpop.f32.mrf.mxu1  ;;  %v7872_v56 = vpop.f32.mrf.mxu0 }
 0x265   :  { %14674 = vst [vmem:[#allocation59_spill] sm:$0xff] %v10938_v20 }
 0x266   :  { %v10942_v43 = vpop.f32.mrf.mxu1  ;;  %v1738_v40 = vpop.f32.mrf.mxu0  ;;  %8016 = vmatmul.mubr.msk.bf16.gmra.mxu1 %vm272_vm1, %v2040_v54  ;;  %8138 = vmatmul.mubr.msk.bf16.gmra.mxu0 %vm272_vm1, %v2720_v16  ;;  %v2721_v54 = vpack.c.bf16 %v2649_v55, %v2648_v46  ;;  %v2651_v46 = vld [vmem:[%s14553_s0 + $0xcb] sm:$0xff] }
 0x267   :  { %v10949_v47 = vadd.f32 %v1738_v40, %v1129_v13  ;;  %8019 = vmatprep.mubr.msk.bf16.mxu1 %vm8971_vm2, %v14591_v26  ;;  %8141 = vmatprep.mubr.msk.bf16.mxu0 %vm8971_vm2, %v14591_v26  ;;  %v1137_v13 = vadd.f32 %v10632_v39, %v14679_v6  ;;  %v1982_v39 = vld [vmem:[%s14553_s0 + $0x17a] sm:$0xff]  ;;  %v14683_v6 = vld [vmem:[#allocation9_spill] sm:$0xff] }
 0x268   :  { %v7753_v40 = vpop.f32.mrf.mxu1  ;;  %v7875_v11 = vpop.f32.mrf.mxu0 }
 0x269   :  { %14676 = vst [vmem:[#allocation5_spill] sm:$0xff] %v10949_v47  ;;  %v14681_v40 = vld [vmem:[#allocation8_spill] sm:$0xff] }
 0x26a   :  { %v10966_v50 = vpop.f32.mrf.mxu1  ;;  %v1741_v21 = vpop.f32.mrf.mxu0  ;;  %v1140_v11 = vadd.f32 %v10656_v36, %v14681_v40  ;;  %v1983_v36 = vld [vmem:[%s14553_s0 + $0x182] sm:$0xff] }
 0x26b   :  { %v10968_v16 = vadd.f32 %v1741_v21, %v1132_v4  ;;  %v2042_v21 = vpack.c.bf16 %v1982_v39, %v1981_v60  ;;  %v2652_v39 = vld [vmem:[%s14553_s0 + $0xd3] sm:$0xff] }
 0x26c   :  { %v7754_v58 = vpop.f32.mrf.mxu1  ;;  %v7876_v56 = vpop.f32.mrf.mxu0 }
 0x26d   :  { %14678 = vst [vmem:[#allocation6_spill] sm:$0xff] %v10968_v16 }
 0x26e   :  { %v10972_v47 = vpop.f32.mrf.mxu1  ;;  %v1746_v20 = vpop.f32.mrf.mxu0  ;;  %8020 = vmatmul.mubr.msk.bf16.gmra.mxu1 %vm272_vm1, %v2041_v2  ;;  %8142 = vmatmul.mubr.msk.bf16.gmra.mxu0 %vm272_vm1, %v2721_v54  ;;  %v2722_v2 = vpack.c.bf16 %v2651_v46, %v2650_v29  ;;  %v2653_v29 = vld [vmem:[%s14553_s0 + $0xdb] sm:$0xff] }
 0x26f   :  { %v10979_v63 = vadd.f32 %v1746_v20, %v1137_v13  ;;  %8023 = vmatprep.mubr.msk.bf16.mxu1 %vm8971_vm2, %v14591_v26  ;;  %8145 = vmatprep.mubr.msk.bf16.mxu0 %vm8971_vm2, %v14591_v26  ;;  %v1145_v13 = vadd.f32 %v10662_v27, %v14683_v6  ;;  %v1984_v27 = vld [vmem:[%s14553_s0 + $0x18a] sm:$0xff]  ;;  %v14687_v6 = vld [vmem:[#allocation11_spill] sm:$0xff] }
 0x270   :  { %v7757_v20 = vpop.f32.mrf.mxu1  ;;  %v7879_v55 = vpop.f32.mrf.mxu0 }
 0x271   :  { %14680 = vst [vmem:[#allocation7_spill] sm:$0xff] %v10979_v63  ;;  %v14685_v20 = vld [vmem:[#allocation10_spill] sm:$0xff] }
 0x272   :  { %v10996_v18 = vpop.f32.mrf.mxu1  ;;  %v1749_v4 = vpop.f32.mrf.mxu0  ;;  %v1148_v55 = vadd.f32 %v10686_v14, %v14685_v20  ;;  %v1985_v14 = vld [vmem:[%s14553_s0 + $0x192] sm:$0xff] }
 0x273   :  { %v10998_v54 = vadd.f32 %v1749_v4, %v1140_v11  ;;  %v2043_v4 = vpack.c.bf16 %v1984_v27, %v1983_v36  ;;  %v2654_v27 = vld [vmem:[%s14553_s0 + $0xe3] sm:$0xff] }
 0x274   :  { %v7758_v58 = vpop.f32.mrf.mxu1  ;;  %v7880_v56 = vpop.f32.mrf.mxu0 }
 0x275   :  { %14682 = vst [vmem:[#allocation8_spill] sm:$0xff] %v10998_v54 }
 0x276   :  { %v11002_v63 = vpop.f32.mrf.mxu1  ;;  %v1754_v16 = vpop.f32.mrf.mxu0  ;;  %8024 = vmatmul.mubr.msk.bf16.gmra.mxu1 %vm272_vm1, %v2042_v21  ;;  %8146 = vmatmul.mubr.msk.bf16.gmra.mxu0 %vm272_vm1, %v2722_v2  ;;  %v2723_v21 = vpack.c.bf16 %v2653_v29, %v2652_v39  ;;  %v2655_v39 = vld [vmem:[%s14553_s0 + $0xeb] sm:$0xff] }
 0x277   :  { %v11009_v60 = vadd.f32 %v1754_v16, %v1145_v13  ;;  %8027 = vmatprep.mubr.msk.bf16.mxu1 %vm8971_vm2, %v14591_v26  ;;  %8149 = vmatprep.mubr.msk.bf16.mxu0 %vm8971_vm2, %v14591_v26  ;;  %v1153_v13 = vadd.f32 %v10692_v52, %v14687_v6  ;;  %v1986_v52 = vld [vmem:[%s14553_s0 + $0x19a] sm:$0xff]  ;;  %v14690_v6 = vld [vmem:[#allocation13_spill] sm:$0xff] }
 0x278   :  { %v7761_v16 = vpop.f32.mrf.mxu1  ;;  %v7883_v46 = vpop.f32.mrf.mxu0 }
 0x279   :  { %14684 = vst [vmem:[#allocation9_spill] sm:$0xff] %v11009_v60  ;;  %v14689_v16 = vld [vmem:[#allocation12_spill] sm:$0xff] }
 0x27a   :  { %v11026_v40 = vpop.f32.mrf.mxu1  ;;  %v1757_v11 = vpop.f32.mrf.mxu0  ;;  %v1156_v46 = vadd.f32 %v10716_v31, %v14689_v16  ;;  %v1987_v31 = vld [vmem:[%s14553_s0 + $0x1a2] sm:$0xff] }
 0x27b   :  { %v11028_v2 = vadd.f32 %v1757_v11, %v1148_v55  ;;  %v2044_v11 = vpack.c.bf16 %v1986_v52, %v1985_v14  ;;  %v14692_v14 = vld [vmem:[#allocation60_spill] sm:$0xff] }
 0x27c   :  { %v7762_v58 = vpop.f32.mrf.mxu1  ;;  %v7884_v56 = vpop.f32.mrf.mxu0 }
 0x27d   :  { %14686 = vst [vmem:[#allocation10_spill] sm:$0xff] %v11028_v2 }
 0x27e   :  { %v11032_v60 = vpop.f32.mrf.mxu1  ;;  %v1762_v54 = vpop.f32.mrf.mxu0  ;;  %8028 = vmatmul.mubr.msk.bf16.gmra.mxu1 %vm272_vm1, %v2043_v4  ;;  %8150 = vmatmul.mubr.msk.bf16.gmra.mxu0 %vm272_vm1, %v2723_v21  ;;  %v2724_v4 = vpack.c.bf16 %v2655_v39, %v2654_v27  ;;  %v2656_v27 = vld [vmem:[%s14553_s0 + $0xf3] sm:$0xff] }
 0x27f   :  { %v11039_v36 = vadd.f32 %v1762_v54, %v1153_v13  ;;  %8031 = vmatprep.mubr.msk.bf16.mxu1 %vm8971_vm2, %v14591_v26  ;;  %8153 = vmatprep.mubr.msk.bf16.mxu0 %vm8971_vm2, %v14591_v26  ;;  %v1161_v13 = vadd.f32 %v10722_v9, %v14690_v6  ;;  %v1988_v9 = vld [vmem:[%s14553_s0 + $0x1aa] sm:$0xff] }
 0x280   :  { %v7765_v54 = vpop.f32.mrf.mxu1  ;;  %v7887_v29 = vpop.f32.mrf.mxu0 }
 0x281   :  { %14688 = vst [vmem:[#allocation11_spill] sm:$0xff] %v11039_v36  ;;  %v14693_v29 = vld [vmem:[#allocation14_spill] sm:$0xff] }
 0x282   :  { %v1243_v20 = vpop.f32.mrf.mxu1  ;;  %v1765_v55 = vpop.f32.mrf.mxu0  ;;  %v1164_v16 = vadd.f32 %v10746_v0, %v14693_v29  ;;  %v1989_v0 = vld [vmem:[%s14553_s0 + $0x1b2] sm:$0xff] }
 0x283   :  { %v11056_v21 = vadd.f32 %v1765_v55, %v1156_v46  ;;  %v2045_v55 = vpack.c.bf16 %v1988_v9, %v1987_v31  ;;  %v2658_v9 = vld [vmem:[%s14553_s0 + $0x103] sm:$0xff] }
 0x284   :  { %v7766_v58 = vpop.f32.mrf.mxu1  ;;  %v7888_v56 = vpop.f32.mrf.mxu0 }
 0x286   :  { %v1770_v36 = vpop.f32.mrf.mxu0  ;;  %v2221_v2 = vpop.f32.mrf.mxu1  ;;  %8032 = vmatmul.mubr.msk.bf16.gmra.mxu1 %vm272_vm1, %v2044_v11  ;;  %8154 = vmatmul.mubr.msk.bf16.gmra.mxu0 %vm272_vm1, %v2724_v4 }
 0x287   :  { %v11065_v54 = vadd.f32 %v1770_v36, %v1161_v13  ;;  %v11068_v52 = vadd.f32 %v2221_v2, %v14692_v14  ;;  %8035 = vmatprep.mubr.msk.bf16.mxu1 %vm8971_vm2, %v14591_v26  ;;  %8157 = vmatprep.mubr.msk.bf16.mxu0 %vm8971_vm2, %v14591_v26  ;;  %v2657_v36 = vld [vmem:[%s14553_s0 + $0xfb] sm:$0xff]  ;;  %v14694_v13 = vld [vmem:[#allocation15_spill] sm:$0xff] }
 0x288   :  { %v7891_v2 = vpop.f32.mrf.mxu0  ;;  %v7937_v39 = vpop.f32.mrf.mxu1  ;;  %v2725_v11 = vpack.c.bf16 %v2657_v36, %v2656_v27  ;;  %v1169_v14 = vadd.f32 %v10752_v25, %v14694_v13  ;;  %v1990_v25 = vld [vmem:[%s14553_s0 + $0x1ba] sm:$0xff]  ;;  %v14696_v13 = vld [vmem:[#allocation17_spill] sm:$0xff] }
 0x289   :  { %14691 = vst [vmem:[#allocation12_spill] sm:$0xff] %v11065_v54  ;;  %v14695_v36 = vld [vmem:[#allocation16_spill] sm:$0xff] }
 0x28a   :  { %v1773_v46 = vpop.f32.mrf.mxu0  ;;  %v2224_v20 = vpop.f32.mrf.mxu1  ;;  %v1172_v39 = vadd.f32 %v10776_v5, %v14695_v36  ;;  %v1991_v5 = vld [vmem:[%s14553_s0 + $0x1c2] sm:$0xff] }
 0x28b   :  { %v11085_v4 = vadd.f32 %v1773_v46, %v1164_v16  ;;  %v11088_v58 = vadd.f32 %v2224_v20, %v10184_v35  ;;  %v2046_v46 = vpack.c.bf16 %v1990_v25, %v1989_v0  ;;  %v2660_v25 = vld [vmem:[%s14553_s0 + $0x113] sm:$0xff] }
 0x28c   :  { %v7892_v56 = vpop.f32.mrf.mxu0  ;;  %v7938_v6 = vpop.f32.mrf.mxu1 }
 0x28e   :  { %v1778_v54 = vpop.f32.mrf.mxu0  ;;  %v2229_v2 = vpop.f32.mrf.mxu1  ;;  %8036 = vmatmul.mubr.msk.bf16.gmra.mxu1 %vm272_vm1, %v2045_v55  ;;  %8158 = vmatmul.mubr.msk.bf16.gmra.mxu0 %vm272_vm1, %v2725_v11 }
 0x28f   :  { %v11097_v31 = vadd.f32 %v1778_v54, %v1169_v14  ;;  %v11100_v35 = vadd.f32 %v2229_v2, %v10195_v7  ;;  %8039 = vmatprep.mubr.msk.bf16.mxu1 %vm8971_vm2, %v14591_v26  ;;  %8161 = vmatprep.mubr.msk.bf16.mxu0 %vm8971_vm2, %v14591_v26  ;;  %v2659_v54 = vld [vmem:[%s14553_s0 + $0x10b] sm:$0xff]  ;;  %v1177_v14 = vadd.f32 %v10782_v49, %v14696_v13 }
 0x290   :  { %v7895_v7 = vpop.f32.mrf.mxu0  ;;  %v7941_v27 = vpop.f32.mrf.mxu1  ;;  %v2726_v20 = vpack.c.bf16 %v2659_v54, %v2658_v9  ;;  %v1992_v49 = vld [vmem:[%s14553_s0 + $0x1ca] sm:$0xff]  ;;  %v2661_v9 = vld [vmem:[%s14553_s0 + $0x11b] sm:$0xff] }
 0x291   :  { %v14697_v27 = vld [vmem:[#allocation18_spill] sm:$0xff] }
 0x292   :  { %v1781_v29 = vpop.f32.mrf.mxu0  ;;  %v2232_v16 = vpop.f32.mrf.mxu1  ;;  %v1180_v36 = vadd.f32 %v10806_v57, %v14697_v27  ;;  %v1993_v57 = vld [vmem:[%s14553_s0 + $0x1d2] sm:$0xff] }
 0x293   :  { %v11117_v55 = vadd.f32 %v1781_v29, %v1172_v39  ;;  %v11120_v11 = vadd.f32 %v2232_v16, %v10214_v32  ;;  %v2047_v16 = vpack.c.bf16 %v1992_v49, %v1991_v5  ;;  %v2662_v49 = vld [vmem:[%s14553_s0 + $0x123] sm:$0xff] }
 0x294   :  { %v7896_v56 = vpop.f32.mrf.mxu0  ;;  %v7942_v6 = vpop.f32.mrf.mxu1 }
 0x296   :  { %v1786_v2 = vpop.f32.mrf.mxu0  ;;  %v2237_v7 = vpop.f32.mrf.mxu1  ;;  %8040 = vmatmul.mubr.msk.bf16.gmra.mxu1 %vm272_vm1, %v2046_v46  ;;  %8162 = vmatmul.mubr.msk.bf16.gmra.mxu0 %vm272_vm1, %v2726_v20  ;;  %v2727_v46 = vpack.c.bf16 %v2661_v9, %v2660_v25  ;;  %v2663_v25 = vld [vmem:[%s14553_s0 + $0x12b] sm:$0xff] }
 0x297   :  { %v11129_v0 = vadd.f32 %v1786_v2, %v1177_v14  ;;  %v11132_v32 = vadd.f32 %v2237_v7, %v10225_v15  ;;  %8043 = vmatprep.mubr.msk.bf16.mxu1 %vm8971_vm2, %v14591_v26  ;;  %8165 = vmatprep.mubr.msk.bf16.mxu0 %vm8971_vm2, %v14591_v26  ;;  %v14698_v14 = vld [vmem:[#allocation19_spill] sm:$0xff] }
 0x298   :  { %v7899_v15 = vpop.f32.mrf.mxu0  ;;  %v7945_v54 = vpop.f32.mrf.mxu1  ;;  %v1185_v2 = vadd.f32 %v10816_v10, %v14698_v14  ;;  %v1994_v10 = vld [vmem:[%s14553_s0 + $0x1da] sm:$0xff] }
 0x299   :  { %v14699_v54 = vld [vmem:[#allocation20_spill] sm:$0xff] }
 0x29a   :  { %v1789_v39 = vpop.f32.mrf.mxu0  ;;  %v2240_v29 = vpop.f32.mrf.mxu1  ;;  %v1188_v27 = vadd.f32 %v10845_v48, %v14699_v54  ;;  %v1995_v48 = vld [vmem:[%s14553_s0 + $0x1e2] sm:$0xff] }
 0x29b   :  { %v11149_v20 = vadd.f32 %v1789_v39, %v1180_v36  ;;  %v11152_v56 = vadd.f32 %v2240_v29, %v10244_v53  ;;  %v2048_v29 = vpack.c.bf16 %v1994_v10, %v1993_v57  ;;  %v2664_v10 = vld [vmem:[%s14553_s0 + $0x133] sm:$0xff] }
 0x29c   :  { %v7900_v6 = vpop.f32.mrf.mxu0  ;;  %v7946_v13 = vpop.f32.mrf.mxu1 }
 0x29e   :  { %v1794_v7 = vpop.f32.mrf.mxu0  ;;  %v2245_v15 = vpop.f32.mrf.mxu1  ;;  %8044 = vmatmul.mubr.msk.bf16.gmra.mxu1 %vm272_vm1, %v2047_v16  ;;  %8166 = vmatmul.mubr.msk.bf16.gmra.mxu0 %vm272_vm1, %v2727_v46  ;;  %v2728_v16 = vpack.c.bf16 %v2663_v25, %v2662_v49  ;;  %v2665_v49 = vld [vmem:[%s14553_s0 + $0x13b] sm:$0xff] }
 0x29f   :  { %v11161_v5 = vadd.f32 %v1794_v7, %v1185_v2  ;;  %v11164_v53 = vadd.f32 %v2245_v15, %v10255_v22  ;;  %8047 = vmatprep.mubr.msk.bf16.mxu1 %vm8971_vm2, %v14591_v26  ;;  %8169 = vmatprep.mubr.msk.bf16.mxu0 %vm8971_vm2, %v14591_v26  ;;  %v14700_v2 = vld [vmem:[#allocation21_spill] sm:$0xff] }
 0x2a0   :  { %v7903_v22 = vpop.f32.mrf.mxu0  ;;  %v7949_v9 = vpop.f32.mrf.mxu1  ;;  %v1193_v7 = vadd.f32 %v10852_v38, %v14700_v2  ;;  %v1996_v38 = vld [vmem:[%s14553_s0 + $0x1ea] sm:$0xff] }
 0x2a1   :  { %v14701_v9 = vld [vmem:[#allocation22_spill] sm:$0xff] }
 0x2a2   :  { %v1797_v36 = vpop.f32.mrf.mxu0  ;;  %v2248_v39 = vpop.f32.mrf.mxu1  ;;  %v1196_v54 = vadd.f32 %v10876_v61, %v14701_v9  ;;  %v1997_v61 = vld [vmem:[%s14553_s0 + $0x1f2] sm:$0xff] }
 0x2a3   :  { %v11181_v46 = vadd.f32 %v1797_v36, %v1188_v27  ;;  %v11184_v6 = vadd.f32 %v2248_v39, %v10274_v12  ;;  %v2049_v39 = vpack.c.bf16 %v1996_v38, %v1995_v48  ;;  %v14704_v38 = vld [vmem:[#allocation61_spill] sm:$0xff] }
 0x2a4   :  { %v7904_v13 = vpop.f32.mrf.mxu0  ;;  %v7950_v14 = vpop.f32.mrf.mxu1 }
 0x2a6   :  { %v1802_v15 = vpop.f32.mrf.mxu0  ;;  %v2253_v22 = vpop.f32.mrf.mxu1  ;;  %8048 = vmatmul.mubr.msk.bf16.gmra.mxu1 %vm272_vm1, %v2048_v29  ;;  %8170 = vmatmul.mubr.msk.bf16.gmra.mxu0 %vm272_vm1, %v2728_v16  ;;  %v2729_v29 = vpack.c.bf16 %v2665_v49, %v2664_v10  ;;  %v2666_v10 = vld [vmem:[%s14553_s0 + $0x143] sm:$0xff]  ;;  %v2667_v49 = vld [vmem:[%s14553_s0 + $0x14b] sm:$0xff] }
 0x2a7   :  { %v11193_v57 = vadd.f32 %v1802_v15, %v1193_v7  ;;  %v11196_v12 = vadd.f32 %v2253_v22, %v10282_v17  ;;  %8051 = vmatprep.mubr.msk.bf16.mxu1 %vm8971_vm2, %v14591_v26  ;;  %8173 = vmatprep.mubr.msk.bf16.mxu0 %vm8971_vm2, %v14591_v26  ;;  %v14702_v7 = vld [vmem:[#allocation23_spill] sm:$0xff] }
 0x2a8   :  { %v7907_v17 = vpop.f32.mrf.mxu0  ;;  %v7953_v25 = vpop.f32.mrf.mxu1  ;;  %v1201_v15 = vadd.f32 %v10882_v1, %v14702_v7  ;;  %v1998_v1 = vld [vmem:[%s14553_s0 + $0x1fa] sm:$0xff] }
 0x2aa   :  { %v1805_v27 = vpop.f32.mrf.mxu0  ;;  %v2256_v36 = vpop.f32.mrf.mxu1 }
 0x2ab   :  { %v11213_v16 = vadd.f32 %v1805_v27, %v1196_v54  ;;  %v11216_v13 = vadd.f32 %v2256_v36, %v10301_v30  ;;  %v14705_v54 = vld [vmem:[#allocation24_spill] sm:$0xff] }
 0x2ac   :  { %v7908_v14 = vpop.f32.mrf.mxu0  ;;  %v7954_v2 = vpop.f32.mrf.mxu1  ;;  %v1204_v27 = vadd.f32 %v10906_v44, %v14705_v54  ;;  %v1999_v44 = vld [vmem:[%s14553_s0 + $0x202] sm:$0xff] }
 0x2ad   :  { %v2730_v14 = vpack.c.bf16 %v2667_v49, %v2666_v10  ;;  %v14707_v49 = vld [vmem:[#allocation26_spill] sm:$0xff] }
 0x2ae   :  { %v1810_v22 = vpop.f32.mrf.mxu0  ;;  %v2261_v17 = vpop.f32.mrf.mxu1  ;;  %8052 = vmatmul.mubr.msk.bf16.gmra.mxu1 %vm272_vm1, %v2049_v39  ;;  %8174 = vmatmul.mubr.msk.bf16.gmra.mxu0 %vm272_vm1, %v2729_v29  ;;  %v2050_v29 = vpack.c.bf16 %v1998_v1, %v1997_v61  ;;  %v2668_v1 = vld [vmem:[%s14553_s0 + $0x153] sm:$0xff] }
 0x2af   :  { %v11225_v48 = vadd.f32 %v1810_v22, %v1201_v15  ;;  %v11228_v30 = vadd.f32 %v2261_v17, %v14704_v38  ;;  %8055 = vmatprep.mubr.msk.bf16.mxu1 %vm8971_vm2, %v14591_v26  ;;  %8177 = vmatprep.mubr.msk.bf16.mxu0 %vm8971_vm2, %v14591_v26  ;;  %v14706_v17 = vld [vmem:[#allocation25_spill] sm:$0xff] }
 0x2b0   :  { %v7911_v25 = vpop.f32.mrf.mxu0  ;;  %v7957_v9 = vpop.f32.mrf.mxu1  ;;  %v1209_v38 = vadd.f32 %v10912_v42, %v14706_v17  ;;  %v2000_v42 = vld [vmem:[%s14553_s0 + $0x20a] sm:$0xff]  ;;  %v14708_v17 = vld [vmem:[#allocation27_spill] sm:$0xff] }
 0x2b1   :  { %14703 = vst [vmem:[#allocation13_spill] sm:$0xff] %v11225_v48  ;;  %v1212_v9 = vadd.f32 %v10936_v3, %v14707_v49  ;;  %v2001_v3 = vld [vmem:[%s14553_s0 + $0x212] sm:$0xff] }
 0x2b2   :  { %v1813_v36 = vpop.f32.mrf.mxu0  ;;  %v2264_v39 = vpop.f32.mrf.mxu1 }
 0x2b3   :  { %v11245_v2 = vadd.f32 %v1813_v36, %v1204_v27  ;;  %v11248_v7 = vadd.f32 %v2264_v39, %v10331_v19  ;;  %v2051_v36 = vpack.c.bf16 %v2000_v42, %v1999_v44  ;;  %v2670_v42 = vld [vmem:[%s14553_s0 + $0x163] sm:$0xff] }
 0x2b4   :  { %v7912_v15 = vpop.f32.mrf.mxu0  ;;  %v7958_v22 = vpop.f32.mrf.mxu1 }
 0x2b6   :  { %v1818_v48 = vpop.f32.mrf.mxu0  ;;  %v2269_v25 = vpop.f32.mrf.mxu1  ;;  %8056 = vmatmul.mubr.msk.bf16.gmra.mxu1 %vm272_vm1, %v2050_v29  ;;  %8178 = vmatmul.mubr.msk.bf16.gmra.mxu0 %vm272_vm1, %v2730_v14 }
 0x2b7   :  { %v11257_v61 = vadd.f32 %v1818_v48, %v1209_v38  ;;  %v11260_v19 = vadd.f32 %v2269_v25, %v10342_v62  ;;  %8059 = vmatprep.mubr.msk.bf16.mxu1 %vm8971_vm2, %v14591_v26  ;;  %8181 = vmatprep.mubr.msk.bf16.mxu0 %vm8971_vm2, %v14591_v26  ;;  %v2669_v48 = vld [vmem:[%s14553_s0 + $0x15b] sm:$0xff]  ;;  %v1217_v38 = vadd.f32 %v10942_v43, %v14708_v17 }
 0x2b8   :  { %v7915_v62 = vpop.f32.mrf.mxu0  ;;  %v7961_v10 = vpop.f32.mrf.mxu1  ;;  %v2731_v39 = vpack.c.bf16 %v2669_v48, %v2668_v1  ;;  %v2002_v43 = vld [vmem:[%s14553_s0 + $0x21a] sm:$0xff]  ;;  %v2671_v1 = vld [vmem:[%s14553_s0 + $0x16b] sm:$0xff] }
 0x2b9   :  { %v14709_v10 = vld [vmem:[#allocation28_spill] sm:$0xff] }
 0x2ba   :  { %v1821_v54 = vpop.f32.mrf.mxu0  ;;  %v2272_v27 = vpop.f32.mrf.mxu1  ;;  %v1220_v49 = vadd.f32 %v10966_v50, %v14709_v10  ;;  %v2003_v50 = vld [vmem:[%s14553_s0 + $0x222] sm:$0xff] }
 0x2bb   :  { %v11277_v29 = vadd.f32 %v1821_v54, %v1212_v9  ;;  %v11280_v14 = vadd.f32 %v2272_v27, %v10361_v34  ;;  %v2052_v27 = vpack.c.bf16 %v2002_v43, %v2001_v3  ;;  %v2672_v43 = vld [vmem:[%s14553_s0 + $0x173] sm:$0xff] }
 0x2bc   :  { %v7916_v15 = vpop.f32.mrf.mxu0  ;;  %v7962_v22 = vpop.f32.mrf.mxu1 }
 0x2be   :  { %v1826_v25 = vpop.f32.mrf.mxu0  ;;  %v2277_v62 = vpop.f32.mrf.mxu1  ;;  %8060 = vmatmul.mubr.msk.bf16.gmra.mxu1 %vm272_vm1, %v2051_v36  ;;  %8182 = vmatmul.mubr.msk.bf16.gmra.mxu0 %vm272_vm1, %v2731_v39  ;;  %v2732_v36 = vpack.c.bf16 %v2671_v1, %v2670_v42  ;;  %v2673_v42 = vld [vmem:[%s14553_s0 + $0x17b] sm:$0xff] }
 0x2bf   :  { %v11289_v44 = vadd.f32 %v1826_v25, %v1217_v38  ;;  %v11292_v34 = vadd.f32 %v2277_v62, %v10372_v24  ;;  %8063 = vmatprep.mubr.msk.bf16.mxu1 %vm8971_vm2, %v14591_v26  ;;  %8185 = vmatprep.mubr.msk.bf16.mxu0 %vm8971_vm2, %v14591_v26  ;;  %v14710_v38 = vld [vmem:[#allocation29_spill] sm:$0xff] }
 0x2c0   :  { %v7919_v24 = vpop.f32.mrf.mxu0  ;;  %v7965_v48 = vpop.f32.mrf.mxu1  ;;  %v1225_v25 = vadd.f32 %v10972_v47, %v14710_v38  ;;  %v2004_v47 = vld [vmem:[%s14553_s0 + $0x22a] sm:$0xff] }
 0x2c1   :  { %v14711_v48 = vld [vmem:[#allocation30_spill] sm:$0xff] }
 0x2c2   :  { %v1829_v9 = vpop.f32.mrf.mxu0  ;;  %v2280_v54 = vpop.f32.mrf.mxu1  ;;  %v1228_v10 = vadd.f32 %v10996_v18, %v14711_v48  ;;  %v2005_v18 = vld [vmem:[%s14553_s0 + $0x232] sm:$0xff] }
 0x2c3   :  { %v11309_v39 = vadd.f32 %v1829_v9, %v1220_v49  ;;  %v11312_v15 = vadd.f32 %v2280_v54, %v10391_v23  ;;  %v2053_v54 = vpack.c.bf16 %v2004_v47, %v2003_v50  ;;  %v2674_v47 = vld [vmem:[%s14553_s0 + $0x183] sm:$0xff] }
 0x2c4   :  { %v7920_v22 = vpop.f32.mrf.mxu0  ;;  %v7966_v17 = vpop.f32.mrf.mxu1 }
 0x2c6   :  { %v1834_v62 = vpop.f32.mrf.mxu0  ;;  %v2285_v24 = vpop.f32.mrf.mxu1  ;;  %8064 = vmatmul.mubr.msk.bf16.gmra.mxu1 %vm272_vm1, %v2052_v27  ;;  %8186 = vmatmul.mubr.msk.bf16.gmra.mxu0 %vm272_vm1, %v2732_v36  ;;  %v2733_v27 = vpack.c.bf16 %v2673_v42, %v2672_v43  ;;  %v2675_v43 = vld [vmem:[%s14553_s0 + $0x18b] sm:$0xff] }
 0x2c7   :  { %v11321_v3 = vadd.f32 %v1834_v62, %v1225_v25  ;;  %v11324_v23 = vadd.f32 %v2285_v24, %v10402_v59  ;;  %8067 = vmatprep.mubr.msk.bf16.mxu1 %vm8971_vm2, %v14591_v26  ;;  %8189 = vmatprep.mubr.msk.bf16.mxu0 %vm8971_vm2, %v14591_v26  ;;  %v14713_v25 = vld [vmem:[#allocation32_spill] sm:$0xff] }
 0x2c8   :  { %v7923_v59 = vpop.f32.mrf.mxu0  ;;  %v7969_v1 = vpop.f32.mrf.mxu1  ;;  %v1233_v62 = vadd.f32 %v11002_v63, %v14713_v25  ;;  %v2006_v63 = vld [vmem:[%s14553_s0 + $0x23a] sm:$0xff] }
 0x2c9   :  { %v14715_v1 = vld [vmem:[#allocation34_spill] sm:$0xff] }
 0x2ca   :  { %v1837_v49 = vpop.f32.mrf.mxu0  ;;  %v2288_v9 = vpop.f32.mrf.mxu1  ;;  %v1236_v48 = vadd.f32 %v11026_v40, %v14715_v1  ;;  %v2007_v40 = vld [vmem:[%s14553_s0 + $0x242] sm:$0xff] }
 0x2cb   :  { %v11341_v36 = vadd.f32 %v1837_v49, %v1228_v10  ;;  %v11344_v22 = vadd.f32 %v2288_v9, %v10421_v41  ;;  %v2054_v9 = vpack.c.bf16 %v2006_v63, %v2005_v18  ;;  %v2676_v63 = vld [vmem:[%s14553_s0 + $0x193] sm:$0xff] }
 0x2cc   :  { %v7924_v17 = vpop.f32.mrf.mxu0  ;;  %v7970_v38 = vpop.f32.mrf.mxu1 }
 0x2cd   :  { %14712 = vst [vmem:[#allocation60_spill] sm:$0xff] %v11341_v36 }
 0x2ce   :  { %v1842_v24 = vpop.f32.mrf.mxu0  ;;  %v2293_v59 = vpop.f32.mrf.mxu1  ;;  %8068 = vmatmul.mubr.msk.bf16.gmra.mxu1 %vm272_vm1, %v2053_v54  ;;  %8190 = vmatmul.mubr.msk.bf16.gmra.mxu0 %vm272_vm1, %v2733_v27  ;;  %v2734_v54 = vpack.c.bf16 %v2675_v43, %v2674_v47  ;;  %v2677_v47 = vld [vmem:[%s14553_s0 + $0x19b] sm:$0xff] }
 0x2cf   :  { %v11353_v50 = vadd.f32 %v1842_v24, %v1233_v62  ;;  %v11356_v41 = vadd.f32 %v2293_v59, %v10432_v45  ;;  %8071 = vmatprep.mubr.msk.bf16.mxu1 %vm8971_vm2, %v14591_v26  ;;  %8193 = vmatprep.mubr.msk.bf16.mxu0 %vm8971_vm2, %v14591_v26  ;;  %v14717_v62 = vld [vmem:[#allocation36_spill] sm:$0xff] }
 0x2d0   :  { %v7927_v45 = vpop.f32.mrf.mxu0  ;;  %v7973_v42 = vpop.f32.mrf.mxu1  ;;  %v1241_v24 = vadd.f32 %v11032_v60, %v14717_v62  ;;  %v2008_v60 = vld [vmem:[%s14553_s0 + $0x24a] sm:$0xff]  ;;  %v2009_v62 = vld [vmem:[%s14553_s0 + $0x252] sm:$0xff] }
 0x2d1   :  { %14714 = vst [vmem:[#allocation14_spill] sm:$0xff] %v11353_v50 }
 0x2d2   :  { %v1845_v10 = vpop.f32.mrf.mxu0  ;;  %v2296_v49 = vpop.f32.mrf.mxu1 }
 0x2d3   :  { %v11373_v27 = vadd.f32 %v1845_v10, %v1236_v48  ;;  %v11376_v17 = vadd.f32 %v2296_v49, %v10451_v33  ;;  %v2055_v48 = vpack.c.bf16 %v2008_v60, %v2007_v40  ;;  %v2735_v10 = vpack.c.bf16 %v2677_v47, %v2676_v63 }
 0x2d4   :  { %v7928_v38 = vpop.f32.mrf.mxu0  ;;  %v7974_v25 = vpop.f32.mrf.mxu1 }
 0x2d5   :  { %14716 = vst [vmem:[#allocation15_spill] sm:$0xff] %v11373_v27 }
 0x2d6   :  { %v1850_v59 = vpop.f32.mrf.mxu0  ;;  %v2301_v45 = vpop.f32.mrf.mxu1  ;;  %8072 = vmatmul.mubr.msk.bf16.gmra.mxu1 %vm272_vm1, %v2054_v9  ;;  %8194 = vmatmul.mubr.msk.bf16.gmra.mxu0 %vm272_vm1, %v2734_v54 }
 0x2d7   :  { %v11385_v18 = vadd.f32 %v1850_v59, %v1241_v24  ;;  %v11388_v33 = vadd.f32 %v2301_v45, %v10462_v28  ;;  %8075 = vmatprep.mubr.msk.bf16.mxu1 %vm8971_vm2, %v14591_v26  ;;  %8197 = vmatprep.mubr.msk.bf16.mxu0 %vm8971_vm2, %v14591_v26  ;;  %v2678_v45 = vld [vmem:[%s14553_s0 + $0x1a3] sm:$0xff] }
 0x2d8   :  { %v7931_v28 = vpop.f32.mrf.mxu0  ;;  %v7977_v43 = vpop.f32.mrf.mxu1 }
 0x2d9   :  { %14718 = vst [vmem:[#allocation16_spill] sm:$0xff] %v11385_v18 }
 0x2da   :  { %v1853_v42 = vpop.f32.mrf.mxu0  ;;  %v2304_v1 = vpop.f32.mrf.mxu1 }
 0x2db   :  { %v11404_v49 = vadd.f32 %v2304_v1, %v10481_v51  ;;  %v2010_v51 = vld [vmem:[%s14553_s0 + $0x25a] sm:$0xff] }
 0x2dc   :  { %v7932_v9 = vpop.f32.mrf.mxu0  ;;  %v7978_v54 = vpop.f32.mrf.mxu1  ;;  %v2056_v47 = vpack.c.bf16 %v2010_v51, %v2009_v62  ;;  %v2680_v62 = vld [vmem:[%s14553_s0 + $0x1b3] sm:$0xff]  ;;  %v2681_v51 = vld [vmem:[%s14553_s0 + $0x1bb] sm:$0xff] }
 0x2dd   :  { %v2011_v54 = vld [vmem:[%s14553_s0 + $0x262] sm:$0xff] }
 0x2de   :  { %v2309_v38 = vpop.f32.mrf.mxu1  ;;  %8076 = vmatmul.mubr.msk.bf16.gmra.mxu1 %vm272_vm1, %v2055_v48  ;;  %v2912_v25 = vpop.f32.mrf.mxu0  ;;  %8198 = vmatmul.mubr.msk.bf16.gmra.mxu0 %vm272_vm1, %v2735_v10 }
 0x2df   :  { %v11412_v24 = vadd.f32 %v2309_v38, %v10492_v37  ;;  %v11415_v59 = vadd.f32 %v2912_v25, %v11068_v52  ;;  %8079 = vmatprep.mubr.msk.bf16.mxu1 %vm8971_vm2, %v14591_v26  ;;  %8201 = vmatprep.mubr.msk.bf16.mxu0 %vm8971_vm2, %v14591_v26  ;;  %v2679_v37 = vld [vmem:[%s14553_s0 + $0x1ab] sm:$0xff] }
 0x2e0   :  { %v7981_v52 = vpop.f32.mrf.mxu1  ;;  %v8103_v40 = vpop.f32.mrf.mxu0  ;;  %v2736_v28 = vpack.c.bf16 %v2679_v37, %v2678_v45  ;;  %v14721_v38 = vld [vmem:[#allocation62_spill] sm:$0xff] }
 0x2e1   :  { %14719 = vst [vmem:[#allocation17_spill] sm:$0xff] %v11415_v59 }
 0x2e2   :  { %v2312_v60 = vpop.f32.mrf.mxu1  ;;  %v2915_v63 = vpop.f32.mrf.mxu0 }
 0x2e3   :  { %v11431_v43 = vadd.f32 %v2312_v60, %v10511_v8  ;;  %v11434_v42 = vadd.f32 %v2915_v63, %v11088_v58  ;;  %v2012_v58 = vld [vmem:[%s14553_s0 + $0x26a] sm:$0xff]  ;;  %v2737_v60 = vpack.c.bf16 %v2681_v51, %v2680_v62  ;;  %v14723_v63 = vld [vmem:[#allocation63_spill] sm:$0xff] }
 0x2e4   :  { %v7982_v1 = vpop.f32.mrf.mxu1  ;;  %v8104_v48 = vpop.f32.mrf.mxu0  ;;  %v2057_v40 = vpack.c.bf16 %v2012_v58, %v2011_v54  ;;  %v14725_v54 = vld [vmem:[#allocation31_spill] sm:$0xff]  ;;  %v2682_v51 = vld [vmem:[%s14553_s0 + $0x1c3] sm:$0xff] }
 0x2e5   :  { %14720 = vst [vmem:[#allocation18_spill] sm:$0xff] %v11434_v42 }
 0x2e6   :  { %v2317_v10 = vpop.f32.mrf.mxu1  ;;  %8080 = vmatmul.mubr.msk.bf16.gmra.mxu1 %vm272_vm1, %v2056_v47  ;;  %v2920_v9 = vpop.f32.mrf.mxu0  ;;  %8202 = vmatmul.mubr.msk.bf16.gmra.mxu0 %vm272_vm1, %v2736_v28 }
 0x2e7   :  { %v11442_v25 = vadd.f32 %v2317_v10, %v14721_v38  ;;  %v11445_v8 = vadd.f32 %v2920_v9, %v11100_v35  ;;  %8083 = vmatprep.mubr.msk.bf16.mxu1 %vm8971_vm2, %v14591_v26  ;;  %8205 = vmatprep.mubr.msk.bf16.mxu0 %vm8971_vm2, %v14591_v26  ;;  %v2013_v38 = vld [vmem:[%s14553_s0 + $0x272] sm:$0xff] }
 0x2e8   :  { %v7985_v35 = vpop.f32.mrf.mxu1  ;;  %v8107_v45 = vpop.f32.mrf.mxu0 }
 0x2e9   :  { %14722 = vst [vmem:[#allocation19_spill] sm:$0xff] %v11445_v8  ;;  %v2683_v35 = vld [vmem:[%s14553_s0 + $0x1cb] sm:$0xff] }
 0x2ea   :  { %v2320_v37 = vpop.f32.mrf.mxu1  ;;  %v2923_v52 = vpop.f32.mrf.mxu0 }
 0x2eb   :  { %v11461_v47 = vadd.f32 %v2320_v37, %v14723_v63  ;;  %v11464_v28 = vadd.f32 %v2923_v52, %v11120_v11  ;;  %v2014_v11 = vld [vmem:[%s14553_s0 + $0x27a] sm:$0xff]  ;;  %v14727_v63 = vld [vmem:[#allocation33_spill] sm:$0xff] }
 0x2ec   :  { %v7986_v1 = vpop.f32.mrf.mxu1  ;;  %v8108_v48 = vpop.f32.mrf.mxu0 }
 0x2ed   :  { %14724 = vst [vmem:[#allocation20_spill] sm:$0xff] %v11464_v28 }
 0x2ee   :  { %v2325_v10 = vpop.f32.mrf.mxu1  ;;  %8084 = vmatmul.mubr.msk.bf16.gmra.mxu1 %vm272_vm1, %v2057_v40  ;;  %v2928_v9 = vpop.f32.mrf.mxu0  ;;  %8206 = vmatmul.mubr.msk.bf16.gmra.mxu0 %vm272_vm1, %v2737_v60  ;;  %v2058_v40 = vpack.c.bf16 %v2014_v11, %v2013_v38  ;;  %v2738_v60 = vpack.c.bf16 %v2683_v35, %v2682_v51  ;;  %v14729_v38 = vld [vmem:[#allocation35_spill] sm:$0xff] }
 0x2ef   :  { %v11472_v58 = vadd.f32 %v2325_v10, %v14725_v54  ;;  %v11475_v62 = vadd.f32 %v2928_v9, %v11132_v32  ;;  %8087 = vmatprep.mubr.msk.bf16.mxu1 %vm8971_vm2, %v14591_v26  ;;  %8209 = vmatprep.mubr.msk.bf16.mxu0 %vm8971_vm2, %v14591_v26  ;;  %v2684_v35 = vld [vmem:[%s14553_s0 + $0x1d3] sm:$0xff] }
 0x2f0   :  { %v7989_v32 = vpop.f32.mrf.mxu1  ;;  %v8111_v45 = vpop.f32.mrf.mxu0 }
 0x2f1   :  { %14726 = vst [vmem:[#allocation21_spill] sm:$0xff] %v11475_v62  ;;  %v2015_v32 = vld [vmem:[%s14553_s0 + $0x282] sm:$0xff] }
 0x2f2   :  { %v2328_v37 = vpop.f32.mrf.mxu1  ;;  %v2931_v52 = vpop.f32.mrf.mxu0  ;;  %v2685_v45 = vld [vmem:[%s14553_s0 + $0x1db] sm:$0xff] }
 0x2f3   :  { %v11491_v1 = vadd.f32 %v2328_v37, %v14727_v63  ;;  %v11494_v48 = vadd.f32 %v2931_v52, %v11152_v56  ;;  %v2016_v56 = vld [vmem:[%s14553_s0 + $0x28a] sm:$0xff]  ;;  %v14731_v63 = vld [vmem:[#allocation37_spill] sm:$0xff] }
 0x2f4   :  { %v7990_v10 = vpop.f32.mrf.mxu1  ;;  %v8112_v9 = vpop.f32.mrf.mxu0 }
 0x2f5   :  { %14728 = vst [vmem:[#allocation22_spill] sm:$0xff] %v11494_v48 }
 0x2f6   :  { %v2333_v54 = vpop.f32.mrf.mxu1  ;;  %8088 = vmatmul.mubr.msk.bf16.gmra.mxu1 %vm272_vm1, %v2058_v40  ;;  %v2936_v62 = vpop.f32.mrf.mxu0  ;;  %8210 = vmatmul.mubr.msk.bf16.gmra.mxu0 %vm272_vm1, %v2738_v60  ;;  %v2059_v40 = vpack.c.bf16 %v2016_v56, %v2015_v32  ;;  %v2739_v60 = vpack.c.bf16 %v2685_v45, %v2684_v35  ;;  %v2686_v56 = vld [vmem:[%s14553_s0 + $0x1e3] sm:$0xff] }
 0x2f7   :  { %v11502_v11 = vadd.f32 %v2333_v54, %v14729_v38  ;;  %v11505_v51 = vadd.f32 %v2936_v62, %v11164_v53  ;;  %8091 = vmatprep.mubr.msk.bf16.mxu1 %vm8971_vm2, %v14591_v26  ;;  %8213 = vmatprep.mubr.msk.bf16.mxu0 %vm8971_vm2, %v14591_v26 }
 0x2f8   :  { %v7993_v53 = vpop.f32.mrf.mxu1  ;;  %v8115_v62 = vpop.f32.mrf.mxu0 }
 0x2f9   :  { %14730 = vst [vmem:[#allocation23_spill] sm:$0xff] %v11505_v51  ;;  %v14733_v53 = vld [vmem:[#allocation38_spill] sm:$0xff] }
 0x2fa   :  { %v2336_v37 = vpop.f32.mrf.mxu1  ;;  %v2939_v52 = vpop.f32.mrf.mxu0 }
 0x2fb   :  { %v11521_v10 = vadd.f32 %v2336_v37, %v14731_v63  ;;  %v11524_v9 = vadd.f32 %v2939_v52, %v11184_v6  ;;  %v2017_v6 = vld [vmem:[%s14553_s0 + $0x292] sm:$0xff] }
 0x2fc   :  { %v7994_v54 = vpop.f32.mrf.mxu1  ;;  %v8116_v38 = vpop.f32.mrf.mxu0  ;;  %v2060_v37 = vpack.c.bf16 %v2017_v6, %v2017_v6  ;;  %v14737_v6 = vld [vmem:[#allocation40_spill] sm:$0xff] }
 0x2fd   :  { %14732 = vst [vmem:[#allocation61_spill] sm:$0xff] %v11524_v9 }
 0x2fe   :  { %v2341_v51 = vpop.f32.mrf.mxu1  ;;  %8092 = vmatmul.mubr.msk.bf16.gmra.mxu1 %vm272_vm1, %v2059_v40  ;;  %v2944_v48 = vpop.f32.mrf.mxu0  ;;  %8214 = vmatmul.mubr.msk.bf16.gmra.mxu0 %vm272_vm1, %v2739_v60  ;;  %v14735_v40 = vld [vmem:[#allocation39_spill] sm:$0xff] }
 0x2ff   :  { %v11529_v62 = vadd.f32 %v2341_v51, %v14733_v53  ;;  %v11532_v32 = vadd.f32 %v2944_v48, %v11196_v12  ;;  %8095 = vmatprep.mubr.msk.bf16.mxu1 %vm8971_vm2, %v14591_v26  ;;  %8217 = vmatprep.mubr.msk.bf16.mxu0 %vm8971_vm2, %v14591_v26  ;;  %v2687_v51 = vld [vmem:[%s14553_s0 + $0x1eb] sm:$0xff] }
 0x300   :  { %v7997_v12 = vpop.f32.mrf.mxu1  ;;  %v8119_v48 = vpop.f32.mrf.mxu0  ;;  %v2740_v52 = vpack.c.bf16 %v2687_v51, %v2686_v56 }
 0x301   :  { %14734 = vst [vmem:[#allocation24_spill] sm:$0xff] %v11532_v32  ;;  %v2688_v12 = vld [vmem:[%s14553_s0 + $0x1f3] sm:$0xff] }
 0x302   :  { %v2344_v35 = vpop.f32.mrf.mxu1  ;;  %v2947_v45 = vpop.f32.mrf.mxu0  ;;  %v3319_v48 = vld [vmem:[%s14553_s0 + $0x14] sm:$0xff] }
 0x303   :  { %v11548_v60 = vadd.f32 %v2344_v35, %v14735_v40  ;;  %v11551_v63 = vadd.f32 %v2947_v45, %v11216_v13  ;;  %v2689_v13 = vld [vmem:[%s14553_s0 + $0x1fb] sm:$0xff] }
 0x304   :  { %v7998_v54 = vpop.f32.mrf.mxu1  ;;  %v8120_v38 = vpop.f32.mrf.mxu0  ;;  %v3320_v35 = vld [vmem:[%s14553_s0 + $0x1c] sm:$0xff] }
 0x305   :  { %14736 = vst [vmem:[#allocation25_spill] sm:$0xff] %v11551_v63  ;;  %v3402_v40 = vpack.c.bf16 %v3320_v35, %v3319_v48  ;;  %v14739_v54 = vld [vmem:[#allocation41_spill] sm:$0xff] }
 0x306   :  { %v2349_v53 = vpop.f32.mrf.mxu1  ;;  %8096 = vmatmul.mubr.msk.bf16.gmra.mxu1 %vm272_vm1, %v2060_v37  ;;  %v2952_v32 = vpop.f32.mrf.mxu0  ;;  %8218 = vmatmul.mubr.msk.bf16.gmra.mxu0 %vm272_vm1, %v2740_v52  ;;  %v2741_v52 = vpack.c.bf16 %v2689_v13, %v2688_v12  ;;  %v14741_v12 = vld [vmem:[#allocation42_spill] sm:$0xff] }
 0x307   :  { %v11559_v56 = vadd.f32 %v2349_v53, %v14737_v6  ;;  %v11562_v51 = vadd.f32 %v2952_v32, %v11228_v30  ;;  %8221 = vmatprep.mubr.msk.bf16.mxu0 %vm8971_vm2, %v14591_v26  ;;  %8267 = vmatprep.mubr.msk.bf16.mxu1 %vm8971_vm2, %v14591_v26 }
 0x308   :  { %v8001_v30 = vpop.f32.mrf.mxu1  ;;  %v8123_v32 = vpop.f32.mrf.mxu0 }
 0x309   :  { %14738 = vst [vmem:[#allocation26_spill] sm:$0xff] %v11562_v51  ;;  %v2690_v30 = vld [vmem:[%s14553_s0 + $0x203] sm:$0xff] }
 0x30a   :  { %v2352_v45 = vpop.f32.mrf.mxu1  ;;  %v2955_v37 = vpop.f32.mrf.mxu0 }
 0x30b   :  { %v11578_v38 = vadd.f32 %v2352_v45, %v14739_v54  ;;  %v11581_v53 = vadd.f32 %v2955_v37, %v11248_v7  ;;  %v2691_v7 = vld [vmem:[%s14553_s0 + $0x20b] sm:$0xff] }
 0x30c   :  { %v8002_v6 = vpop.f32.mrf.mxu1  ;;  %v8124_v51 = vpop.f32.mrf.mxu0  ;;  %v2742_v45 = vpack.c.bf16 %v2691_v7, %v2690_v30  ;;  %v2692_v30 = vld [vmem:[%s14553_s0 + $0x213] sm:$0xff] }
 0x30d   :  { %14740 = vst [vmem:[#allocation27_spill] sm:$0xff] %v11581_v53  ;;  %v3321_v51 = vld [vmem:[%s14553_s0 + $0x24] sm:$0xff]  ;;  %v14745_v7 = vld [vmem:[#allocation44_spill] sm:$0xff] }
 0x30e   :  { %v2357_v63 = vpop.f32.mrf.mxu1  ;;  %v2960_v9 = vpop.f32.mrf.mxu0  ;;  %8222 = vmatmul.mubr.msk.bf16.gmra.mxu0 %vm272_vm1, %v2741_v52  ;;  %8268 = vmatmul.mubr.msk.bf16.vlgmr.msra.gmra.mxu1 %vm272_vm1, %v3402_v40  ;;  %v14743_v52 = vld [vmem:[#allocation43_spill] sm:$0xff] }
 0x30f   :  { %v11589_v13 = vadd.f32 %v2357_v63, %v14741_v12  ;;  %v11592_v48 = vadd.f32 %v2960_v9, %v11260_v19  ;;  %8225 = vmatprep.mubr.msk.bf16.mxu0 %vm8971_vm2, %v14591_v26  ;;  %8271 = vmatprep.mubr.msk.bf16.mxu1 %vm8971_vm2, %v14591_v26  ;;  %v3322_v63 = vld [vmem:[%s14553_s0 + $0x2c] sm:$0xff] }
 0x310   :  { %v8005_v19 = vpop.f32.mrf.mxu1  ;;  %v8127_v9 = vpop.f32.mrf.mxu0  ;;  %v11607_v37 = vpack.c.bf16 %v3322_v63, %v3321_v51 }
 0x311   :  { %14742 = vst [vmem:[#allocation28_spill] sm:$0xff] %v11592_v48  ;;  %v3323_v19 = vld [vmem:[%s14553_s0 + $0x34] sm:$0xff] }
 0x312   :  { %v2360_v35 = vpop.f32.mrf.mxu1  ;;  %v2963_v32 = vpop.f32.mrf.mxu0 }
 0x313   :  { %v11610_v40 = vadd.f32 %v2360_v35, %v14743_v52  ;;  %v11613_v54 = vadd.f32 %v2963_v32, %v11280_v14  ;;  %v2693_v14 = vld [vmem:[%s14553_s0 + $0x21b] sm:$0xff] }
 0x314   :  { %v8006_v6 = vpop.f32.mrf.mxu1  ;;  %v8128_v12 = vpop.f32.mrf.mxu0  ;;  %v2743_v32 = vpack.c.bf16 %v2693_v14, %v2692_v30  ;;  %v14747_v52 = vld [vmem:[#allocation45_spill] sm:$0xff]  ;;  %v14749_v14 = vld [vmem:[#allocation46_spill] sm:$0xff] }
 0x315   :  { %14744 = vst [vmem:[#allocation29_spill] sm:$0xff] %v11613_v54  ;;  %v2694_v30 = vld [vmem:[%s14553_s0 + $0x223] sm:$0xff] }
 0x316   :  { %v2365_v48 = vpop.f32.mrf.mxu1  ;;  %v2968_v53 = vpop.f32.mrf.mxu0  ;;  %8226 = vmatmul.mubr.msk.bf16.gmra.mxu0 %vm272_vm1, %v2742_v45  ;;  %8272 = vmatmul.mubr.msk.bf16.gmra.mxu1 %vm272_vm1, %v11607_v37 }
 0x317   :  { %v11622_v51 = vadd.f32 %v2365_v48, %v14745_v7  ;;  %v11625_v63 = vadd.f32 %v2968_v53, %v11292_v34  ;;  %8229 = vmatprep.mubr.msk.bf16.mxu0 %vm8971_vm2, %v14591_v26  ;;  %8275 = vmatprep.mubr.msk.bf16.mxu1 %vm8971_vm2, %v14591_v26  ;;  %v3324_v48 = vld [vmem:[%s14553_s0 + $0x3c] sm:$0xff] }
 0x318   :  { %v8009_v34 = vpop.f32.mrf.mxu1  ;;  %v8131_v53 = vpop.f32.mrf.mxu0  ;;  %v11640_v45 = vpack.c.bf16 %v3324_v48, %v3323_v19 }
 0x319   :  { %14746 = vst [vmem:[#allocation30_spill] sm:$0xff] %v11625_v63 }
 0x31a   :  { %v2368_v9 = vpop.f32.mrf.mxu1  ;;  %v2971_v35 = vpop.f32.mrf.mxu0 }
 0x31b   :  { %v11643_v6 = vadd.f32 %v2368_v9, %v14747_v52  ;;  %v11646_v12 = vadd.f32 %v2971_v35, %v11312_v15  ;;  %v2695_v15 = vld [vmem:[%s14553_s0 + $0x22b] sm:$0xff] }
 0x31c   :  { %v8010_v7 = vpop.f32.mrf.mxu1  ;;  %v8132_v63 = vpop.f32.mrf.mxu0  ;;  %v2744_v9 = vpack.c.bf16 %v2695_v15, %v2694_v30  ;;  %v2696_v30 = vld [vmem:[%s14553_s0 + $0x233] sm:$0xff] }
 0x31d   :  { %14748 = vst [vmem:[#allocation32_spill] sm:$0xff] %v11646_v12  ;;  %v3325_v63 = vld [vmem:[%s14553_s0 + $0x44] sm:$0xff]  ;;  %v14753_v15 = vld [vmem:[#allocation48_spill] sm:$0xff] }
 0x31e   :  { %v2373_v54 = vpop.f32.mrf.mxu1  ;;  %v2976_v28 = vpop.f32.mrf.mxu0  ;;  %8230 = vmatmul.mubr.msk.bf16.gmra.mxu0 %vm272_vm1, %v2743_v32  ;;  %8276 = vmatmul.mubr.msk.bf16.gmra.mxu1 %vm272_vm1, %v11640_v45  ;;  %v14751_v32 = vld [vmem:[#allocation47_spill] sm:$0xff] }
 0x31f   :  { %v11655_v19 = vadd.f32 %v2373_v54, %v14749_v14  ;;  %v11658_v48 = vadd.f32 %v2976_v28, %v11324_v23  ;;  %8233 = vmatprep.mubr.msk.bf16.mxu0 %vm8971_vm2, %v14591_v26  ;;  %8279 = vmatprep.mubr.msk.bf16.mxu1 %vm8971_vm2, %v14591_v26  ;;  %v3326_v54 = vld [vmem:[%s14553_s0 + $0x4c] sm:$0xff] }
 0x320   :  { %v8013_v23 = vpop.f32.mrf.mxu1  ;;  %v8135_v28 = vpop.f32.mrf.mxu0  ;;  %v11673_v35 = vpack.c.bf16 %v3326_v54, %v3325_v63 }
 0x321   :  { %14750 = vst [vmem:[#allocation34_spill] sm:$0xff] %v11658_v48 }
 0x322   :  { %v2376_v34 = vpop.f32.mrf.mxu1  ;;  %v2979_v53 = vpop.f32.mrf.mxu0 }
 0x323   :  { %v11676_v52 = vadd.f32 %v2376_v34, %v14751_v32  ;;  %v11679_v7 = vadd.f32 %v2979_v53, %v11344_v22  ;;  %v2697_v22 = vld [vmem:[%s14553_s0 + $0x23b] sm:$0xff] }
 0x324   :  { %v8014_v14 = vpop.f32.mrf.mxu1  ;;  %v8136_v48 = vpop.f32.mrf.mxu0  ;;  %v2745_v34 = vpack.c.bf16 %v2697_v22, %v2696_v30  ;;  %v2698_v30 = vld [vmem:[%s14553_s0 + $0x243] sm:$0xff] }
 0x325   :  { %14752 = vst [vmem:[#allocation36_spill] sm:$0xff] %v11679_v7  ;;  %v3327_v48 = vld [vmem:[%s14553_s0 + $0x54] sm:$0xff]  ;;  %v14757_v22 = vld [vmem:[#allocation50_spill] sm:$0xff] }
 0x326   :  { %v2381_v12 = vpop.f32.mrf.mxu1  ;;  %v2984_v8 = vpop.f32.mrf.mxu0  ;;  %8234 = vmatmul.mubr.msk.bf16.gmra.mxu0 %vm272_vm1, %v2744_v9  ;;  %8280 = vmatmul.mubr.msk.bf16.gmra.mxu1 %vm272_vm1, %v11673_v35  ;;  %v14755_v9 = vld [vmem:[#allocation49_spill] sm:$0xff] }
 0x327   :  { %v11688_v63 = vadd.f32 %v2381_v12, %v14753_v15  ;;  %v11691_v54 = vadd.f32 %v2984_v8, %v11356_v41  ;;  %8237 = vmatprep.mubr.msk.bf16.mxu0 %vm8971_vm2, %v14591_v26  ;;  %8283 = vmatprep.mubr.msk.bf16.mxu1 %vm8971_vm2, %v14591_v26  ;;  %v3328_v12 = vld [vmem:[%s14553_s0 + $0x5c] sm:$0xff] }
 0x328   :  { %v8017_v41 = vpop.f32.mrf.mxu1  ;;  %v8139_v8 = vpop.f32.mrf.mxu0  ;;  %v11706_v53 = vpack.c.bf16 %v3328_v12, %v3327_v48 }
 0x329   :  { %14754 = vst [vmem:[#allocation62_spill] sm:$0xff] %v11691_v54 }
 0x32a   :  { %v2384_v23 = vpop.f32.mrf.mxu1  ;;  %v2987_v28 = vpop.f32.mrf.mxu0 }
 0x32b   :  { %v11709_v32 = vadd.f32 %v2384_v23, %v14755_v9  ;;  %v11712_v14 = vadd.f32 %v2987_v28, %v11376_v17  ;;  %v2699_v17 = vld [vmem:[%s14553_s0 + $0x24b] sm:$0xff] }
 0x32c   :  { %v8018_v15 = vpop.f32.mrf.mxu1  ;;  %v8140_v54 = vpop.f32.mrf.mxu0  ;;  %v2746_v23 = vpack.c.bf16 %v2699_v17, %v2698_v30  ;;  %v2700_v30 = vld [vmem:[%s14553_s0 + $0x253] sm:$0xff] }
 0x32d   :  { %14756 = vst [vmem:[#allocation63_spill] sm:$0xff] %v11712_v14  ;;  %v3329_v54 = vld [vmem:[%s14553_s0 + $0x64] sm:$0xff]  ;;  %v14761_v17 = vld [vmem:[#allocation52_spill] sm:$0xff] }
 0x32e   :  { %v2389_v7 = vpop.f32.mrf.mxu1  ;;  %v2992_v42 = vpop.f32.mrf.mxu0  ;;  %8238 = vmatmul.mubr.msk.bf16.gmra.mxu0 %vm272_vm1, %v2745_v34  ;;  %8284 = vmatmul.mubr.msk.bf16.gmra.mxu1 %vm272_vm1, %v11706_v53  ;;  %v14759_v34 = vld [vmem:[#allocation51_spill] sm:$0xff] }
 0x32f   :  { %v11721_v48 = vadd.f32 %v2389_v7, %v14757_v22  ;;  %v11724_v12 = vadd.f32 %v2992_v42, %v11388_v33  ;;  %8241 = vmatprep.mubr.msk.bf16.mxu0 %vm8971_vm2, %v14591_v26  ;;  %8287 = vmatprep.mubr.msk.bf16.mxu1 %vm8971_vm2, %v14591_v26  ;;  %v3330_v7 = vld [vmem:[%s14553_s0 + $0x6c] sm:$0xff] }
 0x330   :  { %v8021_v33 = vpop.f32.mrf.mxu1  ;;  %v8143_v42 = vpop.f32.mrf.mxu0  ;;  %v11739_v28 = vpack.c.bf16 %v3330_v7, %v3329_v54 }
 0x331   :  { %14758 = vst [vmem:[#allocation31_spill] sm:$0xff] %v11724_v12 }
 0x332   :  { %v2392_v41 = vpop.f32.mrf.mxu1  ;;  %v2995_v8 = vpop.f32.mrf.mxu0 }
 0x333   :  { %v11742_v9 = vadd.f32 %v2392_v41, %v14759_v34  ;;  %v11745_v15 = vadd.f32 %v2995_v8, %v11404_v49  ;;  %v2701_v49 = vld [vmem:[%s14553_s0 + $0x25b] sm:$0xff] }
 0x334   :  { %v8022_v22 = vpop.f32.mrf.mxu1  ;;  %v8144_v12 = vpop.f32.mrf.mxu0  ;;  %v2747_v41 = vpack.c.bf16 %v2701_v49, %v2700_v30  ;;  %v2702_v30 = vld [vmem:[%s14553_s0 + $0x263] sm:$0xff] }
 0x335   :  { %14760 = vst [vmem:[#allocation33_spill] sm:$0xff] %v11745_v15  ;;  %v3331_v12 = vld [vmem:[%s14553_s0 + $0x74] sm:$0xff]  ;;  %v14765_v49 = vld [vmem:[#allocation54_spill] sm:$0xff] }
 0x336   :  { %v2397_v14 = vpop.f32.mrf.mxu1  ;;  %v3000_v59 = vpop.f32.mrf.mxu0  ;;  %8242 = vmatmul.mubr.msk.bf16.gmra.mxu0 %vm272_vm1, %v2746_v23  ;;  %8288 = vmatmul.mubr.msk.bf16.gmra.mxu1 %vm272_vm1, %v11739_v28  ;;  %v14763_v23 = vld [vmem:[#allocation53_spill] sm:$0xff] }
 0x337   :  { %v11754_v54 = vadd.f32 %v2397_v14, %v14761_v17  ;;  %v11757_v7 = vadd.f32 %v3000_v59, %v11412_v24  ;;  %8245 = vmatprep.mubr.msk.bf16.mxu0 %vm8971_vm2, %v14591_v26  ;;  %8291 = vmatprep.mubr.msk.bf16.mxu1 %vm8971_vm2, %v14591_v26  ;;  %v3332_v14 = vld [vmem:[%s14553_s0 + $0x7c] sm:$0xff] }
 0x338   :  { %v8025_v24 = vpop.f32.mrf.mxu1  ;;  %v8147_v59 = vpop.f32.mrf.mxu0  ;;  %v11772_v8 = vpack.c.bf16 %v3332_v14, %v3331_v12 }
 0x339   :  { %14762 = vst [vmem:[#allocation35_spill] sm:$0xff] %v11757_v7 }
 0x33a   :  { %v2400_v33 = vpop.f32.mrf.mxu1  ;;  %v3003_v42 = vpop.f32.mrf.mxu0 }
 0x33b   :  { %v11775_v34 = vadd.f32 %v2400_v33, %v14763_v23  ;;  %v11778_v22 = vadd.f32 %v3003_v42, %v11431_v43  ;;  %v2703_v43 = vld [vmem:[%s14553_s0 + $0x26b] sm:$0xff] }
 0x33c   :  { %v8026_v17 = vpop.f32.mrf.mxu1  ;;  %v8148_v7 = vpop.f32.mrf.mxu0  ;;  %v2748_v33 = vpack.c.bf16 %v2703_v43, %v2702_v30  ;;  %v2704_v30 = vld [vmem:[%s14553_s0 + $0x273] sm:$0xff] }
 0x33d   :  { %14764 = vst [vmem:[#allocation37_spill] sm:$0xff] %v11778_v22  ;;  %v3333_v7 = vld [vmem:[%s14553_s0 + $0x84] sm:$0xff]  ;;  %v14769_v43 = vld [vmem:[#allocation56_spill] sm:$0xff] }
 0x33e   :  { %v2405_v15 = vpop.f32.mrf.mxu1  ;;  %v3008_v18 = vpop.f32.mrf.mxu0  ;;  %8246 = vmatmul.mubr.msk.bf16.gmra.mxu0 %vm272_vm1, %v2747_v41  ;;  %8292 = vmatmul.mubr.msk.bf16.gmra.mxu1 %vm272_vm1, %v11772_v8  ;;  %v14767_v41 = vld [vmem:[#allocation55_spill] sm:$0xff] }
 0x33f   :  { %v11787_v12 = vadd.f32 %v2405_v15, %v14765_v49  ;;  %v11790_v14 = vadd.f32 %v3008_v18, %v11442_v25  ;;  %8249 = vmatprep.mubr.msk.bf16.mxu0 %vm8971_vm2, %v14591_v26  ;;  %8295 = vmatprep.mubr.msk.bf16.mxu1 %vm8971_vm2, %v14591_v26  ;;  %v3334_v15 = vld [vmem:[%s14553_s0 + $0x8c] sm:$0xff] }
 0x340   :  { %v8029_v18 = vpop.f32.mrf.mxu1  ;;  %v8151_v25 = vpop.f32.mrf.mxu0  ;;  %v11805_v42 = vpack.c.bf16 %v3334_v15, %v3333_v7 }
 0x341   :  { %14766 = vst [vmem:[#allocation38_spill] sm:$0xff] %v11790_v14 }
 0x342   :  { %v2408_v24 = vpop.f32.mrf.mxu1  ;;  %v3011_v59 = vpop.f32.mrf.mxu0 }
 0x343   :  { %v11808_v23 = vadd.f32 %v2408_v24, %v14767_v41  ;;  %v11811_v17 = vadd.f32 %v3011_v59, %v11461_v47  ;;  %v2705_v47 = vld [vmem:[%s14553_s0 + $0x27b] sm:$0xff] }
 0x344   :  { %v8030_v49 = vpop.f32.mrf.mxu1  ;;  %v8152_v14 = vpop.f32.mrf.mxu0  ;;  %v2749_v24 = vpack.c.bf16 %v2705_v47, %v2704_v30  ;;  %v2706_v30 = vld [vmem:[%s14553_s0 + $0x283] sm:$0xff] }
 0x345   :  { %14768 = vst [vmem:[#allocation39_spill] sm:$0xff] %v11811_v17  ;;  %v3335_v14 = vld [vmem:[%s14553_s0 + $0x94] sm:$0xff]  ;;  %v14773_v47 = vld [vmem:[#allocation58_spill] sm:$0xff] }
 0x346   :  { %v2413_v22 = vpop.f32.mrf.mxu1  ;;  %v3016_v27 = vpop.f32.mrf.mxu0  ;;  %8250 = vmatmul.mubr.msk.bf16.gmra.mxu0 %vm272_vm1, %v2748_v33  ;;  %8296 = vmatmul.mubr.msk.bf16.gmra.mxu1 %vm272_vm1, %v11805_v42  ;;  %v14771_v33 = vld [vmem:[#allocation57_spill] sm:$0xff] }
 0x347   :  { %v11820_v7 = vadd.f32 %v2413_v22, %v14769_v43  ;;  %v11823_v15 = vadd.f32 %v3016_v27, %v11472_v58  ;;  %8253 = vmatprep.mubr.msk.bf16.mxu0 %vm8971_vm2, %v14591_v26  ;;  %8299 = vmatprep.mubr.msk.bf16.mxu1 %vm8971_vm2, %v14591_v26  ;;  %v3336_v22 = vld [vmem:[%s14553_s0 + $0x9c] sm:$0xff] }
 0x348   :  { %v8033_v27 = vpop.f32.mrf.mxu1  ;;  %v8155_v58 = vpop.f32.mrf.mxu0  ;;  %v11838_v59 = vpack.c.bf16 %v3336_v22, %v3335_v14 }
 0x349   :  { %14770 = vst [vmem:[#allocation40_spill] sm:$0xff] %v11823_v15 }
 0x34a   :  { %v2416_v18 = vpop.f32.mrf.mxu1  ;;  %v3019_v25 = vpop.f32.mrf.mxu0 }
 0x34b   :  { %v11841_v41 = vadd.f32 %v2416_v18, %v14771_v33  ;;  %v11844_v49 = vadd.f32 %v3019_v25, %v11491_v1  ;;  %v2707_v1 = vld [vmem:[%s14553_s0 + $0x28b] sm:$0xff] }
 0x34c   :  { %v8034_v43 = vpop.f32.mrf.mxu1  ;;  %v8156_v15 = vpop.f32.mrf.mxu0  ;;  %v2750_v18 = vpack.c.bf16 %v2707_v1, %v2706_v30 }
 0x34d   :  { %14772 = vst [vmem:[#allocation41_spill] sm:$0xff] %v11844_v49  ;;  %v3337_v15 = vld [vmem:[%s14553_s0 + $0xa4] sm:$0xff] }
 0x34e   :  { %v2421_v17 = vpop.f32.mrf.mxu1  ;;  %v3024_v50 = vpop.f32.mrf.mxu0  ;;  %8254 = vmatmul.mubr.msk.bf16.gmra.mxu0 %vm272_vm1, %v2749_v24  ;;  %8300 = vmatmul.mubr.msk.bf16.gmra.mxu1 %vm272_vm1, %v11838_v59  ;;  %v14775_v24 = vld [vmem:[#allocation59_spill] sm:$0xff] }
 0x34f   :  { %v11853_v14 = vadd.f32 %v2421_v17, %v14773_v47  ;;  %v11856_v22 = vadd.f32 %v3024_v50, %v11502_v11  ;;  %8257 = vmatprep.mubr.msk.bf16.mxu0 %vm8971_vm2, %v14591_v26  ;;  %8303 = vmatprep.mubr.msk.bf16.mxu1 %vm8971_vm2, %v14591_v26  ;;  %v3338_v17 = vld [vmem:[%s14553_s0 + $0xac] sm:$0xff] }
 0x350   :  { %v8037_v50 = vpop.f32.mrf.mxu1  ;;  %v8159_v11 = vpop.f32.mrf.mxu0  ;;  %v11871_v25 = vpack.c.bf16 %v3338_v17, %v3337_v15 }
 0x351   :  { %14774 = vst [vmem:[#allocation42_spill] sm:$0xff] %v11856_v22  ;;  %v14777_v50 = vld [vmem:[#allocation5_spill] sm:$0xff] }
 0x352   :  { %v2424_v27 = vpop.f32.mrf.mxu1  ;;  %v3027_v58 = vpop.f32.mrf.mxu0 }
 0x353   :  { %v11874_v33 = vadd.f32 %v2424_v27, %v14775_v24  ;;  %v11877_v43 = vadd.f32 %v3027_v58, %v11521_v10  ;;  %v2708_v10 = vld [vmem:[%s14553_s0 + $0x293] sm:$0xff]  ;;  %v14779_v58 = vld [vmem:[#allocation6_spill] sm:$0xff] }
 0x354   :  { %v8038_v47 = vpop.f32.mrf.mxu1  ;;  %v8160_v22 = vpop.f32.mrf.mxu0  ;;  %v2751_v17 = vpack.c.bf16 %v2708_v10, %v2708_v10 }
 0x355   :  { %14776 = vst [vmem:[#allocation43_spill] sm:$0xff] %v11877_v43  ;;  %v3339_v22 = vld [vmem:[%s14553_s0 + $0xb4] sm:$0xff] }
 0x356   :  { %v2429_v49 = vpop.f32.mrf.mxu1  ;;  %v3032_v36 = vpop.f32.mrf.mxu0  ;;  %8258 = vmatmul.mubr.msk.bf16.gmra.mxu0 %vm272_vm1, %v2750_v18  ;;  %8304 = vmatmul.mubr.msk.bf16.gmra.mxu1 %vm272_vm1, %v11871_v25 }
 0x357   :  { %v11883_v11 = vadd.f32 %v2429_v49, %v14777_v50  ;;  %v11886_v30 = vadd.f32 %v3032_v36, %v11529_v62  ;;  %8261 = vmatprep.mubr.msk.bf16.mxu0 %vm8971_vm2, %v14591_v26  ;;  %8307 = vmatprep.mubr.msk.bf16.mxu1 %vm8971_vm2, %v14591_v26  ;;  %v3340_v49 = vld [vmem:[%s14553_s0 + $0xbc] sm:$0xff] }
 0x358   :  { %v8041_v36 = vpop.f32.mrf.mxu1  ;;  %v8163_v62 = vpop.f32.mrf.mxu0  ;;  %v11901_v27 = vpack.c.bf16 %v3340_v49, %v3339_v22  ;;  %v3342_v22 = vld [vmem:[%s14553_s0 + $0xcc] sm:$0xff] }
 0x359   :  { %14778 = vst [vmem:[#allocation44_spill] sm:$0xff] %v11886_v30  ;;  %v14780_v36 = vld [vmem:[#allocation7_spill] sm:$0xff] }
 0x35a   :  { %v2432_v1 = vpop.f32.mrf.mxu1  ;;  %v3035_v15 = vpop.f32.mrf.mxu0 }
 0x35b   :  { %v11904_v18 = vadd.f32 %v2432_v1, %v14779_v58  ;;  %v11907_v24 = vadd.f32 %v3035_v15, %v11548_v60  ;;  %v3341_v60 = vld [vmem:[%s14553_s0 + $0xc4] sm:$0xff] }
 0x35c   :  { %v8042_v47 = vpop.f32.mrf.mxu1  ;;  %v8164_v50 = vpop.f32.mrf.mxu0 }
 0x35e   :  { %v2437_v30 = vpop.f32.mrf.mxu1  ;;  %v3040_v43 = vpop.f32.mrf.mxu0  ;;  %8262 = vmatmul.mubr.msk.bf16.gmra.mxu0 %vm272_vm1, %v2751_v17  ;;  %8308 = vmatmul.mubr.msk.bf16.gmra.mxu1 %vm272_vm1, %v11901_v27 }
 0x35f   :  { %v11913_v62 = vadd.f32 %v2437_v30, %v14780_v36  ;;  %v11916_v10 = vadd.f32 %v3040_v43, %v11559_v56  ;;  %8311 = vmatprep.mubr.msk.bf16.mxu1 %vm8971_vm2, %v14591_v26  ;;  %8433 = vmatprep.mubr.msk.bf16.mxu0 %vm8971_vm2, %v14591_v26  ;;  %v11928_v56 = vpack.c.bf16 %v3342_v22, %v3341_v60  ;;  %v14782_v43 = vld [vmem:[#allocation8_spill] sm:$0xff] }
 0x360   :  { %v8045_v49 = vpop.f32.mrf.mxu1  ;;  %v8167_v30 = vpop.f32.mrf.mxu0 }
 0x361   :  { %14781 = vst [vmem:[#allocation45_spill] sm:$0xff] %v11916_v10  ;;  %v14784_v49 = vld [vmem:[#allocation9_spill] sm:$0xff] }
 0x362   :  { %v2440_v1 = vpop.f32.mrf.mxu1  ;;  %v3043_v15 = vpop.f32.mrf.mxu0 }
 0x363   :  { %v11931_v17 = vadd.f32 %v2440_v1, %v14782_v43  ;;  %v11934_v58 = vadd.f32 %v3043_v15, %v11578_v38  ;;  %v3343_v38 = vld [vmem:[%s14553_s0 + $0xd4] sm:$0xff] }
 0x364   :  { %v8046_v47 = vpop.f32.mrf.mxu1  ;;  %v8168_v50 = vpop.f32.mrf.mxu0 }
 0x365   :  { %14783 = vst [vmem:[#allocation46_spill] sm:$0xff] %v11934_v58 }
 0x366   :  { %v2445_v36 = vpop.f32.mrf.mxu1  ;;  %v3048_v10 = vpop.f32.mrf.mxu0  ;;  %8312 = vmatmul.mubr.msk.bf16.gmra.mxu1 %vm272_vm1, %v11928_v56  ;;  %8434 = vmatmul.mubr.msk.bf16.vlgmr.msra.gmra.mxu0 %vm272_vm1, %v11607_v37  ;;  %v3344_v37 = vld [vmem:[%s14553_s0 + $0xdc] sm:$0xff] }
 0x367   :  { %v11941_v30 = vadd.f32 %v2445_v36, %v14784_v49  ;;  %v11944_v60 = vadd.f32 %v3048_v10, %v11589_v13  ;;  %8315 = vmatprep.mubr.msk.bf16.mxu1 %vm8971_vm2, %v14591_v26  ;;  %8437 = vmatprep.mubr.msk.bf16.mxu0 %vm8971_vm2, %v14591_v26  ;;  %v11956_v13 = vpack.c.bf16 %v3344_v37, %v3343_v38  ;;  %v14786_v10 = vld [vmem:[#allocation10_spill] sm:$0xff] }
 0x368   :  { %v8049_v22 = vpop.f32.mrf.mxu1  ;;  %v8171_v1 = vpop.f32.mrf.mxu0 }
 0x369   :  { %14785 = vst [vmem:[#allocation47_spill] sm:$0xff] %v11944_v60  ;;  %v14787_v22 = vld [vmem:[#allocation11_spill] sm:$0xff] }
 0x36a   :  { %v2448_v15 = vpop.f32.mrf.mxu1  ;;  %v3051_v43 = vpop.f32.mrf.mxu0 }
 0x36b   :  { %v11959_v47 = vadd.f32 %v2448_v15, %v14786_v10  ;;  %v11962_v50 = vadd.f32 %v3051_v43, %v11610_v40  ;;  %v3345_v40 = vld [vmem:[%s14553_s0 + $0xe4] sm:$0xff] }
 0x36c   :  { %v8050_v36 = vpop.f32.mrf.mxu1  ;;  %v8172_v49 = vpop.f32.mrf.mxu0 }
 0x36e   :  { %v2453_v60 = vpop.f32.mrf.mxu1  ;;  %v3056_v58 = vpop.f32.mrf.mxu0  ;;  %8316 = vmatmul.mubr.msk.bf16.gmra.mxu1 %vm272_vm1, %v11956_v13  ;;  %8438 = vmatmul.mubr.msk.bf16.gmra.mxu0 %vm272_vm1, %v11640_v45  ;;  %v3346_v45 = vld [vmem:[%s14553_s0 + $0xec] sm:$0xff] }
 0x36f   :  { %v11969_v1 = vadd.f32 %v2453_v60, %v14787_v22  ;;  %v11972_v38 = vadd.f32 %v3056_v58, %v11622_v51  ;;  %8319 = vmatprep.mubr.msk.bf16.mxu1 %vm8971_vm2, %v14591_v26  ;;  %8441 = vmatprep.mubr.msk.bf16.mxu0 %vm8971_vm2, %v14591_v26  ;;  %v11984_v51 = vpack.c.bf16 %v3346_v45, %v3345_v40 }
 0x370   :  { %v8053_v37 = vpop.f32.mrf.mxu1  ;;  %v8175_v60 = vpop.f32.mrf.mxu0 }
 0x371   :  { %14788 = vst [vmem:[#allocation48_spill] sm:$0xff] %v11972_v38  ;;  %v14789_v37 = vld [vmem:[#allocation12_spill] sm:$0xff] }
 0x372   :  { %v2456_v15 = vpop.f32.mrf.mxu1  ;;  %v3059_v43 = vpop.f32.mrf.mxu0 }
 0x373   :  { %v11987_v58 = vadd.f32 %v2456_v15, %v11056_v21  ;;  %v11990_v10 = vadd.f32 %v3059_v43, %v11643_v6  ;;  %v3347_v21 = vld [vmem:[%s14553_s0 + $0xf4] sm:$0xff]  ;;  %v3348_v6 = vld [vmem:[%s14553_s0 + $0xfc] sm:$0xff] }
 0x374   :  { %v8054_v36 = vpop.f32.mrf.mxu1  ;;  %v8176_v49 = vpop.f32.mrf.mxu0 }
 0x376   :  { %v2461_v22 = vpop.f32.mrf.mxu1  ;;  %v3064_v38 = vpop.f32.mrf.mxu0  ;;  %8320 = vmatmul.mubr.msk.bf16.gmra.mxu1 %vm272_vm1, %v11984_v51  ;;  %8442 = vmatmul.mubr.msk.bf16.gmra.mxu0 %vm272_vm1, %v11673_v35 }
 0x377   :  { %v11997_v60 = vadd.f32 %v2461_v22, %v14789_v37  ;;  %v12000_v40 = vadd.f32 %v3064_v38, %v11655_v19  ;;  %8323 = vmatprep.mubr.msk.bf16.mxu1 %vm8971_vm2, %v14591_v26  ;;  %8445 = vmatprep.mubr.msk.bf16.mxu0 %vm8971_vm2, %v14591_v26  ;;  %v12012_v19 = vpack.c.bf16 %v3348_v6, %v3347_v21 }
 0x378   :  { %v8057_v35 = vpop.f32.mrf.mxu1  ;;  %v8179_v45 = vpop.f32.mrf.mxu0 }
 0x379   :  { %14790 = vst [vmem:[#allocation49_spill] sm:$0xff] %v12000_v40 }
 0x37a   :  { %v2464_v15 = vpop.f32.mrf.mxu1  ;;  %v3067_v43 = vpop.f32.mrf.mxu0 }
 0x37b   :  { %v12015_v38 = vadd.f32 %v2464_v15, %v11085_v4  ;;  %v12018_v36 = vadd.f32 %v3067_v43, %v11676_v52  ;;  %v3349_v4 = vld [vmem:[%s14553_s0 + $0x104] sm:$0xff]  ;;  %v3350_v52 = vld [vmem:[%s14553_s0 + $0x10c] sm:$0xff] }
 0x37c   :  { %v8058_v49 = vpop.f32.mrf.mxu1  ;;  %v8180_v22 = vpop.f32.mrf.mxu0 }
 0x37e   :  { %v2469_v37 = vpop.f32.mrf.mxu1  ;;  %v3072_v40 = vpop.f32.mrf.mxu0  ;;  %8324 = vmatmul.mubr.msk.bf16.gmra.mxu1 %vm272_vm1, %v12012_v19  ;;  %8446 = vmatmul.mubr.msk.bf16.gmra.mxu0 %vm272_vm1, %v11706_v53 }
 0x37f   :  { %v12025_v35 = vadd.f32 %v2469_v37, %v11097_v31  ;;  %v12028_v21 = vadd.f32 %v3072_v40, %v11688_v63  ;;  %8327 = vmatprep.mubr.msk.bf16.mxu1 %vm8971_vm2, %v14591_v26  ;;  %8449 = vmatprep.mubr.msk.bf16.mxu0 %vm8971_vm2, %v14591_v26  ;;  %v12040_v63 = vpack.c.bf16 %v3350_v52, %v3349_v4 }
 0x380   :  { %v8061_v53 = vpop.f32.mrf.mxu1  ;;  %v8183_v31 = vpop.f32.mrf.mxu0 }
 0x382   :  { %v2472_v6 = vpop.f32.mrf.mxu1  ;;  %v3075_v45 = vpop.f32.mrf.mxu0 }
 0x383   :  { %v12043_v40 = vadd.f32 %v2472_v6, %v11117_v55  ;;  %v12046_v15 = vadd.f32 %v3075_v45, %v11709_v32  ;;  %v3351_v55 = vld [vmem:[%s14553_s0 + $0x114] sm:$0xff]  ;;  %v3352_v32 = vld [vmem:[%s14553_s0 + $0x11c] sm:$0xff] }
 0x384   :  { %v8062_v43 = vpop.f32.mrf.mxu1  ;;  %v8184_v49 = vpop.f32.mrf.mxu0 }
 0x386   :  { %v2477_v22 = vpop.f32.mrf.mxu1  ;;  %v3080_v37 = vpop.f32.mrf.mxu0  ;;  %8328 = vmatmul.mubr.msk.bf16.gmra.mxu1 %vm272_vm1, %v12040_v63  ;;  %8450 = vmatmul.mubr.msk.bf16.gmra.mxu0 %vm272_vm1, %v11739_v28 }
 0x387   :  { %v12053_v53 = vadd.f32 %v2477_v22, %v11129_v0  ;;  %v12056_v4 = vadd.f32 %v3080_v37, %v11721_v48  ;;  %8331 = vmatprep.mubr.msk.bf16.mxu1 %vm8971_vm2, %v14591_v26  ;;  %8453 = vmatprep.mubr.msk.bf16.mxu0 %vm8971_vm2, %v14591_v26  ;;  %v12068_v48 = vpack.c.bf16 %v3352_v32, %v3351_v55  ;;  %v6893_v22 = vld [vmem:[%s14554_s1 + $0xe] sm:$0x3]  ;;  %v3353_v55 = vld [vmem:[%s14553_s0 + $0x124] sm:$0xff] }
 0x388   :  { %v8065_v28 = vpop.f32.mrf.mxu1  ;;  %v8187_v0 = vpop.f32.mrf.mxu0  ;;  %v4949_v37 = vsel %vm396_vm0, %v6893_v22, 0 }
 0x389   :  { %14791 = vst [vmem:[#allocation50_spill] sm:$0xff] %v12056_v4  ;;  %8598 = vmatpush3.bf16.msra.mxu1 %v4949_v37 }
 0x38a   :  { %v2480_v52 = vpop.f32.mrf.mxu1  ;;  %v3083_v31 = vpop.f32.mrf.mxu0 }
 0x38b   :  { %v12071_v6 = vadd.f32 %v2480_v52, %v11149_v20  ;;  %v12074_v45 = vadd.f32 %v3083_v31, %v11742_v9 }
 0x38c   :  { %v8066_v43 = vpop.f32.mrf.mxu1  ;;  %v8188_v49 = vpop.f32.mrf.mxu0 }
 0x38d   :  { %14792 = vst [vmem:[#allocation51_spill] sm:$0xff] %v12074_v45 }
 0x38e   :  { %v2485_v28 = vpop.f32.mrf.mxu1  ;;  %v3088_v0 = vpop.f32.mrf.mxu0  ;;  %8332 = vmatmul.mubr.msk.bf16.gmra.mxu1 %vm272_vm1, %v12068_v48  ;;  %8454 = vmatmul.mubr.msk.bf16.gmra.mxu0 %vm272_vm1, %v11772_v8  ;;  %v3354_v8 = vld [vmem:[%s14553_s0 + $0x12c] sm:$0xff] }
 0x38f   :  { %v12085_v20 = vadd.f32 %v2485_v28, %v11161_v5  ;;  %v12088_v9 = vadd.f32 %v3088_v0, %v11754_v54  ;;  %8335 = vmatprep.mubr.msk.bf16.mxu1 %vm8971_vm2, %v14591_v26  ;;  %8457 = vmatprep.mubr.msk.bf16.mxu0 %vm8971_vm2, %v14591_v26  ;;  %v6935_v5 = vld [vmem:[%s14554_s1 + $0x10] sm:$0x3]  ;;  %v12104_v49 = vpack.c.bf16 %v3354_v8, %v3353_v55 }
 0x390   :  { %v8069_v54 = vpop.f32.mrf.mxu1  ;;  %v8191_v32 = vpop.f32.mrf.mxu0  ;;  %v5640_v52 = vsel %vm396_vm0, %v6935_v5, 0 }
 0x391   :  { %14793 = vst [vmem:[#allocation52_spill] sm:$0xff] %v12088_v9  ;;  %8764 = vmatpush3.bf16.msra.mxu0 %v5640_v52 }
 0x392   :  { %v2488_v31 = vpop.f32.mrf.mxu1  ;;  %v3091_v43 = vpop.f32.mrf.mxu0 }
 0x393   :  { %v12107_v22 = vadd.f32 %v2488_v31, %v11181_v46  ;;  %v12110_v28 = vadd.f32 %v3091_v43, %v11775_v34  ;;  %v3355_v46 = vld [vmem:[%s14553_s0 + $0x134] sm:$0xff]  ;;  %v3356_v34 = vld [vmem:[%s14553_s0 + $0x13c] sm:$0xff] }
 0x394   :  { %v8070_v0 = vpop.f32.mrf.mxu1  ;;  %v8192_v9 = vpop.f32.mrf.mxu0  ;;  %v14794_v31 = vld [vmem:[#allocation13_spill] sm:$0xff] }
 0x396   :  { %v2493_v45 = vpop.f32.mrf.mxu1  ;;  %v3096_v4 = vpop.f32.mrf.mxu0  ;;  %8336 = vmatmul.mubr.msk.bf16.gmra.mxu1 %vm272_vm1, %v12104_v49  ;;  %8458 = vmatmul.mubr.msk.bf16.gmra.mxu0 %vm272_vm1, %v11805_v42 }
 0x397   :  { %v12117_v37 = vadd.f32 %v2493_v45, %v11193_v57  ;;  %v12120_v55 = vadd.f32 %v3096_v4, %v11787_v12  ;;  %8339 = vmatprep.mubr.msk.bf16.mxu1 %vm8971_vm2, %v14591_v26  ;;  %8461 = vmatprep.mubr.msk.bf16.mxu0 %vm8971_vm2, %v14591_v26  ;;  %v12132_v12 = vpack.c.bf16 %v3356_v34, %v3355_v46 }
 0x398   :  { %v8073_v42 = vpop.f32.mrf.mxu1  ;;  %v8195_v57 = vpop.f32.mrf.mxu0 }
 0x39a   :  { %v2496_v45 = vpop.f32.mrf.mxu1  ;;  %v3099_v9 = vpop.f32.mrf.mxu0 }
 0x39b   :  { %v12135_v4 = vadd.f32 %v2496_v45, %v11213_v16  ;;  %v12138_v8 = vadd.f32 %v3099_v9, %v11808_v23  ;;  %v3357_v16 = vld [vmem:[%s14553_s0 + $0x144] sm:$0xff]  ;;  %v3358_v23 = vld [vmem:[%s14553_s0 + $0x14c] sm:$0xff] }
 0x39c   :  { %v8074_v5 = vpop.f32.mrf.mxu1  ;;  %v8196_v54 = vpop.f32.mrf.mxu0 }
 0x39e   :  { %v2501_v32 = vpop.f32.mrf.mxu1  ;;  %v3104_v52 = vpop.f32.mrf.mxu0  ;;  %8340 = vmatmul.mubr.msk.bf16.gmra.mxu1 %vm272_vm1, %v12132_v12  ;;  %8462 = vmatmul.mubr.msk.bf16.gmra.mxu0 %vm272_vm1, %v11838_v59 }
 0x39f   :  { %v12145_v43 = vadd.f32 %v2501_v32, %v14794_v31  ;;  %v12148_v0 = vadd.f32 %v3104_v52, %v11820_v7  ;;  %8343 = vmatprep.mubr.msk.bf16.mxu1 %vm8971_vm2, %v14591_v26  ;;  %8465 = vmatprep.mubr.msk.bf16.mxu0 %vm8971_vm2, %v14591_v26  ;;  %v12160_v7 = vpack.c.bf16 %v3358_v23, %v3357_v16 }
 0x3a0   :  { %v8077_v59 = vpop.f32.mrf.mxu1  ;;  %v8199_v46 = vpop.f32.mrf.mxu0 }
 0x3a2   :  { %v2504_v34 = vpop.f32.mrf.mxu1  ;;  %v3107_v42 = vpop.f32.mrf.mxu0 }
 0x3a3   :  { %v12163_v57 = vadd.f32 %v2504_v34, %v11245_v2  ;;  %v12166_v45 = vadd.f32 %v3107_v42, %v11841_v41  ;;  %v3359_v2 = vld [vmem:[%s14553_s0 + $0x154] sm:$0xff]  ;;  %v3360_v41 = vld [vmem:[%s14553_s0 + $0x15c] sm:$0xff] }
 0x3a4   :  { %v8078_v9 = vpop.f32.mrf.mxu1  ;;  %v8200_v5 = vpop.f32.mrf.mxu0 }
 0x3a6   :  { %v2509_v54 = vpop.f32.mrf.mxu1  ;;  %v3112_v32 = vpop.f32.mrf.mxu0  ;;  %8344 = vmatmul.mubr.msk.bf16.gmra.mxu1 %vm272_vm1, %v12160_v7  ;;  %8466 = vmatmul.mubr.msk.bf16.gmra.mxu0 %vm272_vm1, %v11871_v25 }
 0x3a7   :  { %v12173_v52 = vadd.f32 %v2509_v54, %v11257_v61  ;;  %v12176_v31 = vadd.f32 %v3112_v32, %v11853_v14  ;;  %8347 = vmatprep.mubr.msk.bf16.mxu1 %vm8971_vm2, %v14591_v26  ;;  %8469 = vmatprep.mubr.msk.bf16.mxu0 %vm8971_vm2, %v14591_v26  ;;  %v12188_v14 = vpack.c.bf16 %v3360_v41, %v3359_v2 }
 0x3a8   :  { %v8081_v25 = vpop.f32.mrf.mxu1  ;;  %v8203_v61 = vpop.f32.mrf.mxu0 }
 0x3aa   :  { %v2512_v16 = vpop.f32.mrf.mxu1  ;;  %v3115_v23 = vpop.f32.mrf.mxu0 }
 0x3ab   :  { %v12191_v59 = vadd.f32 %v2512_v16, %v11277_v29  ;;  %v12194_v46 = vadd.f32 %v3115_v23, %v11874_v33  ;;  %v3361_v29 = vld [vmem:[%s14553_s0 + $0x164] sm:$0xff]  ;;  %v3362_v33 = vld [vmem:[%s14553_s0 + $0x16c] sm:$0xff] }
 0x3ac   :  { %v8082_v34 = vpop.f32.mrf.mxu1  ;;  %v8204_v42 = vpop.f32.mrf.mxu0 }
 0x3ae   :  { %v2517_v9 = vpop.f32.mrf.mxu1  ;;  %v3120_v5 = vpop.f32.mrf.mxu0  ;;  %8348 = vmatmul.mubr.msk.bf16.gmra.mxu1 %vm272_vm1, %v12188_v14  ;;  %8470 = vmatmul.mubr.msk.bf16.gmra.mxu0 %vm272_vm1, %v11901_v27 }
 0x3af   :  { %v12201_v54 = vadd.f32 %v2517_v9, %v11289_v44  ;;  %v12204_v32 = vadd.f32 %v3120_v5, %v11883_v11  ;;  %8351 = vmatprep.mubr.msk.bf16.mxu1 %vm8971_vm2, %v14591_v26  ;;  %8473 = vmatprep.mubr.msk.bf16.mxu0 %vm8971_vm2, %v14591_v26  ;;  %v12216_v11 = vpack.c.bf16 %v3362_v33, %v3361_v29 }
 0x3b0   :  { %v8085_v27 = vpop.f32.mrf.mxu1  ;;  %v8207_v44 = vpop.f32.mrf.mxu0 }
 0x3b1   :  { %v14795_v27 = vld [vmem:[#allocation60_spill] sm:$0xff] }
 0x3b2   :  { %v2520_v2 = vpop.f32.mrf.mxu1  ;;  %v3123_v41 = vpop.f32.mrf.mxu0 }
 0x3b3   :  { %v12219_v25 = vadd.f32 %v2520_v2, %v11309_v39  ;;  %v12222_v61 = vadd.f32 %v3123_v41, %v11904_v18  ;;  %v3363_v39 = vld [vmem:[%s14553_s0 + $0x174] sm:$0xff]  ;;  %v3364_v18 = vld [vmem:[%s14553_s0 + $0x17c] sm:$0xff] }
 0x3b4   :  { %v8086_v16 = vpop.f32.mrf.mxu1  ;;  %v8208_v23 = vpop.f32.mrf.mxu0 }
 0x3b6   :  { %v2525_v34 = vpop.f32.mrf.mxu1  ;;  %v3128_v42 = vpop.f32.mrf.mxu0  ;;  %8352 = vmatmul.mubr.msk.bf16.gmra.mxu1 %vm272_vm1, %v12216_v11  ;;  %8474 = vmatmul.mubr.msk.bf16.gmra.mxu0 %vm272_vm1, %v11928_v56 }
 0x3b7   :  { %v12229_v9 = vadd.f32 %v2525_v34, %v11321_v3  ;;  %v12232_v5 = vadd.f32 %v3128_v42, %v11913_v62  ;;  %8355 = vmatprep.mubr.msk.bf16.mxu1 %vm8971_vm2, %v14591_v26  ;;  %8477 = vmatprep.mubr.msk.bf16.mxu0 %vm8971_vm2, %v14591_v26  ;;  %v12244_v62 = vpack.c.bf16 %v3364_v18, %v3363_v39  ;;  %v14796_v42 = vld [vmem:[#allocation14_spill] sm:$0xff] }
 0x3b8   :  { %v8089_v56 = vpop.f32.mrf.mxu1  ;;  %v8211_v3 = vpop.f32.mrf.mxu0 }
 0x3ba   :  { %v2528_v29 = vpop.f32.mrf.mxu1  ;;  %v3131_v33 = vpop.f32.mrf.mxu0 }
 0x3bb   :  { %v12247_v44 = vadd.f32 %v2528_v29, %v14795_v27  ;;  %v12250_v2 = vadd.f32 %v3131_v33, %v11931_v17  ;;  %v3365_v17 = vld [vmem:[%s14553_s0 + $0x184] sm:$0xff]  ;;  %v14798_v27 = vld [vmem:[#allocation15_spill] sm:$0xff] }
 0x3bc   :  { %v8090_v41 = vpop.f32.mrf.mxu1  ;;  %v8212_v16 = vpop.f32.mrf.mxu0 }
 0x3be   :  { %v2533_v23 = vpop.f32.mrf.mxu1  ;;  %v3136_v34 = vpop.f32.mrf.mxu0  ;;  %8356 = vmatmul.mubr.msk.bf16.gmra.mxu1 %vm272_vm1, %v12244_v62  ;;  %8478 = vmatmul.mubr.msk.bf16.gmra.mxu0 %vm272_vm1, %v11956_v13  ;;  %v3366_v13 = vld [vmem:[%s14553_s0 + $0x18c] sm:$0xff] }
 0x3bf   :  { %v12257_v56 = vadd.f32 %v2533_v23, %v14796_v42  ;;  %v12260_v39 = vadd.f32 %v3136_v34, %v11941_v30  ;;  %8359 = vmatprep.mubr.msk.bf16.mxu1 %vm8971_vm2, %v14591_v26  ;;  %8481 = vmatprep.mubr.msk.bf16.mxu0 %vm8971_vm2, %v14591_v26  ;;  %v12272_v30 = vpack.c.bf16 %v3366_v13, %v3365_v17 }
 0x3c0   :  { %v8093_v18 = vpop.f32.mrf.mxu1  ;;  %v8215_v3 = vpop.f32.mrf.mxu0 }
 0x3c1   :  { %14797 = vst [vmem:[#allocation53_spill] sm:$0xff] %v12260_v39  ;;  %v14800_v18 = vld [vmem:[#allocation16_spill] sm:$0xff] }
 0x3c2   :  { %v2536_v29 = vpop.f32.mrf.mxu1  ;;  %v3139_v33 = vpop.f32.mrf.mxu0 }
 0x3c3   :  { %v12275_v41 = vadd.f32 %v2536_v29, %v14798_v27  ;;  %v12278_v16 = vadd.f32 %v3139_v33, %v11959_v47  ;;  %v3367_v47 = vld [vmem:[%s14553_s0 + $0x194] sm:$0xff] }
 0x3c4   :  { %v8094_v23 = vpop.f32.mrf.mxu1  ;;  %v8216_v34 = vpop.f32.mrf.mxu0 }
 0x3c5   :  { %14799 = vst [vmem:[#allocation54_spill] sm:$0xff] %v12278_v16 }
 0x3c6   :  { %v2541_v42 = vpop.f32.mrf.mxu1  ;;  %v3144_v39 = vpop.f32.mrf.mxu0  ;;  %8360 = vmatmul.mubr.msk.bf16.gmra.mxu1 %vm272_vm1, %v12272_v30  ;;  %8482 = vmatmul.mubr.msk.bf16.gmra.mxu0 %vm272_vm1, %v11984_v51  ;;  %v3368_v51 = vld [vmem:[%s14553_s0 + $0x19c] sm:$0xff] }
 0x3c7   :  { %v12285_v3 = vadd.f32 %v2541_v42, %v14800_v18  ;;  %v12288_v17 = vadd.f32 %v3144_v39, %v11969_v1  ;;  %8363 = vmatprep.mubr.msk.bf16.mxu1 %vm8971_vm2, %v14591_v26  ;;  %8485 = vmatprep.mubr.msk.bf16.mxu0 %vm8971_vm2, %v14591_v26  ;;  %v12300_v1 = vpack.c.bf16 %v3368_v51, %v3367_v47 }
 0x3c8   :  { %v8097_v13 = vpop.f32.mrf.mxu1  ;;  %v8219_v29 = vpop.f32.mrf.mxu0 }
 0x3c9   :  { %14801 = vst [vmem:[#allocation55_spill] sm:$0xff] %v12288_v17  ;;  %v14804_v29 = vld [vmem:[#allocation17_spill] sm:$0xff] }
 0x3ca   :  { %v2544_v33 = vpop.f32.mrf.mxu1  ;;  %v3147_v27 = vpop.f32.mrf.mxu0 }
 0x3cb   :  { %v12303_v39 = vadd.f32 %v3147_v27, %v11987_v58  ;;  %v3369_v58 = vld [vmem:[%s14553_s0 + $0x1a4] sm:$0xff] }
 0x3cc   :  { %v8098_v23 = vpop.f32.mrf.mxu1  ;;  %v8220_v34 = vpop.f32.mrf.mxu0 }
 0x3cd   :  { %14802 = vst [vmem:[#allocation56_spill] sm:$0xff] %v12303_v39 }
 0x3ce   :  { %v3152_v42 = vpop.f32.mrf.mxu0  ;;  %v3603_v18 = vpop.f32.mrf.mxu1  ;;  %8364 = vmatmul.mubr.msk.bf16.gmra.mxu1 %vm272_vm1, %v12300_v1  ;;  %8486 = vmatmul.mubr.msk.bf16.gmra.mxu0 %vm272_vm1, %v12012_v19  ;;  %v3370_v19 = vld [vmem:[%s14553_s0 + $0x1ac] sm:$0xff] }
 0x3cf   :  { %v12310_v13 = vadd.f32 %v3152_v42, %v11997_v60  ;;  %v12313_v33 = vadd.f32 %v3603_v18, %v14804_v29  ;;  %8367 = vmatprep.mubr.msk.bf16.mxu1 %vm8971_vm2, %v14591_v26  ;;  %8489 = vmatprep.mubr.msk.bf16.mxu0 %vm8971_vm2, %v14591_v26  ;;  %v12325_v23 = vpack.c.bf16 %v3370_v19, %v3369_v58  ;;  %v14806_v42 = vld [vmem:[#allocation18_spill] sm:$0xff]  ;;  %v14808_v58 = vld [vmem:[#allocation19_spill] sm:$0xff] }
 0x3d0   :  { %v8223_v47 = vpop.f32.mrf.mxu0  ;;  %v8269_v60 = vpop.f32.mrf.mxu1 }
 0x3d1   :  { %14803 = vst [vmem:[#allocation57_spill] sm:$0xff] %v12310_v13 }
 0x3d2   :  { %v3155_v51 = vpop.f32.mrf.mxu0  ;;  %v3606_v27 = vpop.f32.mrf.mxu1 }
 0x3d3   :  { %v12328_v34 = vadd.f32 %v3155_v51, %v12015_v38  ;;  %v12331_v18 = vadd.f32 %v3606_v27, %v14806_v42  ;;  %v3371_v38 = vld [vmem:[%s14553_s0 + $0x1b4] sm:$0xff] }
 0x3d4   :  { %v8224_v29 = vpop.f32.mrf.mxu0  ;;  %v8270_v13 = vpop.f32.mrf.mxu1  ;;  %v14810_v27 = vld [vmem:[#allocation20_spill] sm:$0xff] }
 0x3d5   :  { %14805 = vst [vmem:[#allocation58_spill] sm:$0xff] %v12328_v34 }
 0x3d6   :  { %v3160_v39 = vpop.f32.mrf.mxu0  ;;  %v3611_v17 = vpop.f32.mrf.mxu1  ;;  %8368 = vmatmul.mubr.msk.bf16.gmra.mxu1 %vm272_vm1, %v12325_v23  ;;  %8490 = vmatmul.mubr.msk.bf16.gmra.mxu0 %vm272_vm1, %v12040_v63  ;;  %v3372_v63 = vld [vmem:[%s14553_s0 + $0x1bc] sm:$0xff] }
 0x3d7   :  { %v12338_v47 = vadd.f32 %v3160_v39, %v12025_v35  ;;  %v12341_v19 = vadd.f32 %v3611_v17, %v14808_v58  ;;  %8371 = vmatprep.mubr.msk.bf16.mxu1 %vm8971_vm2, %v14591_v26  ;;  %8493 = vmatprep.mubr.msk.bf16.mxu0 %vm8971_vm2, %v14591_v26  ;;  %v12353_v17 = vpack.c.bf16 %v3372_v63, %v3371_v38  ;;  %v14812_v38 = vld [vmem:[#allocation21_spill] sm:$0xff] }
 0x3d8   :  { %v8227_v13 = vpop.f32.mrf.mxu0  ;;  %v8273_v35 = vpop.f32.mrf.mxu1 }
 0x3d9   :  { %14807 = vst [vmem:[#allocation59_spill] sm:$0xff] %v12338_v47 }
 0x3da   :  { %v3163_v39 = vpop.f32.mrf.mxu0  ;;  %v3614_v60 = vpop.f32.mrf.mxu1 }
 0x3db   :  { %v12356_v51 = vadd.f32 %v3163_v39, %v12043_v40  ;;  %v12359_v42 = vadd.f32 %v3614_v60, %v14810_v27  ;;  %v3373_v40 = vld [vmem:[%s14553_s0 + $0x1c4] sm:$0xff] }
 0x3dc   :  { %v8228_v29 = vpop.f32.mrf.mxu0  ;;  %v8274_v58 = vpop.f32.mrf.mxu1  ;;  %v14814_v27 = vld [vmem:[#allocation22_spill] sm:$0xff] }
 0x3dd   :  { %14809 = vst [vmem:[#allocation5_spill] sm:$0xff] %v12356_v51 }
 0x3de   :  { %v3168_v47 = vpop.f32.mrf.mxu0  ;;  %v3619_v34 = vpop.f32.mrf.mxu1  ;;  %8372 = vmatmul.mubr.msk.bf16.gmra.mxu1 %vm272_vm1, %v12353_v17  ;;  %8494 = vmatmul.mubr.msk.bf16.gmra.mxu0 %vm272_vm1, %v12068_v48  ;;  %v3374_v48 = vld [vmem:[%s14553_s0 + $0x1cc] sm:$0xff] }
 0x3df   :  { %v12366_v13 = vadd.f32 %v3168_v47, %v12053_v53  ;;  %v12369_v63 = vadd.f32 %v3619_v34, %v14812_v38  ;;  %8375 = vmatprep.mubr.msk.bf16.mxu1 %vm8971_vm2, %v14591_v26  ;;  %8497 = vmatprep.mubr.msk.bf16.mxu0 %vm8971_vm2, %v14591_v26  ;;  %v12381_v34 = vpack.c.bf16 %v3374_v48, %v3373_v40  ;;  %v14816_v40 = vld [vmem:[#allocation23_spill] sm:$0xff] }
 0x3e0   :  { %v8231_v35 = vpop.f32.mrf.mxu0  ;;  %v8277_v53 = vpop.f32.mrf.mxu1 }
 0x3e1   :  { %14811 = vst [vmem:[#allocation6_spill] sm:$0xff] %v12366_v13 }
 0x3e2   :  { %v3171_v47 = vpop.f32.mrf.mxu0  ;;  %v3622_v39 = vpop.f32.mrf.mxu1 }
 0x3e3   :  { %v12384_v60 = vadd.f32 %v3171_v47, %v12071_v6  ;;  %v12387_v29 = vadd.f32 %v3622_v39, %v14814_v27  ;;  %v3375_v6 = vld [vmem:[%s14553_s0 + $0x1d4] sm:$0xff]  ;;  %v14818_v27 = vld [vmem:[#allocation61_spill] sm:$0xff] }
 0x3e4   :  { %v8232_v58 = vpop.f32.mrf.mxu0  ;;  %v8278_v38 = vpop.f32.mrf.mxu1 }
 0x3e5   :  { %14813 = vst [vmem:[#allocation7_spill] sm:$0xff] %v12384_v60 }
 0x3e6   :  { %v3176_v13 = vpop.f32.mrf.mxu0  ;;  %v3627_v51 = vpop.f32.mrf.mxu1  ;;  %8376 = vmatmul.mubr.msk.bf16.gmra.mxu1 %vm272_vm1, %v12381_v34  ;;  %8498 = vmatmul.mubr.msk.bf16.gmra.mxu0 %vm272_vm1, %v12104_v49  ;;  %v3376_v49 = vld [vmem:[%s14553_s0 + $0x1dc] sm:$0xff] }
 0x3e7   :  { %v12394_v35 = vadd.f32 %v3176_v13, %v12085_v20  ;;  %v12397_v48 = vadd.f32 %v3627_v51, %v14816_v40  ;;  %8379 = vmatprep.mubr.msk.bf16.mxu1 %vm8971_vm2, %v14591_v26  ;;  %8501 = vmatprep.mubr.msk.bf16.mxu0 %vm8971_vm2, %v14591_v26  ;;  %v12409_v51 = vpack.c.bf16 %v3376_v49, %v3375_v6  ;;  %v14820_v6 = vld [vmem:[#allocation24_spill] sm:$0xff] }
 0x3e8   :  { %v8235_v53 = vpop.f32.mrf.mxu0  ;;  %v8281_v20 = vpop.f32.mrf.mxu1 }
 0x3e9   :  { %14815 = vst [vmem:[#allocation8_spill] sm:$0xff] %v12394_v35 }
 0x3ea   :  { %v3179_v13 = vpop.f32.mrf.mxu0  ;;  %v3630_v47 = vpop.f32.mrf.mxu1 }
 0x3eb   :  { %v12412_v39 = vadd.f32 %v3179_v13, %v12107_v22  ;;  %v12415_v58 = vadd.f32 %v3630_v47, %v14818_v27  ;;  %v3377_v22 = vld [vmem:[%s14553_s0 + $0x1e4] sm:$0xff] }
 0x3ec   :  { %v8236_v38 = vpop.f32.mrf.mxu0  ;;  %v8282_v40 = vpop.f32.mrf.mxu1  ;;  %v14822_v27 = vld [vmem:[#allocation25_spill] sm:$0xff] }
 0x3ed   :  { %14817 = vst [vmem:[#allocation9_spill] sm:$0xff] %v12412_v39 }
 0x3ee   :  { %v3184_v35 = vpop.f32.mrf.mxu0  ;;  %v3635_v60 = vpop.f32.mrf.mxu1  ;;  %8380 = vmatmul.mubr.msk.bf16.gmra.mxu1 %vm272_vm1, %v12409_v51  ;;  %8502 = vmatmul.mubr.msk.bf16.gmra.mxu0 %vm272_vm1, %v12132_v12  ;;  %v3378_v12 = vld [vmem:[%s14553_s0 + $0x1ec] sm:$0xff] }
 0x3ef   :  { %v12422_v53 = vadd.f32 %v3184_v35, %v12117_v37  ;;  %v12425_v49 = vadd.f32 %v3635_v60, %v14820_v6  ;;  %8383 = vmatprep.mubr.msk.bf16.mxu1 %vm8971_vm2, %v14591_v26  ;;  %8505 = vmatprep.mubr.msk.bf16.mxu0 %vm8971_vm2, %v14591_v26  ;;  %v12437_v60 = vpack.c.bf16 %v3378_v12, %v3377_v22  ;;  %v14824_v22 = vld [vmem:[#allocation26_spill] sm:$0xff] }
 0x3f0   :  { %v8239_v20 = vpop.f32.mrf.mxu0  ;;  %v8285_v37 = vpop.f32.mrf.mxu1 }
 0x3f1   :  { %14819 = vst [vmem:[#allocation10_spill] sm:$0xff] %v12422_v53 }
 0x3f2   :  { %v3187_v35 = vpop.f32.mrf.mxu0  ;;  %v3638_v13 = vpop.f32.mrf.mxu1 }
 0x3f3   :  { %v12440_v47 = vadd.f32 %v3187_v35, %v12135_v4  ;;  %v12443_v38 = vadd.f32 %v3638_v13, %v14822_v27  ;;  %v3379_v4 = vld [vmem:[%s14553_s0 + $0x1f4] sm:$0xff] }
 0x3f4   :  { %v8240_v40 = vpop.f32.mrf.mxu0  ;;  %v8286_v6 = vpop.f32.mrf.mxu1  ;;  %v14826_v27 = vld [vmem:[#allocation27_spill] sm:$0xff] }
 0x3f5   :  { %14821 = vst [vmem:[#allocation11_spill] sm:$0xff] %v12440_v47 }
 0x3f6   :  { %v3192_v53 = vpop.f32.mrf.mxu0  ;;  %v3643_v39 = vpop.f32.mrf.mxu1  ;;  %8384 = vmatmul.mubr.msk.bf16.gmra.mxu1 %vm272_vm1, %v12437_v60  ;;  %8506 = vmatmul.mubr.msk.bf16.gmra.mxu0 %vm272_vm1, %v12160_v7  ;;  %v3380_v7 = vld [vmem:[%s14553_s0 + $0x1fc] sm:$0xff] }
 0x3f7   :  { %v12450_v20 = vadd.f32 %v3192_v53, %v12145_v43  ;;  %v12453_v12 = vadd.f32 %v3643_v39, %v14824_v22  ;;  %8387 = vmatprep.mubr.msk.bf16.mxu1 %vm8971_vm2, %v14591_v26  ;;  %8509 = vmatprep.mubr.msk.bf16.mxu0 %vm8971_vm2, %v14591_v26  ;;  %v12465_v39 = vpack.c.bf16 %v3380_v7, %v3379_v4  ;;  %v14828_v4 = vld [vmem:[#allocation28_spill] sm:$0xff] }
 0x3f8   :  { %v8243_v37 = vpop.f32.mrf.mxu0  ;;  %v8289_v43 = vpop.f32.mrf.mxu1 }
 0x3f9   :  { %14823 = vst [vmem:[#allocation12_spill] sm:$0xff] %v12450_v20 }
 0x3fa   :  { %v3195_v53 = vpop.f32.mrf.mxu0  ;;  %v3646_v35 = vpop.f32.mrf.mxu1 }
 0x3fb   :  { %v12468_v13 = vadd.f32 %v3195_v53, %v12163_v57  ;;  %v12471_v40 = vadd.f32 %v3646_v35, %v14826_v27  ;;  %v3381_v57 = vld [vmem:[%s14553_s0 + $0x204] sm:$0xff] }
 0x3fc   :  { %v8244_v6 = vpop.f32.mrf.mxu0  ;;  %v8290_v22 = vpop.f32.mrf.mxu1  ;;  %v14830_v27 = vld [vmem:[#allocation29_spill] sm:$0xff] }
 0x3fd   :  { %14825 = vst [vmem:[#allocation13_spill] sm:$0xff] %v12468_v13 }
 0x3fe   :  { %v3200_v20 = vpop.f32.mrf.mxu0  ;;  %v3651_v47 = vpop.f32.mrf.mxu1  ;;  %8388 = vmatmul.mubr.msk.bf16.gmra.mxu1 %vm272_vm1, %v12465_v39  ;;  %8510 = vmatmul.mubr.msk.bf16.gmra.mxu0 %vm272_vm1, %v12188_v14  ;;  %v3382_v14 = vld [vmem:[%s14553_s0 + $0x20c] sm:$0xff] }
 0x3ff   :  { %v12478_v37 = vadd.f32 %v3200_v20, %v12173_v52  ;;  %v12481_v7 = vadd.f32 %v3651_v47, %v14828_v4  ;;  %8391 = vmatprep.mubr.msk.bf16.mxu1 %vm8971_vm2, %v14591_v26  ;;  %8513 = vmatprep.mubr.msk.bf16.mxu0 %vm8971_vm2, %v14591_v26  ;;  %v12493_v47 = vpack.c.bf16 %v3382_v14, %v3381_v57  ;;  %v14832_v57 = vld [vmem:[#allocation30_spill] sm:$0xff] }
 0x400   :  { %v8247_v43 = vpop.f32.mrf.mxu0  ;;  %v8293_v52 = vpop.f32.mrf.mxu1 }
 0x401   :  { %14827 = vst [vmem:[#allocation60_spill] sm:$0xff] %v12478_v37 }
 0x402   :  { %v3203_v20 = vpop.f32.mrf.mxu0  ;;  %v3654_v53 = vpop.f32.mrf.mxu1 }
 0x403   :  { %v12496_v35 = vadd.f32 %v3203_v20, %v12191_v59  ;;  %v12499_v6 = vadd.f32 %v3654_v53, %v14830_v27  ;;  %v3383_v59 = vld [vmem:[%s14553_s0 + $0x214] sm:$0xff] }
 0x404   :  { %v8248_v22 = vpop.f32.mrf.mxu0  ;;  %v8294_v4 = vpop.f32.mrf.mxu1  ;;  %v14834_v27 = vld [vmem:[#allocation32_spill] sm:$0xff] }
 0x405   :  { %14829 = vst [vmem:[#allocation14_spill] sm:$0xff] %v12496_v35 }
 0x406   :  { %v3208_v37 = vpop.f32.mrf.mxu0  ;;  %v3659_v13 = vpop.f32.mrf.mxu1  ;;  %8392 = vmatmul.mubr.msk.bf16.gmra.mxu1 %vm272_vm1, %v12493_v47  ;;  %8514 = vmatmul.mubr.msk.bf16.gmra.mxu0 %vm272_vm1, %v12216_v11  ;;  %v3384_v11 = vld [vmem:[%s14553_s0 + $0x21c] sm:$0xff] }
 0x407   :  { %v12506_v43 = vadd.f32 %v3208_v37, %v12201_v54  ;;  %v12509_v14 = vadd.f32 %v3659_v13, %v14832_v57  ;;  %8395 = vmatprep.mubr.msk.bf16.mxu1 %vm8971_vm2, %v14591_v26  ;;  %8517 = vmatprep.mubr.msk.bf16.mxu0 %vm8971_vm2, %v14591_v26  ;;  %v12521_v13 = vpack.c.bf16 %v3384_v11, %v3383_v59  ;;  %v14836_v59 = vld [vmem:[#allocation34_spill] sm:$0xff] }
 0x408   :  { %v8251_v52 = vpop.f32.mrf.mxu0  ;;  %v8297_v54 = vpop.f32.mrf.mxu1 }
 0x409   :  { %14831 = vst [vmem:[#allocation15_spill] sm:$0xff] %v12506_v43 }
 0x40a   :  { %v3211_v37 = vpop.f32.mrf.mxu0  ;;  %v3662_v20 = vpop.f32.mrf.mxu1 }
 0x40b   :  { %v12524_v53 = vadd.f32 %v3211_v37, %v12219_v25  ;;  %v12527_v22 = vadd.f32 %v3662_v20, %v14834_v27  ;;  %v3385_v25 = vld [vmem:[%s14553_s0 + $0x224] sm:$0xff]  ;;  %v14838_v27 = vld [vmem:[#allocation36_spill] sm:$0xff] }
 0x40c   :  { %v8252_v4 = vpop.f32.mrf.mxu0  ;;  %v8298_v57 = vpop.f32.mrf.mxu1 }
 0x40d   :  { %14833 = vst [vmem:[#allocation16_spill] sm:$0xff] %v12524_v53 }
 0x40e   :  { %v3216_v43 = vpop.f32.mrf.mxu0  ;;  %v3667_v35 = vpop.f32.mrf.mxu1  ;;  %8396 = vmatmul.mubr.msk.bf16.gmra.mxu1 %vm272_vm1, %v12521_v13  ;;  %8518 = vmatmul.mubr.msk.bf16.gmra.mxu0 %vm272_vm1, %v12244_v62  ;;  %v3386_v62 = vld [vmem:[%s14553_s0 + $0x22c] sm:$0xff] }
 0x40f   :  { %v12534_v52 = vadd.f32 %v3216_v43, %v12229_v9  ;;  %v12537_v11 = vadd.f32 %v3667_v35, %v14836_v59  ;;  %8399 = vmatprep.mubr.msk.bf16.mxu1 %vm8971_vm2, %v14591_v26  ;;  %8521 = vmatprep.mubr.msk.bf16.mxu0 %vm8971_vm2, %v14591_v26  ;;  %v12549_v35 = vpack.c.bf16 %v3386_v62, %v3385_v25  ;;  %v14840_v25 = vld [vmem:[#allocation62_spill] sm:$0xff] }
 0x410   :  { %v8255_v54 = vpop.f32.mrf.mxu0  ;;  %v8301_v9 = vpop.f32.mrf.mxu1 }
 0x411   :  { %14835 = vst [vmem:[#allocation17_spill] sm:$0xff] %v12534_v52 }
 0x412   :  { %v3219_v43 = vpop.f32.mrf.mxu0  ;;  %v3670_v37 = vpop.f32.mrf.mxu1 }
 0x413   :  { %v12552_v20 = vadd.f32 %v3219_v43, %v12247_v44  ;;  %v12555_v4 = vadd.f32 %v3670_v37, %v14838_v27  ;;  %v3387_v44 = vld [vmem:[%s14553_s0 + $0x234] sm:$0xff] }
 0x414   :  { %v8256_v57 = vpop.f32.mrf.mxu0  ;;  %v8302_v59 = vpop.f32.mrf.mxu1  ;;  %v14842_v27 = vld [vmem:[#allocation63_spill] sm:$0xff] }
 0x415   :  { %14837 = vst [vmem:[#allocation18_spill] sm:$0xff] %v12552_v20 }
 0x416   :  { %v3224_v52 = vpop.f32.mrf.mxu0  ;;  %v3675_v53 = vpop.f32.mrf.mxu1  ;;  %8400 = vmatmul.mubr.msk.bf16.gmra.mxu1 %vm272_vm1, %v12549_v35  ;;  %8522 = vmatmul.mubr.msk.bf16.gmra.mxu0 %vm272_vm1, %v12272_v30  ;;  %v3388_v30 = vld [vmem:[%s14553_s0 + $0x23c] sm:$0xff] }
 0x417   :  { %v12562_v54 = vadd.f32 %v3224_v52, %v12257_v56  ;;  %v12565_v62 = vadd.f32 %v3675_v53, %v14840_v25  ;;  %8403 = vmatprep.mubr.msk.bf16.mxu1 %vm8971_vm2, %v14591_v26  ;;  %8525 = vmatprep.mubr.msk.bf16.mxu0 %vm8971_vm2, %v14591_v26  ;;  %v12577_v53 = vpack.c.bf16 %v3388_v30, %v3387_v44  ;;  %v14844_v44 = vld [vmem:[#allocation31_spill] sm:$0xff] }
 0x418   :  { %v8259_v9 = vpop.f32.mrf.mxu0  ;;  %v8305_v56 = vpop.f32.mrf.mxu1 }
 0x419   :  { %14839 = vst [vmem:[#allocation19_spill] sm:$0xff] %v12562_v54 }
 0x41a   :  { %v3227_v52 = vpop.f32.mrf.mxu0  ;;  %v3678_v43 = vpop.f32.mrf.mxu1 }
 0x41b   :  { %v12580_v37 = vadd.f32 %v3227_v52, %v12275_v41  ;;  %v12583_v57 = vadd.f32 %v3678_v43, %v14842_v27  ;;  %v3389_v41 = vld [vmem:[%s14553_s0 + $0x244] sm:$0xff] }
 0x41c   :  { %v8260_v59 = vpop.f32.mrf.mxu0  ;;  %v8306_v25 = vpop.f32.mrf.mxu1  ;;  %v14845_v43 = vld [vmem:[#allocation33_spill] sm:$0xff] }
 0x41d   :  { %14841 = vst [vmem:[#allocation20_spill] sm:$0xff] %v12580_v37  ;;  %v14846_v37 = vld [vmem:[#allocation35_spill] sm:$0xff] }
 0x41e   :  { %v3232_v54 = vpop.f32.mrf.mxu0  ;;  %v3683_v20 = vpop.f32.mrf.mxu1  ;;  %8404 = vmatmul.mubr.msk.bf16.gmra.mxu1 %vm272_vm1, %v12577_v53  ;;  %8526 = vmatmul.mubr.msk.bf16.gmra.mxu0 %vm272_vm1, %v12300_v1  ;;  %v3390_v1 = vld [vmem:[%s14553_s0 + $0x24c] sm:$0xff] }
 0x41f   :  { %v12590_v9 = vadd.f32 %v3232_v54, %v12285_v3  ;;  %v12593_v30 = vadd.f32 %v3683_v20, %v14844_v44  ;;  %8407 = vmatprep.mubr.msk.bf16.mxu1 %vm8971_vm2, %v14591_v26  ;;  %8529 = vmatprep.mubr.msk.bf16.mxu0 %vm8971_vm2, %v14591_v26  ;;  %v12605_v20 = vpack.c.bf16 %v3390_v1, %v3389_v41  ;;  %v3391_v41 = vld [vmem:[%s14553_s0 + $0x254] sm:$0xff] }
 0x420   :  { %v8263_v56 = vpop.f32.mrf.mxu0  ;;  %v8309_v3 = vpop.f32.mrf.mxu1 }
 0x421   :  { %14843 = vst [vmem:[#allocation21_spill] sm:$0xff] %v12590_v9 }
 0x422   :  { %v3235_v54 = vpop.f32.mrf.mxu0  ;;  %v3686_v52 = vpop.f32.mrf.mxu1 }
 0x423   :  { %v12608_v27 = vadd.f32 %v3686_v52, %v14845_v43 }
 0x424   :  { %v8264_v59 = vpop.f32.mrf.mxu0  ;;  %v8310_v25 = vpop.f32.mrf.mxu1 }
 0x426   :  { %v3691_v44 = vpop.f32.mrf.mxu1  ;;  %8408 = vmatmul.mubr.msk.bf16.gmra.mxu1 %vm272_vm1, %v12605_v20  ;;  %v4294_v9 = vpop.f32.mrf.mxu0  ;;  %8530 = vmatmul.mubr.msk.bf16.gmra.mxu0 %vm272_vm1, %v12325_v23  ;;  %v3392_v23 = vld [vmem:[%s14553_s0 + $0x25c] sm:$0xff] }
 0x427   :  { %v12615_v56 = vadd.f32 %v3691_v44, %v14846_v37  ;;  %v12618_v3 = vadd.f32 %v4294_v9, %v12313_v33  ;;  %8411 = vmatprep.mubr.msk.bf16.mxu1 %vm8971_vm2, %v14591_v26  ;;  %8533 = vmatprep.mubr.msk.bf16.mxu0 %vm8971_vm2, %v14591_v26  ;;  %v12630_v33 = vpack.c.bf16 %v3392_v23, %v3391_v41  ;;  %v14848_v9 = vld [vmem:[#allocation37_spill] sm:$0xff] }
 0x428   :  { %v8313_v1 = vpop.f32.mrf.mxu1  ;;  %v8435_v37 = vpop.f32.mrf.mxu0 }
 0x429   :  { %14847 = vst [vmem:[#allocation22_spill] sm:$0xff] %v12618_v3  ;;  %v14850_v1 = vld [vmem:[#allocation38_spill] sm:$0xff] }
 0x42a   :  { %v3694_v54 = vpop.f32.mrf.mxu1  ;;  %v4297_v52 = vpop.f32.mrf.mxu0 }
 0x42b   :  { %v12633_v43 = vadd.f32 %v3694_v54, %v14848_v9  ;;  %v12636_v59 = vadd.f32 %v4297_v52, %v12331_v18  ;;  %v3393_v18 = vld [vmem:[%s14553_s0 + $0x264] sm:$0xff] }
 0x42c   :  { %v8314_v25 = vpop.f32.mrf.mxu1  ;;  %v8436_v44 = vpop.f32.mrf.mxu0 }
 0x42d   :  { %14849 = vst [vmem:[#allocation23_spill] sm:$0xff] %v12636_v59 }
 0x42e   :  { %v3699_v3 = vpop.f32.mrf.mxu1  ;;  %8412 = vmatmul.mubr.msk.bf16.gmra.mxu1 %vm272_vm1, %v12630_v33  ;;  %v4302_v16 = vpop.f32.mrf.mxu0  ;;  %8534 = vmatmul.mubr.msk.bf16.gmra.mxu0 %vm272_vm1, %v12353_v17  ;;  %v3394_v17 = vld [vmem:[%s14553_s0 + $0x26c] sm:$0xff] }
 0x42f   :  { %v12643_v37 = vadd.f32 %v3699_v3, %v14850_v1  ;;  %v12646_v41 = vadd.f32 %v4302_v16, %v12341_v19  ;;  %8415 = vmatprep.mubr.msk.bf16.mxu1 %vm8971_vm2, %v14591_v26  ;;  %8537 = vmatprep.mubr.msk.bf16.mxu0 %vm8971_vm2, %v14591_v26  ;;  %v12658_v16 = vpack.c.bf16 %v3394_v17, %v3393_v18  ;;  %v14852_v19 = vld [vmem:[#allocation39_spill] sm:$0xff] }
 0x430   :  { %v8317_v23 = vpop.f32.mrf.mxu1  ;;  %v8439_v3 = vpop.f32.mrf.mxu0 }
 0x431   :  { %14851 = vst [vmem:[#allocation61_spill] sm:$0xff] %v12646_v41  ;;  %v14854_v23 = vld [vmem:[#allocation40_spill] sm:$0xff] }
 0x432   :  { %v3702_v54 = vpop.f32.mrf.mxu1  ;;  %v4305_v52 = vpop.f32.mrf.mxu0 }
 0x433   :  { %v12661_v9 = vadd.f32 %v3702_v54, %v14852_v19  ;;  %v12664_v25 = vadd.f32 %v4305_v52, %v12359_v42  ;;  %v3395_v42 = vld [vmem:[%s14553_s0 + $0x274] sm:$0xff] }
 0x434   :  { %v8318_v44 = vpop.f32.mrf.mxu1  ;;  %v8440_v1 = vpop.f32.mrf.mxu0 }
 0x435   :  { %14853 = vst [vmem:[#allocation24_spill] sm:$0xff] %v12664_v25 }
 0x436   :  { %v3707_v41 = vpop.f32.mrf.mxu1  ;;  %8416 = vmatmul.mubr.msk.bf16.gmra.mxu1 %vm272_vm1, %v12658_v16  ;;  %v4310_v59 = vpop.f32.mrf.mxu0  ;;  %8538 = vmatmul.mubr.msk.bf16.gmra.mxu0 %vm272_vm1, %v12381_v34  ;;  %v3396_v34 = vld [vmem:[%s14553_s0 + $0x27c] sm:$0xff] }
 0x437   :  { %v12671_v3 = vadd.f32 %v3707_v41, %v14854_v23  ;;  %v12674_v18 = vadd.f32 %v4310_v59, %v12369_v63  ;;  %8419 = vmatprep.mubr.msk.bf16.mxu1 %vm8971_vm2, %v14591_v26  ;;  %8541 = vmatprep.mubr.msk.bf16.mxu0 %vm8971_vm2, %v14591_v26  ;;  %v12686_v63 = vpack.c.bf16 %v3396_v34, %v3395_v42  ;;  %v14856_v59 = vld [vmem:[#allocation41_spill] sm:$0xff] }
 0x438   :  { %v8321_v17 = vpop.f32.mrf.mxu1  ;;  %v8443_v41 = vpop.f32.mrf.mxu0 }
 0x439   :  { %14855 = vst [vmem:[#allocation25_spill] sm:$0xff] %v12674_v18  ;;  %v14858_v17 = vld [vmem:[#allocation42_spill] sm:$0xff] }
 0x43a   :  { %v3710_v54 = vpop.f32.mrf.mxu1  ;;  %v4313_v52 = vpop.f32.mrf.mxu0 }
 0x43b   :  { %v12689_v19 = vadd.f32 %v3710_v54, %v14856_v59  ;;  %v12692_v44 = vadd.f32 %v4313_v52, %v12387_v29  ;;  %v3397_v29 = vld [vmem:[%s14553_s0 + $0x284] sm:$0xff] }
 0x43c   :  { %v8322_v1 = vpop.f32.mrf.mxu1  ;;  %v8444_v23 = vpop.f32.mrf.mxu0 }
 0x43d   :  { %14857 = vst [vmem:[#allocation26_spill] sm:$0xff] %v12692_v44 }
 0x43e   :  { %v3715_v18 = vpop.f32.mrf.mxu1  ;;  %8420 = vmatmul.mubr.msk.bf16.gmra.mxu1 %vm272_vm1, %v12686_v63  ;;  %v4318_v25 = vpop.f32.mrf.mxu0  ;;  %8542 = vmatmul.mubr.msk.bf16.gmra.mxu0 %vm272_vm1, %v12409_v51  ;;  %v3398_v51 = vld [vmem:[%s14553_s0 + $0x28c] sm:$0xff] }
 0x43f   :  { %v12699_v41 = vadd.f32 %v3715_v18, %v14858_v17  ;;  %v12702_v42 = vadd.f32 %v4318_v25, %v12397_v48  ;;  %8423 = vmatprep.mubr.msk.bf16.mxu1 %vm8971_vm2, %v14591_v26  ;;  %8545 = vmatprep.mubr.msk.bf16.mxu0 %vm8971_vm2, %v14591_v26  ;;  %v12714_v48 = vpack.c.bf16 %v3398_v51, %v3397_v29  ;;  %v14860_v25 = vld [vmem:[#allocation43_spill] sm:$0xff] }
 0x440   :  { %v8325_v34 = vpop.f32.mrf.mxu1  ;;  %v8447_v18 = vpop.f32.mrf.mxu0 }
 0x441   :  { %14859 = vst [vmem:[#allocation27_spill] sm:$0xff] %v12702_v42  ;;  %v14861_v34 = vld [vmem:[#allocation44_spill] sm:$0xff] }
 0x442   :  { %v3718_v54 = vpop.f32.mrf.mxu1  ;;  %v4321_v52 = vpop.f32.mrf.mxu0 }
 0x443   :  { %v12717_v59 = vadd.f32 %v3718_v54, %v14860_v25  ;;  %v12720_v1 = vadd.f32 %v4321_v52, %v12415_v58  ;;  %v12739_v58 = vld [vmem:[%s14553_s0 + $0x294] sm:$0xff] }
 0x444   :  { %v8326_v23 = vpop.f32.mrf.mxu1  ;;  %v8448_v17 = vpop.f32.mrf.mxu0 }
 0x446   :  { %v3723_v42 = vpop.f32.mrf.mxu1  ;;  %8424 = vmatmul.mubr.msk.bf16.gmra.mxu1 %vm272_vm1, %v12714_v48  ;;  %v4326_v44 = vpop.f32.mrf.mxu0  ;;  %8546 = vmatmul.mubr.msk.bf16.gmra.mxu0 %vm272_vm1, %v12437_v60 }
 0x447   :  { %v12727_v18 = vadd.f32 %v3723_v42, %v14861_v34  ;;  %v12730_v29 = vadd.f32 %v4326_v44, %v12425_v49  ;;  %8427 = vmatprep.mubr.msk.bf16.mxu1 %vm8971_vm2, %v14591_v26  ;;  %8549 = vmatprep.mubr.msk.bf16.mxu0 %vm8971_vm2, %v14591_v26  ;;  %v3442_v42 = vpack.c.bf16 %v12739_v58, %v12739_v58 }
 0x448   :  { %v8329_v51 = vpop.f32.mrf.mxu1  ;;  %v8451_v54 = vpop.f32.mrf.mxu0 }
 0x449   :  { %14862 = vst [vmem:[#allocation28_spill] sm:$0xff] %v12730_v29  ;;  %v14864_v51 = vld [vmem:[#allocation45_spill] sm:$0xff] }
 0x44a   :  { %v3726_v60 = vpop.f32.mrf.mxu1  ;;  %v4329_v52 = vpop.f32.mrf.mxu0 }
 0x44b   :  { %v12744_v49 = vadd.f32 %v3726_v60, %v11907_v24  ;;  %v12747_v44 = vadd.f32 %v4329_v52, %v12443_v38  ;;  %v4701_v24 = vld [vmem:[%s14553_s0 + $0x25] sm:$0xff]  ;;  %v4702_v38 = vld [vmem:[%s14553_s0 + $0x2d] sm:$0xff] }
 0x44c   :  { %v8330_v25 = vpop.f32.mrf.mxu1  ;;  %v8452_v23 = vpop.f32.mrf.mxu0 }
 0x44d   :  { %14863 = vst [vmem:[#allocation29_spill] sm:$0xff] %v12747_v44  ;;  %v14866_v25 = vld [vmem:[#allocation46_spill] sm:$0xff] }
 0x44e   :  { %v3731_v17 = vpop.f32.mrf.mxu1  ;;  %8428 = vmatmul.mubr.msk.bf16.gmra.mxu1 %vm272_vm1, %v3442_v42  ;;  %v4334_v34 = vpop.f32.mrf.mxu0  ;;  %8550 = vmatmul.mubr.msk.bf16.gmra.mxu0 %vm272_vm1, %v12465_v39 }
 0x44f   :  { %v12753_v54 = vadd.f32 %v3731_v17, %v14864_v51  ;;  %v12756_v29 = vadd.f32 %v4334_v34, %v12453_v12  ;;  %8553 = vmatprep.mubr.msk.bf16.mxu0 %vm8971_vm2, %v14591_v26  ;;  %8599 = vmatprep.mubr.msk.bf16.mxu1 %vm8971_vm2, %v14591_v26  ;;  %v4784_v12 = vpack.c.bf16 %v4702_v38, %v4701_v24 }
 0x450   :  { %v8333_v39 = vpop.f32.mrf.mxu1  ;;  %v8455_v60 = vpop.f32.mrf.mxu0 }
 0x451   :  { %14865 = vst [vmem:[#allocation30_spill] sm:$0xff] %v12756_v29  ;;  %v14867_v39 = vld [vmem:[#allocation47_spill] sm:$0xff] }
 0x452   :  { %v3734_v52 = vpop.f32.mrf.mxu1  ;;  %v4337_v42 = vpop.f32.mrf.mxu0 }
 0x453   :  { %v12769_v23 = vadd.f32 %v3734_v52, %v14866_v25  ;;  %v12772_v17 = vadd.f32 %v4337_v42, %v12471_v40  ;;  %v4703_v40 = vld [vmem:[%s14553_s0 + $0x35] sm:$0xff] }
 0x454   :  { %v8334_v34 = vpop.f32.mrf.mxu1  ;;  %v8456_v51 = vpop.f32.mrf.mxu0 }
 0x456   :  { %v3739_v29 = vpop.f32.mrf.mxu1  ;;  %v4342_v44 = vpop.f32.mrf.mxu0  ;;  %8554 = vmatmul.mubr.msk.bf16.gmra.mxu0 %vm272_vm1, %v12493_v47  ;;  %8600 = vmatmul.mubr.msk.bf16.vlgmr.msra.gmra.mxu1 %vm272_vm1, %v4784_v12  ;;  %v4704_v47 = vld [vmem:[%s14553_s0 + $0x3d] sm:$0xff] }
 0x457   :  { %v12778_v60 = vadd.f32 %v3739_v29, %v14867_v39  ;;  %v12781_v24 = vadd.f32 %v4342_v44, %v12481_v7  ;;  %8557 = vmatprep.mubr.msk.bf16.mxu0 %vm8971_vm2, %v14591_v26  ;;  %8603 = vmatprep.mubr.msk.bf16.mxu1 %vm8971_vm2, %v14591_v26  ;;  %v4785_v7 = vpack.c.bf16 %v4704_v47, %v4703_v40 }
 0x458   :  { %v8337_v38 = vpop.f32.mrf.mxu1  ;;  %v8459_v29 = vpop.f32.mrf.mxu0 }
 0x459   :  { %v14868_v38 = vld [vmem:[#allocation48_spill] sm:$0xff] }
 0x45a   :  { %v3742_v52 = vpop.f32.mrf.mxu1  ;;  %v4345_v42 = vpop.f32.mrf.mxu0 }
 0x45b   :  { %v12794_v44 = vadd.f32 %v3742_v52, %v11962_v50  ;;  %v12797_v12 = vadd.f32 %v4345_v42, %v12499_v6  ;;  %v4705_v50 = vld [vmem:[%s14553_s0 + $0x45] sm:$0xff]  ;;  %v4706_v6 = vld [vmem:[%s14553_s0 + $0x4d] sm:$0xff] }
 0x45c   :  { %v8338_v25 = vpop.f32.mrf.mxu1  ;;  %v8460_v34 = vpop.f32.mrf.mxu0 }
 0x45e   :  { %v3747_v51 = vpop.f32.mrf.mxu1  ;;  %v4350_v39 = vpop.f32.mrf.mxu0  ;;  %8558 = vmatmul.mubr.msk.bf16.gmra.mxu0 %vm272_vm1, %v12521_v13  ;;  %8604 = vmatmul.mubr.msk.bf16.gmra.mxu1 %vm272_vm1, %v4785_v7 }
 0x45f   :  { %v12803_v29 = vadd.f32 %v3747_v51, %v14868_v38  ;;  %v12806_v40 = vadd.f32 %v4350_v39, %v12509_v14  ;;  %8561 = vmatprep.mubr.msk.bf16.mxu0 %vm8971_vm2, %v14591_v26  ;;  %8607 = vmatprep.mubr.msk.bf16.mxu1 %vm8971_vm2, %v14591_v26  ;;  %v4786_v14 = vpack.c.bf16 %v4706_v6, %v4705_v50 }
 0x460   :  { %v8341_v13 = vpop.f32.mrf.mxu1  ;;  %v8463_v47 = vpop.f32.mrf.mxu0 }
 0x461   :  { %v14869_v13 = vld [vmem:[#allocation49_spill] sm:$0xff] }
 0x462   :  { %v3750_v52 = vpop.f32.mrf.mxu1  ;;  %v4353_v42 = vpop.f32.mrf.mxu0 }
 0x463   :  { %v12819_v7 = vadd.f32 %v3750_v52, %v11990_v10  ;;  %v12822_v25 = vadd.f32 %v4353_v42, %v12527_v22  ;;  %v4707_v10 = vld [vmem:[%s14553_s0 + $0x55] sm:$0xff]  ;;  %v4708_v22 = vld [vmem:[%s14553_s0 + $0x5d] sm:$0xff] }
 0x464   :  { %v8342_v34 = vpop.f32.mrf.mxu1  ;;  %v8464_v51 = vpop.f32.mrf.mxu0 }
 0x466   :  { %v3755_v39 = vpop.f32.mrf.mxu1  ;;  %v4358_v38 = vpop.f32.mrf.mxu0  ;;  %8562 = vmatmul.mubr.msk.bf16.gmra.mxu0 %vm272_vm1, %v12549_v35  ;;  %8608 = vmatmul.mubr.msk.bf16.gmra.mxu1 %vm272_vm1, %v4786_v14 }
 0x467   :  { %v12828_v47 = vadd.f32 %v3755_v39, %v14869_v13  ;;  %v12831_v50 = vadd.f32 %v4358_v38, %v12537_v11  ;;  %8565 = vmatprep.mubr.msk.bf16.mxu0 %vm8971_vm2, %v14591_v26  ;;  %8611 = vmatprep.mubr.msk.bf16.mxu1 %vm8971_vm2, %v14591_v26  ;;  %v4787_v11 = vpack.c.bf16 %v4708_v22, %v4707_v10 }
 0x468   :  { %v8345_v35 = vpop.f32.mrf.mxu1  ;;  %v8467_v6 = vpop.f32.mrf.mxu0 }
 0x46a   :  { %v3758_v52 = vpop.f32.mrf.mxu1  ;;  %v4361_v42 = vpop.f32.mrf.mxu0 }
 0x46b   :  { %v12844_v14 = vadd.f32 %v3758_v52, %v12018_v36  ;;  %v12847_v34 = vadd.f32 %v4361_v42, %v12555_v4  ;;  %v4709_v36 = vld [vmem:[%s14553_s0 + $0x65] sm:$0xff]  ;;  %v4710_v4 = vld [vmem:[%s14553_s0 + $0x6d] sm:$0xff] }
 0x46c   :  { %v8346_v51 = vpop.f32.mrf.mxu1  ;;  %v8468_v39 = vpop.f32.mrf.mxu0 }
 0x46e   :  { %v3763_v38 = vpop.f32.mrf.mxu1  ;;  %v4366_v13 = vpop.f32.mrf.mxu0  ;;  %8566 = vmatmul.mubr.msk.bf16.gmra.mxu0 %vm272_vm1, %v12577_v53  ;;  %8612 = vmatmul.mubr.msk.bf16.gmra.mxu1 %vm272_vm1, %v4787_v11 }
 0x46f   :  { %v12853_v35 = vadd.f32 %v3763_v38, %v12028_v21  ;;  %v12856_v10 = vadd.f32 %v4366_v13, %v12565_v62  ;;  %8569 = vmatprep.mubr.msk.bf16.mxu0 %vm8971_vm2, %v14591_v26  ;;  %8615 = vmatprep.mubr.msk.bf16.mxu1 %vm8971_vm2, %v14591_v26  ;;  %v4788_v62 = vpack.c.bf16 %v4710_v4, %v4709_v36  ;;  %v14870_v13 = vld [vmem:[#allocation50_spill] sm:$0xff] }
 0x470   :  { %v8349_v53 = vpop.f32.mrf.mxu1  ;;  %v8471_v21 = vpop.f32.mrf.mxu0 }
 0x472   :  { %v3766_v22 = vpop.f32.mrf.mxu1  ;;  %v4369_v6 = vpop.f32.mrf.mxu0 }
 0x473   :  { %v12869_v52 = vadd.f32 %v3766_v22, %v12046_v15  ;;  %v12872_v42 = vadd.f32 %v4369_v6, %v12583_v57  ;;  %v4711_v15 = vld [vmem:[%s14553_s0 + $0x75] sm:$0xff]  ;;  %v4712_v57 = vld [vmem:[%s14553_s0 + $0x7d] sm:$0xff] }
 0x474   :  { %v8350_v11 = vpop.f32.mrf.mxu1  ;;  %v8472_v51 = vpop.f32.mrf.mxu0  ;;  %v14871_v6 = vld [vmem:[#allocation51_spill] sm:$0xff] }
 0x476   :  { %v3771_v39 = vpop.f32.mrf.mxu1  ;;  %v4374_v38 = vpop.f32.mrf.mxu0  ;;  %8570 = vmatmul.mubr.msk.bf16.gmra.mxu0 %vm272_vm1, %v12605_v20  ;;  %8616 = vmatmul.mubr.msk.bf16.gmra.mxu1 %vm272_vm1, %v4788_v62 }
 0x477   :  { %v12878_v53 = vadd.f32 %v3771_v39, %v14870_v13  ;;  %v12881_v36 = vadd.f32 %v4374_v38, %v12593_v30  ;;  %8573 = vmatprep.mubr.msk.bf16.mxu0 %vm8971_vm2, %v14591_v26  ;;  %8619 = vmatprep.mubr.msk.bf16.mxu1 %vm8971_vm2, %v14591_v26  ;;  %v4789_v30 = vpack.c.bf16 %v4712_v57, %v4711_v15 }
 0x478   :  { %v8353_v20 = vpop.f32.mrf.mxu1  ;;  %v8475_v4 = vpop.f32.mrf.mxu0 }
 0x479   :  { %v14872_v20 = vld [vmem:[#allocation52_spill] sm:$0xff] }
 0x47a   :  { %v3774_v21 = vpop.f32.mrf.mxu1  ;;  %v4377_v22 = vpop.f32.mrf.mxu0 }
 0x47b   :  { %v12894_v62 = vadd.f32 %v3774_v21, %v14871_v6  ;;  %v12897_v11 = vadd.f32 %v4377_v22, %v12608_v27  ;;  %v4713_v27 = vld [vmem:[%s14553_s0 + $0x85] sm:$0xff] }
 0x47c   :  { %v8354_v51 = vpop.f32.mrf.mxu1  ;;  %v8476_v39 = vpop.f32.mrf.mxu0 }
 0x47e   :  { %v3779_v38 = vpop.f32.mrf.mxu1  ;;  %v4382_v13 = vpop.f32.mrf.mxu0  ;;  %8574 = vmatmul.mubr.msk.bf16.gmra.mxu0 %vm272_vm1, %v12630_v33  ;;  %8620 = vmatmul.mubr.msk.bf16.gmra.mxu1 %vm272_vm1, %v4789_v30  ;;  %v4714_v33 = vld [vmem:[%s14553_s0 + $0x8d] sm:$0xff] }
 0x47f   :  { %v12903_v4 = vadd.f32 %v3779_v38, %v14872_v20  ;;  %v12906_v15 = vadd.f32 %v4382_v13, %v12615_v56  ;;  %8577 = vmatprep.mubr.msk.bf16.mxu0 %vm8971_vm2, %v14591_v26  ;;  %8623 = vmatprep.mubr.msk.bf16.mxu1 %vm8971_vm2, %v14591_v26  ;;  %v4790_v56 = vpack.c.bf16 %v4714_v33, %v4713_v27 }
 0x480   :  { %v8357_v57 = vpop.f32.mrf.mxu1  ;;  %v8479_v21 = vpop.f32.mrf.mxu0 }
 0x482   :  { %v3782_v22 = vpop.f32.mrf.mxu1  ;;  %v4385_v30 = vpop.f32.mrf.mxu0 }
 0x483   :  { %v12919_v6 = vadd.f32 %v3782_v22, %v12110_v28  ;;  %v12922_v51 = vadd.f32 %v4385_v30, %v12633_v43  ;;  %v4715_v28 = vld [vmem:[%s14553_s0 + $0x95] sm:$0xff]  ;;  %v4716_v43 = vld [vmem:[%s14553_s0 + $0x9d] sm:$0xff] }
 0x484   :  { %v8358_v39 = vpop.f32.mrf.mxu1  ;;  %v8480_v38 = vpop.f32.mrf.mxu0 }
 0x486   :  { %v3787_v13 = vpop.f32.mrf.mxu1  ;;  %v4390_v20 = vpop.f32.mrf.mxu0  ;;  %8578 = vmatmul.mubr.msk.bf16.gmra.mxu0 %vm272_vm1, %v12658_v16  ;;  %8624 = vmatmul.mubr.msk.bf16.gmra.mxu1 %vm272_vm1, %v4790_v56 }
 0x487   :  { %v12928_v57 = vadd.f32 %v3787_v13, %v12120_v55  ;;  %v12931_v27 = vadd.f32 %v4390_v20, %v12643_v37  ;;  %8581 = vmatprep.mubr.msk.bf16.mxu0 %vm8971_vm2, %v14591_v26  ;;  %8627 = vmatprep.mubr.msk.bf16.mxu1 %vm8971_vm2, %v14591_v26  ;;  %v4791_v37 = vpack.c.bf16 %v4716_v43, %v4715_v28 }
 0x488   :  { %v8361_v16 = vpop.f32.mrf.mxu1  ;;  %v8483_v55 = vpop.f32.mrf.mxu0 }
 0x48a   :  { %v3790_v33 = vpop.f32.mrf.mxu1  ;;  %v4393_v21 = vpop.f32.mrf.mxu0 }
 0x48b   :  { %v12944_v22 = vadd.f32 %v3790_v33, %v12138_v8  ;;  %v12947_v30 = vadd.f32 %v4393_v21, %v12661_v9  ;;  %v4717_v8 = vld [vmem:[%s14553_s0 + $0xa5] sm:$0xff]  ;;  %v4718_v9 = vld [vmem:[%s14553_s0 + $0xad] sm:$0xff] }
 0x48c   :  { %v8362_v56 = vpop.f32.mrf.mxu1  ;;  %v8484_v39 = vpop.f32.mrf.mxu0 }
 0x48e   :  { %v3795_v38 = vpop.f32.mrf.mxu1  ;;  %v4398_v13 = vpop.f32.mrf.mxu0  ;;  %8582 = vmatmul.mubr.msk.bf16.gmra.mxu0 %vm272_vm1, %v12686_v63  ;;  %8628 = vmatmul.mubr.msk.bf16.gmra.mxu1 %vm272_vm1, %v4791_v37 }
 0x48f   :  { %v12953_v20 = vadd.f32 %v3795_v38, %v12148_v0  ;;  %v12956_v28 = vadd.f32 %v4398_v13, %v12671_v3  ;;  %8585 = vmatprep.mubr.msk.bf16.mxu0 %vm8971_vm2, %v14591_v26  ;;  %8631 = vmatprep.mubr.msk.bf16.mxu1 %vm8971_vm2, %v14591_v26  ;;  %v4792_v3 = vpack.c.bf16 %v4718_v9, %v4717_v8 }
 0x490   :  { %v8365_v63 = vpop.f32.mrf.mxu1  ;;  %v8487_v0 = vpop.f32.mrf.mxu0 }
 0x492   :  { %v3798_v43 = vpop.f32.mrf.mxu1  ;;  %v4401_v16 = vpop.f32.mrf.mxu0 }
 0x493   :  { %v12969_v55 = vadd.f32 %v3798_v43, %v12166_v45  ;;  %v12972_v33 = vadd.f32 %v4401_v16, %v12689_v19  ;;  %v4089_v45 = vld [vmem:[%s14553_s0 + $0x29c] sm:$0xff] }
 0x494   :  { %v8366_v21 = vpop.f32.mrf.mxu1  ;;  %v8488_v37 = vpop.f32.mrf.mxu0  ;;  %v4719_v19 = vld [vmem:[%s14553_s0 + $0xb5] sm:$0xff]  ;;  %v4132_v63 = vpack.c.bf16 %v4089_v45, %v12739_v58 }
 0x496   :  { %v3803_v56 = vpop.f32.mrf.mxu1  ;;  %v4406_v39 = vpop.f32.mrf.mxu0  ;;  %8586 = vmatmul.mubr.msk.bf16.gmra.mxu0 %vm272_vm1, %v12714_v48  ;;  %8632 = vmatmul.mubr.msk.bf16.gmra.mxu1 %vm272_vm1, %v4792_v3 }
 0x497   :  { %v12978_v38 = vadd.f32 %v3803_v56, %v12176_v31  ;;  %v12981_v13 = vadd.f32 %v4406_v39, %v12699_v41  ;;  %8589 = vmatprep.mubr.msk.bf16.mxu0 %vm8971_vm2, %v14591_v26  ;;  %8635 = vmatprep.mubr.msk.bf16.mxu1 %vm8971_vm2, %v14591_v26  ;;  %v4720_v31 = vld [vmem:[%s14553_s0 + $0xbd] sm:$0xff] }
 0x498   :  { %v8369_v41 = vpop.f32.mrf.mxu1  ;;  %v8491_v48 = vpop.f32.mrf.mxu0  ;;  %v4793_v0 = vpack.c.bf16 %v4720_v31, %v4719_v19 }
 0x49a   :  { %v3806_v8 = vpop.f32.mrf.mxu1  ;;  %v4409_v9 = vpop.f32.mrf.mxu0 }
 0x49b   :  { %v12998_v43 = vadd.f32 %v3806_v8, %v12194_v46  ;;  %v13001_v16 = vadd.f32 %v4409_v9, %v12717_v59  ;;  %v4090_v46 = vld [vmem:[%s14553_s0 + $0x2a4] sm:$0xff] }
 0x49c   :  { %v8370_v3 = vpop.f32.mrf.mxu1  ;;  %v8492_v21 = vpop.f32.mrf.mxu0  ;;  %v4721_v59 = vld [vmem:[%s14553_s0 + $0xc5] sm:$0xff]  ;;  %v4133_v41 = vpack.c.bf16 %v4090_v46, %v4090_v46 }
 0x49d   :  { %v5392_v46 = vld [vmem:[%s14553_s0 + $0x26] sm:$0xff] }
 0x49e   :  { %v3811_v37 = vpop.f32.mrf.mxu1  ;;  %v4414_v56 = vpop.f32.mrf.mxu0  ;;  %8590 = vmatmul.mubr.msk.bf16.gmra.mxu0 %vm272_vm1, %v4132_v63  ;;  %8636 = vmatmul.mubr.msk.bf16.gmra.mxu1 %vm272_vm1, %v4793_v0 }
 0x49f   :  { %v13006_v39 = vadd.f32 %v3811_v37, %v12204_v32  ;;  %v13009_v58 = vadd.f32 %v4414_v56, %v12727_v18  ;;  %8593 = vmatprep.mubr.msk.bf16.mxu0 %vm8971_vm2, %v14591_v26  ;;  %8639 = vmatprep.mubr.msk.bf16.mxu1 %vm8971_vm2, %v14591_v26  ;;  %v4722_v32 = vld [vmem:[%s14553_s0 + $0xcd] sm:$0xff]  ;;  %v4723_v37 = vld [vmem:[%s14553_s0 + $0xd5] sm:$0xff] }
 0x4a0   :  { %v8373_v18 = vpop.f32.mrf.mxu1  ;;  %v8495_v45 = vpop.f32.mrf.mxu0  ;;  %v4794_v48 = vpack.c.bf16 %v4722_v32, %v4721_v59 }
 0x4a2   :  { %v3814_v19 = vpop.f32.mrf.mxu1  ;;  %v4417_v31 = vpop.f32.mrf.mxu0 }
 0x4a3   :  { %v13025_v8 = vadd.f32 %v3814_v19, %v12222_v61  ;;  %v13028_v9 = vadd.f32 %v4417_v31, %v12744_v49  ;;  %v4724_v49 = vld [vmem:[%s14553_s0 + $0xdd] sm:$0xff] }
 0x4a4   :  { %v8374_v63 = vpop.f32.mrf.mxu1  ;;  %v8496_v0 = vpop.f32.mrf.mxu0  ;;  %v4795_v45 = vpack.c.bf16 %v4724_v49, %v4723_v37  ;;  %v14873_v37 = vld [vmem:[#allocation53_spill] sm:$0xff] }
 0x4a6   :  { %v3819_v3 = vpop.f32.mrf.mxu1  ;;  %v4422_v21 = vpop.f32.mrf.mxu0  ;;  %8594 = vmatmul.mubr.msk.bf16.gmra.mxu0 %vm272_vm1, %v4133_v41  ;;  %8640 = vmatmul.mubr.msk.bf16.gmra.mxu1 %vm272_vm1, %v4794_v48 }
 0x4a7   :  { %v13036_v56 = vadd.f32 %v3819_v3, %v12232_v5  ;;  %v13039_v61 = vadd.f32 %v4422_v21, %v12753_v54  ;;  %8643 = vmatprep.mubr.msk.bf16.mxu1 %vm8971_vm2, %v14591_v26  ;;  %8765 = vmatprep.mubr.msk.bf16.mxu0 %vm8971_vm2, %v14591_v26  ;;  %v5393_v5 = vld [vmem:[%s14553_s0 + $0x2e] sm:$0xff]  ;;  %v4725_v21 = vld [vmem:[%s14553_s0 + $0xe5] sm:$0xff] }
 0x4a8   :  { %v8377_v54 = vpop.f32.mrf.mxu1  ;;  %v8499_v59 = vpop.f32.mrf.mxu0  ;;  %v5475_v19 = vpack.c.bf16 %v5393_v5, %v5392_v46  ;;  %v5394_v46 = vld [vmem:[%s14553_s0 + $0x36] sm:$0xff]  ;;  %v5395_v5 = vld [vmem:[%s14553_s0 + $0x3e] sm:$0xff] }
 0x4aa   :  { %v3822_v32 = vpop.f32.mrf.mxu1  ;;  %v4425_v18 = vpop.f32.mrf.mxu0 }
 0x4ab   :  { %v13055_v31 = vadd.f32 %v3822_v32, %v12250_v2  ;;  %v13058_v41 = vadd.f32 %v4425_v18, %v12769_v23  ;;  %v4726_v23 = vld [vmem:[%s14553_s0 + $0xed] sm:$0xff] }
 0x4ac   :  { %v8378_v48 = vpop.f32.mrf.mxu1  ;;  %v8500_v63 = vpop.f32.mrf.mxu0  ;;  %v4796_v18 = vpack.c.bf16 %v4726_v23, %v4725_v21  ;;  %v14877_v21 = vld [vmem:[#allocation55_spill] sm:$0xff] }
 0x4ae   :  { %v3827_v0 = vpop.f32.mrf.mxu1  ;;  %v4430_v3 = vpop.f32.mrf.mxu0  ;;  %8644 = vmatmul.mubr.msk.bf16.gmra.mxu1 %vm272_vm1, %v4795_v45  ;;  %8766 = vmatmul.mubr.msk.bf16.vlgmr.msra.gmra.mxu0 %vm272_vm1, %v5475_v19  ;;  %v5476_v45 = vpack.c.bf16 %v5395_v5, %v5394_v46  ;;  %v14875_v19 = vld [vmem:[#allocation54_spill] sm:$0xff] }
 0x4af   :  { %v13066_v49 = vadd.f32 %v3827_v0, %v14873_v37  ;;  %v13069_v2 = vadd.f32 %v4430_v3, %v12778_v60  ;;  %8647 = vmatprep.mubr.msk.bf16.mxu1 %vm8971_vm2, %v14591_v26  ;;  %8769 = vmatprep.mubr.msk.bf16.mxu0 %vm8971_vm2, %v14591_v26  ;;  %v5396_v5 = vld [vmem:[%s14553_s0 + $0x46] sm:$0xff] }
 0x4b0   :  { %v8381_v60 = vpop.f32.mrf.mxu1  ;;  %v8503_v54 = vpop.f32.mrf.mxu0 }
 0x4b1   :  { %14874 = vst [vmem:[#allocation32_spill] sm:$0xff] %v13069_v2  ;;  %v4727_v60 = vld [vmem:[%s14553_s0 + $0xf5] sm:$0xff] }
 0x4b2   :  { %v3830_v59 = vpop.f32.mrf.mxu1  ;;  %v4433_v32 = vpop.f32.mrf.mxu0  ;;  %v5397_v54 = vld [vmem:[%s14553_s0 + $0x4e] sm:$0xff] }
 0x4b3   :  { %v13085_v48 = vadd.f32 %v3830_v59, %v14875_v19  ;;  %v13088_v63 = vadd.f32 %v4433_v32, %v12794_v44  ;;  %v4728_v44 = vld [vmem:[%s14553_s0 + $0xfd] sm:$0xff] }
 0x4b4   :  { %v8382_v0 = vpop.f32.mrf.mxu1  ;;  %v8504_v3 = vpop.f32.mrf.mxu0  ;;  %v14879_v19 = vld [vmem:[#allocation56_spill] sm:$0xff] }
 0x4b5   :  { %14876 = vst [vmem:[#allocation34_spill] sm:$0xff] %v13088_v63 }
 0x4b6   :  { %v3835_v37 = vpop.f32.mrf.mxu1  ;;  %v4438_v2 = vpop.f32.mrf.mxu0  ;;  %8648 = vmatmul.mubr.msk.bf16.gmra.mxu1 %vm272_vm1, %v4796_v18  ;;  %8770 = vmatmul.mubr.msk.bf16.gmra.mxu0 %vm272_vm1, %v5476_v45  ;;  %v4797_v18 = vpack.c.bf16 %v4728_v44, %v4727_v60  ;;  %v5477_v45 = vpack.c.bf16 %v5397_v54, %v5396_v5  ;;  %v14881_v60 = vld [vmem:[#allocation57_spill] sm:$0xff]  ;;  %v5398_v54 = vld [vmem:[%s14553_s0 + $0x56] sm:$0xff] }
 0x4b7   :  { %v13096_v23 = vadd.f32 %v3835_v37, %v14877_v21  ;;  %v13099_v46 = vadd.f32 %v4438_v2, %v12803_v29  ;;  %8651 = vmatprep.mubr.msk.bf16.mxu1 %vm8971_vm2, %v14591_v26  ;;  %8773 = vmatprep.mubr.msk.bf16.mxu0 %vm8971_vm2, %v14591_v26 }
 0x4b8   :  { %v8385_v29 = vpop.f32.mrf.mxu1  ;;  %v8507_v2 = vpop.f32.mrf.mxu0 }
 0x4b9   :  { %14878 = vst [vmem:[#allocation36_spill] sm:$0xff] %v13099_v46  ;;  %v4729_v29 = vld [vmem:[%s14553_s0 + $0x105] sm:$0xff] }
 0x4ba   :  { %v3838_v59 = vpop.f32.mrf.mxu1  ;;  %v4441_v32 = vpop.f32.mrf.mxu0 }
 0x4bb   :  { %v13115_v0 = vadd.f32 %v3838_v59, %v14879_v19  ;;  %v13118_v3 = vadd.f32 %v4441_v32, %v12819_v7  ;;  %v4730_v7 = vld [vmem:[%s14553_s0 + $0x10d] sm:$0xff] }
 0x4bc   :  { %v8386_v37 = vpop.f32.mrf.mxu1  ;;  %v8508_v21 = vpop.f32.mrf.mxu0  ;;  %v4798_v32 = vpack.c.bf16 %v4730_v7, %v4729_v29  ;;  %v14885_v29 = vld [vmem:[#allocation59_spill] sm:$0xff] }
 0x4bd   :  { %14880 = vst [vmem:[#allocation62_spill] sm:$0xff] %v13118_v3 }
 0x4be   :  { %v3843_v46 = vpop.f32.mrf.mxu1  ;;  %v4446_v63 = vpop.f32.mrf.mxu0  ;;  %8652 = vmatmul.mubr.msk.bf16.gmra.mxu1 %vm272_vm1, %v4797_v18  ;;  %8774 = vmatmul.mubr.msk.bf16.gmra.mxu0 %vm272_vm1, %v5477_v45  ;;  %v14883_v45 = vld [vmem:[#allocation58_spill] sm:$0xff] }
 0x4bf   :  { %v13126_v44 = vadd.f32 %v3843_v46, %v14881_v60  ;;  %v13129_v5 = vadd.f32 %v4446_v63, %v12828_v47  ;;  %8655 = vmatprep.mubr.msk.bf16.mxu1 %vm8971_vm2, %v14591_v26  ;;  %8777 = vmatprep.mubr.msk.bf16.mxu0 %vm8971_vm2, %v14591_v26  ;;  %v5399_v46 = vld [vmem:[%s14553_s0 + $0x5e] sm:$0xff] }
 0x4c0   :  { %v8389_v47 = vpop.f32.mrf.mxu1  ;;  %v8511_v63 = vpop.f32.mrf.mxu0  ;;  %v5478_v18 = vpack.c.bf16 %v5399_v46, %v5398_v54  ;;  %v5400_v46 = vld [vmem:[%s14553_s0 + $0x66] sm:$0xff] }
 0x4c1   :  { %14882 = vst [vmem:[#allocation63_spill] sm:$0xff] %v13129_v5  ;;  %v4731_v47 = vld [vmem:[%s14553_s0 + $0x115] sm:$0xff] }
 0x4c2   :  { %v3846_v2 = vpop.f32.mrf.mxu1  ;;  %v4449_v59 = vpop.f32.mrf.mxu0 }
 0x4c3   :  { %v13145_v19 = vadd.f32 %v3846_v2, %v14883_v45  ;;  %v13148_v37 = vadd.f32 %v4449_v59, %v12844_v14  ;;  %v4732_v14 = vld [vmem:[%s14553_s0 + $0x11d] sm:$0xff] }
 0x4c4   :  { %v8390_v21 = vpop.f32.mrf.mxu1  ;;  %v8512_v60 = vpop.f32.mrf.mxu0  ;;  %v4799_v59 = vpack.c.bf16 %v4732_v14, %v4731_v47  ;;  %v14889_v47 = vld [vmem:[#allocation6_spill] sm:$0xff] }
 0x4c5   :  { %14884 = vst [vmem:[#allocation31_spill] sm:$0xff] %v13148_v37 }
 0x4c6   :  { %v3851_v5 = vpop.f32.mrf.mxu1  ;;  %v4454_v3 = vpop.f32.mrf.mxu0  ;;  %8656 = vmatmul.mubr.msk.bf16.gmra.mxu1 %vm272_vm1, %v4798_v32  ;;  %8778 = vmatmul.mubr.msk.bf16.gmra.mxu0 %vm272_vm1, %v5478_v18  ;;  %v14887_v18 = vld [vmem:[#allocation5_spill] sm:$0xff] }
 0x4c7   :  { %v13156_v7 = vadd.f32 %v3851_v5, %v14885_v29  ;;  %v13159_v54 = vadd.f32 %v4454_v3, %v12853_v35  ;;  %8659 = vmatprep.mubr.msk.bf16.mxu1 %vm8971_vm2, %v14591_v26  ;;  %8781 = vmatprep.mubr.msk.bf16.mxu0 %vm8971_vm2, %v14591_v26  ;;  %v5401_v5 = vld [vmem:[%s14553_s0 + $0x6e] sm:$0xff] }
 0x4c8   :  { %v8393_v35 = vpop.f32.mrf.mxu1  ;;  %v8515_v3 = vpop.f32.mrf.mxu0  ;;  %v5479_v32 = vpack.c.bf16 %v5401_v5, %v5400_v46  ;;  %v5402_v5 = vld [vmem:[%s14553_s0 + $0x76] sm:$0xff] }
 0x4c9   :  { %14886 = vst [vmem:[#allocation33_spill] sm:$0xff] %v13159_v54  ;;  %v4733_v35 = vld [vmem:[%s14553_s0 + $0x125] sm:$0xff] }
 0x4ca   :  { %v3854_v63 = vpop.f32.mrf.mxu1  ;;  %v4457_v2 = vpop.f32.mrf.mxu0 }
 0x4cb   :  { %v13175_v45 = vadd.f32 %v3854_v63, %v14887_v18  ;;  %v13178_v21 = vadd.f32 %v4457_v2, %v12869_v52  ;;  %v4734_v52 = vld [vmem:[%s14553_s0 + $0x12d] sm:$0xff] }
 0x4cc   :  { %v8394_v60 = vpop.f32.mrf.mxu1  ;;  %v8516_v29 = vpop.f32.mrf.mxu0  ;;  %v4800_v2 = vpack.c.bf16 %v4734_v52, %v4733_v35  ;;  %v14893_v35 = vld [vmem:[#allocation8_spill] sm:$0xff] }
 0x4cd   :  { %14888 = vst [vmem:[#allocation35_spill] sm:$0xff] %v13178_v21 }
 0x4ce   :  { %v3859_v54 = vpop.f32.mrf.mxu1  ;;  %v4462_v37 = vpop.f32.mrf.mxu0  ;;  %8660 = vmatmul.mubr.msk.bf16.gmra.mxu1 %vm272_vm1, %v4799_v59  ;;  %8782 = vmatmul.mubr.msk.bf16.gmra.mxu0 %vm272_vm1, %v5479_v32  ;;  %v14891_v32 = vld [vmem:[#allocation7_spill] sm:$0xff] }
 0x4cf   :  { %v13186_v14 = vadd.f32 %v3859_v54, %v14889_v47  ;;  %v13189_v46 = vadd.f32 %v4462_v37, %v12878_v53  ;;  %8663 = vmatprep.mubr.msk.bf16.mxu1 %vm8971_vm2, %v14591_v26  ;;  %8785 = vmatprep.mubr.msk.bf16.mxu0 %vm8971_vm2, %v14591_v26  ;;  %v5403_v54 = vld [vmem:[%s14553_s0 + $0x7e] sm:$0xff] }
 0x4d0   :  { %v8397_v53 = vpop.f32.mrf.mxu1  ;;  %v8519_v37 = vpop.f32.mrf.mxu0  ;;  %v5480_v59 = vpack.c.bf16 %v5403_v54, %v5402_v5  ;;  %v5404_v54 = vld [vmem:[%s14553_s0 + $0x86] sm:$0xff] }
 0x4d1   :  { %14890 = vst [vmem:[#allocation37_spill] sm:$0xff] %v13189_v46  ;;  %v4735_v53 = vld [vmem:[%s14553_s0 + $0x135] sm:$0xff] }
 0x4d2   :  { %v3862_v3 = vpop.f32.mrf.mxu1  ;;  %v4465_v63 = vpop.f32.mrf.mxu0 }
 0x4d3   :  { %v13205_v18 = vadd.f32 %v3862_v3, %v14891_v32  ;;  %v13208_v60 = vadd.f32 %v4465_v63, %v12894_v62  ;;  %v4736_v62 = vld [vmem:[%s14553_s0 + $0x13d] sm:$0xff] }
 0x4d4   :  { %v8398_v29 = vpop.f32.mrf.mxu1  ;;  %v8520_v47 = vpop.f32.mrf.mxu0  ;;  %v4801_v63 = vpack.c.bf16 %v4736_v62, %v4735_v53  ;;  %v14897_v53 = vld [vmem:[#allocation10_spill] sm:$0xff] }
 0x4d5   :  { %14892 = vst [vmem:[#allocation38_spill] sm:$0xff] %v13208_v60 }
 0x4d6   :  { %v3867_v46 = vpop.f32.mrf.mxu1  ;;  %v4470_v21 = vpop.f32.mrf.mxu0  ;;  %8664 = vmatmul.mubr.msk.bf16.gmra.mxu1 %vm272_vm1, %v4800_v2  ;;  %8786 = vmatmul.mubr.msk.bf16.gmra.mxu0 %vm272_vm1, %v5480_v59  ;;  %v14895_v59 = vld [vmem:[#allocation9_spill] sm:$0xff] }
 0x4d7   :  { %v13216_v52 = vadd.f32 %v3867_v46, %v14893_v35  ;;  %v13219_v5 = vadd.f32 %v4470_v21, %v12903_v4  ;;  %8667 = vmatprep.mubr.msk.bf16.mxu1 %vm8971_vm2, %v14591_v26  ;;  %8789 = vmatprep.mubr.msk.bf16.mxu0 %vm8971_vm2, %v14591_v26  ;;  %v5405_v46 = vld [vmem:[%s14553_s0 + $0x8e] sm:$0xff] }
 0x4d8   :  { %v8401_v4 = vpop.f32.mrf.mxu1  ;;  %v8523_v21 = vpop.f32.mrf.mxu0  ;;  %v5481_v2 = vpack.c.bf16 %v5405_v46, %v5404_v54  ;;  %v5406_v46 = vld [vmem:[%s14553_s0 + $0x96] sm:$0xff] }
 0x4d9   :  { %14894 = vst [vmem:[#allocation39_spill] sm:$0xff] %v13219_v5  ;;  %v4737_v4 = vld [vmem:[%s14553_s0 + $0x145] sm:$0xff] }
 0x4da   :  { %v3870_v37 = vpop.f32.mrf.mxu1  ;;  %v4473_v3 = vpop.f32.mrf.mxu0 }
 0x4db   :  { %v13235_v32 = vadd.f32 %v3870_v37, %v14895_v59  ;;  %v13238_v29 = vadd.f32 %v4473_v3, %v12919_v6  ;;  %v4738_v6 = vld [vmem:[%s14553_s0 + $0x14d] sm:$0xff] }
 0x4dc   :  { %v8402_v47 = vpop.f32.mrf.mxu1  ;;  %v8524_v35 = vpop.f32.mrf.mxu0  ;;  %v4802_v3 = vpack.c.bf16 %v4738_v6, %v4737_v4  ;;  %v14901_v4 = vld [vmem:[#allocation12_spill] sm:$0xff] }
 0x4dd   :  { %14896 = vst [vmem:[#allocation40_spill] sm:$0xff] %v13238_v29 }
 0x4de   :  { %v3875_v5 = vpop.f32.mrf.mxu1  ;;  %v4478_v60 = vpop.f32.mrf.mxu0  ;;  %8668 = vmatmul.mubr.msk.bf16.gmra.mxu1 %vm272_vm1, %v4801_v63  ;;  %8790 = vmatmul.mubr.msk.bf16.gmra.mxu0 %vm272_vm1, %v5481_v2  ;;  %v14899_v2 = vld [vmem:[#allocation11_spill] sm:$0xff] }
 0x4df   :  { %v13246_v62 = vadd.f32 %v3875_v5, %v14897_v53  ;;  %v13249_v54 = vadd.f32 %v4478_v60, %v12928_v57  ;;  %8671 = vmatprep.mubr.msk.bf16.mxu1 %vm8971_vm2, %v14591_v26  ;;  %8793 = vmatprep.mubr.msk.bf16.mxu0 %vm8971_vm2, %v14591_v26  ;;  %v5407_v5 = vld [vmem:[%s14553_s0 + $0x9e] sm:$0xff] }
 0x4e0   :  { %v8405_v57 = vpop.f32.mrf.mxu1  ;;  %v8527_v60 = vpop.f32.mrf.mxu0  ;;  %v5482_v63 = vpack.c.bf16 %v5407_v5, %v5406_v46  ;;  %v5408_v5 = vld [vmem:[%s14553_s0 + $0xa6] sm:$0xff] }
 0x4e1   :  { %14898 = vst [vmem:[#allocation41_spill] sm:$0xff] %v13249_v54  ;;  %v4739_v57 = vld [vmem:[%s14553_s0 + $0x155] sm:$0xff] }
 0x4e2   :  { %v3878_v21 = vpop.f32.mrf.mxu1  ;;  %v4481_v37 = vpop.f32.mrf.mxu0 }
 0x4e3   :  { %v13265_v59 = vadd.f32 %v3878_v21, %v14899_v2  ;;  %v13268_v47 = vadd.f32 %v4481_v37, %v12944_v22  ;;  %v4740_v22 = vld [vmem:[%s14553_s0 + $0x15d] sm:$0xff] }
 0x4e4   :  { %v8406_v35 = vpop.f32.mrf.mxu1  ;;  %v8528_v53 = vpop.f32.mrf.mxu0  ;;  %v4803_v37 = vpack.c.bf16 %v4740_v22, %v4739_v57  ;;  %v14905_v57 = vld [vmem:[#allocation60_spill] sm:$0xff] }
 0x4e5   :  { %14900 = vst [vmem:[#allocation42_spill] sm:$0xff] %v13268_v47 }
 0x4e6   :  { %v3883_v54 = vpop.f32.mrf.mxu1  ;;  %v4486_v29 = vpop.f32.mrf.mxu0  ;;  %8672 = vmatmul.mubr.msk.bf16.gmra.mxu1 %vm272_vm1, %v4802_v3  ;;  %8794 = vmatmul.mubr.msk.bf16.gmra.mxu0 %vm272_vm1, %v5482_v63  ;;  %v14903_v63 = vld [vmem:[#allocation13_spill] sm:$0xff] }
 0x4e7   :  { %v13276_v6 = vadd.f32 %v3883_v54, %v14901_v4  ;;  %v13279_v46 = vadd.f32 %v4486_v29, %v12953_v20  ;;  %8675 = vmatprep.mubr.msk.bf16.mxu1 %vm8971_vm2, %v14591_v26  ;;  %8797 = vmatprep.mubr.msk.bf16.mxu0 %vm8971_vm2, %v14591_v26  ;;  %v5409_v54 = vld [vmem:[%s14553_s0 + $0xae] sm:$0xff] }
 0x4e8   :  { %v8409_v20 = vpop.f32.mrf.mxu1  ;;  %v8531_v29 = vpop.f32.mrf.mxu0  ;;  %v5483_v3 = vpack.c.bf16 %v5409_v54, %v5408_v5  ;;  %v5410_v54 = vld [vmem:[%s14553_s0 + $0xb6] sm:$0xff] }
 0x4e9   :  { %14902 = vst [vmem:[#allocation43_spill] sm:$0xff] %v13279_v46  ;;  %v4741_v20 = vld [vmem:[%s14553_s0 + $0x165] sm:$0xff] }
 0x4ea   :  { %v3886_v60 = vpop.f32.mrf.mxu1  ;;  %v4489_v21 = vpop.f32.mrf.mxu0 }
 0x4eb   :  { %v13295_v2 = vadd.f32 %v3886_v60, %v14903_v63  ;;  %v13298_v35 = vadd.f32 %v4489_v21, %v12969_v55  ;;  %v4742_v55 = vld [vmem:[%s14553_s0 + $0x16d] sm:$0xff] }
 0x4ec   :  { %v8410_v53 = vpop.f32.mrf.mxu1  ;;  %v8532_v4 = vpop.f32.mrf.mxu0  ;;  %v4804_v21 = vpack.c.bf16 %v4742_v55, %v4741_v20  ;;  %v14909_v20 = vld [vmem:[#allocation15_spill] sm:$0xff] }
 0x4ed   :  { %14904 = vst [vmem:[#allocation44_spill] sm:$0xff] %v13298_v35 }
 0x4ee   :  { %v3891_v46 = vpop.f32.mrf.mxu1  ;;  %v4494_v47 = vpop.f32.mrf.mxu0  ;;  %8676 = vmatmul.mubr.msk.bf16.gmra.mxu1 %vm272_vm1, %v4803_v37  ;;  %8798 = vmatmul.mubr.msk.bf16.gmra.mxu0 %vm272_vm1, %v5483_v3  ;;  %v14907_v3 = vld [vmem:[#allocation14_spill] sm:$0xff] }
 0x4ef   :  { %v13306_v22 = vadd.f32 %v3891_v46, %v14905_v57  ;;  %v13309_v5 = vadd.f32 %v4494_v47, %v12978_v38  ;;  %8679 = vmatprep.mubr.msk.bf16.mxu1 %vm8971_vm2, %v14591_v26  ;;  %8801 = vmatprep.mubr.msk.bf16.mxu0 %vm8971_vm2, %v14591_v26  ;;  %v5411_v46 = vld [vmem:[%s14553_s0 + $0xbe] sm:$0xff] }
 0x4f0   :  { %v8413_v38 = vpop.f32.mrf.mxu1  ;;  %v8535_v47 = vpop.f32.mrf.mxu0  ;;  %v5484_v37 = vpack.c.bf16 %v5411_v46, %v5410_v54  ;;  %v5412_v46 = vld [vmem:[%s14553_s0 + $0xc6] sm:$0xff] }
 0x4f1   :  { %14906 = vst [vmem:[#allocation45_spill] sm:$0xff] %v13309_v5  ;;  %v4743_v38 = vld [vmem:[%s14553_s0 + $0x175] sm:$0xff] }
 0x4f2   :  { %v3894_v29 = vpop.f32.mrf.mxu1  ;;  %v4497_v60 = vpop.f32.mrf.mxu0 }
 0x4f3   :  { %v13325_v63 = vadd.f32 %v3894_v29, %v14907_v3  ;;  %v13328_v53 = vadd.f32 %v4497_v60, %v12998_v43  ;;  %v4744_v43 = vld [vmem:[%s14553_s0 + $0x17d] sm:$0xff] }
 0x4f4   :  { %v8414_v4 = vpop.f32.mrf.mxu1  ;;  %v8536_v57 = vpop.f32.mrf.mxu0  ;;  %v4805_v60 = vpack.c.bf16 %v4744_v43, %v4743_v38  ;;  %v14913_v38 = vld [vmem:[#allocation17_spill] sm:$0xff] }
 0x4f5   :  { %14908 = vst [vmem:[#allocation46_spill] sm:$0xff] %v13328_v53 }
 0x4f6   :  { %v3899_v5 = vpop.f32.mrf.mxu1  ;;  %v4502_v35 = vpop.f32.mrf.mxu0  ;;  %8680 = vmatmul.mubr.msk.bf16.gmra.mxu1 %vm272_vm1, %v4804_v21  ;;  %8802 = vmatmul.mubr.msk.bf16.gmra.mxu0 %vm272_vm1, %v5484_v37  ;;  %v14911_v37 = vld [vmem:[#allocation16_spill] sm:$0xff] }
 0x4f7   :  { %v13336_v55 = vadd.f32 %v3899_v5, %v14909_v20  ;;  %v13339_v54 = vadd.f32 %v4502_v35, %v13006_v39  ;;  %8683 = vmatprep.mubr.msk.bf16.mxu1 %vm8971_vm2, %v14591_v26  ;;  %8805 = vmatprep.mubr.msk.bf16.mxu0 %vm8971_vm2, %v14591_v26  ;;  %v5413_v5 = vld [vmem:[%s14553_s0 + $0xce] sm:$0xff] }
 0x4f8   :  { %v8417_v39 = vpop.f32.mrf.mxu1  ;;  %v8539_v35 = vpop.f32.mrf.mxu0  ;;  %v5485_v21 = vpack.c.bf16 %v5413_v5, %v5412_v46  ;;  %v5414_v5 = vld [vmem:[%s14553_s0 + $0xd6] sm:$0xff] }
 0x4f9   :  { %14910 = vst [vmem:[#allocation47_spill] sm:$0xff] %v13339_v54  ;;  %v4745_v39 = vld [vmem:[%s14553_s0 + $0x185] sm:$0xff] }
 0x4fa   :  { %v3902_v47 = vpop.f32.mrf.mxu1  ;;  %v4505_v29 = vpop.f32.mrf.mxu0 }
 0x4fb   :  { %v13355_v3 = vadd.f32 %v3902_v47, %v14911_v37  ;;  %v13358_v4 = vadd.f32 %v4505_v29, %v13025_v8  ;;  %v4746_v8 = vld [vmem:[%s14553_s0 + $0x18d] sm:$0xff] }
 0x4fc   :  { %v8418_v57 = vpop.f32.mrf.mxu1  ;;  %v8540_v20 = vpop.f32.mrf.mxu0  ;;  %v4806_v29 = vpack.c.bf16 %v4746_v8, %v4745_v39  ;;  %v14917_v39 = vld [vmem:[#allocation19_spill] sm:$0xff] }
 0x4fd   :  { %14912 = vst [vmem:[#allocation48_spill] sm:$0xff] %v13358_v4 }
 0x4fe   :  { %v3907_v54 = vpop.f32.mrf.mxu1  ;;  %v4510_v53 = vpop.f32.mrf.mxu0  ;;  %8684 = vmatmul.mubr.msk.bf16.gmra.mxu1 %vm272_vm1, %v4805_v60  ;;  %8806 = vmatmul.mubr.msk.bf16.gmra.mxu0 %vm272_vm1, %v5485_v21  ;;  %v14915_v21 = vld [vmem:[#allocation18_spill] sm:$0xff] }
 0x4ff   :  { %v13366_v43 = vadd.f32 %v3907_v54, %v14913_v38  ;;  %v13369_v46 = vadd.f32 %v4510_v53, %v13036_v56  ;;  %8687 = vmatprep.mubr.msk.bf16.mxu1 %vm8971_vm2, %v14591_v26  ;;  %8809 = vmatprep.mubr.msk.bf16.mxu0 %vm8971_vm2, %v14591_v26  ;;  %v5415_v54 = vld [vmem:[%s14553_s0 + $0xde] sm:$0xff] }
 0x500   :  { %v8421_v56 = vpop.f32.mrf.mxu1  ;;  %v8543_v53 = vpop.f32.mrf.mxu0  ;;  %v5486_v60 = vpack.c.bf16 %v5415_v54, %v5414_v5  ;;  %v5416_v54 = vld [vmem:[%s14553_s0 + $0xe6] sm:$0xff] }
 0x501   :  { %14914 = vst [vmem:[#allocation49_spill] sm:$0xff] %v13369_v46  ;;  %v4747_v56 = vld [vmem:[%s14553_s0 + $0x195] sm:$0xff] }
 0x502   :  { %v3910_v35 = vpop.f32.mrf.mxu1  ;;  %v4513_v47 = vpop.f32.mrf.mxu0 }
 0x503   :  { %v13385_v37 = vadd.f32 %v3910_v35, %v14915_v21  ;;  %v13388_v57 = vadd.f32 %v4513_v47, %v13055_v31  ;;  %v4748_v31 = vld [vmem:[%s14553_s0 + $0x19d] sm:$0xff] }
 0x504   :  { %v8422_v20 = vpop.f32.mrf.mxu1  ;;  %v8544_v38 = vpop.f32.mrf.mxu0  ;;  %v4807_v47 = vpack.c.bf16 %v4748_v31, %v4747_v56  ;;  %v14920_v56 = vld [vmem:[#allocation21_spill] sm:$0xff] }
 0x505   :  { %14916 = vst [vmem:[#allocation50_spill] sm:$0xff] %v13388_v57 }
 0x506   :  { %v3915_v46 = vpop.f32.mrf.mxu1  ;;  %v4518_v4 = vpop.f32.mrf.mxu0  ;;  %8688 = vmatmul.mubr.msk.bf16.gmra.mxu1 %vm272_vm1, %v4806_v29  ;;  %8810 = vmatmul.mubr.msk.bf16.gmra.mxu0 %vm272_vm1, %v5486_v60  ;;  %v14919_v60 = vld [vmem:[#allocation20_spill] sm:$0xff] }
 0x507   :  { %v13396_v8 = vadd.f32 %v3915_v46, %v14917_v39  ;;  %v13399_v5 = vadd.f32 %v4518_v4, %v13066_v49  ;;  %8691 = vmatprep.mubr.msk.bf16.mxu1 %vm8971_vm2, %v14591_v26  ;;  %8813 = vmatprep.mubr.msk.bf16.mxu0 %vm8971_vm2, %v14591_v26  ;;  %v5417_v46 = vld [vmem:[%s14553_s0 + $0xee] sm:$0xff] }
 0x508   :  { %v8425_v49 = vpop.f32.mrf.mxu1  ;;  %v8547_v4 = vpop.f32.mrf.mxu0  ;;  %v5487_v29 = vpack.c.bf16 %v5417_v46, %v5416_v54  ;;  %v5418_v46 = vld [vmem:[%s14553_s0 + $0xf6] sm:$0xff] }
 0x509   :  { %14918 = vst [vmem:[#allocation51_spill] sm:$0xff] %v13399_v5  ;;  %v4749_v49 = vld [vmem:[%s14553_s0 + $0x1a5] sm:$0xff] }
 0x50a   :  { %v3918_v53 = vpop.f32.mrf.mxu1  ;;  %v4521_v35 = vpop.f32.mrf.mxu0 }
 0x50b   :  { %v13415_v21 = vadd.f32 %v3918_v53, %v14919_v60  ;;  %v13418_v20 = vadd.f32 %v4521_v35, %v13085_v48  ;;  %v4750_v48 = vld [vmem:[%s14553_s0 + $0x1ad] sm:$0xff] }
 0x50c   :  { %v8426_v38 = vpop.f32.mrf.mxu1  ;;  %v8548_v39 = vpop.f32.mrf.mxu0  ;;  %v4808_v35 = vpack.c.bf16 %v4750_v48, %v4749_v49  ;;  %v14924_v49 = vld [vmem:[#allocation22_spill] sm:$0xff] }
 0x50e   :  { %v3923_v5 = vpop.f32.mrf.mxu1  ;;  %v4526_v57 = vpop.f32.mrf.mxu0  ;;  %8692 = vmatmul.mubr.msk.bf16.gmra.mxu1 %vm272_vm1, %v4807_v47  ;;  %8814 = vmatmul.mubr.msk.bf16.gmra.mxu0 %vm272_vm1, %v5487_v29 }
 0x50f   :  { %v13426_v31 = vadd.f32 %v3923_v5, %v14920_v56  ;;  %v13429_v54 = vadd.f32 %v4526_v57, %v13096_v23  ;;  %8695 = vmatprep.mubr.msk.bf16.mxu1 %vm8971_vm2, %v14591_v26  ;;  %8817 = vmatprep.mubr.msk.bf16.mxu0 %vm8971_vm2, %v14591_v26  ;;  %v5419_v5 = vld [vmem:[%s14553_s0 + $0xfe] sm:$0xff] }
 0x510   :  { %v8429_v23 = vpop.f32.mrf.mxu1  ;;  %v8551_v57 = vpop.f32.mrf.mxu0  ;;  %v5488_v47 = vpack.c.bf16 %v5419_v5, %v5418_v46  ;;  %v5420_v46 = vld [vmem:[%s14553_s0 + $0x106] sm:$0xff] }
 0x511   :  { %14921 = vst [vmem:[#allocation52_spill] sm:$0xff] %v13429_v54  ;;  %v4751_v23 = vld [vmem:[%s14553_s0 + $0x1b5] sm:$0xff] }
 0x512   :  { %v3926_v4 = vpop.f32.mrf.mxu1  ;;  %v4529_v53 = vpop.f32.mrf.mxu0 }
 0x513   :  { %v13445_v29 = vadd.f32 %v4529_v53, %v13115_v0  ;;  %v4752_v0 = vld [vmem:[%s14553_s0 + $0x1bd] sm:$0xff] }
 0x514   :  { %v8430_v60 = vpop.f32.mrf.mxu1  ;;  %v8552_v38 = vpop.f32.mrf.mxu0 }
 0x515   :  { %14922 = vst [vmem:[#allocation53_spill] sm:$0xff] %v13445_v29 }
 0x516   :  { %v4534_v39 = vpop.f32.mrf.mxu0  ;;  %v4985_v56 = vpop.f32.mrf.mxu1  ;;  %8696 = vmatmul.mubr.msk.bf16.gmra.mxu1 %vm272_vm1, %v4808_v35  ;;  %8818 = vmatmul.mubr.msk.bf16.gmra.mxu0 %vm272_vm1, %v5488_v47  ;;  %v4809_v47 = vpack.c.bf16 %v4752_v0, %v4751_v23 }
 0x517   :  { %v13453_v57 = vadd.f32 %v4534_v39, %v13126_v44  ;;  %v13456_v48 = vadd.f32 %v4985_v56, %v14924_v49  ;;  %8699 = vmatprep.mubr.msk.bf16.mxu1 %vm8971_vm2, %v14591_v26  ;;  %8821 = vmatprep.mubr.msk.bf16.mxu0 %vm8971_vm2, %v14591_v26  ;;  %v5421_v44 = vld [vmem:[%s14553_s0 + $0x10e] sm:$0xff] }
 0x518   :  { %v8555_v5 = vpop.f32.mrf.mxu0  ;;  %v8601_v4 = vpop.f32.mrf.mxu1  ;;  %v5489_v60 = vpack.c.bf16 %v5421_v44, %v5420_v46  ;;  %v14926_v39 = vld [vmem:[#allocation23_spill] sm:$0xff] }
 0x519   :  { %14923 = vst [vmem:[#allocation54_spill] sm:$0xff] %v13453_v57  ;;  %v4753_v5 = vld [vmem:[%s14553_s0 + $0x1c5] sm:$0xff]  ;;  %v5422_v46 = vld [vmem:[%s14553_s0 + $0x116] sm:$0xff] }
 0x51a   :  { %v4537_v53 = vpop.f32.mrf.mxu0  ;;  %v4988_v35 = vpop.f32.mrf.mxu1 }
 0x51b   :  { %v13472_v38 = vadd.f32 %v4537_v53, %v13145_v19  ;;  %v13475_v56 = vadd.f32 %v4988_v35, %v14926_v39  ;;  %v14928_v19 = vld [vmem:[#allocation61_spill] sm:$0xff] }
 0x51c   :  { %v8556_v49 = vpop.f32.mrf.mxu0  ;;  %v8602_v57 = vpop.f32.mrf.mxu1 }
 0x51d   :  { %14925 = vst [vmem:[#allocation55_spill] sm:$0xff] %v13472_v38  ;;  %v4754_v57 = vld [vmem:[%s14553_s0 + $0x1cd] sm:$0xff] }
 0x51e   :  { %v4542_v29 = vpop.f32.mrf.mxu0  ;;  %v4993_v54 = vpop.f32.mrf.mxu1  ;;  %8700 = vmatmul.mubr.msk.bf16.gmra.mxu1 %vm272_vm1, %v4809_v47  ;;  %8822 = vmatmul.mubr.msk.bf16.gmra.mxu0 %vm272_vm1, %v5489_v60  ;;  %v4810_v53 = vpack.c.bf16 %v4754_v57, %v4753_v5  ;;  %v14930_v60 = vld [vmem:[#allocation24_spill] sm:$0xff] }
 0x51f   :  { %v13483_v23 = vadd.f32 %v4542_v29, %v13156_v7  ;;  %v13486_v0 = vadd.f32 %v4993_v54, %v14928_v19  ;;  %8703 = vmatprep.mubr.msk.bf16.mxu1 %vm8971_vm2, %v14591_v26  ;;  %8825 = vmatprep.mubr.msk.bf16.mxu0 %vm8971_vm2, %v14591_v26  ;;  %v5423_v7 = vld [vmem:[%s14553_s0 + $0x11e] sm:$0xff] }
 0x520   :  { %v8559_v54 = vpop.f32.mrf.mxu0  ;;  %v8605_v29 = vpop.f32.mrf.mxu1  ;;  %v5490_v35 = vpack.c.bf16 %v5423_v7, %v5422_v46  ;;  %v4756_v46 = vld [vmem:[%s14553_s0 + $0x1dd] sm:$0xff]  ;;  %v5424_v7 = vld [vmem:[%s14553_s0 + $0x126] sm:$0xff] }
 0x521   :  { %14927 = vst [vmem:[#allocation56_spill] sm:$0xff] %v13483_v23  ;;  %v4755_v54 = vld [vmem:[%s14553_s0 + $0x1d5] sm:$0xff] }
 0x522   :  { %v4545_v44 = vpop.f32.mrf.mxu0  ;;  %v4996_v4 = vpop.f32.mrf.mxu1 }
 0x523   :  { %v13502_v47 = vadd.f32 %v4545_v44, %v13175_v45  ;;  %v13505_v39 = vadd.f32 %v4996_v4, %v14930_v60  ;;  %v14932_v45 = vld [vmem:[#allocation25_spill] sm:$0xff]  ;;  %v4811_v4 = vpack.c.bf16 %v4756_v46, %v4755_v54  ;;  %v14934_v60 = vld [vmem:[#allocation26_spill] sm:$0xff] }
 0x524   :  { %v8560_v49 = vpop.f32.mrf.mxu0  ;;  %v8606_v19 = vpop.f32.mrf.mxu1 }
 0x525   :  { %14929 = vst [vmem:[#allocation57_spill] sm:$0xff] %v13502_v47 }
 0x526   :  { %v4550_v23 = vpop.f32.mrf.mxu0  ;;  %v5001_v38 = vpop.f32.mrf.mxu1  ;;  %8704 = vmatmul.mubr.msk.bf16.gmra.mxu1 %vm272_vm1, %v4810_v53  ;;  %8826 = vmatmul.mubr.msk.bf16.gmra.mxu0 %vm272_vm1, %v5490_v35 }
 0x527   :  { %v13513_v5 = vadd.f32 %v4550_v23, %v13186_v14  ;;  %v13516_v57 = vadd.f32 %v5001_v38, %v14932_v45  ;;  %8707 = vmatprep.mubr.msk.bf16.mxu1 %vm8971_vm2, %v14591_v26  ;;  %8829 = vmatprep.mubr.msk.bf16.mxu0 %vm8971_vm2, %v14591_v26  ;;  %v5425_v14 = vld [vmem:[%s14553_s0 + $0x12e] sm:$0xff] }
 0x528   :  { %v8563_v38 = vpop.f32.mrf.mxu0  ;;  %v8609_v23 = vpop.f32.mrf.mxu1  ;;  %v5491_v53 = vpack.c.bf16 %v5425_v14, %v5424_v7  ;;  %v4758_v7 = vld [vmem:[%s14553_s0 + $0x1ed] sm:$0xff]  ;;  %v5426_v14 = vld [vmem:[%s14553_s0 + $0x136] sm:$0xff] }
 0x529   :  { %14931 = vst [vmem:[#allocation58_spill] sm:$0xff] %v13513_v5  ;;  %v4757_v38 = vld [vmem:[%s14553_s0 + $0x1e5] sm:$0xff] }
 0x52a   :  { %v4553_v29 = vpop.f32.mrf.mxu0  ;;  %v5004_v44 = vpop.f32.mrf.mxu1 }
 0x52b   :  { %v13532_v35 = vadd.f32 %v4553_v29, %v13205_v18  ;;  %v13535_v49 = vadd.f32 %v5004_v44, %v14934_v60  ;;  %v14936_v18 = vld [vmem:[#allocation27_spill] sm:$0xff]  ;;  %v4812_v44 = vpack.c.bf16 %v4758_v7, %v4757_v38 }
 0x52c   :  { %v8564_v19 = vpop.f32.mrf.mxu0  ;;  %v8610_v45 = vpop.f32.mrf.mxu1 }
 0x52d   :  { %14933 = vst [vmem:[#allocation59_spill] sm:$0xff] %v13532_v35 }
 0x52e   :  { %v4558_v5 = vpop.f32.mrf.mxu0  ;;  %v5009_v47 = vpop.f32.mrf.mxu1  ;;  %8708 = vmatmul.mubr.msk.bf16.gmra.mxu1 %vm272_vm1, %v4811_v4  ;;  %8830 = vmatmul.mubr.msk.bf16.gmra.mxu0 %vm272_vm1, %v5491_v53 }
 0x52f   :  { %v13543_v54 = vadd.f32 %v4558_v5, %v13216_v52  ;;  %v13546_v46 = vadd.f32 %v5009_v47, %v14936_v18  ;;  %8711 = vmatprep.mubr.msk.bf16.mxu1 %vm8971_vm2, %v14591_v26  ;;  %8833 = vmatprep.mubr.msk.bf16.mxu0 %vm8971_vm2, %v14591_v26  ;;  %v5427_v52 = vld [vmem:[%s14553_s0 + $0x13e] sm:$0xff] }
 0x530   :  { %v8567_v47 = vpop.f32.mrf.mxu0  ;;  %v8613_v5 = vpop.f32.mrf.mxu1  ;;  %v5492_v4 = vpack.c.bf16 %v5427_v52, %v5426_v14  ;;  %v5428_v14 = vld [vmem:[%s14553_s0 + $0x146] sm:$0xff] }
 0x531   :  { %14935 = vst [vmem:[#allocation5_spill] sm:$0xff] %v13543_v54  ;;  %v4759_v47 = vld [vmem:[%s14553_s0 + $0x1f5] sm:$0xff] }
 0x532   :  { %v4561_v23 = vpop.f32.mrf.mxu0  ;;  %v5012_v29 = vpop.f32.mrf.mxu1 }
 0x533   :  { %v13562_v53 = vadd.f32 %v4561_v23, %v13235_v32  ;;  %v13565_v60 = vadd.f32 %v5012_v29, %v12720_v1  ;;  %v14939_v32 = vld [vmem:[#allocation28_spill] sm:$0xff] }
 0x534   :  { %v8568_v19 = vpop.f32.mrf.mxu0  ;;  %v8614_v45 = vpop.f32.mrf.mxu1  ;;  %v4760_v1 = vld [vmem:[%s14553_s0 + $0x1fd] sm:$0xff] }
 0x535   :  { %14937 = vst [vmem:[#allocation6_spill] sm:$0xff] %v13562_v53  ;;  %v4813_v29 = vpack.c.bf16 %v4760_v1, %v4759_v47  ;;  %v14941_v19 = vld [vmem:[#allocation29_spill] sm:$0xff] }
 0x536   :  { %v4566_v18 = vpop.f32.mrf.mxu0  ;;  %v5017_v54 = vpop.f32.mrf.mxu1  ;;  %8712 = vmatmul.mubr.msk.bf16.gmra.mxu1 %vm272_vm1, %v4812_v44  ;;  %8834 = vmatmul.mubr.msk.bf16.gmra.mxu0 %vm272_vm1, %v5492_v4 }
 0x537   :  { %v13573_v38 = vadd.f32 %v4566_v18, %v13246_v62  ;;  %v13576_v7 = vadd.f32 %v5017_v54, %v14939_v32  ;;  %8715 = vmatprep.mubr.msk.bf16.mxu1 %vm8971_vm2, %v14591_v26  ;;  %8837 = vmatprep.mubr.msk.bf16.mxu0 %vm8971_vm2, %v14591_v26  ;;  %v5429_v62 = vld [vmem:[%s14553_s0 + $0x14e] sm:$0xff] }
 0x538   :  { %v8571_v54 = vpop.f32.mrf.mxu0  ;;  %v8617_v52 = vpop.f32.mrf.mxu1  ;;  %v5493_v44 = vpack.c.bf16 %v5429_v62, %v5428_v14  ;;  %v4762_v14 = vld [vmem:[%s14553_s0 + $0x20d] sm:$0xff]  ;;  %v5430_v62 = vld [vmem:[%s14553_s0 + $0x156] sm:$0xff] }
 0x539   :  { %14938 = vst [vmem:[#allocation7_spill] sm:$0xff] %v13573_v38  ;;  %v4761_v54 = vld [vmem:[%s14553_s0 + $0x205] sm:$0xff] }
 0x53a   :  { %v4569_v5 = vpop.f32.mrf.mxu0  ;;  %v5020_v23 = vpop.f32.mrf.mxu1 }
 0x53b   :  { %v13592_v4 = vadd.f32 %v4569_v5, %v13265_v59  ;;  %v13595_v45 = vadd.f32 %v5020_v23, %v14941_v19  ;;  %v14943_v59 = vld [vmem:[#allocation30_spill] sm:$0xff]  ;;  %v4814_v23 = vpack.c.bf16 %v4762_v14, %v4761_v54 }
 0x53c   :  { %v8572_v18 = vpop.f32.mrf.mxu0  ;;  %v8618_v32 = vpop.f32.mrf.mxu1  ;;  %v5432_v14 = vld [vmem:[%s14553_s0 + $0x166] sm:$0xff] }
 0x53d   :  { %14940 = vst [vmem:[#allocation8_spill] sm:$0xff] %v13592_v4  ;;  %v14975_v4 = vld [vmem:[#allocation41_spill] sm:$0xff] }
 0x53e   :  { %v4574_v38 = vpop.f32.mrf.mxu0  ;;  %v5025_v53 = vpop.f32.mrf.mxu1  ;;  %8716 = vmatmul.mubr.msk.bf16.gmra.mxu1 %vm272_vm1, %v4813_v29  ;;  %8838 = vmatmul.mubr.msk.bf16.gmra.mxu0 %vm272_vm1, %v5493_v44 }
 0x53f   :  { %v13603_v47 = vadd.f32 %v4574_v38, %v13276_v6  ;;  %v13606_v1 = vadd.f32 %v5025_v53, %v14943_v59  ;;  %8719 = vmatprep.mubr.msk.bf16.mxu1 %vm8971_vm2, %v14591_v26  ;;  %8841 = vmatprep.mubr.msk.bf16.mxu0 %vm8971_vm2, %v14591_v26  ;;  %v5431_v6 = vld [vmem:[%s14553_s0 + $0x15e] sm:$0xff] }
 0x540   :  { %v8575_v53 = vpop.f32.mrf.mxu0  ;;  %v8621_v38 = vpop.f32.mrf.mxu1  ;;  %v5494_v29 = vpack.c.bf16 %v5431_v6, %v5430_v62 }
 0x541   :  { %14942 = vst [vmem:[#allocation9_spill] sm:$0xff] %v13603_v47  ;;  %v4763_v53 = vld [vmem:[%s14553_s0 + $0x215] sm:$0xff] }
 0x542   :  { %v4577_v52 = vpop.f32.mrf.mxu0  ;;  %v5028_v5 = vpop.f32.mrf.mxu1 }
 0x543   :  { %v13622_v44 = vadd.f32 %v4577_v52, %v13295_v2  ;;  %v13625_v19 = vadd.f32 %v5028_v5, %v12772_v17  ;;  %v4764_v17 = vld [vmem:[%s14553_s0 + $0x21d] sm:$0xff] }
 0x544   :  { %v8576_v18 = vpop.f32.mrf.mxu0  ;;  %v8622_v32 = vpop.f32.mrf.mxu1  ;;  %v4815_v38 = vpack.c.bf16 %v4764_v17, %v4763_v53  ;;  %v5434_v17 = vld [vmem:[%s14553_s0 + $0x176] sm:$0xff] }
 0x545   :  { %14944 = vst [vmem:[#allocation10_spill] sm:$0xff] %v13622_v44 }
 0x546   :  { %v4582_v59 = vpop.f32.mrf.mxu0  ;;  %v5033_v47 = vpop.f32.mrf.mxu1  ;;  %8720 = vmatmul.mubr.msk.bf16.gmra.mxu1 %vm272_vm1, %v4814_v23  ;;  %8842 = vmatmul.mubr.msk.bf16.gmra.mxu0 %vm272_vm1, %v5494_v29 }
 0x547   :  { %v13633_v54 = vadd.f32 %v4582_v59, %v13306_v22  ;;  %v13636_v2 = vadd.f32 %v5033_v47, %v12781_v24  ;;  %8723 = vmatprep.mubr.msk.bf16.mxu1 %vm8971_vm2, %v14591_v26  ;;  %8845 = vmatprep.mubr.msk.bf16.mxu0 %vm8971_vm2, %v14591_v26  ;;  %v5433_v22 = vld [vmem:[%s14553_s0 + $0x16e] sm:$0xff] }
 0x548   :  { %v8579_v24 = vpop.f32.mrf.mxu0  ;;  %v8625_v47 = vpop.f32.mrf.mxu1  ;;  %v5495_v52 = vpack.c.bf16 %v5433_v22, %v5432_v14 }
 0x549   :  { %14945 = vst [vmem:[#allocation11_spill] sm:$0xff] %v13633_v54  ;;  %v4765_v24 = vld [vmem:[%s14553_s0 + $0x225] sm:$0xff] }
 0x54a   :  { %v4585_v62 = vpop.f32.mrf.mxu0  ;;  %v5036_v6 = vpop.f32.mrf.mxu1 }
 0x54b   :  { %v13652_v5 = vadd.f32 %v4585_v62, %v13325_v63  ;;  %v13655_v23 = vadd.f32 %v5036_v6, %v12797_v12  ;;  %v4766_v12 = vld [vmem:[%s14553_s0 + $0x22d] sm:$0xff] }
 0x54c   :  { %v8580_v29 = vpop.f32.mrf.mxu0  ;;  %v8626_v18 = vpop.f32.mrf.mxu1  ;;  %v4816_v62 = vpack.c.bf16 %v4766_v12, %v4765_v24  ;;  %v5436_v12 = vld [vmem:[%s14553_s0 + $0x186] sm:$0xff] }
 0x54d   :  { %14946 = vst [vmem:[#allocation12_spill] sm:$0xff] %v13652_v5 }
 0x54e   :  { %v4590_v32 = vpop.f32.mrf.mxu0  ;;  %v5041_v59 = vpop.f32.mrf.mxu1  ;;  %8724 = vmatmul.mubr.msk.bf16.gmra.mxu1 %vm272_vm1, %v4815_v38  ;;  %8846 = vmatmul.mubr.msk.bf16.gmra.mxu0 %vm272_vm1, %v5495_v52 }
 0x54f   :  { %v13663_v53 = vadd.f32 %v4590_v32, %v13336_v55  ;;  %v13666_v63 = vadd.f32 %v5041_v59, %v12806_v40  ;;  %8727 = vmatprep.mubr.msk.bf16.mxu1 %vm8971_vm2, %v14591_v26  ;;  %8849 = vmatprep.mubr.msk.bf16.mxu0 %vm8971_vm2, %v14591_v26  ;;  %v5435_v55 = vld [vmem:[%s14553_s0 + $0x17e] sm:$0xff] }
 0x550   :  { %v8583_v40 = vpop.f32.mrf.mxu0  ;;  %v8629_v14 = vpop.f32.mrf.mxu1  ;;  %v5496_v6 = vpack.c.bf16 %v5435_v55, %v5434_v17 }
 0x551   :  { %14947 = vst [vmem:[#allocation13_spill] sm:$0xff] %v13663_v53  ;;  %v4767_v40 = vld [vmem:[%s14553_s0 + $0x235] sm:$0xff] }
 0x552   :  { %v4593_v22 = vpop.f32.mrf.mxu0  ;;  %v5044_v47 = vpop.f32.mrf.mxu1 }
 0x553   :  { %v13682_v38 = vadd.f32 %v4593_v22, %v13355_v3  ;;  %v13685_v52 = vadd.f32 %v5044_v47, %v12822_v25  ;;  %v4768_v25 = vld [vmem:[%s14553_s0 + $0x23d] sm:$0xff] }
 0x554   :  { %v8584_v29 = vpop.f32.mrf.mxu0  ;;  %v8630_v18 = vpop.f32.mrf.mxu1  ;;  %v4817_v22 = vpack.c.bf16 %v4768_v25, %v4767_v40  ;;  %v5438_v25 = vld [vmem:[%s14553_s0 + $0x196] sm:$0xff] }
 0x555   :  { %14948 = vst [vmem:[#allocation60_spill] sm:$0xff] %v13682_v38  ;;  %v14967_v38 = vld [vmem:[#allocation37_spill] sm:$0xff] }
 0x556   :  { %v4598_v32 = vpop.f32.mrf.mxu0  ;;  %v5049_v59 = vpop.f32.mrf.mxu1  ;;  %8728 = vmatmul.mubr.msk.bf16.gmra.mxu1 %vm272_vm1, %v4816_v62  ;;  %8850 = vmatmul.mubr.msk.bf16.gmra.mxu0 %vm272_vm1, %v5496_v6 }
 0x557   :  { %v13693_v24 = vadd.f32 %v4598_v32, %v13366_v43  ;;  %v13696_v3 = vadd.f32 %v5049_v59, %v12831_v50  ;;  %8731 = vmatprep.mubr.msk.bf16.mxu1 %vm8971_vm2, %v14591_v26  ;;  %8853 = vmatprep.mubr.msk.bf16.mxu0 %vm8971_vm2, %v14591_v26  ;;  %v5437_v43 = vld [vmem:[%s14553_s0 + $0x18e] sm:$0xff] }
 0x558   :  { %v8587_v50 = vpop.f32.mrf.mxu0  ;;  %v8633_v17 = vpop.f32.mrf.mxu1  ;;  %v5497_v47 = vpack.c.bf16 %v5437_v43, %v5436_v12 }
 0x559   :  { %14949 = vst [vmem:[#allocation14_spill] sm:$0xff] %v13693_v24  ;;  %v4769_v50 = vld [vmem:[%s14553_s0 + $0x245] sm:$0xff] }
 0x55a   :  { %v4601_v55 = vpop.f32.mrf.mxu0  ;;  %v5052_v14 = vpop.f32.mrf.mxu1 }
 0x55b   :  { %v13712_v62 = vadd.f32 %v4601_v55, %v13385_v37  ;;  %v13715_v6 = vadd.f32 %v5052_v14, %v12847_v34  ;;  %v4770_v34 = vld [vmem:[%s14553_s0 + $0x24d] sm:$0xff] }
 0x55c   :  { %v8588_v29 = vpop.f32.mrf.mxu0  ;;  %v8634_v18 = vpop.f32.mrf.mxu1  ;;  %v4818_v55 = vpack.c.bf16 %v4770_v34, %v4769_v50  ;;  %v5440_v34 = vld [vmem:[%s14553_s0 + $0x1a6] sm:$0xff] }
 0x55d   :  { %14950 = vst [vmem:[#allocation15_spill] sm:$0xff] %v13712_v62  ;;  %v14963_v62 = vld [vmem:[#allocation33_spill] sm:$0xff] }
 0x55e   :  { %v4606_v32 = vpop.f32.mrf.mxu0  ;;  %v5057_v59 = vpop.f32.mrf.mxu1  ;;  %8732 = vmatmul.mubr.msk.bf16.gmra.mxu1 %vm272_vm1, %v4817_v22  ;;  %8854 = vmatmul.mubr.msk.bf16.gmra.mxu0 %vm272_vm1, %v5497_v47 }
 0x55f   :  { %v13723_v40 = vadd.f32 %v4606_v32, %v13396_v8  ;;  %v13726_v37 = vadd.f32 %v5057_v59, %v12856_v10  ;;  %8735 = vmatprep.mubr.msk.bf16.mxu1 %vm8971_vm2, %v14591_v26  ;;  %8857 = vmatprep.mubr.msk.bf16.mxu0 %vm8971_vm2, %v14591_v26  ;;  %v5439_v8 = vld [vmem:[%s14553_s0 + $0x19e] sm:$0xff] }
 0x560   :  { %v8591_v10 = vpop.f32.mrf.mxu0  ;;  %v8637_v12 = vpop.f32.mrf.mxu1  ;;  %v5498_v14 = vpack.c.bf16 %v5439_v8, %v5438_v25 }
 0x561   :  { %14951 = vst [vmem:[#allocation16_spill] sm:$0xff] %v13723_v40  ;;  %v4771_v10 = vld [vmem:[%s14553_s0 + $0x255] sm:$0xff] }
 0x562   :  { %v4609_v43 = vpop.f32.mrf.mxu0  ;;  %v5060_v17 = vpop.f32.mrf.mxu1 }
 0x563   :  { %v13742_v22 = vadd.f32 %v4609_v43, %v13415_v21  ;;  %v13745_v47 = vadd.f32 %v5060_v17, %v12872_v42  ;;  %v4772_v42 = vld [vmem:[%s14553_s0 + $0x25d] sm:$0xff] }
 0x564   :  { %v8592_v29 = vpop.f32.mrf.mxu0  ;;  %v8638_v18 = vpop.f32.mrf.mxu1  ;;  %v4819_v43 = vpack.c.bf16 %v4772_v42, %v4771_v10  ;;  %v5442_v42 = vld [vmem:[%s14553_s0 + $0x1b6] sm:$0xff] }
 0x565   :  { %14952 = vst [vmem:[#allocation17_spill] sm:$0xff] %v13742_v22  ;;  %v14959_v22 = vld [vmem:[#allocation63_spill] sm:$0xff] }
 0x566   :  { %v4614_v32 = vpop.f32.mrf.mxu0  ;;  %v5065_v59 = vpop.f32.mrf.mxu1  ;;  %8736 = vmatmul.mubr.msk.bf16.gmra.mxu1 %vm272_vm1, %v4818_v55  ;;  %8858 = vmatmul.mubr.msk.bf16.gmra.mxu0 %vm272_vm1, %v5498_v14 }
 0x567   :  { %v13753_v50 = vadd.f32 %v4614_v32, %v13426_v31  ;;  %v13756_v21 = vadd.f32 %v5065_v59, %v12881_v36  ;;  %8739 = vmatprep.mubr.msk.bf16.mxu1 %vm8971_vm2, %v14591_v26  ;;  %8861 = vmatprep.mubr.msk.bf16.mxu0 %vm8971_vm2, %v14591_v26  ;;  %v5441_v31 = vld [vmem:[%s14553_s0 + $0x1ae] sm:$0xff]  ;;  %v4773_v59 = vld [vmem:[%s14553_s0 + $0x265] sm:$0xff] }
 0x568   :  { %v8595_v36 = vpop.f32.mrf.mxu0  ;;  %v8641_v25 = vpop.f32.mrf.mxu1  ;;  %v5499_v17 = vpack.c.bf16 %v5441_v31, %v5440_v34 }
 0x569   :  { %14953 = vst [vmem:[#allocation18_spill] sm:$0xff] %v13753_v50 }
 0x56a   :  { %v4617_v8 = vpop.f32.mrf.mxu0  ;;  %v5068_v12 = vpop.f32.mrf.mxu1 }
 0x56b   :  { %v13772_v55 = vadd.f32 %v5068_v12, %v12897_v11  ;;  %v4774_v11 = vld [vmem:[%s14553_s0 + $0x26d] sm:$0xff] }
 0x56c   :  { %v8596_v14 = vpop.f32.mrf.mxu0  ;;  %v8642_v29 = vpop.f32.mrf.mxu1  ;;  %v4820_v8 = vpack.c.bf16 %v4774_v11, %v4773_v59  ;;  %v5444_v11 = vld [vmem:[%s14553_s0 + $0x1c6] sm:$0xff] }
 0x56e   :  { %v5073_v18 = vpop.f32.mrf.mxu1  ;;  %8740 = vmatmul.mubr.msk.bf16.gmra.mxu1 %vm272_vm1, %v4819_v43  ;;  %v5676_v32 = vpop.f32.mrf.mxu0  ;;  %8862 = vmatmul.mubr.msk.bf16.gmra.mxu0 %vm272_vm1, %v5499_v17 }
 0x56f   :  { %v13780_v36 = vadd.f32 %v5073_v18, %v12906_v15  ;;  %v13783_v10 = vadd.f32 %v5676_v32, %v13456_v48  ;;  %8743 = vmatprep.mubr.msk.bf16.mxu1 %vm8971_vm2, %v14591_v26  ;;  %8865 = vmatprep.mubr.msk.bf16.mxu0 %vm8971_vm2, %v14591_v26  ;;  %v5443_v15 = vld [vmem:[%s14553_s0 + $0x1be] sm:$0xff] }
 0x570   :  { %v8645_v48 = vpop.f32.mrf.mxu1  ;;  %v8767_v34 = vpop.f32.mrf.mxu0  ;;  %v5500_v12 = vpack.c.bf16 %v5443_v15, %v5442_v42 }
 0x571   :  { %14954 = vst [vmem:[#allocation19_spill] sm:$0xff] %v13783_v10  ;;  %v4775_v48 = vld [vmem:[%s14553_s0 + $0x275] sm:$0xff] }
 0x572   :  { %v5076_v31 = vpop.f32.mrf.mxu1  ;;  %v5679_v25 = vpop.f32.mrf.mxu0 }
 0x573   :  { %v13799_v43 = vadd.f32 %v5076_v31, %v12922_v51  ;;  %v13802_v17 = vadd.f32 %v5679_v25, %v13475_v56  ;;  %v4776_v56 = vld [vmem:[%s14553_s0 + $0x27d] sm:$0xff] }
 0x574   :  { %v8646_v14 = vpop.f32.mrf.mxu1  ;;  %v8768_v29 = vpop.f32.mrf.mxu0  ;;  %v4821_v31 = vpack.c.bf16 %v4776_v56, %v4775_v48  ;;  %v5446_v56 = vld [vmem:[%s14553_s0 + $0x1d6] sm:$0xff] }
 0x576   :  { %v5081_v18 = vpop.f32.mrf.mxu1  ;;  %8744 = vmatmul.mubr.msk.bf16.gmra.mxu1 %vm272_vm1, %v4820_v8  ;;  %v5684_v32 = vpop.f32.mrf.mxu0  ;;  %8866 = vmatmul.mubr.msk.bf16.gmra.mxu0 %vm272_vm1, %v5500_v12 }
 0x577   :  { %v13810_v59 = vadd.f32 %v5081_v18, %v12931_v27  ;;  %v13813_v51 = vadd.f32 %v5684_v32, %v13486_v0  ;;  %8747 = vmatprep.mubr.msk.bf16.mxu1 %vm8971_vm2, %v14591_v26  ;;  %8869 = vmatprep.mubr.msk.bf16.mxu0 %vm8971_vm2, %v14591_v26  ;;  %v5445_v27 = vld [vmem:[%s14553_s0 + $0x1ce] sm:$0xff] }
 0x578   :  { %v8649_v0 = vpop.f32.mrf.mxu1  ;;  %v8771_v42 = vpop.f32.mrf.mxu0  ;;  %v5501_v25 = vpack.c.bf16 %v5445_v27, %v5444_v11 }
 0x579   :  { %v4777_v0 = vld [vmem:[%s14553_s0 + $0x285] sm:$0xff] }
 0x57a   :  { %v5084_v15 = vpop.f32.mrf.mxu1  ;;  %v5687_v34 = vpop.f32.mrf.mxu0 }
 0x57b   :  { %v13829_v8 = vadd.f32 %v5084_v15, %v12947_v30  ;;  %v13832_v12 = vadd.f32 %v5687_v34, %v13505_v39  ;;  %v4778_v39 = vld [vmem:[%s14553_s0 + $0x28d] sm:$0xff] }
 0x57c   :  { %v8650_v14 = vpop.f32.mrf.mxu1  ;;  %v8772_v29 = vpop.f32.mrf.mxu0  ;;  %v4822_v15 = vpack.c.bf16 %v4778_v39, %v4777_v0  ;;  %v5448_v39 = vld [vmem:[%s14553_s0 + $0x1e6] sm:$0xff] }
 0x57e   :  { %v5089_v18 = vpop.f32.mrf.mxu1  ;;  %8748 = vmatmul.mubr.msk.bf16.gmra.mxu1 %vm272_vm1, %v4821_v31  ;;  %v5692_v32 = vpop.f32.mrf.mxu0  ;;  %8870 = vmatmul.mubr.msk.bf16.gmra.mxu0 %vm272_vm1, %v5501_v25 }
 0x57f   :  { %v13840_v48 = vadd.f32 %v5089_v18, %v12956_v28  ;;  %v13843_v30 = vadd.f32 %v5692_v32, %v13516_v57  ;;  %8751 = vmatprep.mubr.msk.bf16.mxu1 %vm8971_vm2, %v14591_v26  ;;  %8873 = vmatprep.mubr.msk.bf16.mxu0 %vm8971_vm2, %v14591_v26  ;;  %v5447_v28 = vld [vmem:[%s14553_s0 + $0x1de] sm:$0xff] }
 0x580   :  { %v8653_v57 = vpop.f32.mrf.mxu1  ;;  %v8775_v11 = vpop.f32.mrf.mxu0  ;;  %v5502_v34 = vpack.c.bf16 %v5447_v28, %v5446_v56 }
 0x581   :  { %v4779_v57 = vld [vmem:[%s14553_s0 + $0x295] sm:$0xff] }
 0x582   :  { %v5092_v27 = vpop.f32.mrf.mxu1  ;;  %v5695_v42 = vpop.f32.mrf.mxu0 }
 0x583   :  { %v13859_v31 = vadd.f32 %v5092_v27, %v12972_v33  ;;  %v13862_v25 = vadd.f32 %v5695_v42, %v13535_v49  ;;  %v4780_v49 = vld [vmem:[%s14553_s0 + $0x29d] sm:$0xff] }
 0x584   :  { %v8654_v14 = vpop.f32.mrf.mxu1  ;;  %v8776_v29 = vpop.f32.mrf.mxu0  ;;  %v4823_v27 = vpack.c.bf16 %v4780_v49, %v4779_v57 }
 0x586   :  { %v5097_v18 = vpop.f32.mrf.mxu1  ;;  %8752 = vmatmul.mubr.msk.bf16.gmra.mxu1 %vm272_vm1, %v4822_v15  ;;  %v5700_v32 = vpop.f32.mrf.mxu0  ;;  %8874 = vmatmul.mubr.msk.bf16.gmra.mxu0 %vm272_vm1, %v5502_v34 }
 0x587   :  { %v13870_v0 = vadd.f32 %v5097_v18, %v12981_v13  ;;  %v13873_v33 = vadd.f32 %v5700_v32, %v13546_v46  ;;  %8755 = vmatprep.mubr.msk.bf16.mxu1 %vm8971_vm2, %v14591_v26  ;;  %8877 = vmatprep.mubr.msk.bf16.mxu0 %vm8971_vm2, %v14591_v26  ;;  %v5449_v13 = vld [vmem:[%s14553_s0 + $0x1ee] sm:$0xff] }
 0x588   :  { %v8657_v46 = vpop.f32.mrf.mxu1  ;;  %v8779_v56 = vpop.f32.mrf.mxu0  ;;  %v5503_v42 = vpack.c.bf16 %v5449_v13, %v5448_v39 }
 0x58a   :  { %v5100_v28 = vpop.f32.mrf.mxu1  ;;  %v5703_v11 = vpop.f32.mrf.mxu0 }
 0x58b   :  { %v13889_v15 = vadd.f32 %v5100_v28, %v13001_v16  ;;  %v13892_v34 = vadd.f32 %v5703_v11, %v13565_v60  ;;  %v4781_v16 = vld [vmem:[%s14553_s0 + $0x2a5] sm:$0xff]  ;;  %v5450_v60 = vld [vmem:[%s14553_s0 + $0x1f6] sm:$0xff] }
 0x58c   :  { %v8658_v14 = vpop.f32.mrf.mxu1  ;;  %v8780_v29 = vpop.f32.mrf.mxu0  ;;  %v4824_v56 = vpack.c.bf16 %v4781_v16, %v4781_v16 }
 0x58e   :  { %v5105_v18 = vpop.f32.mrf.mxu1  ;;  %8756 = vmatmul.mubr.msk.bf16.gmra.mxu1 %vm272_vm1, %v4823_v27  ;;  %v5708_v32 = vpop.f32.mrf.mxu0  ;;  %8878 = vmatmul.mubr.msk.bf16.gmra.mxu0 %vm272_vm1, %v5503_v42 }
 0x58f   :  { %v13897_v46 = vadd.f32 %v5105_v18, %v13009_v58  ;;  %v13900_v57 = vadd.f32 %v5708_v32, %v13576_v7  ;;  %8759 = vmatprep.mubr.msk.bf16.mxu1 %vm8971_vm2, %v14591_v26  ;;  %8881 = vmatprep.mubr.msk.bf16.mxu0 %vm8971_vm2, %v14591_v26  ;;  %v5451_v58 = vld [vmem:[%s14553_s0 + $0x1fe] sm:$0xff] }
 0x590   :  { %v8661_v7 = vpop.f32.mrf.mxu1  ;;  %v8783_v49 = vpop.f32.mrf.mxu0  ;;  %v5504_v28 = vpack.c.bf16 %v5451_v58, %v5450_v60 }
 0x592   :  { %v5108_v39 = vpop.f32.mrf.mxu1  ;;  %v5711_v13 = vpop.f32.mrf.mxu0 }
 0x593   :  { %v13916_v11 = vadd.f32 %v5108_v39, %v13028_v9  ;;  %v13919_v27 = vadd.f32 %v5711_v13, %v13595_v45  ;;  %v5452_v9 = vld [vmem:[%s14553_s0 + $0x206] sm:$0xff]  ;;  %v5453_v45 = vld [vmem:[%s14553_s0 + $0x20e] sm:$0xff] }
 0x594   :  { %v8662_v42 = vpop.f32.mrf.mxu1  ;;  %v8784_v14 = vpop.f32.mrf.mxu0 }
 0x595   :  { %v14955_v14 = vld [vmem:[#allocation32_spill] sm:$0xff] }
 0x596   :  { %v5113_v29 = vpop.f32.mrf.mxu1  ;;  %8760 = vmatmul.mubr.msk.bf16.gmra.mxu1 %vm272_vm1, %v4824_v56  ;;  %v5716_v18 = vpop.f32.mrf.mxu0  ;;  %8882 = vmatmul.mubr.msk.bf16.gmra.mxu0 %vm272_vm1, %v5504_v28 }
 0x597   :  { %v13924_v32 = vadd.f32 %v5113_v29, %v13039_v61  ;;  %v13927_v16 = vadd.f32 %v5716_v18, %v13606_v1  ;;  %8885 = vmatprep.mubr.msk.bf16.mxu0 %vm8971_vm2, %v14591_v26  ;;  %v5505_v61 = vpack.c.bf16 %v5453_v45, %v5452_v9 }
 0x598   :  { %v8665_v60 = vpop.f32.mrf.mxu1  ;;  %v8787_v58 = vpop.f32.mrf.mxu0 }
 0x59a   :  { %v5116_v7 = vpop.f32.mrf.mxu1  ;;  %v5719_v49 = vpop.f32.mrf.mxu0 }
 0x59b   :  { %v13938_v39 = vadd.f32 %v5116_v7, %v13058_v41  ;;  %v13941_v1 = vadd.f32 %v5719_v49, %v13625_v19  ;;  %v5454_v41 = vld [vmem:[%s14553_s0 + $0x216] sm:$0xff]  ;;  %v5455_v19 = vld [vmem:[%s14553_s0 + $0x21e] sm:$0xff]  ;;  %v14956_v49 = vld [vmem:[#allocation34_spill] sm:$0xff] }
 0x59c   :  { %v8666_v13 = vpop.f32.mrf.mxu1  ;;  %v8788_v56 = vpop.f32.mrf.mxu0  ;;  %v5506_v7 = vpack.c.bf16 %v5455_v19, %v5454_v41  ;;  %v5457_v41 = vld [vmem:[%s14553_s0 + $0x22e] sm:$0xff] }
 0x59e   :  { %v5121_v28 = vpop.f32.mrf.mxu1  ;;  %v5724_v42 = vpop.f32.mrf.mxu0  ;;  %8886 = vmatmul.mubr.msk.bf16.gmra.mxu0 %vm272_vm1, %v5505_v61 }
 0x59f   :  { %v13945_v29 = vadd.f32 %v5121_v28, %v14955_v14  ;;  %v13948_v18 = vadd.f32 %v5724_v42, %v13636_v2  ;;  %8889 = vmatprep.mubr.msk.bf16.mxu0 %vm8971_vm2, %v14591_v26  ;;  %v14957_v14 = vld [vmem:[#allocation36_spill] sm:$0xff] }
 0x5a0   :  { %v8669_v9 = vpop.f32.mrf.mxu1  ;;  %v8791_v45 = vpop.f32.mrf.mxu0 }
 0x5a2   :  { %v5124_v60 = vpop.f32.mrf.mxu1  ;;  %v5727_v58 = vpop.f32.mrf.mxu0 }
 0x5a3   :  { %v13959_v61 = vadd.f32 %v5124_v60, %v14956_v49  ;;  %v13962_v2 = vadd.f32 %v5727_v58, %v13655_v23  ;;  %v5456_v23 = vld [vmem:[%s14553_s0 + $0x226] sm:$0xff] }
 0x5a4   :  { %v8670_v13 = vpop.f32.mrf.mxu1  ;;  %v8792_v56 = vpop.f32.mrf.mxu0  ;;  %v14958_v49 = vld [vmem:[#allocation62_spill] sm:$0xff] }
 0x5a6   :  { %v5129_v28 = vpop.f32.mrf.mxu1  ;;  %v5732_v42 = vpop.f32.mrf.mxu0  ;;  %8890 = vmatmul.mubr.msk.bf16.gmra.mxu0 %vm272_vm1, %v5506_v7  ;;  %v5507_v7 = vpack.c.bf16 %v5457_v41, %v5456_v23  ;;  %v5459_v23 = vld [vmem:[%s14553_s0 + $0x23e] sm:$0xff] }
 0x5a7   :  { %v13966_v50 = vadd.f32 %v5129_v28, %v14957_v14  ;;  %v13969_v9 = vadd.f32 %v5732_v42, %v13666_v63  ;;  %8893 = vmatprep.mubr.msk.bf16.mxu0 %vm8971_vm2, %v14591_v26 }
 0x5a8   :  { %v8673_v19 = vpop.f32.mrf.mxu1  ;;  %v8795_v45 = vpop.f32.mrf.mxu0 }
 0x5aa   :  { %v5132_v60 = vpop.f32.mrf.mxu1  ;;  %v5735_v58 = vpop.f32.mrf.mxu0 }
 0x5ab   :  { %v13980_v13 = vadd.f32 %v5132_v60, %v14958_v49  ;;  %v13983_v63 = vadd.f32 %v5735_v58, %v13685_v52  ;;  %v5458_v52 = vld [vmem:[%s14553_s0 + $0x236] sm:$0xff] }
 0x5ac   :  { %v8674_v56 = vpop.f32.mrf.mxu1  ;;  %v8796_v28 = vpop.f32.mrf.mxu0 }
 0x5ae   :  { %v5137_v42 = vpop.f32.mrf.mxu1  ;;  %v5740_v14 = vpop.f32.mrf.mxu0  ;;  %8894 = vmatmul.mubr.msk.bf16.gmra.mxu0 %vm272_vm1, %v5507_v7  ;;  %v14961_v7 = vld [vmem:[#allocation31_spill] sm:$0xff] }
 0x5af   :  { %v13987_v40 = vadd.f32 %v5137_v42, %v14959_v22  ;;  %v13990_v19 = vadd.f32 %v5740_v14, %v13696_v3  ;;  %8897 = vmatprep.mubr.msk.bf16.mxu0 %vm8971_vm2, %v14591_v26  ;;  %v5508_v22 = vpack.c.bf16 %v5459_v23, %v5458_v52  ;;  %v5461_v52 = vld [vmem:[%s14553_s0 + $0x24e] sm:$0xff] }
 0x5b0   :  { %v8677_v41 = vpop.f32.mrf.mxu1  ;;  %v8799_v45 = vpop.f32.mrf.mxu0 }
 0x5b1   :  { %14960 = vst [vmem:[#allocation20_spill] sm:$0xff] %v13990_v19 }
 0x5b2   :  { %v5140_v60 = vpop.f32.mrf.mxu1  ;;  %v5743_v58 = vpop.f32.mrf.mxu0 }
 0x5b3   :  { %v14001_v49 = vadd.f32 %v5140_v60, %v14961_v7  ;;  %v14004_v3 = vadd.f32 %v5743_v58, %v13715_v6  ;;  %v5460_v6 = vld [vmem:[%s14553_s0 + $0x246] sm:$0xff] }
 0x5b4   :  { %v8678_v56 = vpop.f32.mrf.mxu1  ;;  %v8800_v28 = vpop.f32.mrf.mxu0 }
 0x5b5   :  { %14962 = vst [vmem:[#allocation21_spill] sm:$0xff] %v14001_v49 }
 0x5b6   :  { %v5145_v42 = vpop.f32.mrf.mxu1  ;;  %v5748_v14 = vpop.f32.mrf.mxu0  ;;  %8898 = vmatmul.mubr.msk.bf16.gmra.mxu0 %vm272_vm1, %v5508_v22  ;;  %v14965_v22 = vld [vmem:[#allocation35_spill] sm:$0xff] }
 0x5b7   :  { %v14008_v24 = vadd.f32 %v5145_v42, %v14963_v62  ;;  %v14011_v41 = vadd.f32 %v5748_v14, %v13726_v37  ;;  %8901 = vmatprep.mubr.msk.bf16.mxu0 %vm8971_vm2, %v14591_v26  ;;  %v5509_v62 = vpack.c.bf16 %v5461_v52, %v5460_v6  ;;  %v5463_v6 = vld [vmem:[%s14553_s0 + $0x25e] sm:$0xff] }
 0x5b8   :  { %v8681_v23 = vpop.f32.mrf.mxu1  ;;  %v8803_v45 = vpop.f32.mrf.mxu0 }
 0x5b9   :  { %14964 = vst [vmem:[#allocation22_spill] sm:$0xff] %v14008_v24  ;;  %v14987_v24 = vld [vmem:[#allocation47_spill] sm:$0xff] }
 0x5ba   :  { %v5148_v60 = vpop.f32.mrf.mxu1  ;;  %v5751_v58 = vpop.f32.mrf.mxu0 }
 0x5bb   :  { %v14022_v7 = vadd.f32 %v5148_v60, %v14965_v22  ;;  %v14025_v37 = vadd.f32 %v5751_v58, %v13745_v47  ;;  %v5462_v47 = vld [vmem:[%s14553_s0 + $0x256] sm:$0xff] }
 0x5bc   :  { %v8682_v56 = vpop.f32.mrf.mxu1  ;;  %v8804_v28 = vpop.f32.mrf.mxu0 }
 0x5bd   :  { %14966 = vst [vmem:[#allocation23_spill] sm:$0xff] %v14022_v7 }
 0x5be   :  { %v5153_v42 = vpop.f32.mrf.mxu1  ;;  %v5756_v14 = vpop.f32.mrf.mxu0  ;;  %8902 = vmatmul.mubr.msk.bf16.gmra.mxu0 %vm272_vm1, %v5509_v62  ;;  %v14969_v62 = vld [vmem:[#allocation38_spill] sm:$0xff] }
 0x5bf   :  { %v14029_v53 = vadd.f32 %v5153_v42, %v14967_v38  ;;  %v14032_v23 = vadd.f32 %v5756_v14, %v13756_v21  ;;  %8905 = vmatprep.mubr.msk.bf16.mxu0 %vm8971_vm2, %v14591_v26  ;;  %v5510_v38 = vpack.c.bf16 %v5463_v6, %v5462_v47  ;;  %v14971_v14 = vld [vmem:[#allocation39_spill] sm:$0xff]  ;;  %v5464_v47 = vld [vmem:[%s14553_s0 + $0x266] sm:$0xff] }
 0x5c0   :  { %v8685_v52 = vpop.f32.mrf.mxu1  ;;  %v8807_v45 = vpop.f32.mrf.mxu0  ;;  %v5465_v6 = vld [vmem:[%s14553_s0 + $0x26e] sm:$0xff] }
 0x5c1   :  { %14968 = vst [vmem:[#allocation61_spill] sm:$0xff] %v14029_v53  ;;  %v14983_v53 = vld [vmem:[#allocation45_spill] sm:$0xff] }
 0x5c2   :  { %v5156_v60 = vpop.f32.mrf.mxu1  ;;  %v14042_v58 = vpop.f32.mrf.mxu0 }
 0x5c3   :  { %v14045_v21 = vadd.f32 %v5156_v60, %v14969_v62 }
 0x5c4   :  { %v8686_v22 = vpop.f32.mrf.mxu1  ;;  %v8808_v56 = vpop.f32.mrf.mxu0 }
 0x5c5   :  { %14970 = vst [vmem:[#allocation24_spill] sm:$0xff] %v14045_v21  ;;  %v14973_v22 = vld [vmem:[#allocation40_spill] sm:$0xff]  ;;  %v14979_v21 = vld [vmem:[#allocation43_spill] sm:$0xff] }
 0x5c6   :  { %v5161_v28 = vpop.f32.mrf.mxu1  ;;  %v14047_v42 = vpop.f32.mrf.mxu0  ;;  %8906 = vmatmul.mubr.msk.bf16.gmra.mxu0 %vm272_vm1, %v5510_v38  ;;  %v5511_v38 = vpack.c.bf16 %v5465_v6, %v5464_v47  ;;  %v5466_v47 = vld [vmem:[%s14553_s0 + $0x276] sm:$0xff]  ;;  %v5467_v6 = vld [vmem:[%s14553_s0 + $0x27e] sm:$0xff] }
 0x5c7   :  { %v14051_v5 = vadd.f32 %v5161_v28, %v14971_v14  ;;  %8909 = vmatprep.mubr.msk.bf16.mxu0 %vm8971_vm2, %v14591_v26 }
 0x5c8   :  { %v8689_v52 = vpop.f32.mrf.mxu1  ;;  %v8811_v45 = vpop.f32.mrf.mxu0 }
 0x5c9   :  { %14972 = vst [vmem:[#allocation25_spill] sm:$0xff] %v14051_v5 }
 0x5ca   :  { %v5164_v60 = vpop.f32.mrf.mxu1  ;;  %v14061_v62 = vpop.f32.mrf.mxu0 }
 0x5cb   :  { %v14064_v56 = vadd.f32 %v5164_v60, %v14973_v22 }
 0x5cc   :  { %v8690_v28 = vpop.f32.mrf.mxu1  ;;  %v8812_v14 = vpop.f32.mrf.mxu0 }
 0x5cd   :  { %14974 = vst [vmem:[#allocation26_spill] sm:$0xff] %v14064_v56  ;;  %v14977_v28 = vld [vmem:[#allocation42_spill] sm:$0xff] }
 0x5ce   :  { %v5169_v54 = vpop.f32.mrf.mxu1  ;;  %v14066_v44 = vpop.f32.mrf.mxu0  ;;  %8910 = vmatmul.mubr.msk.bf16.gmra.mxu0 %vm272_vm1, %v5511_v38  ;;  %v5512_v38 = vpack.c.bf16 %v5467_v6, %v5466_v47  ;;  %v5468_v47 = vld [vmem:[%s14553_s0 + $0x286] sm:$0xff]  ;;  %v5469_v6 = vld [vmem:[%s14553_s0 + $0x28e] sm:$0xff] }
 0x5cf   :  { %v14070_v5 = vadd.f32 %v5169_v54, %v14975_v4  ;;  %8913 = vmatprep.mubr.msk.bf16.mxu0 %vm8971_vm2, %v14591_v26 }
 0x5d0   :  { %v8693_v52 = vpop.f32.mrf.mxu1  ;;  %v8815_v45 = vpop.f32.mrf.mxu0 }
 0x5d1   :  { %14976 = vst [vmem:[#allocation27_spill] sm:$0xff] %v14070_v5 }
 0x5d2   :  { %v5172_v60 = vpop.f32.mrf.mxu1  ;;  %v14080_v22 = vpop.f32.mrf.mxu0 }
 0x5d3   :  { %v14083_v4 = vadd.f32 %v5172_v60, %v14977_v28 }
 0x5d4   :  { %v8694_v54 = vpop.f32.mrf.mxu1  ;;  %v8816_v14 = vpop.f32.mrf.mxu0 }
 0x5d5   :  { %14978 = vst [vmem:[#allocation28_spill] sm:$0xff] %v14083_v4  ;;  %v5513_v54 = vpack.c.bf16 %v5469_v6, %v5468_v47  ;;  %v5471_v47 = vld [vmem:[%s14553_s0 + $0x29e] sm:$0xff] }
 0x5d6   :  { %v5177_v5 = vpop.f32.mrf.mxu1  ;;  %v14085_v56 = vpop.f32.mrf.mxu0  ;;  %8914 = vmatmul.mubr.msk.bf16.gmra.mxu0 %vm272_vm1, %v5512_v38  ;;  %v14981_v38 = vld [vmem:[#allocation44_spill] sm:$0xff] }
 0x5d7   :  { %v14089_v35 = vadd.f32 %v5177_v5, %v14979_v21  ;;  %8917 = vmatprep.mubr.msk.bf16.mxu0 %vm8971_vm2, %v14591_v26 }
 0x5d8   :  { %v8697_v52 = vpop.f32.mrf.mxu1  ;;  %v8819_v45 = vpop.f32.mrf.mxu0 }
 0x5d9   :  { %14980 = vst [vmem:[#allocation29_spill] sm:$0xff] %v14089_v35  ;;  %v5470_v52 = vld [vmem:[%s14553_s0 + $0x296] sm:$0xff] }
 0x5da   :  { %v5180_v60 = vpop.f32.mrf.mxu1  ;;  %v5783_v28 = vpop.f32.mrf.mxu0 }
 0x5db   :  { %v14100_v14 = vadd.f32 %v5180_v60, %v14981_v38 }
 0x5dc   :  { %v8698_v5 = vpop.f32.mrf.mxu1  ;;  %v8820_v21 = vpop.f32.mrf.mxu0 }
 0x5dd   :  { %14982 = vst [vmem:[#allocation30_spill] sm:$0xff] %v14100_v14  ;;  %v5514_v5 = vpack.c.bf16 %v5471_v47, %v5470_v52  ;;  %v8972_v52 = vmov 1983009808  }
 0x5de   :  { %v5185_v35 = vpop.f32.mrf.mxu1  ;;  %v5788_v4 = vpop.f32.mrf.mxu0  ;;  %8918 = vmatmul.mubr.msk.bf16.gmra.mxu0 %vm272_vm1, %v5513_v54  ;;  %v14985_v54 = vld [vmem:[#allocation46_spill] sm:$0xff]  ;;  %v6258_v47 = vunpack.c.l.s4 %v8972_v52 }
 0x5df   :  { %v14104_v7 = vadd.f32 %v5185_v35, %v14983_v53  ;;  %8921 = vmatprep.mubr.msk.bf16.mxu0 %vm8971_vm2, %v14591_v26 }
 0x5e0   :  { %v8701_v6 = vpop.f32.mrf.mxu1  ;;  %v8823_v45 = vpop.f32.mrf.mxu0 }
 0x5e1   :  { %14984 = vst [vmem:[#allocation32_spill] sm:$0xff] %v14104_v7  ;;  %v5472_v6 = vld [vmem:[%s14553_s0 + $0x2a6] sm:$0xff] }
 0x5e2   :  { %v5188_v60 = vpop.f32.mrf.mxu1  ;;  %v5791_v38 = vpop.f32.mrf.mxu0  ;;  %v5515_v10 = vpack.c.bf16 %v5472_v6, %v5472_v6  ;;  %v14142_v6 = vld [vmem:[%s14556_s3] sm:$0xff] }
 0x5e3   :  { %v14115_v21 = vadd.f32 %v5188_v60, %v14985_v54  ;;  %v6260_v54 = vlaneseq }
 0x5e4   :  { %v8702_v35 = vpop.f32.mrf.mxu1  ;;  %v8824_v53 = vpop.f32.mrf.mxu0 }
 0x5e5   :  { %14986 = vst [vmem:[#allocation34_spill] sm:$0xff] %v14115_v21  ;;  %v6259_v53 = vunpack.c.0.s8 %v6258_v47 }
 0x5e6   :  { %v5193_v7 = vpop.f32.mrf.mxu1  ;;  %v5796_v14 = vpop.f32.mrf.mxu0  ;;  %8922 = vmatmul.mubr.msk.bf16.gmra.mxu0 %vm272_vm1, %v5514_v5 }
 0x5e7   :  { %v14119_v49 = vadd.f32 %v5193_v7, %v14987_v24  ;;  %8925 = vmatprep.mubr.msk.bf16.mxu0 %vm8971_vm2, %v14591_v26  ;;  %v6032_v35 = vadd.f32 %v5796_v14, %v13897_v46  ;;  %v6261_v24 = vshrl.u32 %v6260_v54, 7  ;;  %v14130_v7 = vld [vmem:[%s14555_s2] ss:$0 sm:$0xff]  ;;  %v6031_v26 = vadd.f32 %v5791_v38, %v13889_v15 }
 0x5e8   :  { %v8705_v45 = vpop.f32.mrf.mxu1  ;;  %v8827_v60 = vpop.f32.mrf.mxu0  ;;  %v6105_v46 = vadd.f32 %v14130_v7, %v13983_v63  ;;  %v6029_v63 = vadd.f32 %v5783_v28, %v13859_v31  ;;  %v6103_v31 = vadd.f32 %v14130_v7, %v13962_v2  ;;  %v6027_v2 = vadd.f32 %v14080_v22, %v13829_v8 }
 0x5e9   :  { %14988 = vst [vmem:[#allocation36_spill] sm:$0xff] %v14119_v49  ;;  %v14989_v49 = vld [vmem:[#allocation48_spill] sm:$0xff]  ;;  %v14144_v45 = vsub.s32 %v6259_v53, %v6261_v24  ;;  %v6030_v60 = vadd.f32 %v5788_v4, %v13870_v0  ;;  %v6120_v15 = vadd.f32 %v14130_v7, %v6032_v35  ;;  %v6119_v53 = vadd.f32 %v14130_v7, %v6031_v26  ;;  %v14990_v4 = vld [vmem:[#allocation49_spill] sm:$0xff] }
 0x5ea   :  { %v5196_v21 = vpop.f32.mrf.mxu1  ;;  %v5799_v5 = vpop.f32.mrf.mxu0  ;;  %v6026_v22 = vadd.f32 %v14066_v44, %v13810_v59  ;;  %v6099_v59 = vadd.f32 %v14130_v7, %v13919_v27 }
 0x5eb   :  { %v14134_v19 = vadd.f32 %v5196_v21, %v14989_v49  ;;  %v6033_v52 = vadd.f32 %v5799_v5, %v13916_v11  ;;  %v6104_v11 = vadd.f32 %v14130_v7, %v13969_v9  ;;  %v14155_v54 = vrot.slane %v14142_v6, %v14144_v45 }
 0x5ec   :  { %v8706_v14 = vpop.f32.mrf.mxu1  ;;  %v8828_v47 = vpop.f32.mrf.mxu0  ;;  %v6186_v9 = vmax.f32 %v6105_v46, 0.0  ;;  %v6118_v26 = vadd.f32 %v14130_v7, %v6030_v60  ;;  %v6184_v60 = vmax.f32 %v6103_v31, 0.0  ;;  %v6115_v31 = vadd.f32 %v14130_v7, %v6027_v2 }
 0x5ed   :  { %v6121_v49 = vadd.f32 %v14130_v7, %v6033_v52  ;;  %v6028_v52 = vadd.f32 %v14085_v56, %v13840_v48  ;;  %v6201_v14 = vmax.f32 %v6120_v15, 0.0  ;;  %v6185_v47 = vmax.f32 %v6104_v11, 0.0 }
 0x5ee   :  { %v5201_v38 = vpop.f32.mrf.mxu1  ;;  %v5804_v21 = vpop.f32.mrf.mxu0  ;;  %8926 = vmatmul.mubr.msk.bf16.gmra.mxu0 %vm272_vm1, %v5515_v10  ;;  %v6271_v10 = vcombine.high %v14155_v54, %v14155_v54 }
 0x5ef   :  { %v6202_v0 = vmax.f32 %v6121_v49, 0.0  ;;  %v14159_v35 = vadd.f32 %v5201_v38, %v14990_v4  ;;  %v14162_v5 = vadd.f32 %v5804_v21, %v13924_v32  ;;  %v6102_v32 = vadd.f32 %v14130_v7, %v13948_v18  ;;  %v14991_v4 = vld [vmem:[#allocation50_spill] sm:$0xff] }
 0x5f0   :  { %v8709_v28 = vpop.f32.mrf.mxu1  ;;  %v8831_v24 = vpop.f32.mrf.mxu0  ;;  %6353 = vmatprep.mubr.f32.mxu1 %v6271_v10  ;;  %v6117_v38 = vadd.f32 %v14130_v7, %v6029_v63  ;;  %v6200_v21 = vmax.f32 %v6119_v53, 0.0  ;;  %v6101_v18 = vadd.f32 %v14130_v7, %v13941_v1  ;;  %v6116_v11 = vadd.f32 %v14130_v7, %v6028_v52 }
 0x5f1   :  { %7360 = vmatprep.subr.mxu1 %v6202_v0  ;;  %v6199_v63 = vmax.f32 %v6118_v26, 0.0  ;;  %v6100_v53 = vadd.f32 %v14130_v7, %v13927_v16  ;;  %v6025_v0 = vadd.f32 %v14061_v62, %v13799_v43  ;;  %v14992_v24 = vld [vmem:[#allocation51_spill] sm:$0xff]  ;;  %v6024_v43 = vadd.f32 %v14047_v42, %v13780_v36 }
 0x5f2   :  { %v5204_v46 = vpop.f32.mrf.mxu1  ;;  %v5807_v49 = vpop.f32.mrf.mxu0  ;;  %7361 = vmatpush3.msra.mxu1 %v6186_v9  ;;  %v6198_v28 = vmax.f32 %v6117_v38, 0.0  ;;  %v6182_v16 = vmax.f32 %v6101_v18, 0.0  ;;  %v6114_v62 = vadd.f32 %v14130_v7, %v6026_v22  ;;  %v6180_v42 = vmax.f32 %v6099_v59, 0.0  ;;  %v14993_v22 = vld [vmem:[#allocation52_spill] sm:$0xff]  ;;  %v14994_v59 = vld [vmem:[#allocation53_spill] sm:$0xff] }
 0x5f3   :  { %v14177_v48 = vadd.f32 %v5204_v46, %v14991_v4  ;;  %v14180_v56 = vadd.f32 %v5807_v49, %v13938_v39  ;;  %7362 = vmatprep.subr.mxu1 %v6201_v14  ;;  %v6183_v39 = vmax.f32 %v6102_v32, 0.0  ;;  %v6197_v14 = vmax.f32 %v6116_v11, 0.0 }
 0x5f4   :  { %v8710_v15 = vpop.f32.mrf.mxu1  ;;  %v8832_v8 = vpop.f32.mrf.mxu0  ;;  %7363 = vmatpush3.msra.mxu1 %v6185_v47  ;;  %v6098_v32 = vadd.f32 %v14130_v7, %v13900_v57  ;;  %v6023_v47 = vadd.f32 %v14042_v58, %v13772_v55  ;;  %v6113_v46 = vadd.f32 %v14130_v7, %v6025_v0  ;;  %v6196_v49 = vmax.f32 %v6115_v31, 0.0 }
 0x5f5   :  { %7364 = vmatprep.subr.mxu1 %v6200_v21  ;;  %v6097_v57 = vadd.f32 %v14130_v7, %v13892_v34  ;;  %v6112_v55 = vadd.f32 %v14130_v7, %v6024_v43  ;;  %v6195_v58 = vmax.f32 %v6114_v62, 0.0  ;;  %v6096_v18 = vadd.f32 %v14130_v7, %v13873_v33 }
 0x5f6   :  { %v5209_v9 = vpop.f32.mrf.mxu1  ;;  %v5812_v1 = vpop.f32.mrf.mxu0  ;;  %7365 = vmatpush3.msra.mxu1 %v6184_v60  ;;  %v6194_v8 = vmax.f32 %v6113_v46, 0.0  ;;  %v6110_v0 = vadd.f32 %v14130_v7, %v14032_v23  ;;  %v6093_v23 = vadd.f32 %v14130_v7, %v13832_v12  ;;  %v6108_v62 = vadd.f32 %v14130_v7, %v14011_v41 }
 0x5f7   :  { %v14193_v10 = vadd.f32 %v5209_v9, %v14992_v24  ;;  %v14196_v44 = vadd.f32 %v5812_v1, %v13945_v29  ;;  %7366 = vmatprep.subr.mxu1 %v6199_v63  ;;  %v6181_v29 = vmax.f32 %v6100_v53, 0.0  ;;  %v6095_v63 = vadd.f32 %v14130_v7, %v13862_v25 }
 0x5f8   :  { %v8713_v52 = vpop.f32.mrf.mxu1  ;;  %v8835_v26 = vpop.f32.mrf.mxu0  ;;  %7367 = vmatpush3.msra.mxu1 %v6183_v39  ;;  %v6178_v53 = vmax.f32 %v6097_v57, 0.0  ;;  %v6193_v9 = vmax.f32 %v6112_v55, 0.0  ;;  %v6094_v1 = vadd.f32 %v14130_v7, %v13843_v30  ;;  %v6177_v31 = vmax.f32 %v6096_v18, 0.0 }
 0x5f9   :  { %7368 = vmatprep.subr.mxu1 %v6198_v28  ;;  %v6109_v24 = vadd.f32 %v14130_v7, %v14025_v37  ;;  %v6176_v26 = vmax.f32 %v6095_v63, 0.0  ;;  %v6092_v37 = vadd.f32 %v14130_v7, %v13813_v51  ;;  %v6091_v41 = vadd.f32 %v14130_v7, %v13802_v17 }
 0x5fa   :  { %v5212_v2 = vpop.f32.mrf.mxu1  ;;  %v5815_v27 = vpop.f32.mrf.mxu0  ;;  %7369 = vmatpush3.msra.mxu1 %v6182_v16 }
 0x5fb   :  { %v14209_v38 = vadd.f32 %v5212_v2, %v13418_v20  ;;  %v14212_v36 = vadd.f32 %v5815_v27, %v13959_v61  ;;  %7370 = vmatprep.subr.mxu1 %v6197_v14  ;;  %v6179_v20 = vmax.f32 %v6098_v32, 0.0  ;;  %v6111_v61 = vadd.f32 %v14130_v7, %v6023_v47  ;;  %v14995_v2 = vld [vmem:[#allocation54_spill] sm:$0xff] }
 0x5fc   :  { %v8714_v21 = vpop.f32.mrf.mxu1  ;;  %v8836_v4 = vpop.f32.mrf.mxu0  ;;  %7371 = vmatpush3.msra.mxu1 %v6181_v29  ;;  %v6191_v14 = vmax.f32 %v6110_v0, 0.0  ;;  %v6175_v32 = vmax.f32 %v6094_v1, 0.0  ;;  %v6107_v47 = vadd.f32 %v14130_v7, %v14004_v3  ;;  %v6190_v12 = vmax.f32 %v6109_v24, 0.0  ;;  %v14997_v3 = vld [vmem:[#allocation19_spill] sm:$0xff] }
 0x5fd   :  { %7372 = vmatprep.subr.mxu1 %v6196_v49  ;;  %v6192_v25 = vmax.f32 %v6111_v61, 0.0  ;;  %v6174_v49 = vmax.f32 %v6093_v23, 0.0  ;;  %v6189_v4 = vmax.f32 %v6108_v62, 0.0  ;;  %v6090_v55 = vadd.f32 %v14130_v7, %v14997_v3  ;;  %v14999_v61 = vld [vmem:[#allocation21_spill] sm:$0xff] }
 0x5fe   :  { %v5217_v60 = vpop.f32.mrf.mxu1  ;;  %v5820_v15 = vpop.f32.mrf.mxu0  ;;  %7373 = vmatpush3.msra.mxu1 %v6180_v42  ;;  %v14996_v42 = vld [vmem:[#allocation20_spill] sm:$0xff]  ;;  %v6188_v17 = vmax.f32 %v6107_v47, 0.0 }
 0x5ff   :  { %v14221_v34 = vadd.f32 %v5217_v60, %v14993_v22  ;;  %v14224_v11 = vadd.f32 %v5820_v15, %v13966_v50  ;;  %7374 = vmatprep.subr.mxu1 %v6195_v58  ;;  %v6106_v21 = vadd.f32 %v14130_v7, %v14996_v42  ;;  %v6173_v58 = vmax.f32 %v6092_v37, 0.0  ;;  %v14998_v60 = vld [vmem:[#allocation55_spill] sm:$0xff] }
 0x600   :  { %v8717_v39 = vpop.f32.mrf.mxu1  ;;  %v8839_v33 = vpop.f32.mrf.mxu0  ;;  %7375 = vmatpush3.msra.mxu1 %v6179_v20  ;;  %v6256_v20 = vcombine.high %v14142_v6, %v14142_v6  ;;  %v6172_v22 = vmax.f32 %v6091_v41, 0.0  ;;  %v6171_v0 = vmax.f32 %v6090_v55, 0.0 }
 0x601   :  { %7376 = vmatprep.subr.mxu1 %v6194_v8  ;;  %v6187_v33 = vmax.f32 %v6106_v21, 0.0  ;;  %v15007_v21 = vld [vmem:[#allocation24_spill] sm:$0xff] }
 0x602   :  { %v5220_v28 = vpop.f32.mrf.mxu1  ;;  %v5823_v50 = vpop.f32.mrf.mxu0  ;;  %7377 = vmatpush3.msra.mxu1 %v6178_v53  ;;  %v14269_v39 = vrot.slane %v6256_v20, %v14144_v45 }
 0x603   :  { %v14235_v16 = vadd.f32 %v5220_v28, %v14994_v59  ;;  %v14238_v52 = vadd.f32 %v5823_v50, %v13980_v13  ;;  %7378 = vmatprep.subr.mxu1 %v6193_v9  ;;  %v15001_v50 = vld [vmem:[#allocation22_spill] sm:$0xff] }
 0x604   :  { %v8718_v30 = vpop.f32.mrf.mxu1  ;;  %v8840_v43 = vpop.f32.mrf.mxu0  ;;  %7379 = vmatpush3.msra.mxu1 %v6177_v31  ;;  %v6272_v1 = vcombine.high %v14269_v39, %v14269_v39  ;;  %v15000_v31 = vld [vmem:[#allocation56_spill] sm:$0xff] }
 0x605   :  { %7380 = vmatprep.subr.mxu1 %v6192_v25  ;;  %v15003_v43 = vld [vmem:[#allocation23_spill] sm:$0xff] }
 0x606   :  { %v5225_v29 = vpop.f32.mrf.mxu1  ;;  %v5828_v13 = vpop.f32.mrf.mxu0  ;;  %7381 = vmatpush3.msra.mxu1 %v6176_v26  ;;  %v15002_v26 = vld [vmem:[#allocation57_spill] sm:$0xff] }
 0x607   :  { %v14249_v27 = vadd.f32 %v5225_v29, %v14995_v2  ;;  %v14252_v46 = vadd.f32 %v5828_v13, %v13987_v40  ;;  %7382 = vmatprep.subr.mxu1 %v6191_v14  ;;  %v15004_v13 = vld [vmem:[#allocation58_spill] sm:$0xff] }
 0x608   :  { %v8721_v51 = vpop.f32.mrf.mxu1  ;;  %v8843_v57 = vpop.f32.mrf.mxu0  ;;  %7383 = vmatpush3.msra.mxu1 %v6175_v32 }
 0x609   :  { %7384 = vmatprep.subr.mxu1 %v6190_v12  ;;  %v15005_v12 = vld [vmem:[#allocation61_spill] sm:$0xff]  ;;  %v15006_v57 = vld [vmem:[#allocation59_spill] sm:$0xff] }
 0x60a   :  { %v5228_v18 = vpop.f32.mrf.mxu1  ;;  %v5831_v40 = vpop.f32.mrf.mxu0  ;;  %7385 = vmatpush3.msra.mxu1 %v6174_v49 }
 0x60b   :  { %v14263_v15 = vadd.f32 %v5228_v18, %v14998_v60  ;;  %v14266_v8 = vadd.f32 %v5831_v40, %v14999_v61  ;;  %7386 = vmatprep.subr.mxu1 %v6189_v4  ;;  %v15008_v40 = vld [vmem:[#allocation5_spill] sm:$0xff] }
 0x60c   :  { %v8722_v63 = vpop.f32.mrf.mxu1  ;;  %v8844_v53 = vpop.f32.mrf.mxu0  ;;  %7387 = vmatpush3.msra.mxu1 %v6173_v58 }
 0x60d   :  { %7388 = vmatprep.subr.mxu1 %v6188_v17  ;;  %v15009_v17 = vld [vmem:[#allocation25_spill] sm:$0xff] }
 0x60e   :  { %v5233_v9 = vpop.f32.mrf.mxu1  ;;  %v5836_v6 = vpop.f32.mrf.mxu0  ;;  %7389 = vmatpush3.msra.mxu1 %v6172_v22 }
 0x60f   :  { %v14274_v28 = vadd.f32 %v5233_v9, %v15000_v31  ;;  %v14277_v24 = vadd.f32 %v5836_v6, %v15001_v50  ;;  %7390 = vmatprep.subr.mxu1 %v6187_v33  ;;  %v15010_v33 = vld [vmem:[#allocation6_spill] sm:$0xff] }
 0x610   :  { %v8725_v25 = vpop.f32.mrf.mxu1  ;;  %v8847_v59 = vpop.f32.mrf.mxu0  ;;  %7391 = vmatpush3.msra.mxu1 %v6171_v0  ;;  %v15011_v9 = vld [vmem:[#allocation26_spill] sm:$0xff] }
 0x611   :  { %6354 = vmatmul.mubr.f32.vlgmr.msra.gmra.mxu1 %v14155_v54  ;;  %v15012_v59 = vld [vmem:[#allocation7_spill] sm:$0xff] }
 0x612   :  { %v5236_v45 = vpop.f32.mrf.mxu1  ;;  %v5839_v23 = vpop.f32.mrf.mxu0  ;;  %6423 = vmatprep.mubr.f32.mxu1 %v6272_v1 }
 0x613   :  { %v14281_v30 = vadd.f32 %v5236_v45, %v15002_v26  ;;  %v14284_v62 = vadd.f32 %v5839_v23, %v15003_v43  ;;  %v15013_v23 = vld [vmem:[#allocation27_spill] sm:$0xff] }
 0x614   :  { %v8726_v14 = vpop.f32.mrf.mxu1  ;;  %v8848_v37 = vpop.f32.mrf.mxu0 }
 0x616   :  { %v5241_v32 = vpop.f32.mrf.mxu1  ;;  %v5844_v29 = vpop.f32.mrf.mxu0 }
 0x617   :  { %v14287_v47 = vadd.f32 %v5241_v32, %v15004_v13  ;;  %v14290_v2 = vadd.f32 %v5844_v29, %v15005_v12  ;;  %v15014_v29 = vld [vmem:[#allocation8_spill] sm:$0xff] }
 0x618   :  { %v8729_v54 = vpop.f32.mrf.mxu1  ;;  %v8851_v41 = vpop.f32.mrf.mxu0  ;;  %v15016_v12 = vld [vmem:[#allocation28_spill] sm:$0xff] }
 0x61a   :  { %v5244_v49 = vpop.f32.mrf.mxu1  ;;  %v5847_v51 = vpop.f32.mrf.mxu0 }
 0x61b   :  { %v14293_v42 = vadd.f32 %v5244_v49, %v15006_v57  ;;  %v14296_v4 = vadd.f32 %v5847_v51, %v15007_v21  ;;  %v15017_v21 = vld [vmem:[#allocation9_spill] sm:$0xff] }
 0x61c   :  { %v8730_v3 = vpop.f32.mrf.mxu1  ;;  %v8852_v55 = vpop.f32.mrf.mxu0 }
 0x61d   :  { %v15019_v55 = vld [vmem:[#allocation29_spill] sm:$0xff] }
 0x61e   :  { %v5249_v58 = vpop.f32.mrf.mxu1  ;;  %v5852_v18 = vpop.f32.mrf.mxu0 }
 0x61f   :  { %v14299_v20 = vadd.f32 %v5249_v58, %v15008_v40  ;;  %v14302_v60 = vadd.f32 %v5852_v18, %v15009_v17 }
 0x620   :  { %v8733_v61 = vpop.f32.mrf.mxu1  ;;  %v8855_v22 = vpop.f32.mrf.mxu0 }
 0x621   :  { %v15020_v22 = vld [vmem:[#allocation10_spill] sm:$0xff] }
 0x622   :  { %v5252_v63 = vpop.f32.mrf.mxu1  ;;  %v5855_v53 = vpop.f32.mrf.mxu0 }
 0x623   :  { %v14305_v0 = vadd.f32 %v5252_v63, %v15010_v33  ;;  %v14308_v6 = vadd.f32 %v5855_v53, %v15011_v9  ;;  %v15022_v53 = vld [vmem:[#allocation30_spill] sm:$0xff] }
 0x624   :  { %v8734_v1 = vpop.f32.mrf.mxu1  ;;  %v8856_v31 = vpop.f32.mrf.mxu0 }
 0x626   :  { %v5257_v50 = vpop.f32.mrf.mxu1  ;;  %v5860_v25 = vpop.f32.mrf.mxu0 }
 0x627   :  { %v14311_v45 = vadd.f32 %v5257_v50, %v15012_v59  ;;  %v14314_v26 = vadd.f32 %v5860_v25, %v15013_v23  ;;  %v15023_v25 = vld [vmem:[#allocation11_spill] sm:$0xff]  ;;  %v15025_v23 = vld [vmem:[#allocation32_spill] sm:$0xff] }
 0x628   :  { %v8737_v43 = vpop.f32.mrf.mxu1  ;;  %v8859_v14 = vpop.f32.mrf.mxu0 }
 0x62a   :  { %v5260_v37 = vpop.f32.mrf.mxu1  ;;  %v5863_v32 = vpop.f32.mrf.mxu0 }
 0x62b   :  { %v14317_v13 = vadd.f32 %v5260_v37, %v15014_v29  ;;  %v14320_v54 = vadd.f32 %v5863_v32, %v15016_v12  ;;  %v15026_v12 = vld [vmem:[#allocation12_spill] sm:$0xff] }
 0x62c   :  { %v8738_v41 = vpop.f32.mrf.mxu1  ;;  %v8860_v49 = vpop.f32.mrf.mxu0 }
 0x62d   :  { %15015 = vst [vmem:[#allocation62_spill] sm:$0xff] %v14317_v13  ;;  %v15028_v49 = vld [vmem:[#allocation34_spill] sm:$0xff] }
 0x62e   :  { %v5265_v51 = vpop.f32.mrf.mxu1  ;;  %v5868_v57 = vpop.f32.mrf.mxu0 }
 0x62f   :  { %v14323_v3 = vadd.f32 %v5265_v51, %v15017_v21  ;;  %v14326_v58 = vadd.f32 %v5868_v57, %v15019_v55 }
 0x630   :  { %v8741_v18 = vpop.f32.mrf.mxu1  ;;  %v8863_v40 = vpop.f32.mrf.mxu0 }
 0x631   :  { %15018 = vst [vmem:[#allocation63_spill] sm:$0xff] %v14323_v3  ;;  %v15029_v40 = vld [vmem:[#allocation13_spill] sm:$0xff] }
 0x632   :  { %v5268_v17 = vpop.f32.mrf.mxu1  ;;  %v5871_v61 = vpop.f32.mrf.mxu0 }
 0x633   :  { %v14329_v63 = vadd.f32 %v5268_v17, %v15020_v22  ;;  %v14332_v33 = vadd.f32 %v5871_v61, %v15022_v53  ;;  %v15031_v61 = vld [vmem:[#allocation36_spill] sm:$0xff] }
 0x634   :  { %v8742_v9 = vpop.f32.mrf.mxu1  ;;  %v8864_v1 = vpop.f32.mrf.mxu0 }
 0x635   :  { %15021 = vst [vmem:[#allocation31_spill] sm:$0xff] %v14329_v63 }
 0x636   :  { %v5273_v31 = vpop.f32.mrf.mxu1  ;;  %v5876_v50 = vpop.f32.mrf.mxu0 }
 0x637   :  { %v14335_v59 = vadd.f32 %v5273_v31, %v15023_v25  ;;  %v14338_v43 = vadd.f32 %v5876_v50, %v15025_v23  ;;  %v15032_v50 = vld [vmem:[#allocation60_spill] sm:$0xff] }
 0x638   :  { %v8745_v14 = vpop.f32.mrf.mxu1  ;;  %v8867_v37 = vpop.f32.mrf.mxu0 }
 0x639   :  { %15024 = vst [vmem:[#allocation33_spill] sm:$0xff] %v14335_v59 }
 0x63a   :  { %v5276_v32 = vpop.f32.mrf.mxu1  ;;  %v5879_v29 = vpop.f32.mrf.mxu0 }
 0x63b   :  { %v14341_v41 = vadd.f32 %v5276_v32, %v15026_v12  ;;  %v14344_v51 = vadd.f32 %v5879_v29, %v15028_v49  ;;  %v15034_v29 = vld [vmem:[#allocation14_spill] sm:$0xff] }
 0x63c   :  { %v8746_v57 = vpop.f32.mrf.mxu1  ;;  %v8868_v21 = vpop.f32.mrf.mxu0 }
 0x63d   :  { %15027 = vst [vmem:[#allocation35_spill] sm:$0xff] %v14341_v41 }
 0x63e   :  { %v5281_v55 = vpop.f32.mrf.mxu1  ;;  %v5884_v18 = vpop.f32.mrf.mxu0 }
 0x63f   :  { %v14347_v17 = vadd.f32 %v5281_v55, %v15029_v40  ;;  %v14350_v22 = vadd.f32 %v5884_v18, %v15031_v61  ;;  %v15036_v18 = vld [vmem:[#allocation15_spill] sm:$0xff] }
 0x640   :  { %v8749_v53 = vpop.f32.mrf.mxu1  ;;  %v8871_v9 = vpop.f32.mrf.mxu0 }
 0x641   :  { %15030 = vst [vmem:[#allocation37_spill] sm:$0xff] %v14347_v17 }
 0x642   :  { %v5284_v1 = vpop.f32.mrf.mxu1  ;;  %v14352_v31 = vpop.f32.mrf.mxu0 }
 0x643   :  { %v14355_v25 = vadd.f32 %v5284_v1, %v15032_v50  ;;  %v15038_v50 = vld [vmem:[#allocation16_spill] sm:$0xff] }
 0x644   :  { %v8750_v23 = vpop.f32.mrf.mxu1  ;;  %v8872_v14 = vpop.f32.mrf.mxu0 }
 0x645   :  { %15033 = vst [vmem:[#allocation38_spill] sm:$0xff] %v14355_v25 }
 0x646   :  { %v5289_v37 = vpop.f32.mrf.mxu1  ;;  %v14357_v32 = vpop.f32.mrf.mxu0 }
 0x647   :  { %v14360_v12 = vadd.f32 %v5289_v37, %v15034_v29  ;;  %v15040_v29 = vld [vmem:[#allocation17_spill] sm:$0xff] }
 0x648   :  { %v8753_v49 = vpop.f32.mrf.mxu1  ;;  %v8875_v57 = vpop.f32.mrf.mxu0 }
 0x649   :  { %15035 = vst [vmem:[#allocation39_spill] sm:$0xff] %v14360_v12 }
 0x64a   :  { %v5292_v21 = vpop.f32.mrf.mxu1  ;;  %v14362_v55 = vpop.f32.mrf.mxu0 }
 0x64b   :  { %v14365_v40 = vadd.f32 %v5292_v21, %v15036_v18  ;;  %v15041_v21 = vld [vmem:[#allocation18_spill] sm:$0xff] }
 0x64c   :  { %v8754_v61 = vpop.f32.mrf.mxu1  ;;  %v8876_v53 = vpop.f32.mrf.mxu0 }
 0x64d   :  { %15037 = vst [vmem:[#allocation40_spill] sm:$0xff] %v14365_v40 }
 0x64e   :  { %v5297_v9 = vpop.f32.mrf.mxu1  ;;  %v5900_v1 = vpop.f32.mrf.mxu0 }
 0x64f   :  { %v14368_v23 = vadd.f32 %v5297_v9, %v15038_v50 }
 0x650   :  { %v8757_v14 = vpop.f32.mrf.mxu1  ;;  %v8879_v13 = vpop.f32.mrf.mxu0 }
 0x651   :  { %15039 = vst [vmem:[#allocation41_spill] sm:$0xff] %v14368_v23 }
 0x652   :  { %v5300_v3 = vpop.f32.mrf.mxu1  ;;  %v5903_v37 = vpop.f32.mrf.mxu0 }
 0x653   :  { %v14371_v49 = vadd.f32 %v5300_v3, %v15040_v29 }
 0x654   :  { %v8758_v57 = vpop.f32.mrf.mxu1  ;;  %v8880_v63 = vpop.f32.mrf.mxu0 }
 0x656   :  { %v5305_v59 = vpop.f32.mrf.mxu1  ;;  %v5908_v41 = vpop.f32.mrf.mxu0 }
 0x657   :  { %v14374_v18 = vadd.f32 %v5305_v59, %v15041_v21  ;;  %v6137_v21 = vadd.f32 %v14130_v7, %v14320_v54  ;;  %v6135_v54 = vadd.f32 %v14130_v7, %v14308_v6 }
 0x658   :  { %v8883_v61 = vpop.f32.mrf.mxu0  ;;  %v8761_v53 = vpop.f32.mrf.mxu1 }
 0x65a   :  { %v5911_v17 = vpop.f32.mrf.mxu0  ;;  %v5308_v25 = vpop.f32.mrf.mxu1 }
 0x65c   :  { %v8884_v9 = vpop.f32.mrf.mxu0  ;;  %v8762_v50 = vpop.f32.mrf.mxu1 }
 0x65e   :  { %v5916_v14 = vpop.f32.mrf.mxu0 }
 0x65f   :  { %v6062_v25 = vadd.f32 %v5916_v14, %v14249_v27  ;;  %v6218_v27 = vmax.f32 %v6137_v21, 0.0  ;;  %v6060_v14 = vadd.f32 %v5908_v41, %v14221_v34  ;;  %v6133_v34 = vadd.f32 %v14130_v7, %v14296_v4 }
 0x660   :  { %v8887_v13 = vpop.f32.mrf.mxu0  ;;  %v6216_v41 = vmax.f32 %v6135_v54, 0.0 }
 0x661   :  { %v6150_v13 = vadd.f32 %v14130_v7, %v6062_v25 }
 0x662   :  { %v5919_v12 = vpop.f32.mrf.mxu0 }
 0x663   :  { %v6063_v57 = vadd.f32 %v5919_v12, %v14263_v15  ;;  %v6231_v21 = vmax.f32 %v6150_v13, 0.0 }
 0x664   :  { %v8888_v40 = vpop.f32.mrf.mxu0 }
 0x665   :  { %v6136_v40 = vadd.f32 %v14130_v7, %v14314_v26  ;;  %v6151_v15 = vadd.f32 %v14130_v7, %v6063_v57 }
 0x666   :  { %v5924_v23 = vpop.f32.mrf.mxu0 }
 0x667   :  { %v6064_v29 = vadd.f32 %v5924_v23, %v14274_v28  ;;  %v6061_v28 = vadd.f32 %v5911_v17, %v14235_v16  ;;  %v6134_v16 = vadd.f32 %v14130_v7, %v14302_v60  ;;  %v6217_v26 = vmax.f32 %v6136_v40, 0.0 }
 0x668   :  { %v8891_v3 = vpop.f32.mrf.mxu0  ;;  %v6058_v60 = vadd.f32 %v5900_v1, %v14193_v10  ;;  %v6131_v10 = vadd.f32 %v14130_v7, %v14284_v62  ;;  %v6214_v1 = vmax.f32 %v6133_v34, 0.0 }
 0x669   :  { %v6152_v53 = vadd.f32 %v14130_v7, %v6064_v29  ;;  %v6149_v29 = vadd.f32 %v14130_v7, %v6061_v28  ;;  %v6055_v28 = vadd.f32 %v14352_v31, %v14134_v19  ;;  %v6128_v19 = vadd.f32 %v14130_v7, %v14252_v46 }
 0x66a   :  { %v5927_v63 = vpop.f32.mrf.mxu0  ;;  %v6146_v40 = vadd.f32 %v14130_v7, %v6058_v60 }
 0x66b   :  { %v6065_v59 = vadd.f32 %v5927_v63, %v14281_v30  ;;  %v6233_v3 = vmax.f32 %v6152_v53, 0.0  ;;  %v6232_v63 = vmax.f32 %v6151_v15, 0.0  ;;  %v6230_v25 = vmax.f32 %v6149_v29, 0.0 }
 0x66c   :  { %v8892_v61 = vpop.f32.mrf.mxu0 }
 0x66d   :  { %v6153_v9 = vadd.f32 %v14130_v7, %v6065_v59  ;;  %v6148_v59 = vadd.f32 %v14130_v7, %v6060_v14 }
 0x66e   :  { %v5932_v50 = vpop.f32.mrf.mxu0 }
 0x66f   :  { %v6234_v12 = vmax.f32 %v6153_v9, 0.0  ;;  %v14389_v30 = vadd.f32 %v5932_v50, %v14287_v47  ;;  %v6059_v47 = vadd.f32 %v5903_v37, %v14209_v38  ;;  %v6132_v38 = vadd.f32 %v14130_v7, %v14290_v2 }
 0x670   :  { %v8895_v23 = vpop.f32.mrf.mxu0  ;;  %v6215_v37 = vmax.f32 %v6134_v16, 0.0  ;;  %v6056_v2 = vadd.f32 %v14357_v32, %v14159_v35  ;;  %v6229_v50 = vmax.f32 %v6148_v59, 0.0  ;;  %v6129_v35 = vadd.f32 %v14130_v7, %v14266_v8 }
 0x671   :  { %7395 = vmatprep.subr.mxu1 %v6234_v12  ;;  %v6147_v4 = vadd.f32 %v14130_v7, %v6059_v47  ;;  %v6212_v32 = vmax.f32 %v6131_v10, 0.0  ;;  %v6127_v8 = vadd.f32 %v14130_v7, %v14238_v52  ;;  %v6209_v47 = vmax.f32 %v6128_v19, 0.0  ;;  %v15043_v19 = vld [vmem:[#allocation41_spill] sm:$0xff] }
 0x672   :  { %v5935_v17 = vpop.f32.mrf.mxu0  ;;  %7396 = vmatpush3.msra.mxu1 %v6218_v27  ;;  %v6227_v27 = vmax.f32 %v6146_v40, 0.0  ;;  %v6125_v52 = vadd.f32 %v14130_v7, %v14212_v36  ;;  %v6123_v36 = vadd.f32 %v14130_v7, %v14180_v56  ;;  %v14467_v56 = vld.sshfl [vmem:[%s14556_s3 + $0x8] sm:$0x33 pattern:$0x76325410]  ;;  %v15042_v40 = vmov 0.0  }
 0x673   :  { %v14400_v6 = vadd.f32 %v5935_v17, %v14293_v42  ;;  %7397 = vmatprep.subr.mxu1 %v6233_v3  ;;  %v6057_v42 = vadd.f32 %v14362_v55, %v14177_v48  ;;  %v6130_v48 = vadd.f32 %v14130_v7, %v14277_v24  ;;  %v6213_v55 = vmax.f32 %v6132_v38, 0.0 }
 0x674   :  { %v8896_v57 = vpop.f32.mrf.mxu0  ;;  %7398 = vmatpush3.msra.mxu1 %v6217_v26  ;;  %v6228_v15 = vmax.f32 %v6147_v4, 0.0  ;;  %v6144_v24 = vadd.f32 %v14130_v7, %v6056_v2  ;;  %v6210_v3 = vmax.f32 %v6129_v35, 0.0  ;;  %v6142_v26 = vadd.f32 %v14130_v7, %v14350_v22 }
 0x675   :  { %7399 = vmatprep.subr.mxu1 %v6232_v63  ;;  %v6145_v62 = vadd.f32 %v14130_v7, %v6057_v42  ;;  %v6211_v31 = vmax.f32 %v6130_v48, 0.0  ;;  %v6126_v17 = vadd.f32 %v14130_v7, %v14224_v11  ;;  %v6208_v34 = vmax.f32 %v6127_v8, 0.0 }
 0x676   :  { %v5940_v61 = vpop.f32.mrf.mxu0  ;;  %7400 = vmatpush3.msra.mxu1 %v6216_v41  ;;  %v6225_v46 = vmax.f32 %v6144_v24, 0.0  ;;  %v6140_v22 = vadd.f32 %v14130_v7, %v14338_v43  ;;  %v6223_v57 = vmax.f32 %v6142_v26, 0.0  ;;  %v6124_v11 = vadd.f32 %v14130_v7, %v14196_v44 }
 0x677   :  { %v14412_v53 = vadd.f32 %v5940_v61, %v14299_v20  ;;  %7401 = vmatprep.subr.mxu1 %v6231_v21  ;;  %v6226_v14 = vmax.f32 %v6145_v62, 0.0  ;;  %v6207_v60 = vmax.f32 %v6126_v17, 0.0  ;;  %v6206_v38 = vmax.f32 %v6125_v52, 0.0 }
 0x678   :  { %v8899_v9 = vpop.f32.mrf.mxu0  ;;  %7402 = vmatpush3.msra.mxu1 %v6215_v37  ;;  %v6138_v43 = vadd.f32 %v14130_v7, %v14326_v58  ;;  %v6221_v61 = vmax.f32 %v6140_v22, 0.0  ;;  %v6122_v44 = vadd.f32 %v14130_v7, %v14162_v5  ;;  %v6205_v42 = vmax.f32 %v6124_v11, 0.0 }
 0x679   :  { %7403 = vmatprep.subr.mxu1 %v6230_v25  ;;  %v6204_v25 = vmax.f32 %v6123_v36, 0.0  ;;  %v6280_v5 = vcombine.high %v14467_v56, %v14467_v56 }
 0x67a   :  { %v5943_v20 = vpop.f32.mrf.mxu0  ;;  %7404 = vmatpush3.msra.mxu1 %v6214_v1  ;;  %v6219_v58 = vmax.f32 %v6138_v43, 0.0  ;;  %v6203_v1 = vmax.f32 %v6122_v44, 0.0 }
 0x67b   :  { %v14425_v12 = vadd.f32 %v5943_v20, %v14305_v0  ;;  %7405 = vmatprep.subr.mxu1 %v6229_v50  ;;  %v6143_v0 = vadd.f32 %v14130_v7, %v6055_v28 }
 0x67c   :  { %v8900_v54 = vpop.f32.mrf.mxu0  ;;  %7406 = vmatpush3.msra.mxu1 %v6213_v55 }
 0x67d   :  { %7407 = vmatprep.subr.mxu1 %v6228_v15  ;;  %v6224_v63 = vmax.f32 %v6143_v0, 0.0  ;;  %v15044_v0 = vld [vmem:[#allocation40_spill] sm:$0xff] }
 0x67e   :  { %v5948_v23 = vpop.f32.mrf.mxu0  ;;  %7408 = vmatpush3.msra.mxu1 %v6212_v32 }
 0x67f   :  { %v14434_v13 = vadd.f32 %v5948_v23, %v14311_v45  ;;  %7409 = vmatprep.subr.mxu1 %v6227_v27  ;;  %v6141_v45 = vadd.f32 %v14130_v7, %v14344_v51  ;;  %v6139_v51 = vadd.f32 %v14130_v7, %v14332_v33 }
 0x680   :  { %v8903_v16 = vpop.f32.mrf.mxu0  ;;  %7410 = vmatpush3.msra.mxu1 %v6211_v31 }
 0x681   :  { %7411 = vmatprep.subr.mxu1 %v6226_v14  ;;  %v6222_v21 = vmax.f32 %v6141_v45, 0.0  ;;  %v6220_v33 = vmax.f32 %v6139_v51, 0.0 }
 0x682   :  { %v14442_v29 = vpop.f32.mrf.mxu0  ;;  %7412 = vmatpush3.msra.mxu1 %v6210_v3  ;;  %v15045_v3 = vld [vmem:[#allocation39_spill] sm:$0xff] }
 0x683   :  { %7413 = vmatprep.subr.mxu1 %v6225_v46 }
 0x684   :  { %v8904_v41 = vpop.f32.mrf.mxu0  ;;  %7414 = vmatpush3.msra.mxu1 %v6209_v47  ;;  %v15046_v47 = vld [vmem:[#allocation38_spill] sm:$0xff] }
 0x685   :  { %7415 = vmatprep.subr.mxu1 %v6224_v63  ;;  %v15047_v41 = vld [vmem:[#allocation37_spill] sm:$0xff] }
 0x686   :  { %v14452_v59 = vpop.f32.mrf.mxu0  ;;  %7416 = vmatpush3.msra.mxu1 %v6208_v34 }
 0x687   :  { %7417 = vmatprep.subr.mxu1 %v6223_v57 }
 0x688   :  { %v8907_v37 = vpop.f32.mrf.mxu0  ;;  %7418 = vmatpush3.msra.mxu1 %v6207_v60  ;;  %v15048_v60 = vld [vmem:[#allocation35_spill] sm:$0xff] }
 0x689   :  { %7419 = vmatprep.subr.mxu1 %v6222_v21  ;;  %v15049_v37 = vld [vmem:[#allocation33_spill] sm:$0xff] }
 0x68a   :  { %v14462_v4 = vpop.f32.mrf.mxu0  ;;  %7420 = vmatpush3.msra.mxu1 %v6206_v38 }
 0x68b   :  { %7421 = vmatprep.subr.mxu1 %v6221_v61 }
 0x68c   :  { %v8908_v10 = vpop.f32.mrf.mxu0  ;;  %7422 = vmatpush3.msra.mxu1 %v6205_v42  ;;  %v15050_v42 = vld [vmem:[#allocation31_spill] sm:$0xff] }
 0x68d   :  { %7423 = vmatprep.subr.mxu1 %v6220_v33  ;;  %v6073_v33 = vadd.f32 %v14462_v4, %v15050_v42 }
 0x68e   :  { %v5964_v9 = vpop.f32.mrf.mxu0  ;;  %7424 = vmatpush3.msra.mxu1 %v6204_v25 }
 0x68f   :  { %7425 = vmatprep.subr.mxu1 %v6219_v58  ;;  %v6074_v43 = vadd.f32 %v5964_v9, %v15049_v37  ;;  %v15051_v58 = vld [vmem:[#allocation63_spill] sm:$0xff]  ;;  %v6161_v4 = vadd.f32 %v14130_v7, %v6073_v33 }
 0x690   :  { %v8911_v2 = vpop.f32.mrf.mxu0  ;;  %7426 = vmatpush3.msra.mxu1 %v6203_v1  ;;  %v6072_v1 = vadd.f32 %v14452_v59, %v15051_v58 }
 0x691   :  { %6429 = vmatprep.subr.mxu1 %v15042_v40  ;;  %6424 = vmatmul.mubr.f32.vlgmr.msra.gmra.mxu1 %v14269_v39  ;;  %v6162_v9 = vadd.f32 %v14130_v7, %v6074_v43  ;;  %v15052_v2 = vld [vmem:[#allocation62_spill] sm:$0xff] }
 0x692   :  { %v5967_v50 = vpop.f32.mrf.mxu0  ;;  %6979 = vmatprep.mubr.msk.f32.mxu1 %vm6286_vm3, %v6280_v5 }
 0x693   :  { %v6075_v51 = vadd.f32 %v5967_v50, %v15048_v60  ;;  %v6071_v50 = vadd.f32 %v14442_v29, %v15052_v2  ;;  %v6158_v29 = vadd.f32 %v14130_v7, %v14434_v13  ;;  %v6155_v13 = vadd.f32 %v14130_v7, %v14400_v6 }
 0x694   :  { %v8912_v48 = vpop.f32.mrf.mxu0 }
 0x695   :  { %v6163_v25 = vadd.f32 %v14130_v7, %v6075_v51  ;;  %v6159_v59 = vadd.f32 %v14130_v7, %v6071_v50 }
 0x696   :  { %v5972_v55 = vpop.f32.mrf.mxu0 }
 0x697   :  { %v6076_v22 = vadd.f32 %v5972_v55, %v15047_v41  ;;  %v6244_v48 = vmax.f32 %v6163_v25, 0.0  ;;  %v6160_v55 = vadd.f32 %v14130_v7, %v6072_v1 }
 0x698   :  { %v8915_v20 = vpop.f32.mrf.mxu0 }
 0x699   :  { %v6164_v61 = vadd.f32 %v14130_v7, %v6076_v22  ;;  %v6243_v20 = vmax.f32 %v6162_v9, 0.0 }
 0x69a   :  { %v5975_v28 = vpop.f32.mrf.mxu0 }
 0x69b   :  { %v6077_v45 = vadd.f32 %v5975_v28, %v15046_v47  ;;  %v6245_v5 = vmax.f32 %v6164_v61, 0.0  ;;  %v6242_v28 = vmax.f32 %v6161_v4, 0.0 }
 0x69c   :  { %v8916_v62 = vpop.f32.mrf.mxu0 }
 0x69d   :  { %v6165_v21 = vadd.f32 %v14130_v7, %v6077_v45  ;;  %v6241_v62 = vmax.f32 %v6160_v55, 0.0 }
 0x69e   :  { %v5980_v15 = vpop.f32.mrf.mxu0 }
 0x69f   :  { %v6078_v16 = vadd.f32 %v5980_v15, %v15045_v3  ;;  %v6246_v10 = vmax.f32 %v6165_v21, 0.0  ;;  %v6157_v15 = vadd.f32 %v14130_v7, %v14425_v12  ;;  %v6154_v12 = vadd.f32 %v14130_v7, %v14389_v30  ;;  %v6501_v30 = vld [vmem:[%s14557_s4 + $0x10] sm:$0xff] }
 0x6a0   :  { %v8919_v35 = vpop.f32.mrf.mxu0 }
 0x6a1   :  { %v6166_v57 = vadd.f32 %v14130_v7, %v6078_v16  ;;  %v6240_v35 = vmax.f32 %v6159_v59, 0.0 }
 0x6a2   :  { %v5983_v32 = vpop.f32.mrf.mxu0 }
 0x6a3   :  { %v6079_v14 = vadd.f32 %v5983_v32, %v15044_v0  ;;  %v6247_v44 = vmax.f32 %v6166_v57, 0.0  ;;  %v6156_v32 = vadd.f32 %v14130_v7, %v14412_v53  ;;  %v6236_v53 = vmax.f32 %v6155_v13, 0.0  ;;  %v6499_v0 = vld [vmem:[%s14557_s4] sm:$0xff] }
 0x6a4   :  { %v8920_v54 = vpop.f32.mrf.mxu0 }
 0x6a5   :  { %v6167_v63 = vadd.f32 %v14130_v7, %v6079_v14  ;;  %v6239_v54 = vmax.f32 %v6158_v29, 0.0 }
 0x6a6   :  { %v5988_v24 = vpop.f32.mrf.mxu0 }
 0x6a7   :  { %v6080_v31 = vadd.f32 %v5988_v24, %v15043_v19  ;;  %v6248_v36 = vmax.f32 %v6167_v63, 0.0  ;;  %v6238_v24 = vmax.f32 %v6157_v15, 0.0  ;;  %v6237_v19 = vmax.f32 %v6156_v32, 0.0 }
 0x6a8   :  { %v8923_v27 = vpop.f32.mrf.mxu0 }
 0x6a9   :  { %v6168_v26 = vadd.f32 %v14130_v7, %v6080_v31  ;;  %v8947_v31 = vld [vmem:[%s14555_s2] ss:$0 sm:$0xff] }
 0x6aa   :  { %v5991_v23 = vpop.f32.mrf.mxu0 }
 0x6ab   :  { %v6081_v39 = vadd.f32 %v5991_v23, %v14371_v49  ;;  %v6249_v11 = vmax.f32 %v6168_v26, 0.0 }
 0x6ac   :  { %v8924_v8 = vpop.f32.mrf.mxu0 }
 0x6ad   :  { %v6169_v46 = vadd.f32 %v14130_v7, %v6081_v39  ;;  %v6502_v7 = vld [vmem:[%s14557_s4 + $0x18] sm:$0xff] }
 0x6ae   :  { %v5996_v17 = vpop.f32.mrf.mxu0 }
 0x6af   :  { %v6250_v52 = vmax.f32 %v6169_v46, 0.0  ;;  %v6082_v27 = vadd.f32 %v5996_v17, %v14374_v18  ;;  %v6235_v18 = vmax.f32 %v6154_v12, 0.0 }
 0x6b0   :  { %v8927_v34 = vpop.f32.mrf.mxu0 }
 0x6b1   :  { %6430 = vmatpush1.msra.mxu1 %v6250_v52  ;;  %v6170_v23 = vadd.f32 %v8947_v31, %v6082_v27 }
 0x6b2   :  { %6431 = vmatprep.subr.mxu1 %v15042_v40  ;;  %v5999_v49 = vpop.f32.mrf.mxu0 }
 0x6b3   :  { %6432 = vmatpush1.msra.mxu1 %v6249_v11  ;;  %v6251_v6 = vmax.f32 %v6170_v23, 0.0 }
 0x6b4   :  { %6433 = vmatprep.subr.mxu1 %v15042_v40  ;;  %v8928_v38 = vpop.f32.mrf.mxu0 }
 0x6b5   :  { %6434 = vmatpush1.msra.mxu1 %v6248_v36 }
 0x6b6   :  { %6435 = vmatprep.subr.mxu1 %v15042_v40 }
 0x6b7   :  { %6436 = vmatpush1.msra.mxu1 %v6247_v44 }
 0x6b8   :  { %6437 = vmatprep.subr.mxu1 %v15042_v40 }
 0x6b9   :  { %6438 = vmatpush1.msra.mxu1 %v6246_v10 }
 0x6ba   :  { %6439 = vmatprep.subr.mxu1 %v15042_v40 }
 0x6bb   :  { %6440 = vmatpush1.msra.mxu1 %v6245_v5 }
 0x6bc   :  { %6441 = vmatprep.subr.mxu1 %v15042_v40 }
 0x6bd   :  { %6442 = vmatpush1.msra.mxu1 %v6244_v48 }
 0x6be   :  { %6443 = vmatprep.subr.mxu1 %v15042_v40 }
 0x6bf   :  { %6444 = vmatpush1.msra.mxu1 %v6243_v20 }
 0x6c0   :  { %6445 = vmatprep.subr.mxu1 %v15042_v40 }
 0x6c1   :  { %6446 = vmatpush1.msra.mxu1 %v6242_v28 }
 0x6c2   :  { %6447 = vmatprep.subr.mxu1 %v15042_v40 }
 0x6c3   :  { %6448 = vmatpush1.msra.mxu1 %v6241_v62 }
 0x6c4   :  { %6449 = vmatprep.subr.mxu1 %v15042_v40 }
 0x6c5   :  { %6450 = vmatpush1.msra.mxu1 %v6240_v35 }
 0x6c6   :  { %6451 = vmatprep.subr.mxu1 %v15042_v40 }
 0x6c7   :  { %6452 = vmatpush1.msra.mxu1 %v6239_v54 }
 0x6c8   :  { %6453 = vmatprep.subr.mxu1 %v15042_v40 }
 0x6c9   :  { %6454 = vmatpush1.msra.mxu1 %v6238_v24 }
 0x6ca   :  { %6455 = vmatprep.subr.mxu1 %v15042_v40 }
 0x6cb   :  { %6456 = vmatpush1.msra.mxu1 %v6237_v19 }
 0x6cc   :  { %6457 = vmatprep.subr.mxu1 %v15042_v40 }
 0x6cd   :  { %6458 = vmatpush1.msra.mxu1 %v6236_v53 }
 0x6ce   :  { %6459 = vmatprep.subr.mxu1 %v15042_v40 }
 0x6cf   :  { %6460 = vmatpush1.msra.mxu1 %v6235_v18 }
 0x6d0   :  { %6491 = vmatprep.subr.mxu1 %v15042_v40 }
 0x6d1   :  { %6492 = vmatpush2.msra.mxu1 %v6251_v6  ;;  %v7392_v14 = vpop.f32.mrf.mxu1 }
 0x6d2   :  { %6494 = vmatmul.mubr.f32.vlgmr.msra.gmra.mxu1 %v14467_v56  ;;  %8929 = vmatprep.subr.mxu1 %v15042_v40  ;;  %v6500_v56 = vld [vmem:[%s14557_s4 + $0x8] sm:$0xff]  ;;  %s8948_s4 = scalar_lea.vmem %s6593_s17, 32 }
 0x6d3   :  { %8937 = vmatprep.mubr.msk.f32.mxu1 %vm8971_vm2, %v15042_v40  ;;  %8930 = vmatpush3.msra.mxu1 %v6502_v7  ;;  %v7393_v39 = vpop.f32.mrf.mxu1  ;;  %p8949_p0 = scmp.ne.s32.totalorder %s6593_s17, %s8948_s4  ;;  %p8954_p2 = scmp.lt.s32.totalorder %s8948_s4, %s8948_s4 }
 0x6d4   :  { %8931 = vmatprep.subr.mxu1 %v15042_v40  ;;  %v7394_v26 = vadd.f32 %v7393_v39, %v7392_v14 }
 0x6d5   :  { %8932 = vmatpush3.msra.mxu1 %v6501_v30  ;;  %p8955_p3 = por %p8954_p2, %p8953_p1 }
 0x6d6   :  { %8933 = vmatprep.subr.mxu1 %v15042_v40 }
 0x6d7   :  { %8934 = vmatpush3.msra.mxu1 %v6500_v56  ;;  %p8956_p4 = pnand %p8955_p3, %p8949_p0 }
 0x6d8   :  { %8935 = vmatprep.subr.mxu1 %v15042_v40  ;;  %v6980_v40 = vld [vmem:[%s14558_s5] ss:$0 sm:$0xff] }
 0x6d9   :  { %8936 = vmatpush3.msra.mxu1 %v6499_v0 }
 0x751   :  { %v7427_v8 = vpop.f32.mrf.mxu1 }
 0x753   :  { %v7428_v3 = vpop.f32.mrf.mxu1 }
 0x754   :  { %v7429_v16 = vadd.f32 %v7428_v3, %v7427_v8 }
 0x756   :  { %v6426_v46 = vadd.f32 %v7429_v16, %v7394_v26 }
 0x792   :  { %v6495_v17 = vpop.f32.mrf.mxu1 }
 0x793   :  { %v6496_v47 = vadd.f32 %v6495_v17, %v6426_v46 }
 0x794   :  { %v6497_v45 = vpop.f32.mrf.mxu1 }
 0x795   :  { %8938 = vmatmul.mubr.msk.f32.vlgmr.msra.gmra.mxu1 %vm6510_vm4, %v6496_v47 }
 0x855   :  { %v6580_v63 = vpop.f32.mrf.mxu1 }
 0x856   :  { %v6581_v52 = vadd.f32 %v6980_v40, %v6580_v63 }
 0x857   :  { %v8939_v34 = vpop.f32.mrf.mxu1 }
 0x858   :  { %6585 = vst.msk [vmem:[#allocation2] sm:$0x3] %vm6584_vm5, %v6581_v52 }
 0x859   :  { %8959 = shalt.err (!%p8956_p4)
}
 0x85a   :  { %6595 = dma.vmem_to_hbm [thread:$0]  %s6593_s17, 32, %s14559_s6, [#allocation3]  }
 0x85b   :  { %8968 = dma.done.wait [#allocation3], 32  }
 0x85c   :  { %8969 = vsyncadd [#allocation3], 4294967264 }
 0x85d   :  { %6599 = vsyncpa [#allocation3], 1 }

</bundles_post_ra>
